<compile_context>
chip_gen: v5e
topology: v5e:2x2
jax: 0.10.0
libtpu: 0.0.40
codegen_flags: <defaults>
</compile_context>

<pallas_src>
import numpy as np
import jax
import jax.numpy as jnp
from jax import lax
from jax.experimental import pallas as pl
from jax.experimental.pallas import tpu as pltpu

LANE = 128  # TPU lane width (last-dim tile)


def _round_up(n, m):
    return (n + m - 1) // m * m


# ----------------------------------------------------------------------------
# Parameter setup (glue, plain numpy / jax.random)
# ----------------------------------------------------------------------------
def init_raw_params(key, dim_input):
    """Deterministic init mimicking PyTorch's U(-1/sqrt(fan_in), 1/sqrt(fan_in))."""
    if dim_input == 512:
        dim_latent = (1, 32)
    else:
        dim_latent = (3, 32)
    latent = dim_latent[0] * dim_latent[1]

    keys = jax.random.split(key, 20)
    ki = iter(keys)

    def u(k, shape, fan_in):
        bound = 1.0 / np.sqrt(fan_in)
        return jax.random.uniform(k, shape, jnp.float32, -bound, bound)

    convs = []
    for (ci, co, K) in [(1, 4, 7), (4, 8, 7), (8, 16, 7), (16, 32, 7)]:
        w = u(next(ki), (co, ci, K), ci * K)       # Conv1d weight (C_out, C_in, K)
        b = u(next(ki), (co,), ci * K)
        convs.append((w, b))

    convts = []
    for (ci, co, K) in [(32, 16, 7), (16, 8, 7), (8, 4, 7), (4, 1, 8)]:
        w = u(next(ki), (ci, co, K), ci * K)       # ConvTranspose1d weight (C_in, C_out, K)
        b = u(next(ki), (co,), ci * K)
        convts.append((w, b))

    fcs = []
    for _ in range(2):                              # fc_moy, fc_var
        w = u(next(ki), (latent, latent), latent)   # Linear weight (out, in)
        b = u(next(ki), (latent,), latent)
        fcs.append((w, b))

    return convs, convts, fcs, dim_latent


def conv1d_dense(w, b, L_in, stride):
    """Dense matrix M s.t. flat(conv1d(x)) = flat(x) @ M + bias (channel-major flatten)."""
    C_out, C_in, K = w.shape
    L_out = (L_in - K) // stride + 1
    M = np.zeros((C_in * L_in, C_out * L_out), np.float32)
    for co in range(C_out):
        for ci in range(C_in):
            for k in range(K):
                for t in range(L_out):
                    M[ci * L_in + t * stride + k, co * L_out + t] = w[co, ci, k]
    bias = np.repeat(b, L_out).astype(np.float32)
    return M, bias, L_out


def convt1d_dense(w, b, L_in, stride):
    """Dense matrix for ConvTranspose1d (no padding, no output_padding)."""
    C_in, C_out, K = w.shape
    L_out = (L_in - 1) * stride + K
    M = np.zeros((C_in * L_in, C_out * L_out), np.float32)
    for ci in range(C_in):
        for co in range(C_out):
            for l in range(L_in):
                for k in range(K):
                    M[ci * L_in + l, co * L_out + l * stride + k] = w[ci, co, k]
    bias = np.repeat(b, L_out).astype(np.float32)
    return M, bias, L_out


def _pad_wb(M, bias):
    """Zero-pad (K_in, N_out) weight + bias to 128-lane multiples; weight -> bf16.

    Zero padding is exact: padded output lanes are 0 (zero weight columns +
    zero bias), and padded input rows of the next layer have zero weights,
    so padded lanes never contaminate real lanes through the chain.
    """
    K_in, N_out = M.shape
    Kp, Np = _round_up(K_in, LANE), _round_up(N_out, LANE)
    Mp = np.zeros((Kp, Np), np.float32)
    Mp[:K_in, :N_out] = M
    bp = np.zeros((1, Np), np.float32)
    bp[0, :N_out] = bias
    return jnp.asarray(Mp, jnp.bfloat16), jnp.asarray(bp, jnp.float32)


def build_dense_ops(convs, convts, fcs, dim_input, dim_latent):
    """Kernel operand list: [W1,b1,...,W4,b4, Wm,bm, Wv,bv, Wt1,bt1,...,Wt4,bt4]."""
    ops = []
    L = dim_input
    for (w, b) in convs:
        M, bias, L = conv1d_dense(np.asarray(w), np.asarray(b), L, 4)
        ops += list(_pad_wb(M, bias))
    for (w, b) in fcs:
        ops += list(_pad_wb(np.asarray(w).T, np.asarray(b)))    # (in, out)
    L = dim_latent[0]
    for (w, b) in convts:
        M, bias, L = convt1d_dense(np.asarray(w), np.asarray(b), L, 4)
        ops += list(_pad_wb(M, bias))
    return ops


# ----------------------------------------------------------------------------
# Pallas kernel: full VAE forward pass for one batch tile
# ----------------------------------------------------------------------------
def vae_kernel(x_ref, eps_ref,
               w1_ref, b1_ref, w2_ref, b2_ref, w3_ref, b3_ref, w4_ref, b4_ref,
               wm_ref, bm_ref, wv_ref, bv_ref,
               wt1_ref, bt1_ref, wt2_ref, bt2_ref, wt3_ref, bt3_ref,
               wt4_ref, bt4_ref,
               recon_ref, moy_ref, logvar_ref):

    def mm(a_f32, w_ref, b_ref):
        # bf16 MXU operands, f32 accumulation, f32 bias add.
        return jnp.dot(a_f32.astype(jnp.bfloat16), w_ref[...],
                       preferred_element_type=jnp.float32) + b_ref[...]

    def relu(v):
        return jnp.maximum(v, 0.0)

    # ---- encoder: 4x (conv-as-matmul + relu) ----
    h = relu(mm(x_ref[...], w1_ref, b1_ref))
    h = relu(mm(h, w2_ref, b2_ref))
    h = relu(mm(h, w3_ref, b3_ref))
    h = relu(mm(h, w4_ref, b4_ref))

    # ---- latent heads (lane-padded to 128; padded lanes are exactly 0) ----
    moy = mm(h, wm_ref, bm_ref)
    logvar = mm(h, wv_ref, bv_ref)
    moy_ref[...] = moy
    logvar_ref[...] = logvar

    # ---- reparametrize (eps provided as input, zero in padded lanes) ----
    z = moy + eps_ref[...] * jnp.exp(0.5 * logvar)

    # ---- decoder: 3x (convT-as-matmul + relu), last convT + sigmoid ----
    d = relu(mm(z, wt1_ref, bt1_ref))
    d = relu(mm(d, wt2_ref, bt2_ref))
    d = relu(mm(d, wt3_ref, bt3_ref))
    d = mm(d, wt4_ref, bt4_ref)
    # sigmoid with the reciprocal on the EUP slot (f32 throughout)
    recon_ref[...] = pl.reciprocal(1.0 + jnp.exp(-d), approx=True)


def vae_forward(x, eps, dense_ops, dim_input, latent, tile_b=128):
    """x: (B, dim_input) f32; eps: (B, latent) f32. Returns (recon, moy, logvar)."""
    B = x.shape[0]
    latent_p = _round_up(latent, LANE)

    # Pad the batch to a multiple of the tile (rows are zero-padded; sliced off below).
    Bp = _round_up(max(B, tile_b), tile_b)
    if Bp != B:
        x = jnp.pad(x, ((0, Bp - B), (0, 0)))
    eps_p = jnp.zeros((Bp, latent_p), jnp.float32).at[:B, :latent].set(eps)

    num_tiles = Bp // tile_b

    def row_spec(width):
        return pl.BlockSpec((tile_b, width), lambda i: (i, 0))

    def const_spec(arr):
        # Full-array block, constant index -> stays resident in VMEM across the grid.
        return pl.BlockSpec(arr.shape, lambda i: (0, 0))

    in_specs = [row_spec(dim_input), row_spec(latent_p)] + [const_spec(a) for a in dense_ops]
    out_specs = (row_spec(dim_input), row_spec(latent_p), row_spec(latent_p))
    out_shape = (jax.ShapeDtypeStruct((Bp, dim_input), jnp.float32),   # recon
                 jax.ShapeDtypeStruct((Bp, latent_p), jnp.float32),    # moy (padded)
                 jax.ShapeDtypeStruct((Bp, latent_p), jnp.float32))    # logvar (padded)

    fn = pl.pallas_call(
        vae_kernel,
        grid=(num_tiles,),
        out_shape=out_shape,
        in_specs=in_specs,
        out_specs=out_specs,
        compiler_params=pltpu.CompilerParams(
            dimension_semantics=("parallel",),        # v7x: batch tiles split across TCs
            vmem_limit_bytes=32 * 1024 * 1024,        # bf16 weights (~2x1.8MB buffered) + tiles
        ),
    )
    recon, moy_p, logvar_p = fn(x, eps_p, *dense_ops)
    return recon[:B], moy_p[:B, :latent], logvar_p[:B, :latent]


# ----------------------------------------------------------------------------
# Pure-JAX reference (uses lax.conv) for a sanity check
# ----------------------------------------------------------------------------
def _ref_conv1d(x, w, b, stride):
    out = lax.conv_general_dilated(
        x, w, window_strides=(stride,), padding='VALID',
        dimension_numbers=('NCH', 'OIH', 'NCH'),
        precision=lax.Precision.HIGHEST)
    return out + b[None, :, None]


def _ref_convt1d(x, w, b, stride):
    K = w.shape[2]
    w2 = jnp.flip(jnp.transpose(w, (1, 0, 2)), axis=2)   # (C_out, C_in, K), flipped taps
    out = lax.conv_general_dilated(
        x, w2, window_strides=(1,), padding=[(K - 1, K - 1)],
        lhs_dilation=(stride,),
        dimension_numbers=('NCH', 'OIH', 'NCH'),
        precision=lax.Precision.HIGHEST)
    return out + b[None, :, None]


def reference_forward(x, eps, convs, convts, fcs, dim_input, dim_latent):
    B = x.shape[0]
    h = x.reshape(B, 1, dim_input)
    for (w, b) in convs:
        h = jax.nn.relu(_ref_conv1d(h, w, b, 4))
    h = h.reshape(B, -1)
    (wm, bm), (wv, bv) = fcs
    moy = jnp.matmul(h, wm.T, precision=lax.Precision.HIGHEST) + bm
    logvar = jnp.matmul(h, wv.T, precision=lax.Precision.HIGHEST) + bv
    z = moy + eps * jnp.exp(0.5 * logvar)
    d = z.reshape(B, dim_latent[1], dim_latent[0])
    for i, (w, b) in enumerate(convts):
        d = _ref_convt1d(d, w, b, 4)
        if i < len(convts) - 1:
            d = jax.nn.relu(d)
    d = jax.nn.sigmoid(d)
    return d.reshape(B, dim_input), moy, logvar


# ----------------------------------------------------------------------------
if __name__ == "__main__":
    DIM_INPUT = 512           # small config supported by the module (latent = (1, 32))
    B = 256                   # 2 batch tiles of 128 rows -> MXU actually gets fed
    TILE_B = 128

    key = jax.random.PRNGKey(0)
    k_params, k_x, k_eps = jax.random.split(key, 3)

    convs, convts, fcs, dim_latent = init_raw_params(k_params, DIM_INPUT)
    latent = dim_latent[0] * dim_latent[1]
    dense_ops = build_dense_ops(convs, convts, fcs, DIM_INPUT, dim_latent)

    x = jax.random.uniform(k_x, (B, DIM_INPUT), jnp.float32, -1.0, 1.0)
    # TODO(synk): torch.randn_like has no in-kernel equivalent that keeps an exact
    # reference check; eps is drawn here and passed in.
    eps = jax.random.normal(k_eps, (B, latent), jnp.float32)

    recon, moy, logvar = vae_forward(x, eps, dense_ops, DIM_INPUT, latent, tile_b=TILE_B)
    jax.block_until_ready((recon, moy, logvar))

    r_ref, m_ref, lv_ref = reference_forward(x, eps, convs, convts, fcs,
                                             DIM_INPUT, dim_latent)
    # bf16 MXU operands vs f32 HIGHEST reference -> slightly looser tolerance.
    np.testing.assert_allclose(np.asarray(moy), np.asarray(m_ref), rtol=2e-2, atol=2e-2)
    np.testing.assert_allclose(np.asarray(logvar), np.asarray(lv_ref), rtol=2e-2, atol=2e-2)
    np.testing.assert_allclose(np.asarray(recon), np.asarray(r_ref), rtol=2e-2, atol=2e-2)

    assert recon.shape == (B, DIM_INPUT) and moy.shape == (B, latent) and logvar.shape == (B, latent)
    print("KERNEL_OK")
</pallas_src>

<mosaic_0001>
module attributes {stable_mosaic.version = 11 : i64} {
  func.func @vae_kernel(%arg0: i32, %arg1: memref<128x512xf32, #tpu.memory_space<vmem>>, %arg2: memref<128x128xf32, #tpu.memory_space<vmem>>, %arg3: memref<512x512xbf16, #tpu.memory_space<vmem>>, %arg4: memref<1x512xf32, #tpu.memory_space<vmem>>, %arg5: memref<512x256xbf16, #tpu.memory_space<vmem>>, %arg6: memref<1x256xf32, #tpu.memory_space<vmem>>, %arg7: memref<256x128xbf16, #tpu.memory_space<vmem>>, %arg8: memref<1x128xf32, #tpu.memory_space<vmem>>, %arg9: memref<128x128xbf16, #tpu.memory_space<vmem>>, %arg10: memref<1x128xf32, #tpu.memory_space<vmem>>, %arg11: memref<128x128xbf16, #tpu.memory_space<vmem>>, %arg12: memref<1x128xf32, #tpu.memory_space<vmem>>, %arg13: memref<128x128xbf16, #tpu.memory_space<vmem>>, %arg14: memref<1x128xf32, #tpu.memory_space<vmem>>, %arg15: memref<128x128xbf16, #tpu.memory_space<vmem>>, %arg16: memref<1x128xf32, #tpu.memory_space<vmem>>, %arg17: memref<128x256xbf16, #tpu.memory_space<vmem>>, %arg18: memref<1x256xf32, #tpu.memory_space<vmem>>, %arg19: memref<256x512xbf16, #tpu.memory_space<vmem>>, %arg20: memref<1x512xf32, #tpu.memory_space<vmem>>, %arg21: memref<512x512xbf16, #tpu.memory_space<vmem>>, %arg22: memref<1x512xf32, #tpu.memory_space<vmem>>, %arg23: memref<128x512xf32, #tpu.memory_space<vmem>>, %arg24: memref<128x128xf32, #tpu.memory_space<vmem>>, %arg25: memref<128x128xf32, #tpu.memory_space<vmem>>) attributes {dimension_semantics = [#tpu.dimension_semantics<parallel>], iteration_bounds = array<i64: 2>, scalar_prefetch = 0 : i64, scratch_operands = 0 : i64, tpu.core_type = #tpu.core_type<tc>, window_params = [{transform_indices = @transform_0, window_bounds = array<i64: 128, 512>}, {transform_indices = @transform_1, window_bounds = array<i64: 128, 128>}, {pipeline_mode = #tpu.pipeline_mode<synchronous>, transform_indices = @transform_2, window_bounds = array<i64: 512, 512>}, {pipeline_mode = #tpu.pipeline_mode<synchronous>, transform_indices = @transform_3, window_bounds = array<i64: 1, 512>}, {pipeline_mode = #tpu.pipeline_mode<synchronous>, transform_indices = @transform_4, window_bounds = array<i64: 512, 256>}, {pipeline_mode = #tpu.pipeline_mode<synchronous>, transform_indices = @transform_5, window_bounds = array<i64: 1, 256>}, {pipeline_mode = #tpu.pipeline_mode<synchronous>, transform_indices = @transform_6, window_bounds = array<i64: 256, 128>}, {pipeline_mode = #tpu.pipeline_mode<synchronous>, transform_indices = @transform_7, window_bounds = array<i64: 1, 128>}, {pipeline_mode = #tpu.pipeline_mode<synchronous>, transform_indices = @transform_8, window_bounds = array<i64: 128, 128>}, {pipeline_mode = #tpu.pipeline_mode<synchronous>, transform_indices = @transform_9, window_bounds = array<i64: 1, 128>}, {pipeline_mode = #tpu.pipeline_mode<synchronous>, transform_indices = @transform_10, window_bounds = array<i64: 128, 128>}, {pipeline_mode = #tpu.pipeline_mode<synchronous>, transform_indices = @transform_11, window_bounds = array<i64: 1, 128>}, {pipeline_mode = #tpu.pipeline_mode<synchronous>, transform_indices = @transform_12, window_bounds = array<i64: 128, 128>}, {pipeline_mode = #tpu.pipeline_mode<synchronous>, transform_indices = @transform_13, window_bounds = array<i64: 1, 128>}, {pipeline_mode = #tpu.pipeline_mode<synchronous>, transform_indices = @transform_14, window_bounds = array<i64: 128, 128>}, {pipeline_mode = #tpu.pipeline_mode<synchronous>, transform_indices = @transform_15, window_bounds = array<i64: 1, 128>}, {pipeline_mode = #tpu.pipeline_mode<synchronous>, transform_indices = @transform_16, window_bounds = array<i64: 128, 256>}, {pipeline_mode = #tpu.pipeline_mode<synchronous>, transform_indices = @transform_17, window_bounds = array<i64: 1, 256>}, {pipeline_mode = #tpu.pipeline_mode<synchronous>, transform_indices = @transform_18, window_bounds = array<i64: 256, 512>}, {pipeline_mode = #tpu.pipeline_mode<synchronous>, transform_indices = @transform_19, window_bounds = array<i64: 1, 512>}, {pipeline_mode = #tpu.pipeline_mode<synchronous>, transform_indices = @transform_20, window_bounds = array<i64: 512, 512>}, {pipeline_mode = #tpu.pipeline_mode<synchronous>, transform_indices = @transform_21, window_bounds = array<i64: 1, 512>}, {transform_indices = @transform_22, window_bounds = array<i64: 128, 512>}, {transform_indices = @transform_23, window_bounds = array<i64: 128, 128>}, {transform_indices = @transform_24, window_bounds = array<i64: 128, 128>}]} {
    %c0 = arith.constant 0 : index
    %c0_0 = arith.constant 0 : index
    %0 = vector.load %arg1[%c0, %c0_0] : memref<128x512xf32, #tpu.memory_space<vmem>>, vector<128x512xf32>
    %1 = arith.truncf %0 : vector<128x512xf32> to vector<128x512xbf16>
    %c0_1 = arith.constant 0 : index
    %c0_2 = arith.constant 0 : index
    %2 = vector.load %arg3[%c0_1, %c0_2] : memref<512x512xbf16, #tpu.memory_space<vmem>>, vector<512x512xbf16>
    %cst = arith.constant dense<0.000000e+00> : vector<128x512xf32>
    %3 = tpu.matmul %1, %2, %cst {dimension_numbers = #tpu.dot_dimension_numbers<[1], [0], [0], [1], [0, 0, 1, 1], [], []>} : vector<128x512xbf16>, vector<512x512xbf16>, vector<128x512xf32> -> vector<128x512xf32>
    %c0_3 = arith.constant 0 : index
    %c0_4 = arith.constant 0 : index
    %4 = vector.load %arg4[%c0_3, %c0_4] : memref<1x512xf32, #tpu.memory_space<vmem>>, vector<1x512xf32>
    %5 = vector.broadcast %4 : vector<1x512xf32> to vector<128x512xf32>
    %6 = arith.addf %3, %5 : vector<128x512xf32>
    %cst_5 = arith.constant 0.000000e+00 : f32
    %7 = vector.broadcast %cst_5 : f32 to vector<128x512xf32>
    %8 = arith.maximumf %6, %7 : vector<128x512xf32>
    %9 = arith.truncf %8 : vector<128x512xf32> to vector<128x512xbf16>
    %c0_6 = arith.constant 0 : index
    %c0_7 = arith.constant 0 : index
    %10 = vector.load %arg5[%c0_6, %c0_7] : memref<512x256xbf16, #tpu.memory_space<vmem>>, vector<512x256xbf16>
    %cst_8 = arith.constant dense<0.000000e+00> : vector<128x256xf32>
    %11 = tpu.matmul %9, %10, %cst_8 {dimension_numbers = #tpu.dot_dimension_numbers<[1], [0], [0], [1], [0, 0, 1, 1], [], []>} : vector<128x512xbf16>, vector<512x256xbf16>, vector<128x256xf32> -> vector<128x256xf32>
    %c0_9 = arith.constant 0 : index
    %c0_10 = arith.constant 0 : index
    %12 = vector.load %arg6[%c0_9, %c0_10] : memref<1x256xf32, #tpu.memory_space<vmem>>, vector<1x256xf32>
    %13 = vector.broadcast %12 : vector<1x256xf32> to vector<128x256xf32>
    %14 = arith.addf %11, %13 : vector<128x256xf32>
    %cst_11 = arith.constant 0.000000e+00 : f32
    %15 = vector.broadcast %cst_11 : f32 to vector<128x256xf32>
    %16 = arith.maximumf %14, %15 : vector<128x256xf32>
    %17 = arith.truncf %16 : vector<128x256xf32> to vector<128x256xbf16>
    %c0_12 = arith.constant 0 : index
    %c0_13 = arith.constant 0 : index
    %18 = vector.load %arg7[%c0_12, %c0_13] : memref<256x128xbf16, #tpu.memory_space<vmem>>, vector<256x128xbf16>
    %cst_14 = arith.constant dense<0.000000e+00> : vector<128x128xf32>
    %19 = tpu.matmul %17, %18, %cst_14 {dimension_numbers = #tpu.dot_dimension_numbers<[1], [0], [0], [1], [0, 0, 1, 1], [], []>} : vector<128x256xbf16>, vector<256x128xbf16>, vector<128x128xf32> -> vector<128x128xf32>
    %c0_15 = arith.constant 0 : index
    %c0_16 = arith.constant 0 : index
    %20 = vector.load %arg8[%c0_15, %c0_16] : memref<1x128xf32, #tpu.memory_space<vmem>>, vector<1x128xf32>
    %21 = vector.broadcast %20 : vector<1x128xf32> to vector<128x128xf32>
    %22 = arith.addf %19, %21 : vector<128x128xf32>
    %cst_17 = arith.constant 0.000000e+00 : f32
    %23 = vector.broadcast %cst_17 : f32 to vector<128x128xf32>
    %24 = arith.maximumf %22, %23 : vector<128x128xf32>
    %25 = arith.truncf %24 : vector<128x128xf32> to vector<128x128xbf16>
    %c0_18 = arith.constant 0 : index
    %c0_19 = arith.constant 0 : index
    %26 = vector.load %arg9[%c0_18, %c0_19] : memref<128x128xbf16, #tpu.memory_space<vmem>>, vector<128x128xbf16>
    %cst_20 = arith.constant dense<0.000000e+00> : vector<128x128xf32>
    %27 = tpu.matmul %25, %26, %cst_20 {dimension_numbers = #tpu.dot_dimension_numbers<[1], [0], [0], [1], [0, 0, 1, 1], [], []>} : vector<128x128xbf16>, vector<128x128xbf16>, vector<128x128xf32> -> vector<128x128xf32>
    %c0_21 = arith.constant 0 : index
    %c0_22 = arith.constant 0 : index
    %28 = vector.load %arg10[%c0_21, %c0_22] : memref<1x128xf32, #tpu.memory_space<vmem>>, vector<1x128xf32>
    %29 = vector.broadcast %28 : vector<1x128xf32> to vector<128x128xf32>
    %30 = arith.addf %27, %29 : vector<128x128xf32>
    %cst_23 = arith.constant 0.000000e+00 : f32
    %31 = vector.broadcast %cst_23 : f32 to vector<128x128xf32>
    %32 = arith.maximumf %30, %31 : vector<128x128xf32>
    %33 = arith.truncf %32 : vector<128x128xf32> to vector<128x128xbf16>
    %c0_24 = arith.constant 0 : index
    %c0_25 = arith.constant 0 : index
    %34 = vector.load %arg11[%c0_24, %c0_25] : memref<128x128xbf16, #tpu.memory_space<vmem>>, vector<128x128xbf16>
    %cst_26 = arith.constant dense<0.000000e+00> : vector<128x128xf32>
    %35 = tpu.matmul %33, %34, %cst_26 {dimension_numbers = #tpu.dot_dimension_numbers<[1], [0], [0], [1], [0, 0, 1, 1], [], []>} : vector<128x128xbf16>, vector<128x128xbf16>, vector<128x128xf32> -> vector<128x128xf32>
    %c0_27 = arith.constant 0 : index
    %c0_28 = arith.constant 0 : index
    %36 = vector.load %arg12[%c0_27, %c0_28] : memref<1x128xf32, #tpu.memory_space<vmem>>, vector<1x128xf32>
    %37 = vector.broadcast %36 : vector<1x128xf32> to vector<128x128xf32>
    %38 = arith.addf %35, %37 : vector<128x128xf32>
    %39 = arith.truncf %32 : vector<128x128xf32> to vector<128x128xbf16>
    %c0_29 = arith.constant 0 : index
    %c0_30 = arith.constant 0 : index
    %40 = vector.load %arg13[%c0_29, %c0_30] : memref<128x128xbf16, #tpu.memory_space<vmem>>, vector<128x128xbf16>
    %cst_31 = arith.constant dense<0.000000e+00> : vector<128x128xf32>
    %41 = tpu.matmul %39, %40, %cst_31 {dimension_numbers = #tpu.dot_dimension_numbers<[1], [0], [0], [1], [0, 0, 1, 1], [], []>} : vector<128x128xbf16>, vector<128x128xbf16>, vector<128x128xf32> -> vector<128x128xf32>
    %c0_32 = arith.constant 0 : index
    %c0_33 = arith.constant 0 : index
    %42 = vector.load %arg14[%c0_32, %c0_33] : memref<1x128xf32, #tpu.memory_space<vmem>>, vector<1x128xf32>
    %43 = vector.broadcast %42 : vector<1x128xf32> to vector<128x128xf32>
    %44 = arith.addf %41, %43 : vector<128x128xf32>
    %c0_34 = arith.constant 0 : index
    %c0_35 = arith.constant 0 : index
    %45 = vector.load %arg24[%c0_34, %c0_35] : memref<128x128xf32, #tpu.memory_space<vmem>>, vector<128x128xf32>
    tpu.vector_store %arg24[%c0_34, %c0_35], %38 {strides = array<i32>} : memref<128x128xf32, #tpu.memory_space<vmem>>, vector<128x128xf32>,
    %c0_36 = arith.constant 0 : index
    %c0_37 = arith.constant 0 : index
    %46 = vector.load %arg25[%c0_36, %c0_37] : memref<128x128xf32, #tpu.memory_space<vmem>>, vector<128x128xf32>
    tpu.vector_store %arg25[%c0_36, %c0_37], %44 {strides = array<i32>} : memref<128x128xf32, #tpu.memory_space<vmem>>, vector<128x128xf32>,
    %c0_38 = arith.constant 0 : index
    %c0_39 = arith.constant 0 : index
    %47 = vector.load %arg2[%c0_38, %c0_39] : memref<128x128xf32, #tpu.memory_space<vmem>>, vector<128x128xf32>
    %cst_40 = arith.constant 5.000000e-01 : f32
    %48 = vector.broadcast %cst_40 : f32 to vector<128x128xf32>
    %49 = arith.mulf %48, %44 : vector<128x128xf32>
    %50 = math.exp %49 : vector<128x128xf32>
    %51 = arith.mulf %47, %50 : vector<128x128xf32>
    %52 = arith.addf %38, %51 : vector<128x128xf32>
    %53 = arith.truncf %52 : vector<128x128xf32> to vector<128x128xbf16>
    %c0_41 = arith.constant 0 : index
    %c0_42 = arith.constant 0 : index
    %54 = vector.load %arg15[%c0_41, %c0_42] : memref<128x128xbf16, #tpu.memory_space<vmem>>, vector<128x128xbf16>
    %cst_43 = arith.constant dense<0.000000e+00> : vector<128x128xf32>
    %55 = tpu.matmul %53, %54, %cst_43 {dimension_numbers = #tpu.dot_dimension_numbers<[1], [0], [0], [1], [0, 0, 1, 1], [], []>} : vector<128x128xbf16>, vector<128x128xbf16>, vector<128x128xf32> -> vector<128x128xf32>
    %c0_44 = arith.constant 0 : index
    %c0_45 = arith.constant 0 : index
    %56 = vector.load %arg16[%c0_44, %c0_45] : memref<1x128xf32, #tpu.memory_space<vmem>>, vector<1x128xf32>
    %57 = vector.broadcast %56 : vector<1x128xf32> to vector<128x128xf32>
    %58 = arith.addf %55, %57 : vector<128x128xf32>
    %cst_46 = arith.constant 0.000000e+00 : f32
    %59 = vector.broadcast %cst_46 : f32 to vector<128x128xf32>
    %60 = arith.maximumf %58, %59 : vector<128x128xf32>
    %61 = arith.truncf %60 : vector<128x128xf32> to vector<128x128xbf16>
    %c0_47 = arith.constant 0 : index
    %c0_48 = arith.constant 0 : index
    %62 = vector.load %arg17[%c0_47, %c0_48] : memref<128x256xbf16, #tpu.memory_space<vmem>>, vector<128x256xbf16>
    %cst_49 = arith.constant dense<0.000000e+00> : vector<128x256xf32>
    %63 = tpu.matmul %61, %62, %cst_49 {dimension_numbers = #tpu.dot_dimension_numbers<[1], [0], [0], [1], [0, 0, 1, 1], [], []>} : vector<128x128xbf16>, vector<128x256xbf16>, vector<128x256xf32> -> vector<128x256xf32>
    %c0_50 = arith.constant 0 : index
    %c0_51 = arith.constant 0 : index
    %64 = vector.load %arg18[%c0_50, %c0_51] : memref<1x256xf32, #tpu.memory_space<vmem>>, vector<1x256xf32>
    %65 = vector.broadcast %64 : vector<1x256xf32> to vector<128x256xf32>
    %66 = arith.addf %63, %65 : vector<128x256xf32>
    %cst_52 = arith.constant 0.000000e+00 : f32
    %67 = vector.broadcast %cst_52 : f32 to vector<128x256xf32>
    %68 = arith.maximumf %66, %67 : vector<128x256xf32>
    %69 = arith.truncf %68 : vector<128x256xf32> to vector<128x256xbf16>
    %c0_53 = arith.constant 0 : index
    %c0_54 = arith.constant 0 : index
    %70 = vector.load %arg19[%c0_53, %c0_54] : memref<256x512xbf16, #tpu.memory_space<vmem>>, vector<256x512xbf16>
    %cst_55 = arith.constant dense<0.000000e+00> : vector<128x512xf32>
    %71 = tpu.matmul %69, %70, %cst_55 {dimension_numbers = #tpu.dot_dimension_numbers<[1], [0], [0], [1], [0, 0, 1, 1], [], []>} : vector<128x256xbf16>, vector<256x512xbf16>, vector<128x512xf32> -> vector<128x512xf32>
    %c0_56 = arith.constant 0 : index
    %c0_57 = arith.constant 0 : index
    %72 = vector.load %arg20[%c0_56, %c0_57] : memref<1x512xf32, #tpu.memory_space<vmem>>, vector<1x512xf32>
    %73 = vector.broadcast %72 : vector<1x512xf32> to vector<128x512xf32>
    %74 = arith.addf %71, %73 : vector<128x512xf32>
    %cst_58 = arith.constant 0.000000e+00 : f32
    %75 = vector.broadcast %cst_58 : f32 to vector<128x512xf32>
    %76 = arith.maximumf %74, %75 : vector<128x512xf32>
    %77 = arith.truncf %76 : vector<128x512xf32> to vector<128x512xbf16>
    %c0_59 = arith.constant 0 : index
    %c0_60 = arith.constant 0 : index
    %78 = vector.load %arg21[%c0_59, %c0_60] : memref<512x512xbf16, #tpu.memory_space<vmem>>, vector<512x512xbf16>
    %cst_61 = arith.constant dense<0.000000e+00> : vector<128x512xf32>
    %79 = tpu.matmul %77, %78, %cst_61 {dimension_numbers = #tpu.dot_dimension_numbers<[1], [0], [0], [1], [0, 0, 1, 1], [], []>} : vector<128x512xbf16>, vector<512x512xbf16>, vector<128x512xf32> -> vector<128x512xf32>
    %c0_62 = arith.constant 0 : index
    %c0_63 = arith.constant 0 : index
    %80 = vector.load %arg22[%c0_62, %c0_63] : memref<1x512xf32, #tpu.memory_space<vmem>>, vector<1x512xf32>
    %81 = vector.broadcast %80 : vector<1x512xf32> to vector<128x512xf32>
    %82 = arith.addf %79, %81 : vector<128x512xf32>
    %cst_64 = arith.constant 0.000000e+00 : f32
    %83 = vector.broadcast %cst_64 : f32 to vector<128x512xf32>
    %84 = arith.subf %83, %82 : vector<128x512xf32>
    %85 = math.exp %84 : vector<128x512xf32>
    %cst_65 = arith.constant 1.000000e+00 : f32
    %86 = vector.broadcast %cst_65 : f32 to vector<128x512xf32>
    %87 = arith.addf %86, %85 : vector<128x512xf32>
    %88 = tpu.reciprocal %87 {approx = true} : vector<128x512xf32> -> vector<128x512xf32>
    %c0_66 = arith.constant 0 : index
    %c0_67 = arith.constant 0 : index
    %89 = vector.load %arg23[%c0_66, %c0_67] : memref<128x512xf32, #tpu.memory_space<vmem>>, vector<128x512xf32>
    tpu.vector_store %arg23[%c0_66, %c0_67], %88 {strides = array<i32>} : memref<128x512xf32, #tpu.memory_space<vmem>>, vector<128x512xf32>,
    return
  }
  func.func @transform_0(%arg0: i32) -> (i32, i32) {
    %c0_i32 = arith.constant 0 : i32
    %c0_i32_0 = arith.constant 0 : i32
    return %arg0, %c0_i32 : i32, i32
  }
  func.func @transform_1(%arg0: i32) -> (i32, i32) {
    %c0_i32 = arith.constant 0 : i32
    %c0_i32_0 = arith.constant 0 : i32
    return %arg0, %c0_i32 : i32, i32
  }
  func.func @transform_2(%arg0: i32) -> (i32, i32) {
    %c0_i32 = arith.constant 0 : i32
    %c0_i32_0 = arith.constant 0 : i32
    %c0_i32_1 = arith.constant 0 : i32
    return %c0_i32, %c0_i32_0 : i32, i32
  }
  func.func @transform_3(%arg0: i32) -> (i32, i32) {
    %c0_i32 = arith.constant 0 : i32
    %c0_i32_0 = arith.constant 0 : i32
    %c0_i32_1 = arith.constant 0 : i32
    return %c0_i32, %c0_i32_0 : i32, i32
  }
  func.func @transform_4(%arg0: i32) -> (i32, i32) {
    %c0_i32 = arith.constant 0 : i32
    %c0_i32_0 = arith.constant 0 : i32
    %c0_i32_1 = arith.constant 0 : i32
    return %c0_i32, %c0_i32_0 : i32, i32
  }
  func.func @transform_5(%arg0: i32) -> (i32, i32) {
    %c0_i32 = arith.constant 0 : i32
    %c0_i32_0 = arith.constant 0 : i32
    %c0_i32_1 = arith.constant 0 : i32
    return %c0_i32, %c0_i32_0 : i32, i32
  }
  func.func @transform_6(%arg0: i32) -> (i32, i32) {
    %c0_i32 = arith.constant 0 : i32
    %c0_i32_0 = arith.constant 0 : i32
    %c0_i32_1 = arith.constant 0 : i32
    return %c0_i32, %c0_i32_0 : i32, i32
  }
  func.func @transform_7(%arg0: i32) -> (i32, i32) {
    %c0_i32 = arith.constant 0 : i32
    %c0_i32_0 = arith.constant 0 : i32
    %c0_i32_1 = arith.constant 0 : i32
    return %c0_i32, %c0_i32_0 : i32, i32
  }
  func.func @transform_8(%arg0: i32) -> (i32, i32) {
    %c0_i32 = arith.constant 0 : i32
    %c0_i32_0 = arith.constant 0 : i32
    %c0_i32_1 = arith.constant 0 : i32
    return %c0_i32, %c0_i32_0 : i32, i32
  }
  func.func @transform_9(%arg0: i32) -> (i32, i32) {
    %c0_i32 = arith.constant 0 : i32
    %c0_i32_0 = arith.constant 0 : i32
    %c0_i32_1 = arith.constant 0 : i32
    return %c0_i32, %c0_i32_0 : i32, i32
  }
  func.func @transform_10(%arg0: i32) -> (i32, i32) {
    %c0_i32 = arith.constant 0 : i32
    %c0_i32_0 = arith.constant 0 : i32
    %c0_i32_1 = arith.constant 0 : i32
    return %c0_i32, %c0_i32_0 : i32, i32
  }
  func.func @transform_11(%arg0: i32) -> (i32, i32) {
    %c0_i32 = arith.constant 0 : i32
    %c0_i32_0 = arith.constant 0 : i32
    %c0_i32_1 = arith.constant 0 : i32
    return %c0_i32, %c0_i32_0 : i32, i32
  }
  func.func @transform_12(%arg0: i32) -> (i32, i32) {
    %c0_i32 = arith.constant 0 : i32
    %c0_i32_0 = arith.constant 0 : i32
    %c0_i32_1 = arith.constant 0 : i32
    return %c0_i32, %c0_i32_0 : i32, i32
  }
  func.func @transform_13(%arg0: i32) -> (i32, i32) {
    %c0_i32 = arith.constant 0 : i32
    %c0_i32_0 = arith.constant 0 : i32
    %c0_i32_1 = arith.constant 0 : i32
    return %c0_i32, %c0_i32_0 : i32, i32
  }
  func.func @transform_14(%arg0: i32) -> (i32, i32) {
    %c0_i32 = arith.constant 0 : i32
    %c0_i32_0 = arith.constant 0 : i32
    %c0_i32_1 = arith.constant 0 : i32
    return %c0_i32, %c0_i32_0 : i32, i32
  }
  func.func @transform_15(%arg0: i32) -> (i32, i32) {
    %c0_i32 = arith.constant 0 : i32
    %c0_i32_0 = arith.constant 0 : i32
    %c0_i32_1 = arith.constant 0 : i32
    return %c0_i32, %c0_i32_0 : i32, i32
  }
  func.func @transform_16(%arg0: i32) -> (i32, i32) {
    %c0_i32 = arith.constant 0 : i32
    %c0_i32_0 = arith.constant 0 : i32
    %c0_i32_1 = arith.constant 0 : i32
    return %c0_i32, %c0_i32_0 : i32, i32
  }
  func.func @transform_17(%arg0: i32) -> (i32, i32) {
    %c0_i32 = arith.constant 0 : i32
    %c0_i32_0 = arith.constant 0 : i32
    %c0_i32_1 = arith.constant 0 : i32
    return %c0_i32, %c0_i32_0 : i32, i32
  }
  func.func @transform_18(%arg0: i32) -> (i32, i32) {
    %c0_i32 = arith.constant 0 : i32
    %c0_i32_0 = arith.constant 0 : i32
    %c0_i32_1 = arith.constant 0 : i32
    return %c0_i32, %c0_i32_0 : i32, i32
  }
  func.func @transform_19(%arg0: i32) -> (i32, i32) {
    %c0_i32 = arith.constant 0 : i32
    %c0_i32_0 = arith.constant 0 : i32
    %c0_i32_1 = arith.constant 0 : i32
    return %c0_i32, %c0_i32_0 : i32, i32
  }
  func.func @transform_20(%arg0: i32) -> (i32, i32) {
    %c0_i32 = arith.constant 0 : i32
    %c0_i32_0 = arith.constant 0 : i32
    %c0_i32_1 = arith.constant 0 : i32
    return %c0_i32, %c0_i32_0 : i32, i32
  }
  func.func @transform_21(%arg0: i32) -> (i32, i32) {
    %c0_i32 = arith.constant 0 : i32
    %c0_i32_0 = arith.constant 0 : i32
    %c0_i32_1 = arith.constant 0 : i32
    return %c0_i32, %c0_i32_0 : i32, i32
  }
  func.func @transform_22(%arg0: i32) -> (i32, i32) {
    %c0_i32 = arith.constant 0 : i32
    %c0_i32_0 = arith.constant 0 : i32
    return %arg0, %c0_i32 : i32, i32
  }
  func.func @transform_23(%arg0: i32) -> (i32, i32) {
    %c0_i32 = arith.constant 0 : i32
    %c0_i32_0 = arith.constant 0 : i32
    return %arg0, %c0_i32 : i32, i32
  }
  func.func @transform_24(%arg0: i32) -> (i32, i32) {
    %c0_i32 = arith.constant 0 : i32
    %c0_i32_0 = arith.constant 0 : i32
    return %arg0, %c0_i32 : i32, i32
  }
}

</mosaic_0001>

<bundles_post_ra>
// kernel: tpu_custom_call.1
= control target key start
LH: loop header
LB: loop body
LE: loop exit
PB: predicated region body
PF: predicated region fallthrough
CT: control target
= control target key end

     0   :  { %s13440_s0 = inlined_call_operand.hbm [shape: f32[256,512], index: 0, kind: input, shape index: {}]   ;;  %s13441_s1 = inlined_call_operand.hbm [shape: f32[256,128], index: 1, kind: input, shape index: {}]   ;;  %s13442_s2 = inlined_call_operand.hbm [shape: bf16[512,512], index: 2, kind: input, shape index: {}]   ;;  %s13443_s3 = inlined_call_operand.hbm [shape: f32[1,512], index: 3, kind: input, shape index: {}]   ;;  %s13444_s4 = inlined_call_operand.hbm [shape: bf16[512,256], index: 4, kind: input, shape index: {}]   ;;  %s13445_s5 = inlined_call_operand.hbm [shape: f32[1,256], index: 5, kind: input, shape index: {}]   ;;  %s13446_s6 = inlined_call_operand.hbm [shape: bf16[256,128], index: 6, kind: input, shape index: {}]   ;;  %s13447_s7 = inlined_call_operand.hbm [shape: f32[1,128], index: 7, kind: input, shape index: {}]   ;;  %s13448_s8 = inlined_call_operand.hbm [shape: bf16[128,128], index: 8, kind: input, shape index: {}]   ;;  %s13449_s9 = inlined_call_operand.hbm [shape: f32[1,128], index: 9, kind: input, shape index: {}]   ;;  %s13450_s10 = inlined_call_operand.hbm [shape: bf16[128,128], index: 10, kind: input, shape index: {}]   ;;  %s13451_s11 = inlined_call_operand.hbm [shape: f32[1,128], index: 11, kind: input, shape index: {}]   ;;  %s13452_s12 = inlined_call_operand.hbm [shape: bf16[128,128], index: 12, kind: input, shape index: {}]   ;;  %s13453_s13 = inlined_call_operand.vmem [shape: f32[1,128], index: 13, kind: input, shape index: {}]   ;;  %s13454_s14 = inlined_call_operand.hbm [shape: bf16[128,128], index: 14, kind: input, shape index: {}]   ;;  %s13455_s15 = inlined_call_operand.vmem [shape: f32[1,128], index: 15, kind: input, shape index: {}]   ;;  %s13456_s16 = inlined_call_operand.hbm [shape: bf16[128,256], index: 16, kind: input, shape index: {}]   ;;  %s13457_s17 = inlined_call_operand.vmem [shape: f32[1,256], index: 17, kind: input, shape index: {}]   ;;  %s13458_s18 = inlined_call_operand.hbm [shape: bf16[256,512], index: 18, kind: input, shape index: {}]   ;;  %s13459_s19 = inlined_call_operand.vmem [shape: f32[1,512], index: 19, kind: input, shape index: {}]   ;;  %s13460_s20 = inlined_call_operand.hbm [shape: bf16[512,512], index: 20, kind: input, shape index: {}]   ;;  %s13461_s21 = inlined_call_operand.vmem [shape: f32[1,512], index: 21, kind: input, shape index: {}]   ;;  %s13462_s22 = inlined_call_operand.hbm [shape: f32[256,512], index: 22, kind: output, shape index: {0}]   ;;  %s13463_s23 = inlined_call_operand.hbm [shape: f32[256,128], index: 23, kind: output, shape index: {1}]   ;;  %s13464_s24 = inlined_call_operand.hbm [shape: f32[256,128], index: 24, kind: output, shape index: {2}]  }
   0x1   :  { %13485 = sst [smem:[#allocation49_spill]] %s13440_s0 }
   0x2   :  { %13486 = sst [smem:[#allocation50_spill]] %s13441_s1 }
   0x3   :  { %13487 = sst [smem:[#allocation51_spill]] %s13442_s2 }
   0x4   :  { %13488 = sst [smem:[#allocation52_spill]] %s13443_s3 }
   0x5   :  { %13489 = sst [smem:[#allocation53_spill]] %s13444_s4 }
   0x6   :  { %13490 = sst [smem:[#allocation54_spill]] %s13445_s5 }
   0x7   :  { %13491 = sst [smem:[#allocation55_spill]] %s13446_s6 }
   0x8   :  { %13492 = sst [smem:[#allocation56_spill]] %s13447_s7 }
   0x9   :  { %13493 = sst [smem:[#allocation57_spill]] %s13448_s8 }
   0xa   :  { %13494 = sst [smem:[#allocation58_spill]] %s13449_s9 }
   0xb   :  { %13495 = sst [smem:[#allocation59_spill]] %s13450_s10 }
   0xc   :  { %13496 = sst [smem:[#allocation60_spill]] %s13451_s11 }
   0xd   :  { %13497 = sst [smem:[#allocation61_spill]] %s13452_s12 }
   0xe   :  { %13498 = sst [smem:[#allocation62_spill]] %s13453_s13 }
   0xf   :  { %13499 = sst [smem:[#allocation63_spill]] %s13454_s14 }
  0x10   :  { %13500 = sst [smem:[#allocation64_spill]] %s13455_s15 }
  0x11   :  { %13501 = sst [smem:[#allocation65_spill]] %s13456_s16 }
  0x12   :  { %13502 = sst [smem:[#allocation66_spill]] %s13457_s17 }
  0x13   :  { %13503 = sst [smem:[#allocation67_spill]] %s13458_s18 }
  0x14   :  { %13504 = sst [smem:[#allocation68_spill]] %s13459_s19 }
  0x15   :  { %13505 = sst [smem:[#allocation69_spill]] %s13460_s20 }
  0x16   :  { %13506 = sst [smem:[#allocation70_spill]] %s13461_s21 }
  0x17   :  { %13507 = sst [smem:[#allocation71_spill]] %s13462_s22 }
  0x18   :  { %13508 = sst [smem:[#allocation72_spill]] %s13463_s23 }
  0x19   :  { %13509 = sst [smem:[#allocation73_spill]] %s13464_s24 }
  0x1a   :  { %30 = vsyncpa [#allocation3], 0 }
  0x1b   :  { %32 = vsyncpa [#allocation3 + $0x1], 0 }
  0x1c   :  { %33 = vsyncpa [#allocation6], 0 }
  0x1d   :  { %35 = vsyncpa [#allocation6 + $0x1], 0 }
  0x1e   :  { %36 = vsyncpa [#allocation9], 0 }
  0x1f   :  { %37 = vsyncpa [#allocation12], 0 }
  0x20   :  { %38 = vsyncpa [#allocation15], 0 }
  0x21   :  { %39 = vsyncpa [#allocation18], 0 }
  0x22   :  { %40 = vsyncpa [#allocation21], 0 }
  0x23   :  { %41 = vsyncpa [#allocation24], 0 }
  0x24   :  { %42 = vsyncpa [#allocation27], 0 }
  0x25   :  { %43 = vsyncpa [#allocation4], 0 }
  0x26   :  { %45 = vsyncpa [#allocation4 + $0x1], 0 }
  0x27   :  { %46 = vsyncpa [#allocation31], 0 }
  0x28   :  { %48 = vsyncpa [#allocation31 + $0x1], 0  ;;  %s11639_s5 = smov 0   ;;  %s11641_s26 = smov 0  }
  0x29   :  { %s11643_s27 = smov 0   ;;  %s11645_s28 = smov 0  }
  0x2a LB: > { %s13510_s29 = sld [smem:[#allocation51_spill]]  ;;  %s11663_s7 = sadd.s32 4294967295, %s11485_s28   ;;  %s11485_s28 = sphi %s11645_s28, %s13561_s28   ;;  %s11481_s27 = sphi %s11643_s27, %s13560_s27   ;;  %s11477_s26 = sphi %s11641_s26, %s13559_s26   ;;  %s11473_s5 = sphi %s11639_s5, %s13558_s5  }
  0x2b   : > { %p7990_p0 = scmp.ge.s32.totalorder %s11485_s28, 1  ;;  %p75_p1 = scmp.eq.s32.totalorder %s11663_s7, 0 }
  0x2c   : > { %p609_p2 = scmp.lt.s32.totalorder %s11485_s28, 3  ;;  %s11487_s3 = smov [#allocation7]  }
  0x2d   : > { %s622_s25 = sshll.u32 %s11487_s3, 4  ;;  %s13512_s1 = sld [smem:[#allocation52_spill]]  ;;  %s623_s25 = int_to_ptr.vmem [resolvable:$true] %s622_s25 }
  0x2e   : > { %p11668_p3 = pnand %p7990_p0, %p609_p2  ;;  %s13514_s3 = sld [smem:[#allocation54_spill]] }
  0x2f   : > { %s11488_s23 = smov [#allocation8]   ;;  %s13475_s19 = smov 256  }
  0x30   : > { %s620_s0 = sshll.u32 %s13510_s29, 4  ;;  %p10364_p4 = pneg %p11668_p3  ;;  %s621_s0 = int_to_ptr.hbm [resolvable:$true] %s620_s0 }
  0x31   : > { %s637_s21 = sshll.u32 %s11488_s23, 4  ;;  %s13476_s17 = smov 16   ;;  %s638_s21 = int_to_ptr.vmem [resolvable:$true] %s637_s21 }
  0x32   : > { %p11680_p6 = pnand %p10364_p4, %p75_p1  ;;  %s11491_s22 = smov [#allocation11]  }
  0x33   : > { %s635_s6 = sshll.u32 %s13512_s1, 4  ;;  %s13515_s1 = sld [smem:[#allocation56_spill]]  ;;  %s636_s6 = int_to_ptr.hbm [resolvable:$true] %s635_s6 }
  0x34   : > { %s661_s24 = sshll.u32 %s13514_s3, 4  ;;  %s663_s29 = sshll.u32 %s11491_s22, 4  ;;  %s662_s24 = int_to_ptr.hbm [resolvable:$true] %s661_s24  ;;  %s664_s29 = int_to_ptr.vmem [resolvable:$true] %s663_s29 }
  0x35   : > { %10367 = dma.hbm_to_vmem [thread:$0]  (!%p11680_p6), %s621_s0, 16384, %s623_s25, [#allocation6], %s13475_s19, %s13475_s19, %s13476_s17  }
  0x36   : > { %10370 = dma.hbm_to_vmem [thread:$0]  (!%p11680_p6), %s636_s6, 64, %s638_s21, [#allocation9]  }
  0x37   : > { %10376 = dma.hbm_to_vmem [thread:$0]  (!%p11680_p6), %s662_s24, 32, %s664_s29, [#allocation12]  }
  0x38   : > { %s11492_s23 = smov [#allocation14]   ;;  %s13516_s9 = sld [smem:[#allocation58_spill]] }
  0x39   : > { %s687_s15 = sshll.u32 %s13515_s1, 4  ;;  %s689_s3 = sshll.u32 %s11492_s23, 4  ;;  %s688_s15 = int_to_ptr.hbm [resolvable:$true] %s687_s15  ;;  %s690_s3 = int_to_ptr.vmem [resolvable:$true] %s689_s3 }
  0x3a   : > { %10382 = dma.hbm_to_vmem [thread:$0]  (!%p11680_p6), %s688_s15, 16, %s690_s3, [#allocation15]  }
  0x3b   : > { %s13517_s11 = sld [smem:[#allocation60_spill]]  ;;  %s11493_s4 = smov [#allocation17]  }
  0x3c   : > { %s715_s1 = sshll.u32 %s11493_s4, 4  ;;  %s11494_s24 = smov [#allocation20]   ;;  %s716_s1 = int_to_ptr.vmem [resolvable:$true] %s715_s1 }
  0x3d   : > { %s741_s22 = sshll.u32 %s11494_s24, 4  ;;  %s13518_s14 = sld [smem:[#allocation63_spill]]  ;;  %s742_s22 = int_to_ptr.vmem [resolvable:$true] %s741_s22 }
  0x3e   : > { %s713_s25 = sshll.u32 %s13516_s9, 4  ;;  %s11495_s23 = smov [#allocation23]   ;;  %s714_s25 = int_to_ptr.hbm [resolvable:$true] %s713_s25 }
  0x3f   : > { %10388 = dma.hbm_to_vmem [thread:$0]  (!%p11680_p6), %s714_s25, 16, %s716_s1, [#allocation18]  }
  0x40   : > { %s769_s3 = sshll.u32 %s11495_s23, 4  ;;  %s13519_s18 = sld [smem:[#allocation67_spill]]  ;;  %s770_s3 = int_to_ptr.vmem [resolvable:$true] %s769_s3 }
  0x41   : > { %s739_s8 = sshll.u32 %s13517_s11, 4  ;;  %s13471_s4 = smov 64   ;;  %s740_s8 = int_to_ptr.hbm [resolvable:$true] %s739_s8 }
  0x42   : > { %10394 = dma.hbm_to_vmem [thread:$0]  (!%p11680_p6), %s740_s8, 16, %s742_s22, [#allocation21]  }
  0x43   : > { %s767_s15 = sshll.u32 %s13518_s14, 4  ;;  %s13473_s25 = smov 4   ;;  %s768_s15 = int_to_ptr.hbm [resolvable:$true] %s767_s15 }
  0x44   : > { %10400 = dma.hbm_to_vmem [thread:$0]  (!%p11680_p6), %s768_s15, 1024, %s770_s3, [#allocation24], %s13471_s4, %s13471_s4, %s13473_s25  }
  0x45   : > { %s11498_s8 = smov [#allocation26]   ;;  %s13520_s13 = sld [smem:[#allocation53_spill]] }
  0x46   : > { %s801_s6 = sshll.u32 %s13519_s18, 4  ;;  %s803_s1 = sshll.u32 %s11498_s8, 4  ;;  %s802_s6 = int_to_ptr.hbm [resolvable:$true] %s801_s6  ;;  %s804_s1 = int_to_ptr.vmem [resolvable:$true] %s803_s1 }
  0x47   : > { %10406 = dma.hbm_to_vmem [thread:$0]  (!%p11680_p6), %s802_s6, 8192, %s804_s1, [#allocation27], %s13475_s19, %s13475_s19, %s13476_s17  }
  0x48   : > { %s11499_s23 = smov [#allocation10]   ;;  %s13521_s3 = sld [smem:[#allocation55_spill]] }
  0x49   : > { %s648_s0 = sshll.u32 %s11499_s23, 4  ;;  %s13477_s8 = smov 128   ;;  %s649_s0 = int_to_ptr.vmem [resolvable:$true] %s648_s0 }
  0x4a   : > { %s13478_s25 = smov 8   ;;  %s11502_s24 = smov [#allocation13]  }
  0x4b   : > { %s646_s29 = sshll.u32 %s13520_s13, 4  ;;  %s674_s22 = sshll.u32 %s11502_s24, 4  ;;  %s647_s29 = int_to_ptr.hbm [resolvable:$true] %s646_s29  ;;  %s675_s22 = int_to_ptr.vmem [resolvable:$true] %s674_s22 }
  0x4c   : > { %10373 = dma.hbm_to_vmem [thread:$0]  (!%p11680_p6), %s647_s29, 8192, %s649_s0, [#allocation9], %s13477_s8, %s13477_s8, %s13478_s25  }
  0x4d   : > { %s13522_s1 = sld [smem:[#allocation57_spill]]  ;;  %s13523_s21 = smov 4  }
  0x4e   : > { %s672_s4 = sshll.u32 %s13521_s3, 4  ;;  %s13524_s15 = smov 64   ;;  %s673_s4 = int_to_ptr.hbm [resolvable:$true] %s672_s4 }
  0x4f   : > { %10379 = dma.hbm_to_vmem [thread:$0]  (!%p11680_p6), %s673_s4, 2048, %s675_s22, [#allocation12], %s13524_s15, %s13524_s15, %s13523_s21  }
  0x50   : > { %s13525_s10 = sld [smem:[#allocation59_spill]]  ;;  %s11503_s29 = smov [#allocation16]  }
  0x51   : > { %s700_s0 = sshll.u32 %s11503_s29, 4  ;;  %s11504_s24 = smov [#allocation19]   ;;  %s701_s0 = int_to_ptr.vmem [resolvable:$true] %s700_s0 }
  0x52   : > { %s726_s13 = sshll.u32 %s11504_s24, 4  ;;  %s13526_s12 = sld [smem:[#allocation61_spill]]  ;;  %s727_s13 = int_to_ptr.vmem [resolvable:$true] %s726_s13 }
  0x53   : > { %s698_s23 = sshll.u32 %s13522_s1, 4  ;;  %s13527_s16 = sld [smem:[#allocation65_spill]]  ;;  %s699_s23 = int_to_ptr.hbm [resolvable:$true] %s698_s23 }
  0x54   : > { %10385 = dma.hbm_to_vmem [thread:$0]  (!%p11680_p6), %s699_s23, 1024, %s701_s0, [#allocation15], %s13524_s15, %s13524_s15, %s13523_s21  }
  0x55   : > { %s11505_s23 = smov [#allocation22]   ;;  %s13528_s20 = sld [smem:[#allocation69_spill]] }
  0x56   : > { %s724_s17 = sshll.u32 %s13525_s10, 4  ;;  %s752_s29 = sshll.u32 %s11505_s23, 4  ;;  %s725_s17 = int_to_ptr.hbm [resolvable:$true] %s724_s17  ;;  %s753_s29 = int_to_ptr.vmem [resolvable:$true] %s752_s29 }
  0x57   : > { %10391 = dma.hbm_to_vmem [thread:$0]  (!%p11680_p6), %s725_s17, 1024, %s727_s13, [#allocation18], %s13524_s15, %s13524_s15, %s13523_s21  }
  0x58   : > { %s750_s4 = sshll.u32 %s13526_s12, 4  ;;  %s11506_s17 = smov [#allocation25]   ;;  %s751_s4 = int_to_ptr.hbm [resolvable:$true] %s750_s4 }
  0x59   : > { %s784_s3 = sshll.u32 %s13527_s16, 4  ;;  %s786_s0 = sshll.u32 %s11506_s17, 4  ;;  %s785_s3 = int_to_ptr.hbm [resolvable:$true] %s784_s3  ;;  %s787_s0 = int_to_ptr.vmem [resolvable:$true] %s786_s0 }
  0x5a   : > { %10397 = dma.hbm_to_vmem [thread:$0]  (!%p11680_p6), %s751_s4, 1024, %s753_s29, [#allocation21], %s13524_s15, %s13524_s15, %s13523_s21  }
  0x5b   : > { %s818_s6 = sshll.u32 %s13528_s20, 4  ;;  %s11507_s21 = smov [#allocation28]   ;;  %s819_s6 = int_to_ptr.hbm [resolvable:$true] %s818_s6 }
  0x5c   : > { %10403 = dma.hbm_to_vmem [thread:$0]  (!%p11680_p6), %s785_s3, 2048, %s787_s0, [#allocation24], %s13477_s8, %s13477_s8, %s13478_s25  }
  0x5d   : > { %s820_s15 = sshll.u32 %s11507_s21, 4  ;;  %s13529_s1 = smov 16   ;;  %s821_s15 = int_to_ptr.vmem [resolvable:$true] %s820_s15 }
  0x5e   : > { %s13530_s4 = smov 256   ;;  %s13479_s19 = sadd.s32 4294967294, %s11485_s28  }
  0x5f   : > { %10409 = dma.hbm_to_vmem [thread:$0]  (!%p11680_p6), %s819_s6, 16384, %s821_s15, [#allocation27], %s13530_s4, %s13530_s4, %s13529_s1  }
  0x60   : > { %s11785_s22 = sadd.s32 1, %s11485_s28   ;;  %s61_s23 = sadd.s32 1, %s11481_s27 }
  0x61   : > { %s58_s29 = ssub.s32 %s11485_s28, %s11785_s22  ;;  %p68_p7 = scmp.ne.s32.totalorder %s11481_s27, %s11477_s26 }
  0x62   : > { %p59_p8 = scmp.eq.s32.totalorder %s58_s29, 0  ;;  %p69_p9 = scmp.eq.s32.totalorder %s11485_s28, 0 }
  0x63   : > { %p74_p10 = scmp.ne.s32.totalorder %s11477_s26, %s11473_s5  ;;  %p544_p11 = scmp.eq.s32.totalorder %s11663_s7, 1 }
  0x64   : > { %s11797_s3 = scalar_select %p59_p8, %s11481_s27, %s61_s23  }
  0x65   : > { %p11799_p12 = por %p69_p9, %p68_p7  ;;  %p11805_p13 = por %p75_p1, %p74_p10 }
  0x66   : > { %p11809_p0 = por %p544_p11, %p68_p7  ;;  %p550_p2 = scmp.eq.s32.totalorder %s13479_s19, 1 }
  0x67   : > { %p10442_p4 = scmp.lt.s32.totalorder %s11485_s28, 2  ;;  %s11817_s24 = sand.u32 1, %s11481_s27  }
  0x68   : > { %p11819_p6 = por %p550_p2, %p74_p10  ;;  %s8007_s6 = sshll.u32 %s11817_s24, 9 }
  0x69   : > { %s9840_s21 = sshll.u32 %s11485_s28, 9  ;;  %s13535_s4 = sld [smem:[#allocation49_spill]] }
  0x6a   : > { %s841_s8 = scalar_lea.vmem [#allocation2], %s8007_s6  ;;  %p11830_p7 = pnand %p10442_p4, %p11799_p12 }
  0x6b   : > { %s850_s25 = sshll.u32 %s841_s8, 4  ;;  %s860_s9 = sand.u32 1, %s11485_s28   ;;  %s851_s25 = int_to_ptr.vmem [resolvable:$true] %s850_s25 }
  0x6c   : > { %s838_s10 = scalar_lea.sflag [#allocation3], %s11817_s24  ;;  %p11267_p9 = pneg %p11830_p7 }
  0x6f   : > { %s847_s23 = scalar_lea.hbm %s13535_s4, %s9840_s21  ;;  %s11270_s6 = scalar_lea.hbm %s13535_s4, 1024 }
  0x70   : > { %s848_s29 = sshll.u32 %s847_s23, 4  ;;  %s849_s29 = int_to_ptr.hbm [resolvable:$true] %s848_s29 }
  0x71   : > { %s11263_s11 = sshra.s32 %s849_s29, 4  ;;  %s11264_s11 = int_to_ptr.hbm [resolvable:$true] %s11263_s11 }
  0x72   : > { %s11265_s12 = scalar_lea.hbm %s11264_s11, 512  ;;  %p11271_p12 = scmp.lt.s32.totalorder %s11264_s11, %s13535_s4 }
  0x73   : > { %p11266_p8 = scmp.ne.s32.totalorder %s11264_s11, %s11265_s12  ;;  %p11272_p2 = scmp.lt.s32.totalorder %s11270_s6, %s11265_s12 }
  0x75   : > { %p11268_p10 = pnand %p11267_p9, %p11266_p8  ;;  %p11273_p4 = por %p11272_p2, %p11271_p12 }
  0x77   : > { %p11269_p11 = pneg %p11268_p10 }
  0x79   : > { %p11274_p5 = pnand %p11273_p4, %p11269_p11 }
  0x7b   : > { %11277 = shalt.err (!%p11274_p5)
}
  0x7c   : > { %s11508_s1 = smov 512   ;;  %s11509_s23 = smov 32  }
  0x7d   : > { %10413 = dma.hbm_to_vmem [thread:$0]  (!%p11830_p7), %s849_s29, 8192, %s851_s25, %s838_s10, %s11508_s1, %s11508_s1, %s11509_s23  }
  0x7e   : > { %s8011_s14 = sshll.u32 %s11817_s24, 7  ;;  %s9841_s16 = sshll.u32 %s11485_s28, 7 }
  0x7f   : > { %s13537_s18 = sld [smem:[#allocation50_spill]]  ;;  %s864_s11 = scalar_lea.vmem [#allocation5], %s8011_s14 }
  0x80   : > { %s872_s12 = sshll.u32 %s864_s11, 4  ;;  %s861_s6 = scalar_lea.sflag [#allocation6], %s860_s9  ;;  %s873_s12 = int_to_ptr.vmem [resolvable:$true] %s872_s12 }
  0x85   : > { %s869_s20 = scalar_lea.hbm %s13537_s18, %s9841_s16  ;;  %s11300_s24 = scalar_lea.hbm %s13537_s18, 256 }
  0x86   : > { %s870_s21 = sshll.u32 %s869_s20, 4  ;;  %s871_s21 = int_to_ptr.hbm [resolvable:$true] %s870_s21 }
  0x87   : > { %s11293_s15 = sshra.s32 %s871_s21, 4  ;;  %s11294_s15 = int_to_ptr.hbm [resolvable:$true] %s11293_s15 }
  0x88   : > { %s11295_s4 = scalar_lea.hbm %s11294_s15, 128  ;;  %p11301_p11 = scmp.lt.s32.totalorder %s11294_s15, %s13537_s18 }
  0x89   : > { %p11296_p5 = scmp.ne.s32.totalorder %s11294_s15, %s11295_s4  ;;  %p11302_p12 = scmp.lt.s32.totalorder %s11300_s24, %s11295_s4 }
  0x8b   : > { %p11298_p8 = pnand %p11296_p5, %p11267_p9  ;;  %p11303_p2 = por %p11302_p12, %p11301_p11 }
  0x8d   : > { %p11299_p10 = pneg %p11298_p8 }
  0x8f   : > { %p11304_p4 = pnand %p11303_p2, %p11299_p10 }
  0x91   : > { %11307 = shalt.err (!%p11304_p4)
}
  0x92   : > { %s13538_s9 = smov 8   ;;  %s13539_s14 = smov 128  }
  0x93   : > { %10416 = dma.hbm_to_vmem [thread:$0]  (!%p11830_p7), %s871_s21, 2048, %s873_s12, %s861_s6, %s13539_s14, %s13539_s14, %s13538_s9  }
  0x94   : > { %884 = sbr.rel (%p11668_p3) target bundleno = 2685 (0xa7d), region = 108 }
  0x99   : > { %s11871_s20 = sand.u32 1, %s11477_s26  }
  0x9a   : > { %s8015_s4 = sshll.u32 %s11871_s20, 9  ;;  %s887_s1 = scalar_lea.sflag [#allocation3], %s11871_s20 }
  0x9b   : > { %s11877_s23 = scalar_lea.vmem [#allocation2], %s8015_s4 }
  0x9c   : > { %11424 = dma.done.wait (%p11805_p13), %s887_s1, 8192  }
  0x9d   : > { %11426 = vsyncadd (%p11805_p13), %s887_s1, 4294959104  ;;  %s896_s30 = sand.u32 1, %s11663_s7   ;;  %s11885_s19 = sshll.u32 %s11871_s20, 7 }
  0x9e   : > { %s897_s8 = scalar_lea.sflag [#allocation6], %s896_s30  ;;  %s11890_s2 = scalar_lea.vmem [#allocation5], %s11885_s19 }
  0x9f   : > { %11428 = dma.done.wait (%p11805_p13), %s897_s8, 2048  }
  0xa0   : > { %11430 = vsyncadd (%p11805_p13), %s897_s8, 4294965248 }
  0xa1   : > { %11432 = dma.done.wait (%p75_p1), [#allocation6], 16384  }
  0xa2   : > { %11434 = vsyncadd (%p75_p1), [#allocation6], 4294950912 }
  0xa3   : > { %11436 = dma.done.wait (%p75_p1), [#allocation9], 8256  }
  0xa4   : > { %11438 = vsyncadd (%p75_p1), [#allocation9], 4294959040 }
  0xa5   : > { %11440 = dma.done.wait (%p75_p1), [#allocation12], 2080  }
  0xa6   : > { %11442 = vsyncadd (%p75_p1), [#allocation12], 4294965216 }
  0xa7   : > { %11444 = dma.done.wait (%p75_p1), [#allocation15], 1040  }
  0xa8   : > { %11446 = vsyncadd (%p75_p1), [#allocation15], 4294966256 }
  0xa9   : > { %11448 = dma.done.wait (%p75_p1), [#allocation18], 1040  }
  0xaa   : > { %11450 = vsyncadd (%p75_p1), [#allocation18], 4294966256 }
  0xab   : > { %11452 = dma.done.wait (%p75_p1), [#allocation21], 1040  }
  0xac   : > { %11454 = vsyncadd (%p75_p1), [#allocation21], 4294966256 }
  0xad   : > { %11456 = dma.done.wait (%p75_p1), [#allocation24], 3072  }
  0xae   : > { %11458 = vsyncadd (%p75_p1), [#allocation24], 4294964224 }
  0xaf   : > { %11460 = dma.done.wait (%p75_p1), [#allocation27], 24576  }
  0xb0   : > { %11462 = vsyncadd (%p75_p1), [#allocation27], 4294942720  ;;  %v8149_v0 = vld [vmem:[#allocation7 + $0xe0] sm:$0xf]  ;;  %v9872_v1 = vld [vmem:[#allocation7 + $0xec] sm:$0xf0] }
  0xb1   : > { %v8277_v2 = vld [vmem:[#allocation7 + $0x1e0] sm:$0xf]  ;;  %v8150_v3 = vor.u32 %v9872_v1, %v8149_v0  ;;  %v9904_v4 = vld [vmem:[#allocation7 + $0x1ec] sm:$0xf0]  ;;  %s13548_s11 = sld [smem:[#allocation62_spill]]  ;;  %s12499_s12 = scalar_lea.vmem [#allocation32], %s11885_s19 }
  0xb2   : > { %v8405_v5 = vld [vmem:[#allocation7 + $0x2e0] sm:$0xf]  ;;  %v9936_v6 = vld [vmem:[#allocation7 + $0x2ec] sm:$0xf0]  ;;  %v8278_v7 = vor.u32 %v9904_v4, %v8277_v2  ;;  %s12506_s6 = scalar_lea.vmem [#allocation30], %s11885_s19  ;;  %s13549_s25 = sld [smem:[#allocation64_spill]] }
  0xb3   : > { %v8406_v8 = vor.u32 %v9936_v6, %v8405_v5  ;;  %v8533_v9 = vld [vmem:[#allocation7 + $0x3e0] sm:$0xf]  ;;  %v9968_v10 = vld [vmem:[#allocation7 + $0x3ec] sm:$0xf0]  ;;  %1935 = vmatpush.bf16.msra.mxu0 %v8150_v3  ;;  %s13550_s16 = sld [smem:[#allocation66_spill]]  ;;  %s10292_s21 = sshll.u32 %s11663_s7, 7 }
  0xb4   : > { %v8133_v11 = vld [vmem:[#allocation7 + $0xc0] sm:$0xf]  ;;  %v8534_v12 = vor.u32 %v9968_v10, %v8533_v9  ;;  %v9868_v13 = vld [vmem:[#allocation7 + $0xcc] sm:$0xf0]  ;;  %1984 = vmatpush.bf16.msra.mxu1 %v8278_v7  ;;  %s13551_s1 = sld [smem:[#allocation68_spill]]  ;;  %s7668_s24 = sshll.u32 %s12506_s6, 4  ;;  %s13328_s24 = int_to_ptr.vmem [resolvable:$true] %s7668_s24 }
  0xb5   : > { %v8261_v14 = vld [vmem:[#allocation7 + $0x1c0] sm:$0xf]  ;;  %v9900_v15 = vld [vmem:[#allocation7 + $0x1cc] sm:$0xf0]  ;;  %2033 = vmatpush.bf16.msra.mxu2 %v8406_v8  ;;  %v8134_v16 = vor.u32 %v9868_v13, %v8133_v11  ;;  %s13552_s8 = sld [smem:[#allocation70_spill]] }
  0xb6   : > { %v8262_v17 = vor.u32 %v9900_v15, %v8261_v14  ;;  %v8389_v18 = vld [vmem:[#allocation7 + $0x2c0] sm:$0xf]  ;;  %v9932_v19 = vld [vmem:[#allocation7 + $0x2cc] sm:$0xf0]  ;;  %2082 = vmatpush.bf16.msra.mxu3 %v8534_v12  ;;  %s13553_s10 = sld [smem:[#allocation72_spill]] }
  0xb7   : > { %v8517_v20 = vld [vmem:[#allocation7 + $0x3c0] sm:$0xf]  ;;  %v8390_v21 = vor.u32 %v9932_v19, %v8389_v18  ;;  %v9964_v22 = vld [vmem:[#allocation7 + $0x3cc] sm:$0xf0]  ;;  %1936 = vmatpush.bf16.msra.mxu0 %v8134_v16  ;;  %s13554_s14 = sld [smem:[#allocation73_spill]] }
  0xb8   : > { %v8117_v23 = vld [vmem:[#allocation7 + $0xa0] sm:$0xf]  ;;  %v9864_v24 = vld [vmem:[#allocation7 + $0xac] sm:$0xf0]  ;;  %v8518_v25 = vor.u32 %v9964_v22, %v8517_v20  ;;  %1985 = vmatpush.bf16.msra.mxu1 %v8262_v17 }
  0xb9   : > { %v8245_v26 = vld [vmem:[#allocation7 + $0x1a0] sm:$0xf]  ;;  %v9896_v27 = vld [vmem:[#allocation7 + $0x1ac] sm:$0xf0]  ;;  %v8118_v29 = vor.u32 %v9864_v24, %v8117_v23  ;;  %2034 = vmatpush.bf16.msra.mxu2 %v8390_v21 }
  0xba   : > { %v8373_v28 = vld [vmem:[#allocation7 + $0x2a0] sm:$0xf]  ;;  %v9928_v30 = vld [vmem:[#allocation7 + $0x2ac] sm:$0xf0]  ;;  %v8246_v33 = vor.u32 %v9896_v27, %v8245_v26  ;;  %2083 = vmatpush.bf16.msra.mxu3 %v8518_v25 }
  0xbb   : > { %v8501_v31 = vld [vmem:[#allocation7 + $0x3a0] sm:$0xf]  ;;  %v9960_v32 = vld [vmem:[#allocation7 + $0x3ac] sm:$0xf0]  ;;  %v8374_v34 = vor.u32 %v9928_v30, %v8373_v28  ;;  %1937 = vmatpush.bf16.msra.mxu0 %v8118_v29  ;;  %v1062_v30 = vld [vmem:[%s11877_s23 + $0x8] sm:$0xff] }
  0xbc   : > { %v8101_v35 = vld [vmem:[#allocation7 + $0x80] sm:$0xf]  ;;  %v9860_v36 = vld [vmem:[#allocation7 + $0x8c] sm:$0xf0]  ;;  %v8502_v38 = vor.u32 %v9960_v32, %v8501_v31  ;;  %1986 = vmatpush.bf16.msra.mxu1 %v8246_v33  ;;  %v1066_v31 = vld [vmem:[%s11877_s23 + $0x28] sm:$0xff] }
  0xbd   : > { %v8229_v37 = vld [vmem:[#allocation7 + $0x180] sm:$0xf]  ;;  %v9892_v39 = vld [vmem:[#allocation7 + $0x18c] sm:$0xf0]  ;;  %v8102_v44 = vor.u32 %v9860_v36, %v8101_v35  ;;  %2035 = vmatpush.bf16.msra.mxu2 %v8374_v34  ;;  %v9934_v32 = vld [vmem:[#allocation7 + $0x2e4] sm:$0xf] }
  0xbe   : > { %v8357_v40 = vld [vmem:[#allocation7 + $0x280] sm:$0xf]  ;;  %v9924_v41 = vld [vmem:[#allocation7 + $0x28c] sm:$0xf0]  ;;  %v8230_v45 = vor.u32 %v9892_v39, %v8229_v37  ;;  %2084 = vmatpush.bf16.msra.mxu3 %v8502_v38  ;;  %v8407_v33 = vld [vmem:[#allocation7 + $0x2f0] sm:$0xf0] }
  0xbf   : > { %v8485_v42 = vld [vmem:[#allocation7 + $0x380] sm:$0xf]  ;;  %v9956_v43 = vld [vmem:[#allocation7 + $0x38c] sm:$0xf0]  ;;  %v8358_v46 = vor.u32 %v9924_v41, %v8357_v40  ;;  %1938 = vmatpush.bf16.msra.mxu0 %v8102_v44  ;;  %v9966_v36 = vld [vmem:[#allocation7 + $0x3e4] sm:$0xf]  ;;  %v8410_v44 = vor.u32 %v9934_v32, %v8407_v33 }
  0xc0   : > { %v8085_v47 = vld [vmem:[#allocation7 + $0x60] sm:$0xf]  ;;  %v9856_v48 = vld [vmem:[#allocation7 + $0x6c] sm:$0xf0]  ;;  %v8486_v50 = vor.u32 %v9956_v43, %v8485_v42  ;;  %1987 = vmatpush.bf16.msra.mxu1 %v8230_v45  ;;  %v8535_v37 = vld [vmem:[#allocation7 + $0x3f0] sm:$0xf0] }
  0xc1   : > { %v8213_v49 = vld [vmem:[#allocation7 + $0x160] sm:$0xf]  ;;  %v9888_v51 = vld [vmem:[#allocation7 + $0x16c] sm:$0xf0]  ;;  %v8086_v56 = vor.u32 %v9856_v48, %v8085_v47  ;;  %2036 = vmatpush.bf16.msra.mxu2 %v8358_v46  ;;  %v1064_v41 = vld [vmem:[%s11877_s23 + $0x18] sm:$0xff] }
  0xc2   : > { %v8341_v52 = vld [vmem:[#allocation7 + $0x260] sm:$0xf]  ;;  %v9920_v53 = vld [vmem:[#allocation7 + $0x26c] sm:$0xf0]  ;;  %v8214_v57 = vor.u32 %v9888_v51, %v8213_v49  ;;  %2085 = vmatpush.bf16.msra.mxu3 %v8486_v50  ;;  %v1068_v42 = vld [vmem:[%s11877_s23 + $0x38] sm:$0xff]  ;;  %v8538_v49 = vor.u32 %v9966_v36, %v8535_v37 }
  0xc3   : > { %v8469_v54 = vld [vmem:[#allocation7 + $0x360] sm:$0xf]  ;;  %v9952_v55 = vld [vmem:[#allocation7 + $0x36c] sm:$0xf0]  ;;  %v8342_v58 = vor.u32 %v9920_v53, %v8341_v52  ;;  %1939 = vmatpush.bf16.msra.mxu0 %v8086_v56  ;;  %v9870_v45 = vld [vmem:[#allocation7 + $0xe4] sm:$0xf]  ;;  %v11938_v53 = vpack.c.bf16 %v1066_v31, %v1062_v30 }
  0xc4   : > { %v8069_v59 = vld [vmem:[#allocation7 + $0x40] sm:$0xf]  ;;  %v9852_v60 = vld [vmem:[#allocation7 + $0x4c] sm:$0xf0]  ;;  %v8470_v62 = vor.u32 %v9952_v55, %v8469_v54  ;;  %1988 = vmatpush.bf16.msra.mxu1 %v8214_v57  ;;  %v8151_v46 = vld [vmem:[#allocation7 + $0xf0] sm:$0xf0]  ;;  %v11942_v57 = vpack.c.bf16 %v1068_v42, %v1064_v41 }
  0xc5   : > { %v8197_v61 = vld [vmem:[#allocation7 + $0x140] sm:$0xf]  ;;  %v9884_v63 = vld [vmem:[#allocation7 + $0x14c] sm:$0xf0]  ;;  %v8070_v4 = vor.u32 %v9852_v60, %v8069_v59  ;;  %2037 = vmatpush.bf16.msra.mxu2 %v8342_v58  ;;  %v9902_v47 = vld [vmem:[#allocation7 + $0x1e4] sm:$0xf]  ;;  %v8154_v58 = vor.u32 %v9870_v45, %v8151_v46 }
  0xc6   : > { %v8325_v0 = vld [vmem:[#allocation7 + $0x240] sm:$0xf]  ;;  %v9916_v1 = vld [vmem:[#allocation7 + $0x24c] sm:$0xf0]  ;;  %v8198_v5 = vor.u32 %v9884_v63, %v8197_v61  ;;  %2086 = vmatpush.bf16.msra.mxu3 %v8470_v62  ;;  %v8279_v50 = vld [vmem:[#allocation7 + $0x1f0] sm:$0xf0] }
  0xc7   : > { %v8453_v2 = vld [vmem:[#allocation7 + $0x340] sm:$0xf]  ;;  %v9948_v3 = vld [vmem:[#allocation7 + $0x34c] sm:$0xf0]  ;;  %v8326_v6 = vor.u32 %v9916_v1, %v8325_v0  ;;  %1940 = vmatpush.bf16.msra.mxu0 %v8070_v4  ;;  %v9930_v51 = vld [vmem:[#allocation7 + $0x2c4] sm:$0xf]  ;;  %v8282_v59 = vor.u32 %v9902_v47, %v8279_v50 }
  0xc8   : > { %v8053_v7 = vld [vmem:[#allocation7 + $0x20] sm:$0xf]  ;;  %v9848_v8 = vld [vmem:[#allocation7 + $0x2c] sm:$0xf0]  ;;  %v8454_v10 = vor.u32 %v9948_v3, %v8453_v2  ;;  %1989 = vmatpush.bf16.msra.mxu1 %v8198_v5  ;;  %v8391_v52 = vld [vmem:[#allocation7 + $0x2d0] sm:$0xf0] }
  0xc9   : > { %v8181_v9 = vld [vmem:[#allocation7 + $0x120] sm:$0xf]  ;;  %v9880_v11 = vld [vmem:[#allocation7 + $0x12c] sm:$0xf0]  ;;  %v8054_v17 = vor.u32 %v9848_v8, %v8053_v7  ;;  %2038 = vmatpush.bf16.msra.mxu2 %v8326_v6  ;;  %v9962_v55 = vld [vmem:[#allocation7 + $0x3c4] sm:$0xf]  ;;  %v8394_v60 = vor.u32 %v9930_v51, %v8391_v52 }
  0xca   : > { %v8309_v12 = vld [vmem:[#allocation7 + $0x220] sm:$0xf]  ;;  %v9912_v13 = vld [vmem:[#allocation7 + $0x22c] sm:$0xf0]  ;;  %v8182_v21 = vor.u32 %v9880_v11, %v8181_v9  ;;  %2087 = vmatpush.bf16.msra.mxu3 %v8454_v10  ;;  %v8519_v56 = vld [vmem:[#allocation7 + $0x3d0] sm:$0xf0] }
  0xcb   : > { %v8437_v14 = vld [vmem:[#allocation7 + $0x320] sm:$0xf]  ;;  %v9944_v15 = vld [vmem:[#allocation7 + $0x32c] sm:$0xf0]  ;;  %v8310_v22 = vor.u32 %v9912_v13, %v8309_v12  ;;  %1941 = vmatpush.bf16.msra.mxu0 %v8054_v17  ;;  %v9866_v61 = vld [vmem:[#allocation7 + $0xc4] sm:$0xf]  ;;  %v8522_v63 = vor.u32 %v9962_v55, %v8519_v56 }
  0xcc   : > { %v8037_v16 = vld [vmem:[#allocation7] sm:$0xf]  ;;  %v9844_v18 = vld [vmem:[#allocation7 + $0xc] sm:$0xf0]  ;;  %v8438_v26 = vor.u32 %v9944_v15, %v8437_v14  ;;  %1990 = vmatpush.bf16.msra.mxu1 %v8182_v21  ;;  %v8135_v62 = vld [vmem:[#allocation7 + $0xd0] sm:$0xf0] }
  0xcd   : > { %v8165_v19 = vld [vmem:[#allocation7 + $0x100] sm:$0xf]  ;;  %v9876_v20 = vld [vmem:[#allocation7 + $0x10c] sm:$0xf0]  ;;  %v8038_v34 = vor.u32 %v9844_v18, %v8037_v16  ;;  %2039 = vmatpush.bf16.msra.mxu2 %v8310_v22  ;;  %v9898_v0 = vld [vmem:[#allocation7 + $0x1c4] sm:$0xf]  ;;  %v8138_v2 = vor.u32 %v9866_v61, %v8135_v62 }
  0xce   : > { %v8293_v23 = vld [vmem:[#allocation7 + $0x200] sm:$0xf]  ;;  %v9908_v24 = vld [vmem:[#allocation7 + $0x20c] sm:$0xf0]  ;;  %v8166_v38 = vor.u32 %v9876_v20, %v8165_v19  ;;  %2088 = vmatpush.bf16.msra.mxu3 %v8438_v26  ;;  %v8263_v1 = vld [vmem:[#allocation7 + $0x1d0] sm:$0xf0] }
  0xcf   : > { %v8421_v25 = vld [vmem:[#allocation7 + $0x300] sm:$0xf]  ;;  %v9940_v27 = vld [vmem:[#allocation7 + $0x30c] sm:$0xf0]  ;;  %v8294_v39 = vor.u32 %v9908_v24, %v8293_v23  ;;  %1942 = vmatpush.bf16.msra.mxu0 %v8038_v34  ;;  %v9926_v3 = vld [vmem:[#allocation7 + $0x2a4] sm:$0xf]  ;;  %v8266_v6 = vor.u32 %v9898_v0, %v8263_v1 }
  0xd0   : > { %v1061_v28 = vld [vmem:[%s11877_s23] sm:$0xff]  ;;  %v1063_v35 = vld [vmem:[%s11877_s23 + $0x10] sm:$0xff]  ;;  %v8422_v43 = vor.u32 %v9940_v27, %v8421_v25  ;;  %1991 = vmatpush.bf16.msra.mxu1 %v8166_v38  ;;  %v1070_v18 = vld [vmem:[%s11877_s23 + $0x48] sm:$0xff] }
  0xd1   : > { %v1065_v29 = vld [vmem:[%s11877_s23 + $0x20] sm:$0xff]  ;;  %v1067_v40 = vld [vmem:[%s11877_s23 + $0x30] sm:$0xff]  ;;  %2040 = vmatpush.bf16.msra.mxu2 %v8294_v39  ;;  %v1074_v19 = vld [vmem:[%s11877_s23 + $0x68] sm:$0xff] }
  0xd2   : > { %v11936_v48 = vpack.c.bf16 %v1065_v29, %v1061_v28  ;;  %v11940_v54 = vpack.c.bf16 %v1067_v40, %v1063_v35  ;;  %2089 = vmatpush.bf16.msra.mxu3 %v8422_v43  ;;  %v8375_v4 = vld [vmem:[#allocation7 + $0x2b0] sm:$0xf0]  ;;  %v9862_v5 = vld [vmem:[#allocation7 + $0xa4] sm:$0xf]  ;;  %v1072_v22 = vld [vmem:[%s11877_s23 + $0x58] sm:$0xff]  ;;  %v11958_v25 = vpack.c.bf16 %v1074_v19, %v1070_v18 }
  0xd3   : > { %1992 = vmatmul.bf16.vlgmr.msra.gmra.mxu1 %v11938_v53  ;;  %2131 = vmatpush.bf16.msrb.mxu0 %v8154_v58  ;;  %v8378_v7 = vor.u32 %v9926_v3, %v8375_v4  ;;  %v8119_v8 = vld [vmem:[#allocation7 + $0xb0] sm:$0xf0]  ;;  %v9958_v9 = vld [vmem:[#allocation7 + $0x3a4] sm:$0xf]  ;;  %v1076_v23 = vld [vmem:[%s11877_s23 + $0x78] sm:$0xff] }
  0xd4   : > { %1943 = vmatmul.bf16.vlgmr.msra.gmra.mxu0 %v11936_v48  ;;  %2041 = vmatmul.bf16.vlgmr.msra.gmra.mxu2 %v11940_v54  ;;  %v8503_v10 = vld [vmem:[#allocation7 + $0x3b0] sm:$0xf0]  ;;  %v9894_v12 = vld [vmem:[#allocation7 + $0x1a4] sm:$0xf]  ;;  %v8122_v14 = vor.u32 %v9862_v5, %v8119_v8  ;;  %v11962_v27 = vpack.c.bf16 %v1076_v23, %v1072_v22  ;;  %v1078_v42 = vld [vmem:[%s11877_s23 + $0x88] sm:$0xff] }
  0xd5   : > { %2229 = vmatpush.bf16.msrb.mxu2 %v8410_v44  ;;  %2090 = vmatmul.bf16.vlgmr.msra.gmra.mxu3 %v11942_v57  ;;  %v8506_v11 = vor.u32 %v9958_v9, %v8503_v10  ;;  %v8247_v13 = vld [vmem:[#allocation7 + $0x1b0] sm:$0xf0]  ;;  %v1069_v16 = vld [vmem:[%s11877_s23 + $0x40] sm:$0xff]  ;;  %v1082_v43 = vld [vmem:[%s11877_s23 + $0xa8] sm:$0xff] }
  0xd6   : > { %2278 = vmatpush.bf16.msrb.mxu3 %v8538_v49  ;;  %2180 = vmatpush.bf16.msrb.mxu1 %v8282_v59  ;;  %v8250_v15 = vor.u32 %v9894_v12, %v8247_v13  ;;  %v1073_v17 = vld [vmem:[%s11877_s23 + $0x60] sm:$0xff]  ;;  %v1071_v20 = vld [vmem:[%s11877_s23 + $0x50] sm:$0xff]  ;;  %v1080_v46 = vld [vmem:[%s11877_s23 + $0x98] sm:$0xff]  ;;  %v11978_v50 = vpack.c.bf16 %v1082_v43, %v1078_v42 }
  0xd7   : > { %2132 = vmatpush.bf16.msrb.mxu0 %v8138_v2  ;;  %v1075_v21 = vld [vmem:[%s11877_s23 + $0x70] sm:$0xff]  ;;  %v11956_v24 = vpack.c.bf16 %v1073_v17, %v1069_v16  ;;  %v9922_v28 = vld [vmem:[#allocation7 + $0x284] sm:$0xf]  ;;  %v1084_v47 = vld [vmem:[%s11877_s23 + $0xb8] sm:$0xff] }
  0xd8   : > { %v11960_v26 = vpack.c.bf16 %v1075_v21, %v1071_v20  ;;  %v8359_v29 = vld [vmem:[#allocation7 + $0x290] sm:$0xf0]  ;;  %v9858_v30 = vld [vmem:[#allocation7 + $0x84] sm:$0xf]  ;;  %v11982_v52 = vpack.c.bf16 %v1084_v47, %v1080_v46  ;;  %v1088_v10 = vld [vmem:[%s11877_s23 + $0xd8] sm:$0xff] }
  0xd9   : > { %2230 = vmatpush.bf16.msrb.mxu2 %v8394_v60  ;;  %v8362_v31 = vor.u32 %v9922_v28, %v8359_v29  ;;  %v8103_v32 = vld [vmem:[#allocation7 + $0x90] sm:$0xf0]  ;;  %v9954_v33 = vld [vmem:[#allocation7 + $0x384] sm:$0xf] }
  0xda   : > { %2279 = vmatpush.bf16.msrb.mxu3 %v8522_v63  ;;  %2181 = vmatpush.bf16.msrb.mxu1 %v8266_v6  ;;  %v8487_v34 = vld [vmem:[#allocation7 + $0x390] sm:$0xf0]  ;;  %v8106_v35 = vor.u32 %v9858_v30, %v8103_v32  ;;  %v9890_v37 = vld [vmem:[#allocation7 + $0x184] sm:$0xf]  ;;  %v1086_v6 = vld [vmem:[%s11877_s23 + $0xc8] sm:$0xff] }
  0xdb   : > { %2133 = vmatpush.bf16.msrb.mxu0 %v8122_v14  ;;  %v8490_v36 = vor.u32 %v9954_v33, %v8487_v34  ;;  %v8231_v38 = vld [vmem:[#allocation7 + $0x190] sm:$0xf0]  ;;  %v1077_v40 = vld [vmem:[%s11877_s23 + $0x80] sm:$0xff]  ;;  %v1094_v34 = vld [vmem:[%s11877_s23 + $0x108] sm:$0xff] }
  0xdc   : > { %v8234_v39 = vor.u32 %v9890_v37, %v8231_v38  ;;  %v1081_v41 = vld [vmem:[%s11877_s23 + $0xa0] sm:$0xff]  ;;  %v1079_v44 = vld [vmem:[%s11877_s23 + $0x90] sm:$0xff]  ;;  %v1096_v38 = vld [vmem:[%s11877_s23 + $0x118] sm:$0xff] }
  0xdd   : > { %2231 = vmatpush.bf16.msrb.mxu2 %v8378_v7  ;;  %v1083_v45 = vld [vmem:[%s11877_s23 + $0xb0] sm:$0xff]  ;;  %v11976_v49 = vpack.c.bf16 %v1081_v41, %v1077_v40  ;;  %v9918_v55 = vld [vmem:[#allocation7 + $0x264] sm:$0xf]  ;;  %v1090_v7 = vld [vmem:[%s11877_s23 + $0xe8] sm:$0xff] }
  0xde   : > { %2280 = vmatpush.bf16.msrb.mxu3 %v8506_v11  ;;  %2182 = vmatpush.bf16.msrb.mxu1 %v8250_v15  ;;  %v11980_v51 = vpack.c.bf16 %v1083_v45, %v1079_v44  ;;  %v8343_v56 = vld [vmem:[#allocation7 + $0x270] sm:$0xf0]  ;;  %v9854_v58 = vld [vmem:[#allocation7 + $0x64] sm:$0xf]  ;;  %v1092_v11 = vld [vmem:[%s11877_s23 + $0xf8] sm:$0xff]  ;;  %v11998_v13 = vpack.c.bf16 %v1090_v7, %v1086_v6 }
  0xdf   : > { %2134 = vmatpush.bf16.msrb.mxu0 %v8106_v35  ;;  %v8346_v59 = vor.u32 %v9918_v55, %v8343_v56  ;;  %v8087_v60 = vld [vmem:[#allocation7 + $0x70] sm:$0xf0]  ;;  %v9950_v61 = vld [vmem:[#allocation7 + $0x364] sm:$0xf]  ;;  %v12002_v15 = vpack.c.bf16 %v1092_v11, %v1088_v10  ;;  %v1098_v35 = vld [vmem:[%s11877_s23 + $0x128] sm:$0xff] }
  0xe0   : > { %v8471_v62 = vld [vmem:[#allocation7 + $0x370] sm:$0xf0]  ;;  %v8090_v63 = vor.u32 %v9854_v58, %v8087_v60  ;;  %v9886_v1 = vld [vmem:[#allocation7 + $0x164] sm:$0xf]  ;;  %v12018_v41 = vpack.c.bf16 %v1098_v35, %v1094_v34  ;;  %v1104_v6 = vld [vmem:[%s11877_s23 + $0x158] sm:$0xff] }
  0xe1   : > { %2232 = vmatpush.bf16.msrb.mxu2 %v8362_v31  ;;  %v8474_v0 = vor.u32 %v9950_v61, %v8471_v62  ;;  %v8215_v2 = vld [vmem:[#allocation7 + $0x170] sm:$0xf0]  ;;  %v1085_v4 = vld [vmem:[%s11877_s23 + $0xc0] sm:$0xff]  ;;  %v1108_v7 = vld [vmem:[%s11877_s23 + $0x178] sm:$0xff] }
  0xe2   : > { %2281 = vmatpush.bf16.msrb.mxu3 %v8490_v36  ;;  %2183 = vmatpush.bf16.msrb.mxu1 %v8234_v39  ;;  %v8218_v3 = vor.u32 %v9886_v1, %v8215_v2  ;;  %v1089_v5 = vld [vmem:[%s11877_s23 + $0xe0] sm:$0xff]  ;;  %v1087_v8 = vld [vmem:[%s11877_s23 + $0xd0] sm:$0xff]  ;;  %v1100_v39 = vld [vmem:[%s11877_s23 + $0x138] sm:$0xff]  ;;  %v12042_v11 = vpack.c.bf16 %v1108_v7, %v1104_v6 }
  0xe3   : > { %1997 = vmatmul.bf16.gmra.mxu1 %v11958_v25  ;;  %2135 = vmatpush.bf16.msrb.mxu0 %v8090_v63  ;;  %v1091_v9 = vld [vmem:[%s11877_s23 + $0xf0] sm:$0xff]  ;;  %v11996_v12 = vpack.c.bf16 %v1089_v5, %v1085_v4  ;;  %v9914_v16 = vld [vmem:[#allocation7 + $0x244] sm:$0xf]  ;;  %v12022_v43 = vpack.c.bf16 %v1100_v39, %v1096_v38  ;;  %v1102_v2 = vld [vmem:[%s11877_s23 + $0x148] sm:$0xff] }
  0xe4   : > { %1948 = vmatmul.bf16.gmra.mxu0 %v11956_v24  ;;  %2046 = vmatmul.bf16.gmra.mxu2 %v11960_v26  ;;  %v12000_v14 = vpack.c.bf16 %v1091_v9, %v1087_v8  ;;  %v8327_v17 = vld [vmem:[#allocation7 + $0x250] sm:$0xf0]  ;;  %v9850_v18 = vld [vmem:[#allocation7 + $0x44] sm:$0xf]  ;;  %v1110_v34 = vld [vmem:[%s11877_s23 + $0x188] sm:$0xff] }
  0xe5   : > { %2095 = vmatmul.bf16.gmra.mxu3 %v11962_v27  ;;  %2233 = vmatpush.bf16.msrb.mxu2 %v8346_v59  ;;  %v8330_v19 = vor.u32 %v9914_v16, %v8327_v17  ;;  %v8071_v20 = vld [vmem:[#allocation7 + $0x50] sm:$0xf0]  ;;  %v9946_v21 = vld [vmem:[#allocation7 + $0x344] sm:$0xf]  ;;  %v1114_v35 = vld [vmem:[%s11877_s23 + $0x1a8] sm:$0xff] }
  0xe6   : > { %2282 = vmatpush.bf16.msrb.mxu3 %v8474_v0  ;;  %2184 = vmatpush.bf16.msrb.mxu1 %v8218_v3  ;;  %v8455_v22 = vld [vmem:[#allocation7 + $0x350] sm:$0xf0]  ;;  %v8074_v23 = vor.u32 %v9850_v18, %v8071_v20  ;;  %v9882_v29 = vld [vmem:[#allocation7 + $0x144] sm:$0xf]  ;;  %v1106_v3 = vld [vmem:[%s11877_s23 + $0x168] sm:$0xff] }
  0xe7   : > { %v8458_v28 = vor.u32 %v9946_v21, %v8455_v22  ;;  %v8199_v30 = vld [vmem:[#allocation7 + $0x150] sm:$0xf0]  ;;  %v1093_v32 = vld [vmem:[%s11877_s23 + $0x100] sm:$0xff]  ;;  %v12038_v9 = vpack.c.bf16 %v1106_v3, %v1102_v2  ;;  %v1112_v38 = vld [vmem:[%s11877_s23 + $0x198] sm:$0xff] }
  0xe8   : > { %v8202_v31 = vor.u32 %v9882_v29, %v8199_v30  ;;  %2136 = vmatpush.bf16.msrb.mxu0 %v8074_v23  ;;  %v1097_v33 = vld [vmem:[%s11877_s23 + $0x120] sm:$0xff]  ;;  %v1095_v36 = vld [vmem:[%s11877_s23 + $0x110] sm:$0xff]  ;;  %v1116_v39 = vld [vmem:[%s11877_s23 + $0x1b8] sm:$0xff] }
  0xe9   : > { %2234 = vmatpush.bf16.msrb.mxu2 %v8330_v19  ;;  %v1099_v37 = vld [vmem:[%s11877_s23 + $0x130] sm:$0xff]  ;;  %v12016_v40 = vpack.c.bf16 %v1097_v33, %v1093_v32  ;;  %v9910_v44 = vld [vmem:[#allocation7 + $0x224] sm:$0xf]  ;;  %v1118_v3 = vld [vmem:[%s11877_s23 + $0x1c8] sm:$0xff] }
  0xea   : > { %2283 = vmatpush.bf16.msrb.mxu3 %v8458_v28  ;;  %2185 = vmatpush.bf16.msrb.mxu1 %v8202_v31  ;;  %v12020_v42 = vpack.c.bf16 %v1099_v37, %v1095_v36  ;;  %v8311_v45 = vld [vmem:[#allocation7 + $0x230] sm:$0xf0]  ;;  %v9846_v46 = vld [vmem:[#allocation7 + $0x24] sm:$0xf]  ;;  %v1122_v6 = vld [vmem:[%s11877_s23 + $0x1e8] sm:$0xff] }
  0xeb   : > { %v8314_v47 = vor.u32 %v9910_v44, %v8311_v45  ;;  %v8055_v55 = vld [vmem:[#allocation7 + $0x30] sm:$0xf0]  ;;  %v9942_v56 = vld [vmem:[#allocation7 + $0x324] sm:$0xf]  ;;  %v12058_v45 = vpack.c.bf16 %v1114_v35, %v1110_v34  ;;  %v9965_v34 = vld [vmem:[#allocation7 + $0x3d4] sm:$0xf0] }
  0xec   : > { %v8439_v58 = vld [vmem:[#allocation7 + $0x330] sm:$0xf0]  ;;  %v8058_v59 = vor.u32 %v9846_v46, %v8055_v55  ;;  %v9878_v61 = vld [vmem:[#allocation7 + $0x124] sm:$0xf]  ;;  %v8413_v55 = vld [vmem:[#allocation7 + $0x2e8] sm:$0xf] }
  0xed   : > { %v8442_v60 = vor.u32 %v9942_v56, %v8439_v58  ;;  %v8183_v62 = vld [vmem:[#allocation7 + $0x130] sm:$0xf0]  ;;  %2235 = vmatpush.bf16.msrb.mxu2 %v8314_v47  ;;  %v1101_v0 = vld [vmem:[%s11877_s23 + $0x140] sm:$0xff]  ;;  %v12062_v47 = vpack.c.bf16 %v1116_v39, %v1112_v38  ;;  %v9937_v56 = vld [vmem:[#allocation7 + $0x2f4] sm:$0xf0] }
  0xee   : > { %v8186_v63 = vor.u32 %v9878_v61, %v8183_v62  ;;  %2137 = vmatpush.bf16.msrb.mxu0 %v8058_v59  ;;  %v1105_v1 = vld [vmem:[%s11877_s23 + $0x160] sm:$0xff]  ;;  %v1103_v4 = vld [vmem:[%s11877_s23 + $0x150] sm:$0xff]  ;;  %v8157_v58 = vld [vmem:[#allocation7 + $0xe8] sm:$0xf]  ;;  %v8414_v59 = vor.u32 %v9937_v56, %v8413_v55 }
  0xef   : > { %2284 = vmatpush.bf16.msrb.mxu3 %v8442_v60  ;;  %v1107_v5 = vld [vmem:[%s11877_s23 + $0x170] sm:$0xff]  ;;  %v12036_v8 = vpack.c.bf16 %v1105_v1, %v1101_v0  ;;  %v9906_v16 = vld [vmem:[#allocation7 + $0x204] sm:$0xf]  ;;  %v9873_v60 = vld [vmem:[#allocation7 + $0xf4] sm:$0xf0] }
  0xf0   : > { %2186 = vmatpush.bf16.msrb.mxu1 %v8186_v63  ;;  %v12040_v10 = vpack.c.bf16 %v1107_v5, %v1103_v4  ;;  %v8295_v17 = vld [vmem:[#allocation7 + $0x210] sm:$0xf0]  ;;  %v9842_v18 = vld [vmem:[#allocation7 + $0x4] sm:$0xf]  ;;  %v8541_v61 = vld [vmem:[#allocation7 + $0x3e8] sm:$0xf]  ;;  %v8158_v63 = vor.u32 %v9873_v60, %v8157_v58 }
  0xf1   : > { %v8298_v19 = vor.u32 %v9906_v16, %v8295_v17  ;;  %v8039_v20 = vld [vmem:[#allocation7 + $0x10] sm:$0xf0]  ;;  %v9938_v21 = vld [vmem:[#allocation7 + $0x304] sm:$0xf]  ;;  %v9969_v62 = vld [vmem:[#allocation7 + $0x3f4] sm:$0xf0] }
  0xf2   : > { %v8423_v22 = vld [vmem:[#allocation7 + $0x310] sm:$0xf0]  ;;  %v8042_v23 = vor.u32 %v9842_v18, %v8039_v20  ;;  %v9874_v29 = vld [vmem:[#allocation7 + $0x104] sm:$0xf]  ;;  %v8542_v0 = vor.u32 %v9969_v62, %v8541_v61  ;;  %v8285_v4 = vld [vmem:[#allocation7 + $0x1e8] sm:$0xf] }
  0xf3   : > { %2002 = vmatmul.bf16.gmra.mxu1 %v11978_v50  ;;  %v8426_v28 = vor.u32 %v9938_v21, %v8423_v22  ;;  %v8167_v30 = vld [vmem:[#allocation7 + $0x110] sm:$0xf0]  ;;  %2236 = vmatpush.bf16.msrb.mxu2 %v8298_v19  ;;  %v1109_v32 = vld [vmem:[%s11877_s23 + $0x180] sm:$0xff]  ;;  %v9905_v5 = vld [vmem:[#allocation7 + $0x1f4] sm:$0xf0]  ;;  %v12078_v21 = vpack.c.bf16 %v1122_v6, %v1118_v3 }
  0xf4   : > { %1953 = vmatmul.bf16.gmra.mxu0 %v11976_v49  ;;  %2051 = vmatmul.bf16.gmra.mxu2 %v11980_v51  ;;  %v8170_v31 = vor.u32 %v9874_v29, %v8167_v30  ;;  %v1113_v33 = vld [vmem:[%s11877_s23 + $0x1a0] sm:$0xff]  ;;  %v1111_v36 = vld [vmem:[%s11877_s23 + $0x190] sm:$0xff]  ;;  %v8286_v17 = vor.u32 %v9905_v5, %v8285_v4  ;;  %v1120_v18 = vld [vmem:[%s11877_s23 + $0x1d8] sm:$0xff] }
  0xf5   : > { %2100 = vmatmul.bf16.gmra.mxu3 %v11982_v52  ;;  %2138 = vmatpush.bf16.msrb.mxu0 %v8042_v23  ;;  %v1115_v37 = vld [vmem:[%s11877_s23 + $0x1b0] sm:$0xff]  ;;  %v12056_v44 = vpack.c.bf16 %v1113_v33, %v1109_v32  ;;  %v1117_v1 = vld [vmem:[%s11877_s23 + $0x1c0] sm:$0xff]  ;;  %v1124_v19 = vld [vmem:[%s11877_s23 + $0x1f8] sm:$0xff] }
  0xf6   : > { %2285 = vmatpush.bf16.msrb.mxu3 %v8426_v28  ;;  %2187 = vmatpush.bf16.msrb.mxu1 %v8170_v31  ;;  %v12060_v46 = vpack.c.bf16 %v1115_v37, %v1111_v36  ;;  %v1121_v2 = vld [vmem:[%s11877_s23 + $0x1e0] sm:$0xff]  ;;  %v1119_v7 = vld [vmem:[%s11877_s23 + $0x1d0] sm:$0xff]  ;;  %v12082_v23 = vpack.c.bf16 %v1124_v19, %v1120_v18  ;;  %v8397_v28 = vld [vmem:[#allocation7 + $0x2c8] sm:$0xf] }
  0xf7   : > { %2425 = vmatpush.bf16.msra.mxu2 %v8414_v59  ;;  %v1123_v16 = vld [vmem:[%s11877_s23 + $0x1f0] sm:$0xff]  ;;  %v12076_v20 = vpack.c.bf16 %v1121_v2, %v1117_v1  ;;  %v9933_v29 = vld [vmem:[#allocation7 + $0x2d4] sm:$0xf0]  ;;  %v8141_v30 = vld [vmem:[#allocation7 + $0xc8] sm:$0xf] }
  0xf8   : > { %v12080_v22 = vpack.c.bf16 %v1123_v16, %v1119_v7  ;;  %v8398_v31 = vor.u32 %v9933_v29, %v8397_v28  ;;  %v9869_v32 = vld [vmem:[#allocation7 + $0xd4] sm:$0xf0]  ;;  %v8525_v33 = vld [vmem:[#allocation7 + $0x3c8] sm:$0xf]  ;;  %v12088_v37 = vld [vmem:[#allocation8] sm:$0xf] }
  0xf9   : > { %2327 = vmatpush.bf16.msra.mxu0 %v8158_v63  ;;  %v8142_v35 = vor.u32 %v9869_v32, %v8141_v30  ;;  %v8526_v36 = vor.u32 %v9965_v34, %v8525_v33  ;;  %v8269_v38 = vld [vmem:[#allocation7 + $0x1c8] sm:$0xf]  ;;  %v9901_v39 = vld [vmem:[#allocation7 + $0x1d4] sm:$0xf0]  ;;  %v12091_v55 = vperm.slane %v12088_v37, 0 }
  0xfa   : > { %2474 = vmatpush.bf16.msra.mxu3 %v8542_v0  ;;  %2376 = vmatpush.bf16.msra.mxu1 %v8286_v17  ;;  %v8270_v56 = vor.u32 %v9901_v39, %v8269_v38  ;;  %v8381_v62 = vld [vmem:[#allocation7 + $0x2a8] sm:$0xf]  ;;  %v9929_v63 = vld [vmem:[#allocation7 + $0x2b4] sm:$0xf0] }
  0xfb   : > { %2426 = vmatpush.bf16.msra.mxu2 %v8398_v31  ;;  %v8125_v0 = vld [vmem:[#allocation7 + $0xa8] sm:$0xf]  ;;  %v8382_v1 = vor.u32 %v9929_v63, %v8381_v62  ;;  %v9865_v2 = vld [vmem:[#allocation7 + $0xb4] sm:$0xf0] }
  0xfc   : > { %v8509_v3 = vld [vmem:[#allocation7 + $0x3a8] sm:$0xf]  ;;  %v9961_v4 = vld [vmem:[#allocation7 + $0x3b4] sm:$0xf0]  ;;  %v8126_v6 = vor.u32 %v9865_v2, %v8125_v0 }
  0xfd   : > { %2328 = vmatpush.bf16.msra.mxu0 %v8142_v35  ;;  %v8510_v7 = vor.u32 %v9961_v4, %v8509_v3  ;;  %v8253_v31 = vld [vmem:[#allocation7 + $0x1a8] sm:$0xf]  ;;  %v9897_v32 = vld [vmem:[#allocation7 + $0x1b4] sm:$0xf0] }
  0xfe   : > { %2475 = vmatpush.bf16.msra.mxu3 %v8526_v36  ;;  %2377 = vmatpush.bf16.msra.mxu1 %v8270_v56  ;;  %v8254_v33 = vor.u32 %v9897_v32, %v8253_v31  ;;  %v8365_v62 = vld [vmem:[#allocation7 + $0x288] sm:$0xf]  ;;  %v9925_v63 = vld [vmem:[#allocation7 + $0x294] sm:$0xf0] }
  0xff   : > { %2427 = vmatpush.bf16.msra.mxu2 %v8382_v1  ;;  %v8109_v0 = vld [vmem:[#allocation7 + $0x88] sm:$0xf]  ;;  %v8366_v2 = vor.u32 %v9925_v63, %v8365_v62  ;;  %v9861_v3 = vld [vmem:[#allocation7 + $0x94] sm:$0xf0] }
 0x100   : > { %v8493_v4 = vld [vmem:[#allocation7 + $0x388] sm:$0xf] }
 0x101   : > { %2329 = vmatpush.bf16.msra.mxu0 %v8126_v6  ;;  %v8237_v32 = vld [vmem:[#allocation7 + $0x188] sm:$0xf] }
 0x102   : > { %2476 = vmatpush.bf16.msra.mxu3 %v8510_v7  ;;  %2378 = vmatpush.bf16.msra.mxu1 %v8254_v33  ;;  %v8110_v7 = vor.u32 %v9861_v3, %v8109_v0  ;;  %v9893_v33 = vld [vmem:[#allocation7 + $0x194] sm:$0xf0]  ;;  %v8349_v63 = vld [vmem:[#allocation7 + $0x268] sm:$0xf] }
 0x103   : > { %2007 = vmatmul.bf16.gmra.mxu1 %v11998_v13  ;;  %2428 = vmatpush.bf16.msra.mxu2 %v8366_v2  ;;  %v9921_v0 = vld [vmem:[#allocation7 + $0x274] sm:$0xf0]  ;;  %v8093_v2 = vld [vmem:[#allocation7 + $0x68] sm:$0xf] }
 0x104   : > { %1958 = vmatmul.bf16.gmra.mxu0 %v11996_v12  ;;  %2056 = vmatmul.bf16.gmra.mxu2 %v12000_v14  ;;  %v8350_v3 = vor.u32 %v9921_v0, %v8349_v63 }
 0x105   : > { %2105 = vmatmul.bf16.gmra.mxu3 %v12002_v15  ;;  %2330 = vmatpush.bf16.msra.mxu0 %v8110_v7 }
 0x107   : > { %2429 = vmatpush.bf16.msra.mxu2 %v8350_v3  ;;  %v9917_v3 = vld [vmem:[#allocation7 + $0x254] sm:$0xf0] }
 0x113   : > { %2012 = vmatmul.bf16.gmra.mxu1 %v12018_v41 }
 0x114   : > { %1963 = vmatmul.bf16.gmra.mxu0 %v12016_v40  ;;  %2061 = vmatmul.bf16.gmra.mxu2 %v12020_v42 }
 0x115   : > { %2110 = vmatmul.bf16.gmra.mxu3 %v12022_v43 }
 0x123   : > { %2017 = vmatmul.bf16.gmra.mxu1 %v12038_v9 }
 0x124   : > { %1968 = vmatmul.bf16.gmra.mxu0 %v12036_v8  ;;  %2066 = vmatmul.bf16.gmra.mxu2 %v12040_v10 }
 0x125   : > { %2115 = vmatmul.bf16.gmra.mxu3 %v12042_v11 }
 0x133   : > { %2022 = vmatmul.bf16.gmra.mxu1 %v12058_v45 }
 0x134   : > { %1973 = vmatmul.bf16.gmra.mxu0 %v12056_v44  ;;  %2071 = vmatmul.bf16.gmra.mxu2 %v12060_v46 }
 0x135   : > { %2120 = vmatmul.bf16.gmra.mxu3 %v12062_v47 }
 0x143   : > { %2027 = vmatmul.bf16.gmra.mxu1 %v12078_v21 }
 0x144   : > { %1978 = vmatmul.bf16.gmra.mxu0 %v12076_v20  ;;  %2076 = vmatmul.bf16.gmra.mxu2 %v12080_v22 }
 0x145   : > { %2125 = vmatmul.bf16.gmra.mxu3 %v12082_v23 }
 0x150   : > { %v1993_v60 = vpop.f32.mrf.mxu1 }
 0x151   : > { %v1944_v58 = vpop.f32.mrf.mxu0 }
 0x152   : > { %v1945_v59 = vadd.f32 %v1944_v58, %v12091_v55 }
 0x153   : > { %2188 = vmatmul.bf16.vlgmr.msrb.gmra.mxu1 %v11938_v53 }
 0x154   : > { %v1994_v61 = vadd.f32 %v1993_v60, %v1945_v59  ;;  %2139 = vmatmul.bf16.vlgmr.msrb.gmra.mxu0 %v11936_v48  ;;  %2237 = vmatmul.bf16.vlgmr.msrb.gmra.mxu2 %v11940_v54 }
 0x155   : > { %2286 = vmatmul.bf16.vlgmr.msrb.gmra.mxu3 %v11942_v57 }
 0x157   : > { %v2042_v5 = vpop.f32.mrf.mxu2 }
 0x158   : > { %v2043_v16 = vadd.f32 %v2042_v5, %v1994_v61  ;;  %v2091_v17 = vpop.f32.mrf.mxu3  ;;  %v1995_v28 = vpop.f32.mrf.mxu1  ;;  %v9957_v5 = vld [vmem:[#allocation7 + $0x394] sm:$0xf0] }
 0x159   : > { %v1946_v18 = vpop.f32.mrf.mxu0 }
 0x15a   : > { %v1947_v19 = vadd.f32 %v1946_v18, %v12091_v55  ;;  %v2092_v29 = vadd.f32 %v2091_v17, %v2043_v16  ;;  %v8494_v16 = vor.u32 %v9957_v5, %v8493_v4  ;;  %v9857_v4 = vld [vmem:[#allocation7 + $0x74] sm:$0xf0]  ;;  %v8477_v5 = vld [vmem:[#allocation7 + $0x368] sm:$0xf] }
 0x15c   : > { %v1996_v30 = vadd.f32 %v1995_v28, %v1947_v19  ;;  %v2719_v60 = vmax.f32 %v2092_v29, 0.0  ;;  %2477 = vmatpush.bf16.msra.mxu3 %v8494_v16 }
 0x15f   : > { %v2044_v34 = vpop.f32.mrf.mxu2 }
 0x160   : > { %v2045_v35 = vadd.f32 %v2044_v34, %v1996_v30  ;;  %v2093_v36 = vpop.f32.mrf.mxu3  ;;  %v1998_v56 = vpop.f32.mrf.mxu1  ;;  %v8238_v34 = vor.u32 %v9893_v33, %v8237_v32 }
 0x161   : > { %v1949_v38 = vpop.f32.mrf.mxu0 }
 0x162   : > { %v1950_v39 = vadd.f32 %v1949_v38, %v12091_v55  ;;  %v2094_v58 = vadd.f32 %v2093_v36, %v2045_v35  ;;  %2379 = vmatpush.bf16.msra.mxu1 %v8238_v34  ;;  %v8221_v34 = vld [vmem:[#allocation7 + $0x168] sm:$0xf] }
 0x163   : > { %2193 = vmatmul.bf16.gmra.mxu1 %v11958_v25 }
 0x164   : > { %v1999_v59 = vadd.f32 %v1998_v56, %v1950_v39  ;;  %2144 = vmatmul.bf16.gmra.mxu0 %v11956_v24  ;;  %v2723_v61 = vmax.f32 %v2094_v58, 0.0  ;;  %2242 = vmatmul.bf16.gmra.mxu2 %v11960_v26 }
 0x165   : > { %2291 = vmatmul.bf16.gmra.mxu3 %v11962_v27 }
 0x166   : > { %v12104_v1 = vpack.c.bf16 %v2723_v61, %v2719_v60 }
 0x167   : > { %v2047_v6 = vpop.f32.mrf.mxu2 }
 0x168   : > { %v2048_v17 = vadd.f32 %v2047_v6, %v1999_v59  ;;  %v2096_v18 = vpop.f32.mrf.mxu3  ;;  %v2000_v29 = vpop.f32.mrf.mxu1  ;;  %v9953_v6 = vld [vmem:[#allocation7 + $0x374] sm:$0xf0] }
 0x169   : > { %v1951_v19 = vpop.f32.mrf.mxu0 }
 0x16a   : > { %v1952_v28 = vadd.f32 %v1951_v19, %v12091_v55  ;;  %v2097_v30 = vadd.f32 %v2096_v18, %v2048_v17  ;;  %v8094_v17 = vor.u32 %v9857_v4, %v8093_v2  ;;  %v8478_v18 = vor.u32 %v9953_v6, %v8477_v5  ;;  %v8333_v2 = vld [vmem:[#allocation7 + $0x248] sm:$0xf]  ;;  %v9853_v6 = vld [vmem:[#allocation7 + $0x54] sm:$0xf0] }
 0x16b   : > { %v8077_v4 = vld [vmem:[#allocation7 + $0x48] sm:$0xf]  ;;  %v8334_v5 = vor.u32 %v9917_v3, %v8333_v2 }
 0x16c   : > { %v2001_v31 = vadd.f32 %v2000_v29, %v1952_v28  ;;  %v2727_v61 = vmax.f32 %v2097_v30, 0.0  ;;  %2331 = vmatpush.bf16.msra.mxu0 %v8094_v17  ;;  %2478 = vmatpush.bf16.msra.mxu3 %v8478_v18  ;;  %v9949_v17 = vld [vmem:[#allocation7 + $0x354] sm:$0xf0] }
 0x16d   : > { %2430 = vmatpush.bf16.msra.mxu2 %v8334_v5  ;;  %v8317_v5 = vld [vmem:[#allocation7 + $0x228] sm:$0xf] }
 0x16f   : > { %v2049_v35 = vpop.f32.mrf.mxu2 }
 0x170   : > { %v2050_v36 = vadd.f32 %v2049_v35, %v2001_v31  ;;  %v2098_v38 = vpop.f32.mrf.mxu3  ;;  %v2003_v58 = vpop.f32.mrf.mxu1  ;;  %v9889_v35 = vld [vmem:[#allocation7 + $0x174] sm:$0xf0] }
 0x171   : > { %v1954_v39 = vpop.f32.mrf.mxu0 }
 0x172   : > { %v1955_v56 = vadd.f32 %v1954_v39, %v12091_v55  ;;  %v2099_v59 = vadd.f32 %v2098_v38, %v2050_v36  ;;  %v8222_v36 = vor.u32 %v9889_v35, %v8221_v34 }
 0x173   : > { %2198 = vmatmul.bf16.gmra.mxu1 %v11978_v50 }
 0x174   : > { %v2004_v60 = vadd.f32 %v2003_v58, %v1955_v56  ;;  %2149 = vmatmul.bf16.gmra.mxu0 %v11976_v49  ;;  %v2731_v62 = vmax.f32 %v2099_v59, 0.0  ;;  %2247 = vmatmul.bf16.gmra.mxu2 %v11980_v51 }
 0x175   : > { %2296 = vmatmul.bf16.gmra.mxu3 %v11982_v52  ;;  %2380 = vmatpush.bf16.msra.mxu1 %v8222_v36 }
 0x176   : > { %v12112_v7 = vpack.c.bf16 %v2731_v62, %v2727_v61 }
 0x177   : > { %v2052_v16 = vpop.f32.mrf.mxu2 }
 0x178   : > { %v2053_v19 = vadd.f32 %v2052_v16, %v2004_v60  ;;  %v2101_v28 = vpop.f32.mrf.mxu3  ;;  %v2005_v31 = vpop.f32.mrf.mxu1  ;;  %v8461_v16 = vld [vmem:[#allocation7 + $0x348] sm:$0xf] }
 0x179   : > { %v1956_v29 = vpop.f32.mrf.mxu0 }
 0x17a   : > { %v1957_v30 = vadd.f32 %v1956_v29, %v12091_v55  ;;  %v2102_v32 = vadd.f32 %v2101_v28, %v2053_v19  ;;  %v8078_v28 = vor.u32 %v9853_v6, %v8077_v4  ;;  %v8462_v29 = vor.u32 %v9949_v17, %v8461_v16  ;;  %v9913_v6 = vld [vmem:[#allocation7 + $0x234] sm:$0xf0]  ;;  %v8061_v16 = vld [vmem:[#allocation7 + $0x28] sm:$0xf] }
 0x17b   : > { %v8318_v17 = vor.u32 %v9913_v6, %v8317_v5 }
 0x17c   : > { %v2006_v33 = vadd.f32 %v2005_v31, %v1957_v30  ;;  %v2735_v63 = vmax.f32 %v2102_v32, 0.0  ;;  %2332 = vmatpush.bf16.msra.mxu0 %v8078_v28  ;;  %2479 = vmatpush.bf16.msra.mxu3 %v8462_v29  ;;  %v8445_v28 = vld [vmem:[#allocation7 + $0x328] sm:$0xf]  ;;  %v9945_v29 = vld [vmem:[#allocation7 + $0x334] sm:$0xf0] }
 0x17d   : > { %2431 = vmatpush.bf16.msra.mxu2 %v8318_v17 }
 0x17f   : > { %v2054_v38 = vpop.f32.mrf.mxu2 }
 0x180   : > { %v2055_v39 = vadd.f32 %v2054_v38, %v2006_v33  ;;  %v2103_v56 = vpop.f32.mrf.mxu3  ;;  %v2008_v60 = vpop.f32.mrf.mxu1  ;;  %v8205_v38 = vld [vmem:[#allocation7 + $0x148] sm:$0xf] }
 0x181   : > { %v1959_v58 = vpop.f32.mrf.mxu0 }
 0x182   : > { %v1960_v59 = vadd.f32 %v1959_v58, %v12091_v55  ;;  %v2104_v61 = vadd.f32 %v2103_v56, %v2055_v39  ;;  %v9885_v39 = vld [vmem:[#allocation7 + $0x154] sm:$0xf0] }
 0x183   : > { %2203 = vmatmul.bf16.gmra.mxu1 %v11998_v13  ;;  %v8206_v56 = vor.u32 %v9885_v39, %v8205_v38 }
 0x184   : > { %v2009_v62 = vadd.f32 %v2008_v60, %v1960_v59  ;;  %2154 = vmatmul.bf16.gmra.mxu0 %v11996_v12  ;;  %v2739_v0 = vmax.f32 %v2104_v61, 0.0  ;;  %2252 = vmatmul.bf16.gmra.mxu2 %v12000_v14 }
 0x185   : > { %2301 = vmatmul.bf16.gmra.mxu3 %v12002_v15  ;;  %2381 = vmatpush.bf16.msra.mxu1 %v8206_v56 }
 0x186   : > { %v12120_v18 = vpack.c.bf16 %v2739_v0, %v2735_v63 }
 0x187   : > { %v2057_v19 = vpop.f32.mrf.mxu2 }
 0x188   : > { %v2058_v30 = vadd.f32 %v2057_v19, %v2009_v62  ;;  %v2106_v31 = vpop.f32.mrf.mxu3  ;;  %v2010_v34 = vpop.f32.mrf.mxu1  ;;  %v9849_v19 = vld [vmem:[#allocation7 + $0x34] sm:$0xf0] }
 0x189   : > { %v1961_v32 = vpop.f32.mrf.mxu0 }
 0x18a   : > { %v1962_v33 = vadd.f32 %v1961_v32, %v12091_v55  ;;  %v2107_v35 = vadd.f32 %v2106_v31, %v2058_v30  ;;  %v8062_v32 = vor.u32 %v9849_v19, %v8061_v16  ;;  %v8301_v19 = vld [vmem:[#allocation7 + $0x208] sm:$0xf] }
 0x18c   : > { %v2011_v36 = vadd.f32 %v2010_v34, %v1962_v33  ;;  %v2743_v3 = vmax.f32 %v2107_v35, 0.0  ;;  %v8446_v33 = vor.u32 %v9945_v29, %v8445_v28  ;;  %2333 = vmatpush.bf16.msra.mxu0 %v8062_v32  ;;  %v9909_v28 = vld [vmem:[#allocation7 + $0x214] sm:$0xf0]  ;;  %v8045_v29 = vld [vmem:[#allocation7 + $0x8] sm:$0xf] }
 0x18d   : > { %v9845_v32 = vld [vmem:[#allocation7 + $0x14] sm:$0xf0] }
 0x18e   : > { %2480 = vmatpush.bf16.msra.mxu3 %v8446_v33  ;;  %v8429_v33 = vld [vmem:[#allocation7 + $0x308] sm:$0xf] }
 0x18f   : > { %v2059_v58 = vpop.f32.mrf.mxu2 }
 0x190   : > { %v2060_v59 = vadd.f32 %v2059_v58, %v2011_v36  ;;  %v2108_v60 = vpop.f32.mrf.mxu3  ;;  %v2013_v63 = vpop.f32.mrf.mxu1 }
 0x191   : > { %v1964_v61 = vpop.f32.mrf.mxu0 }
 0x192   : > { %v1965_v62 = vadd.f32 %v1964_v61, %v12091_v55  ;;  %v2109_v0 = vadd.f32 %v2108_v60, %v2060_v59  ;;  %v8189_v59 = vld [vmem:[#allocation7 + $0x128] sm:$0xf]  ;;  %v9881_v60 = vld [vmem:[#allocation7 + $0x134] sm:$0xf0] }
 0x193   : > { %2208 = vmatmul.bf16.gmra.mxu1 %v12018_v41  ;;  %v8190_v61 = vor.u32 %v9881_v60, %v8189_v59 }
 0x194   : > { %v2014_v2 = vadd.f32 %v2013_v63, %v1965_v62  ;;  %2159 = vmatmul.bf16.gmra.mxu0 %v12016_v40  ;;  %v2747_v4 = vmax.f32 %v2109_v0, 0.0  ;;  %2257 = vmatmul.bf16.gmra.mxu2 %v12020_v42 }
 0x195   : > { %2306 = vmatmul.bf16.gmra.mxu3 %v12022_v43  ;;  %2382 = vmatpush.bf16.msra.mxu1 %v8190_v61 }
 0x196   : > { %v12128_v30 = vpack.c.bf16 %v2747_v4, %v2743_v3 }
 0x197   : > { %v2062_v31 = vpop.f32.mrf.mxu2 }
 0x198   : > { %v2063_v34 = vadd.f32 %v2062_v31, %v2014_v2  ;;  %v2111_v35 = vpop.f32.mrf.mxu3  ;;  %v2015_v39 = vpop.f32.mrf.mxu1  ;;  %v8302_v31 = vor.u32 %v9909_v28, %v8301_v19 }
 0x199   : > { %v1966_v36 = vpop.f32.mrf.mxu0 }
 0x19a   : > { %v1967_v38 = vadd.f32 %v1966_v36, %v12091_v55  ;;  %v2112_v56 = vadd.f32 %v2111_v35, %v2063_v34  ;;  %v9941_v34 = vld [vmem:[#allocation7 + $0x314] sm:$0xf0]  ;;  %2432 = vmatpush.bf16.msra.mxu2 %v8302_v31 }
 0x19c   : > { %v2016_v58 = vadd.f32 %v2015_v39, %v1967_v38  ;;  %v2751_v16 = vmax.f32 %v2112_v56, 0.0  ;;  %v8046_v38 = vor.u32 %v9845_v32, %v8045_v29  ;;  %v8430_v39 = vor.u32 %v9941_v34, %v8429_v33  ;;  %v9935_v33 = vld [vmem:[#allocation7 + $0x2ec] sm:$0xf]  ;;  %v8415_v34 = vld [vmem:[#allocation7 + $0x2f8] sm:$0xf0] }
 0x19e   : > { %2334 = vmatpush.bf16.msra.mxu0 %v8046_v38  ;;  %2481 = vmatpush.bf16.msra.mxu3 %v8430_v39  ;;  %v8418_v38 = vor.u32 %v9935_v33, %v8415_v34  ;;  %v8159_v39 = vld [vmem:[#allocation7 + $0xf8] sm:$0xf0] }
 0x19f   : > { %v2064_v62 = vpop.f32.mrf.mxu2 }
 0x1a0   : > { %v2065_v63 = vadd.f32 %v2064_v62, %v2016_v58  ;;  %v2113_v0 = vpop.f32.mrf.mxu3  ;;  %v2018_v4 = vpop.f32.mrf.mxu1  ;;  %2621 = vmatpush.bf16.msrb.mxu2 %v8418_v38 }
 0x1a1   : > { %v1969_v3 = vpop.f32.mrf.mxu0 }
 0x1a2   : > { %v1970_v2 = vadd.f32 %v1969_v3, %v12091_v55  ;;  %v2114_v5 = vadd.f32 %v2113_v0, %v2065_v63  ;;  %v8173_v0 = vld [vmem:[#allocation7 + $0x108] sm:$0xf]  ;;  %v9877_v3 = vld [vmem:[#allocation7 + $0x114] sm:$0xf0] }
 0x1a3   : > { %2213 = vmatmul.bf16.gmra.mxu1 %v12038_v9 }
 0x1a4   : > { %v2019_v6 = vadd.f32 %v2018_v4, %v1970_v2  ;;  %2164 = vmatmul.bf16.gmra.mxu0 %v12036_v8  ;;  %v2755_v17 = vmax.f32 %v2114_v5, 0.0  ;;  %2262 = vmatmul.bf16.gmra.mxu2 %v12040_v10  ;;  %v8174_v2 = vor.u32 %v9877_v3, %v8173_v0 }
 0x1a5   : > { %2311 = vmatmul.bf16.gmra.mxu3 %v12042_v11 }
 0x1a6   : > { %v12136_v35 = vpack.c.bf16 %v2755_v17, %v2751_v16  ;;  %2383 = vmatpush.bf16.msra.mxu1 %v8174_v2 }
 0x1a7   : > { %v2067_v36 = vpop.f32.mrf.mxu2 }
 0x1a8   : > { %13540 = vst [vmem:[#allocation45_spill] sm:$0xff] %v12136_v35  ;;  %v2068_v56 = vadd.f32 %v2067_v36, %v2019_v6  ;;  %v2116_v58 = vpop.f32.mrf.mxu3  ;;  %v2020_v61 = vpop.f32.mrf.mxu1  ;;  %v9871_v36 = vld [vmem:[#allocation7 + $0xec] sm:$0xf] }
 0x1a9   : > { %v1971_v59 = vpop.f32.mrf.mxu0 }
 0x1aa   : > { %v1972_v60 = vadd.f32 %v1971_v59, %v12091_v55  ;;  %v2117_v62 = vadd.f32 %v2116_v58, %v2068_v56  ;;  %v9967_v56 = vld [vmem:[#allocation7 + $0x3ec] sm:$0xf]  ;;  %v8543_v58 = vld [vmem:[#allocation7 + $0x3f8] sm:$0xf0] }
 0x1ac   : > { %v2021_v63 = vadd.f32 %v2020_v61, %v1972_v60  ;;  %v2759_v31 = vmax.f32 %v2117_v62, 0.0  ;;  %v8162_v61 = vor.u32 %v9871_v36, %v8159_v39 }
 0x1ae   : > { %2523 = vmatpush.bf16.msrb.mxu0 %v8162_v61  ;;  %v9867_v61 = vld [vmem:[#allocation7 + $0xcc] sm:$0xf] }
 0x1af   : > { %v2069_v4 = vpop.f32.mrf.mxu2 }
 0x1b0   : > { %v2070_v5 = vadd.f32 %v2069_v4, %v2021_v63  ;;  %v2118_v16 = vpop.f32.mrf.mxu3  ;;  %v2023_v19 = vpop.f32.mrf.mxu1  ;;  %v8546_v63 = vor.u32 %v9967_v56, %v8543_v58  ;;  %v9931_v58 = vld [vmem:[#allocation7 + $0x2cc] sm:$0xf] }
 0x1b1   : > { %v1974_v17 = vpop.f32.mrf.mxu0 }
 0x1b2   : > { %v1975_v6 = vadd.f32 %v1974_v17, %v12091_v55  ;;  %v2119_v28 = vadd.f32 %v2118_v16, %v2070_v5  ;;  %2670 = vmatpush.bf16.msrb.mxu3 %v8546_v63  ;;  %v9903_v17 = vld [vmem:[#allocation7 + $0x1ec] sm:$0xf] }
 0x1b3   : > { %2218 = vmatmul.bf16.gmra.mxu1 %v12058_v45 }
 0x1b4   : > { %v2024_v29 = vadd.f32 %v2023_v19, %v1975_v6  ;;  %2169 = vmatmul.bf16.gmra.mxu0 %v12056_v44  ;;  %v2763_v32 = vmax.f32 %v2119_v28, 0.0  ;;  %2267 = vmatmul.bf16.gmra.mxu2 %v12060_v46  ;;  %v8287_v6 = vld [vmem:[#allocation7 + $0x1f8] sm:$0xf0] }
 0x1b5   : > { %2316 = vmatmul.bf16.gmra.mxu3 %v12062_v47  ;;  %v8290_v19 = vor.u32 %v9903_v17, %v8287_v6 }
 0x1b6   : > { %v12144_v59 = vpack.c.bf16 %v2763_v32, %v2759_v31 }
 0x1b7   : > { %v2072_v60 = vpop.f32.mrf.mxu2  ;;  %2572 = vmatpush.bf16.msrb.mxu1 %v8290_v19 }
 0x1b8   : > { %13541 = vst [vmem:[#allocation46_spill] sm:$0xff] %v12144_v59  ;;  %v2073_v62 = vadd.f32 %v2072_v60, %v2024_v29  ;;  %v2121_v0 = vpop.f32.mrf.mxu3  ;;  %v2025_v4 = vpop.f32.mrf.mxu1  ;;  %v8399_v60 = vld [vmem:[#allocation7 + $0x2d8] sm:$0xf0] }
 0x1b9   : > { %v1976_v3 = vpop.f32.mrf.mxu0 }
 0x1ba   : > { %v1977_v2 = vadd.f32 %v1976_v3, %v12091_v55  ;;  %v2122_v5 = vadd.f32 %v2121_v0, %v2073_v62  ;;  %v8402_v0 = vor.u32 %v9931_v58, %v8399_v60  ;;  %v8143_v3 = vld [vmem:[#allocation7 + $0xd8] sm:$0xf0] }
 0x1bb   : > { %v8146_v6 = vor.u32 %v9867_v61, %v8143_v3 }
 0x1bc   : > { %v2026_v16 = vadd.f32 %v2025_v4, %v1977_v2  ;;  %v2767_v39 = vmax.f32 %v2122_v5, 0.0  ;;  %v9963_v2 = vld [vmem:[#allocation7 + $0x3cc] sm:$0xf]  ;;  %v8527_v4 = vld [vmem:[#allocation7 + $0x3d8] sm:$0xf0]  ;;  %2622 = vmatpush.bf16.msrb.mxu2 %v8402_v0 }
 0x1bd   : > { %v8530_v19 = vor.u32 %v9963_v2, %v8527_v4  ;;  %2524 = vmatpush.bf16.msrb.mxu0 %v8146_v6  ;;  %v8383_v4 = vld [vmem:[#allocation7 + $0x2b8] sm:$0xf0]  ;;  %v9959_v6 = vld [vmem:[#allocation7 + $0x3ac] sm:$0xf] }
 0x1bf   : > { %v2074_v28 = vpop.f32.mrf.mxu2  ;;  %2671 = vmatpush.bf16.msrb.mxu3 %v8530_v19  ;;  %v8511_v19 = vld [vmem:[#allocation7 + $0x3b8] sm:$0xf0] }
 0x1c0   : > { %v2075_v31 = vadd.f32 %v2074_v28, %v2026_v16  ;;  %v2123_v32 = vpop.f32.mrf.mxu3  ;;  %v2028_v34 = vpop.f32.mrf.mxu1 }
 0x1c1   : > { %v1979_v33 = vpop.f32.mrf.mxu0 }
 0x1c2   : > { %v1980_v29 = vadd.f32 %v1979_v33, %v12091_v55  ;;  %v2124_v36 = vadd.f32 %v2123_v32, %v2075_v31 }
 0x1c3   : > { %2223 = vmatmul.bf16.gmra.mxu1 %v12078_v21 }
 0x1c4   : > { %v2029_v38 = vadd.f32 %v2028_v34, %v1980_v29  ;;  %2174 = vmatmul.bf16.gmra.mxu0 %v12076_v20  ;;  %v2771_v56 = vmax.f32 %v2124_v36, 0.0  ;;  %2272 = vmatmul.bf16.gmra.mxu2 %v12080_v22  ;;  %v9899_v29 = vld [vmem:[#allocation7 + $0x1cc] sm:$0xf]  ;;  %v8271_v34 = vld [vmem:[#allocation7 + $0x1d8] sm:$0xf0]  ;;  %v12156_v36 = vperm.slane %v12088_v37, 1 }
 0x1c5   : > { %2321 = vmatmul.bf16.gmra.mxu3 %v12082_v23  ;;  %v9927_v37 = vld [vmem:[#allocation7 + $0x2ac] sm:$0xf] }
 0x1c6   : > { %v12152_v63 = vpack.c.bf16 %v2771_v56, %v2767_v39  ;;  %v8274_v39 = vor.u32 %v9899_v29, %v8271_v34  ;;  %v8514_v29 = vor.u32 %v9959_v6, %v8511_v19 }
 0x1c7   : > { %v2077_v62 = vpop.f32.mrf.mxu2 }
 0x1c8   : > { %13542 = vst [vmem:[#allocation47_spill] sm:$0xff] %v12152_v63  ;;  %v2078_v16 = vadd.f32 %v2077_v62, %v2029_v38  ;;  %v2126_v17 = vpop.f32.mrf.mxu3  ;;  %v2030_v31 = vpop.f32.mrf.mxu1  ;;  %2573 = vmatpush.bf16.msrb.mxu1 %v8274_v39  ;;  %2672 = vmatpush.bf16.msrb.mxu3 %v8514_v29  ;;  %v9859_v29 = vld [vmem:[#allocation7 + $0x8c] sm:$0xf] }
 0x1c9   : > { %v1981_v5 = vpop.f32.mrf.mxu0 }
 0x1ca   : > { %v1982_v28 = vadd.f32 %v1981_v5, %v12091_v55  ;;  %v2127_v32 = vadd.f32 %v2126_v17, %v2078_v16  ;;  %v9863_v16 = vld [vmem:[#allocation7 + $0xac] sm:$0xf]  ;;  %v8386_v17 = vor.u32 %v9927_v37, %v8383_v4  ;;  %v8127_v5 = vld [vmem:[#allocation7 + $0xb8] sm:$0xf0] }
 0x1cc   : > { %v2031_v33 = vadd.f32 %v2030_v31, %v1982_v28  ;;  %v2775_v3 = vmax.f32 %v2127_v32, 0.0  ;;  %2623 = vmatpush.bf16.msrb.mxu2 %v8386_v17 }
 0x1cf   : > { %v2079_v56 = vpop.f32.mrf.mxu2 }
 0x1d0   : > { %v2080_v38 = vadd.f32 %v2079_v56, %v2031_v33  ;;  %v2128_v58 = vpop.f32.mrf.mxu3  ;;  %v2189_v55 = vpop.f32.mrf.mxu1  ;;  %v8130_v33 = vor.u32 %v9863_v16, %v8127_v5 }
 0x1d1   : > { %v2140_v60 = vpop.f32.mrf.mxu0 }
 0x1d2   : > { %v2141_v61 = vadd.f32 %v2140_v60, %v12156_v36  ;;  %v2129_v62 = vadd.f32 %v2128_v58, %v2080_v38  ;;  %2525 = vmatpush.bf16.msrb.mxu0 %v8130_v33  ;;  %v8367_v33 = vld [vmem:[#allocation7 + $0x298] sm:$0xf0] }
 0x1d3   : > { %2384 = vmatmul.bf16.vlgmr.msra.gmra.mxu1 %v11938_v53 }
 0x1d4   : > { %v2190_v0 = vadd.f32 %v2189_v55, %v2141_v61  ;;  %2335 = vmatmul.bf16.vlgmr.msra.gmra.mxu0 %v11936_v48  ;;  %v2779_v2 = vmax.f32 %v2129_v62, 0.0  ;;  %2433 = vmatmul.bf16.vlgmr.msra.gmra.mxu2 %v11940_v54  ;;  %v9895_v61 = vld [vmem:[#allocation7 + $0x1ac] sm:$0xf]  ;;  %v8255_v55 = vld [vmem:[#allocation7 + $0x1b8] sm:$0xf0] }
 0x1d5   : > { %2482 = vmatmul.bf16.vlgmr.msra.gmra.mxu3 %v11942_v57  ;;  %v8258_v62 = vor.u32 %v9895_v61, %v8255_v55 }
 0x1d6   : > { %v12163_v28 = vpack.c.bf16 %v2779_v2, %v2775_v3 }
 0x1d7   : > { %v2238_v31 = vpop.f32.mrf.mxu2  ;;  %2574 = vmatpush.bf16.msrb.mxu1 %v8258_v62 }
 0x1d8   : > { %13543 = vst [vmem:[#allocation48_spill] sm:$0xff] %v12163_v28  ;;  %v2239_v32 = vadd.f32 %v2238_v31, %v2190_v0  ;;  %v2287_v34 = vpop.f32.mrf.mxu3  ;;  %v2191_v38 = vpop.f32.mrf.mxu1  ;;  %v9923_v31 = vld [vmem:[#allocation7 + $0x28c] sm:$0xf] }
 0x1d9   : > { %v2142_v39 = vpop.f32.mrf.mxu0 }
 0x1da   : > { %v2143_v56 = vadd.f32 %v2142_v39, %v12156_v36  ;;  %v2288_v58 = vadd.f32 %v2287_v34, %v2239_v32  ;;  %v8370_v34 = vor.u32 %v9923_v31, %v8367_v33  ;;  %v8111_v39 = vld [vmem:[#allocation7 + $0x98] sm:$0xf0] }
 0x1db   : > { %v8114_v61 = vor.u32 %v9859_v29, %v8111_v39 }
 0x1dc   : > { %v2192_v60 = vadd.f32 %v2191_v38, %v2143_v56  ;;  %v2720_v6 = vmax.f32 %v2288_v58, 0.0  ;;  %v9955_v56 = vld [vmem:[#allocation7 + $0x38c] sm:$0xf]  ;;  %v8495_v38 = vld [vmem:[#allocation7 + $0x398] sm:$0xf0]  ;;  %2624 = vmatpush.bf16.msrb.mxu2 %v8370_v34 }
 0x1dd   : > { %v8498_v55 = vor.u32 %v9955_v56, %v8495_v38  ;;  %2526 = vmatpush.bf16.msrb.mxu0 %v8114_v61  ;;  %v9919_v61 = vld [vmem:[#allocation7 + $0x26c] sm:$0xf] }
 0x1df   : > { %v2240_v37 = vpop.f32.mrf.mxu2  ;;  %2673 = vmatpush.bf16.msrb.mxu3 %v8498_v55  ;;  %v8351_v55 = vld [vmem:[#allocation7 + $0x278] sm:$0xf0] }
 0x1e0   : > { %v2241_v3 = vadd.f32 %v2240_v37, %v2192_v60  ;;  %v2289_v2 = vpop.f32.mrf.mxu3  ;;  %v2194_v16 = vpop.f32.mrf.mxu1 }
 0x1e1   : > { %v2145_v4 = vpop.f32.mrf.mxu0 }
 0x1e2   : > { %v2146_v0 = vadd.f32 %v2145_v4, %v12156_v36  ;;  %v2290_v5 = vadd.f32 %v2289_v2, %v2241_v3 }
 0x1e3   : > { %2389 = vmatmul.bf16.gmra.mxu1 %v11958_v25 }
 0x1e4   : > { %v2195_v17 = vadd.f32 %v2194_v16, %v2146_v0  ;;  %2340 = vmatmul.bf16.gmra.mxu0 %v11956_v24  ;;  %v2724_v19 = vmax.f32 %v2290_v5, 0.0  ;;  %2438 = vmatmul.bf16.gmra.mxu2 %v11960_v26  ;;  %v9891_v16 = vld [vmem:[#allocation7 + $0x18c] sm:$0xf]  ;;  %v8239_v5 = vld [vmem:[#allocation7 + $0x198] sm:$0xf0] }
 0x1e5   : > { %2487 = vmatmul.bf16.gmra.mxu3 %v11962_v27 }
 0x1e6   : > { %v12171_v32 = vpack.c.bf16 %v2724_v19, %v2720_v6  ;;  %v8242_v6 = vor.u32 %v9891_v16, %v8239_v5 }
 0x1e7   : > { %v2243_v60 = vpop.f32.mrf.mxu2 }
 0x1e8   : > { %v2244_v58 = vadd.f32 %v2243_v60, %v2195_v17  ;;  %v2292_v62 = vpop.f32.mrf.mxu3  ;;  %v2196_v2 = vpop.f32.mrf.mxu1  ;;  %2575 = vmatpush.bf16.msrb.mxu1 %v8242_v6 }
 0x1e9   : > { %v2147_v37 = vpop.f32.mrf.mxu0 }
 0x1ea   : > { %v2148_v3 = vadd.f32 %v2147_v37, %v12156_v36  ;;  %v2293_v4 = vadd.f32 %v2292_v62, %v2244_v58  ;;  %v9855_v58 = vld [vmem:[#allocation7 + $0x6c] sm:$0xf]  ;;  %v8354_v62 = vor.u32 %v9919_v61, %v8351_v55  ;;  %v8095_v37 = vld [vmem:[#allocation7 + $0x78] sm:$0xf0] }
 0x1eb   : > { %v8098_v5 = vor.u32 %v9855_v58, %v8095_v37  ;;  %v8223_v61 = vld [vmem:[#allocation7 + $0x178] sm:$0xf0] }
 0x1ec   : > { %v2197_v0 = vadd.f32 %v2196_v2, %v2148_v3  ;;  %v2728_v38 = vmax.f32 %v2293_v4, 0.0  ;;  %v9951_v3 = vld [vmem:[#allocation7 + $0x36c] sm:$0xf]  ;;  %v8479_v2 = vld [vmem:[#allocation7 + $0x378] sm:$0xf0]  ;;  %2625 = vmatpush.bf16.msrb.mxu2 %v8354_v62 }
 0x1ed   : > { %v8482_v6 = vor.u32 %v9951_v3, %v8479_v2  ;;  %2527 = vmatpush.bf16.msrb.mxu0 %v8098_v5  ;;  %v9915_v5 = vld [vmem:[#allocation7 + $0x24c] sm:$0xf] }
 0x1ef   : > { %v2245_v19 = vpop.f32.mrf.mxu2  ;;  %2674 = vmatpush.bf16.msrb.mxu3 %v8482_v6  ;;  %v8335_v6 = vld [vmem:[#allocation7 + $0x258] sm:$0xf0] }
 0x1f0   : > { %v2246_v31 = vadd.f32 %v2245_v19, %v2197_v0  ;;  %v2294_v33 = vpop.f32.mrf.mxu3  ;;  %v2199_v39 = vpop.f32.mrf.mxu1 }
 0x1f1   : > { %v2150_v29 = vpop.f32.mrf.mxu0 }
 0x1f2   : > { %v2151_v17 = vadd.f32 %v2150_v29, %v12156_v36  ;;  %v2295_v56 = vadd.f32 %v2294_v33, %v2246_v31 }
 0x1f3   : > { %2394 = vmatmul.bf16.gmra.mxu1 %v11978_v50 }
 0x1f4   : > { %v2200_v34 = vadd.f32 %v2199_v39, %v2151_v17  ;;  %2345 = vmatmul.bf16.gmra.mxu0 %v11976_v49  ;;  %v2732_v60 = vmax.f32 %v2295_v56, 0.0  ;;  %2443 = vmatmul.bf16.gmra.mxu2 %v11980_v51  ;;  %v9887_v56 = vld [vmem:[#allocation7 + $0x16c] sm:$0xf] }
 0x1f5   : > { %2492 = vmatmul.bf16.gmra.mxu3 %v11982_v52  ;;  %v8226_v55 = vor.u32 %v9887_v56, %v8223_v61 }
 0x1f6   : > { %v12179_v0 = vpack.c.bf16 %v2732_v60, %v2728_v38 }
 0x1f7   : > { %v2248_v16 = vpop.f32.mrf.mxu2  ;;  %2576 = vmatpush.bf16.msrb.mxu1 %v8226_v55 }
 0x1f8   : > { %v2249_v4 = vadd.f32 %v2248_v16, %v2200_v34  ;;  %v2297_v19 = vpop.f32.mrf.mxu3  ;;  %v2201_v29 = vpop.f32.mrf.mxu1 }
 0x1f9   : > { %v2152_v31 = vpop.f32.mrf.mxu0 }
 0x1fa   : > { %v2153_v33 = vadd.f32 %v2152_v31, %v12156_v36  ;;  %v2298_v17 = vadd.f32 %v2297_v19, %v2249_v4  ;;  %v8338_v4 = vor.u32 %v9915_v5, %v8335_v6  ;;  %v8079_v19 = vld [vmem:[#allocation7 + $0x58] sm:$0xf0]  ;;  %v9947_v31 = vld [vmem:[#allocation7 + $0x34c] sm:$0xf] }
 0x1fb   : > { %v8207_v5 = vld [vmem:[#allocation7 + $0x158] sm:$0xf0] }
 0x1fc   : > { %v2202_v39 = vadd.f32 %v2201_v29, %v2153_v33  ;;  %v2736_v2 = vmax.f32 %v2298_v17, 0.0  ;;  %v8463_v33 = vld [vmem:[#allocation7 + $0x358] sm:$0xf0]  ;;  %2626 = vmatpush.bf16.msrb.mxu2 %v8338_v4 }
 0x1fd   : > { %v8466_v61 = vor.u32 %v9947_v31, %v8463_v33 }
 0x1ff   : > { %v2250_v28 = vpop.f32.mrf.mxu2  ;;  %2675 = vmatpush.bf16.msrb.mxu3 %v8466_v61  ;;  %v8319_v61 = vld [vmem:[#allocation7 + $0x238] sm:$0xf0] }
 0x200   : > { %v2251_v38 = vadd.f32 %v2250_v28, %v2202_v39  ;;  %v2299_v60 = vpop.f32.mrf.mxu3  ;;  %v2204_v37 = vpop.f32.mrf.mxu1  ;;  %v9851_v28 = vld [vmem:[#allocation7 + $0x4c] sm:$0xf] }
 0x201   : > { %v2155_v58 = vpop.f32.mrf.mxu0  ;;  %v8082_v56 = vor.u32 %v9851_v28, %v8079_v19 }
 0x202   : > { %v2156_v34 = vadd.f32 %v2155_v58, %v12156_v36  ;;  %v2300_v3 = vadd.f32 %v2299_v60, %v2251_v38 }
 0x203   : > { %2399 = vmatmul.bf16.gmra.mxu1 %v11998_v13  ;;  %2528 = vmatpush.bf16.msrb.mxu0 %v8082_v56  ;;  %v9911_v56 = vld [vmem:[#allocation7 + $0x22c] sm:$0xf] }
 0x204   : > { %v2205_v62 = vadd.f32 %v2204_v37, %v2156_v34  ;;  %2350 = vmatmul.bf16.gmra.mxu0 %v11996_v12  ;;  %v2740_v16 = vmax.f32 %v2300_v3, 0.0  ;;  %2448 = vmatmul.bf16.gmra.mxu2 %v12000_v14  ;;  %v9883_v3 = vld [vmem:[#allocation7 + $0x14c] sm:$0xf] }
 0x205   : > { %2497 = vmatmul.bf16.gmra.mxu3 %v12002_v15  ;;  %v8210_v6 = vor.u32 %v9883_v3, %v8207_v5 }
 0x206   : > { %v12187_v29 = vpack.c.bf16 %v2740_v16, %v2736_v2 }
 0x207   : > { %v2253_v39 = vpop.f32.mrf.mxu2  ;;  %2577 = vmatpush.bf16.msrb.mxu1 %v8210_v6 }
 0x208   : > { %v2254_v17 = vadd.f32 %v2253_v39, %v2205_v62  ;;  %v2302_v55 = vpop.f32.mrf.mxu3  ;;  %v2206_v58 = vpop.f32.mrf.mxu1 }
 0x209   : > { %v2157_v38 = vpop.f32.mrf.mxu0 }
 0x20a   : > { %v2158_v60 = vadd.f32 %v2157_v38, %v12156_v36  ;;  %v2303_v34 = vadd.f32 %v2302_v55, %v2254_v17  ;;  %v8322_v17 = vor.u32 %v9911_v56, %v8319_v61  ;;  %v8063_v55 = vld [vmem:[#allocation7 + $0x38] sm:$0xf0]  ;;  %v9943_v38 = vld [vmem:[#allocation7 + $0x32c] sm:$0xf] }
 0x20b   : > { %v8191_v56 = vld [vmem:[#allocation7 + $0x138] sm:$0xf0] }
 0x20c   : > { %v2207_v37 = vadd.f32 %v2206_v58, %v2158_v60  ;;  %v2744_v33 = vmax.f32 %v2303_v34, 0.0  ;;  %v8447_v60 = vld [vmem:[#allocation7 + $0x338] sm:$0xf0]  ;;  %2627 = vmatpush.bf16.msrb.mxu2 %v8322_v17 }
 0x20d   : > { %v8450_v5 = vor.u32 %v9943_v38, %v8447_v60 }
 0x20f   : > { %v2255_v63 = vpop.f32.mrf.mxu2  ;;  %2676 = vmatpush.bf16.msrb.mxu3 %v8450_v5  ;;  %v8303_v5 = vld [vmem:[#allocation7 + $0x218] sm:$0xf0] }
 0x210   : > { %v2256_v2 = vadd.f32 %v2255_v63, %v2207_v37  ;;  %v2304_v16 = vpop.f32.mrf.mxu3  ;;  %v2209_v19 = vpop.f32.mrf.mxu1  ;;  %v9847_v63 = vld [vmem:[#allocation7 + $0x2c] sm:$0xf] }
 0x211   : > { %v2160_v28 = vpop.f32.mrf.mxu0  ;;  %v8066_v3 = vor.u32 %v9847_v63, %v8063_v55 }
 0x212   : > { %v2161_v62 = vadd.f32 %v2160_v28, %v12156_v36  ;;  %v2305_v31 = vadd.f32 %v2304_v16, %v2256_v2 }
 0x213   : > { %2404 = vmatmul.bf16.gmra.mxu1 %v12018_v41  ;;  %2529 = vmatpush.bf16.msrb.mxu0 %v8066_v3  ;;  %v9907_v3 = vld [vmem:[#allocation7 + $0x20c] sm:$0xf] }
 0x214   : > { %v2210_v4 = vadd.f32 %v2209_v19, %v2161_v62  ;;  %2355 = vmatmul.bf16.gmra.mxu0 %v12016_v40  ;;  %v2748_v39 = vmax.f32 %v2305_v31, 0.0  ;;  %2453 = vmatmul.bf16.gmra.mxu2 %v12020_v42  ;;  %v9879_v31 = vld [vmem:[#allocation7 + $0x12c] sm:$0xf] }
 0x215   : > { %2502 = vmatmul.bf16.gmra.mxu3 %v12022_v43  ;;  %v8194_v61 = vor.u32 %v9879_v31, %v8191_v56 }
 0x216   : > { %v12195_v58 = vpack.c.bf16 %v2748_v39, %v2744_v33 }
 0x217   : > { %v2258_v37 = vpop.f32.mrf.mxu2  ;;  %2578 = vmatpush.bf16.msrb.mxu1 %v8194_v61 }
 0x218   : > { %v2259_v34 = vadd.f32 %v2258_v37, %v2210_v4  ;;  %v2307_v6 = vpop.f32.mrf.mxu3  ;;  %v2211_v28 = vpop.f32.mrf.mxu1 }
 0x219   : > { %v2162_v2 = vpop.f32.mrf.mxu0 }
 0x21a   : > { %v2163_v16 = vadd.f32 %v2162_v2, %v12156_v36  ;;  %v2308_v62 = vadd.f32 %v2307_v6, %v2259_v34  ;;  %v8306_v34 = vor.u32 %v9907_v3, %v8303_v5  ;;  %v8047_v6 = vld [vmem:[#allocation7 + $0x18] sm:$0xf0]  ;;  %v9939_v2 = vld [vmem:[#allocation7 + $0x30c] sm:$0xf] }
 0x21b   : > { %v8175_v3 = vld [vmem:[#allocation7 + $0x118] sm:$0xf0] }
 0x21c   : > { %v2212_v19 = vadd.f32 %v2211_v28, %v2163_v16  ;;  %v2752_v60 = vmax.f32 %v2308_v62, 0.0  ;;  %v8431_v16 = vld [vmem:[#allocation7 + $0x318] sm:$0xf0]  ;;  %2628 = vmatpush.bf16.msrb.mxu2 %v8306_v34 }
 0x21d   : > { %v8434_v56 = vor.u32 %v9939_v2, %v8431_v16 }
 0x21f   : > { %v2260_v59 = vpop.f32.mrf.mxu2  ;;  %2677 = vmatpush.bf16.msrb.mxu3 %v8434_v56 }
 0x220   : > { %v2261_v33 = vadd.f32 %v2260_v59, %v2212_v19  ;;  %v2309_v39 = vpop.f32.mrf.mxu3  ;;  %v2214_v55 = vpop.f32.mrf.mxu1  ;;  %v9843_v59 = vld [vmem:[#allocation7 + $0xc] sm:$0xf] }
 0x221   : > { %v2165_v63 = vpop.f32.mrf.mxu0  ;;  %v8050_v31 = vor.u32 %v9843_v59, %v8047_v6 }
 0x222   : > { %v2166_v4 = vadd.f32 %v2165_v63, %v12156_v36  ;;  %v2310_v38 = vadd.f32 %v2309_v39, %v2261_v33 }
 0x223   : > { %2409 = vmatmul.bf16.gmra.mxu1 %v12038_v9  ;;  %2530 = vmatpush.bf16.msrb.mxu0 %v8050_v31 }
 0x224   : > { %v2215_v17 = vadd.f32 %v2214_v55, %v2166_v4  ;;  %2360 = vmatmul.bf16.gmra.mxu0 %v12036_v8  ;;  %v2756_v37 = vmax.f32 %v2310_v38, 0.0  ;;  %2458 = vmatmul.bf16.gmra.mxu2 %v12040_v10  ;;  %v9875_v38 = vld [vmem:[#allocation7 + $0x10c] sm:$0xf] }
 0x225   : > { %2507 = vmatmul.bf16.gmra.mxu3 %v12042_v11  ;;  %v8178_v5 = vor.u32 %v9875_v38, %v8175_v3 }
 0x226   : > { %v12203_v28 = vpack.c.bf16 %v2756_v37, %v2752_v60 }
 0x227   : > { %v2263_v19 = vpop.f32.mrf.mxu2  ;;  %2579 = vmatpush.bf16.msrb.mxu1 %v8178_v5 }
 0x228   : > { %v2264_v62 = vadd.f32 %v2263_v19, %v2215_v17  ;;  %v2312_v61 = vpop.f32.mrf.mxu3  ;;  %v2216_v63 = vpop.f32.mrf.mxu1 }
 0x229   : > { %v2167_v33 = vpop.f32.mrf.mxu0 }
 0x22a   : > { %v2168_v39 = vadd.f32 %v2167_v33, %v12156_v36  ;;  %v2313_v4 = vadd.f32 %v2312_v61, %v2264_v62 }
 0x22c   : > { %v2217_v55 = vadd.f32 %v2216_v63, %v2168_v39  ;;  %v2760_v16 = vmax.f32 %v2313_v4, 0.0 }
 0x22f   : > { %v2265_v35 = vpop.f32.mrf.mxu2 }
 0x230   : > { %v2266_v60 = vadd.f32 %v2265_v35, %v2217_v55  ;;  %v2314_v37 = vpop.f32.mrf.mxu3  ;;  %v2219_v6 = vpop.f32.mrf.mxu1 }
 0x231   : > { %v2170_v59 = vpop.f32.mrf.mxu0 }
 0x232   : > { %v2171_v17 = vadd.f32 %v2170_v59, %v12156_v36  ;;  %v2315_v2 = vadd.f32 %v2314_v37, %v2266_v60 }
 0x233   : > { %2414 = vmatmul.bf16.gmra.mxu1 %v12058_v45 }
 0x234   : > { %v2220_v34 = vadd.f32 %v2219_v6, %v2171_v17  ;;  %2365 = vmatmul.bf16.gmra.mxu0 %v12056_v44  ;;  %v2764_v19 = vmax.f32 %v2315_v2, 0.0  ;;  %2463 = vmatmul.bf16.gmra.mxu2 %v12060_v46 }
 0x235   : > { %2512 = vmatmul.bf16.gmra.mxu3 %v12062_v47 }
 0x236   : > { %v12211_v31 = vpack.c.bf16 %v2764_v19, %v2760_v16  ;;  %v10017_v16 = vld [vmem:[#allocation10 + $0x174] sm:$0xf0] }
 0x237   : > { %v2268_v35 = vpop.f32.mrf.mxu2 }
 0x238   : > { %v2269_v56 = vadd.f32 %v2268_v35, %v2220_v34  ;;  %v2317_v62 = vpop.f32.mrf.mxu3  ;;  %v2221_v39 = vpop.f32.mrf.mxu1  ;;  %v8733_v34 = vld [vmem:[#allocation10 + $0x170] sm:$0xf] }
 0x239   : > { %v2172_v61 = vpop.f32.mrf.mxu0 }
 0x23a   : > { %v2173_v33 = vadd.f32 %v2172_v61, %v12156_v36  ;;  %v2318_v63 = vadd.f32 %v2317_v62, %v2269_v56  ;;  %v8734_v56 = vor.u32 %v10017_v16, %v8733_v34  ;;  %v10001_v34 = vld [vmem:[#allocation10 + $0xf4] sm:$0xf0] }
 0x23c   : > { %v2222_v55 = vadd.f32 %v2221_v39, %v2173_v33  ;;  %v2768_v6 = vmax.f32 %v2318_v63, 0.0  ;;  %3303 = vmatpush.bf16.msra.mxu2 %v8734_v56 }
 0x23f   : > { %v2270_v38 = vpop.f32.mrf.mxu2 }
 0x240   : > { %v2271_v4 = vadd.f32 %v2270_v38, %v2222_v55  ;;  %v2319_v3 = vpop.f32.mrf.mxu3  ;;  %v2224_v37 = vpop.f32.mrf.mxu1 }
 0x241   : > { %v2175_v5 = vpop.f32.mrf.mxu0 }
 0x242   : > { %v2176_v60 = vadd.f32 %v2175_v5, %v12156_v36  ;;  %v2320_v59 = vadd.f32 %v2319_v3, %v2271_v4  ;;  %v12222_v4 = vld [vmem:[#allocation8] sm:$0xf]  ;;  %v8605_v5 = vld [vmem:[#allocation10 + $0x70] sm:$0xf] }
 0x243   : > { %2419 = vmatmul.bf16.gmra.mxu1 %v12078_v21  ;;  %v12225_v3 = vperm.slane %v12222_v4, 2 }
 0x244   : > { %v2225_v17 = vadd.f32 %v2224_v37, %v2176_v60  ;;  %2370 = vmatmul.bf16.gmra.mxu0 %v12076_v20  ;;  %v2772_v2 = vmax.f32 %v2320_v59, 0.0  ;;  %2468 = vmatmul.bf16.gmra.mxu2 %v12080_v22  ;;  %v9985_v60 = vld [vmem:[#allocation10 + $0x74] sm:$0xf0]  ;;  %v8797_v59 = vld [vmem:[#allocation10 + $0x1f0] sm:$0xf] }
 0x245   : > { %2517 = vmatmul.bf16.gmra.mxu3 %v12082_v23  ;;  %v8606_v37 = vor.u32 %v9985_v60, %v8605_v5 }
 0x246   : > { %v12219_v19 = vpack.c.bf16 %v2772_v2, %v2768_v6  ;;  %v10033_v6 = vld [vmem:[#allocation10 + $0x1f4] sm:$0xf0]  ;;  %v8669_v2 = vld [vmem:[#allocation10 + $0xf0] sm:$0xf] }
 0x247   : > { %v2273_v35 = vpop.f32.mrf.mxu2  ;;  %3205 = vmatpush.bf16.msra.mxu0 %v8606_v37  ;;  %v10015_v37 = vld [vmem:[#allocation10 + $0x164] sm:$0xf0] }
 0x248   : > { %v2274_v62 = vadd.f32 %v2273_v35, %v2225_v17  ;;  %v2322_v61 = vpop.f32.mrf.mxu3  ;;  %v2226_v55 = vpop.f32.mrf.mxu1  ;;  %v8798_v17 = vor.u32 %v10033_v6, %v8797_v59 }
 0x249   : > { %v2177_v33 = vpop.f32.mrf.mxu0 }
 0x24a   : > { %v2178_v39 = vadd.f32 %v2177_v33, %v12156_v36  ;;  %v2323_v63 = vadd.f32 %v2322_v61, %v2274_v62  ;;  %v8670_v36 = vor.u32 %v10001_v34, %v8669_v2  ;;  %3352 = vmatpush.bf16.msra.mxu3 %v8798_v17 }
 0x24c   : > { %v2227_v38 = vadd.f32 %v2226_v55, %v2178_v39  ;;  %3254 = vmatpush.bf16.msra.mxu1 %v8670_v36  ;;  %v2776_v5 = vmax.f32 %v2323_v63, 0.0 }
 0x24f   : > { %v2275_v16 = vpop.f32.mrf.mxu2 }
 0x250   : > { %v2276_v35 = vadd.f32 %v2275_v16, %v2227_v38  ;;  %v2324_v56 = vpop.f32.mrf.mxu3  ;;  %v2385_v33 = vpop.f32.mrf.mxu1  ;;  %v8725_v38 = vld [vmem:[#allocation10 + $0x160] sm:$0xf] }
 0x251   : > { %v2336_v62 = vpop.f32.mrf.mxu0  ;;  %v8726_v59 = vor.u32 %v10015_v37, %v8725_v38 }
 0x252   : > { %v2337_v61 = vadd.f32 %v2336_v62, %v12225_v3  ;;  %v2325_v39 = vadd.f32 %v2324_v56, %v2276_v35  ;;  %v9983_v56 = vld [vmem:[#allocation10 + $0x64] sm:$0xf0]  ;;  %v8789_v62 = vld [vmem:[#allocation10 + $0x1e0] sm:$0xf] }
 0x253   : > { %2580 = vmatmul.bf16.vlgmr.msrb.gmra.mxu1 %v11938_v53  ;;  %3304 = vmatpush.bf16.msra.mxu2 %v8726_v59  ;;  %v8597_v53 = vld [vmem:[#allocation10 + $0x60] sm:$0xf] }
 0x254   : > { %v2386_v55 = vadd.f32 %v2385_v33, %v2337_v61  ;;  %2531 = vmatmul.bf16.vlgmr.msrb.gmra.mxu0 %v11936_v48  ;;  %v2780_v60 = vmax.f32 %v2325_v39, 0.0  ;;  %2629 = vmatmul.bf16.vlgmr.msrb.gmra.mxu2 %v11940_v54  ;;  %v8598_v54 = vor.u32 %v9983_v56, %v8597_v53  ;;  %v8661_v61 = vld [vmem:[#allocation10 + $0xe0] sm:$0xf]  ;;  %v9999_v39 = vld [vmem:[#allocation10 + $0xe4] sm:$0xf0] }
 0x255   : > { %2678 = vmatmul.bf16.vlgmr.msrb.gmra.mxu3 %v11942_v57  ;;  %v10031_v57 = vld [vmem:[#allocation10 + $0x1e4] sm:$0xf0] }
 0x256   : > { %v12232_v6 = vpack.c.bf16 %v2780_v60, %v2776_v5  ;;  %v8790_v33 = vor.u32 %v10031_v57, %v8789_v62  ;;  %3206 = vmatpush.bf16.msra.mxu0 %v8598_v54  ;;  %v8662_v60 = vor.u32 %v9999_v39, %v8661_v61 }
 0x257   : > { %v2434_v2 = vpop.f32.mrf.mxu2 }
 0x258   : > { %v2435_v17 = vadd.f32 %v2434_v2, %v2386_v55  ;;  %v2483_v34 = vpop.f32.mrf.mxu3  ;;  %v2387_v63 = vpop.f32.mrf.mxu1  ;;  %3353 = vmatpush.bf16.msra.mxu3 %v8790_v33  ;;  %3255 = vmatpush.bf16.msra.mxu1 %v8662_v60  ;;  %v8781_v60 = vld [vmem:[#allocation10 + $0x1d0] sm:$0xf] }
 0x259   : > { %v2338_v16 = vpop.f32.mrf.mxu0 }
 0x25a   : > { %v2339_v48 = vadd.f32 %v2338_v16, %v12225_v3  ;;  %v2484_v36 = vadd.f32 %v2483_v34, %v2435_v17 }
 0x25c   : > { %v2388_v35 = vadd.f32 %v2387_v63, %v2339_v48  ;;  %v2721_v16 = vmax.f32 %v2484_v36, 0.0  ;;  %v8717_v63 = vld [vmem:[#allocation10 + $0x150] sm:$0xf] }
 0x25f   : > { %v2436_v5 = vpop.f32.mrf.mxu2 }
 0x260   : > { %v2437_v55 = vadd.f32 %v2436_v5, %v2388_v35  ;;  %v2485_v38 = vpop.f32.mrf.mxu3  ;;  %v2390_v2 = vpop.f32.mrf.mxu1  ;;  %v10013_v35 = vld [vmem:[#allocation10 + $0x154] sm:$0xf0] }
 0x261   : > { %v2341_v37 = vpop.f32.mrf.mxu0  ;;  %v8718_v56 = vor.u32 %v10013_v35, %v8717_v63  ;;  %v9981_v5 = vld [vmem:[#allocation10 + $0x54] sm:$0xf0] }
 0x262   : > { %v2342_v59 = vadd.f32 %v2341_v37, %v12225_v3  ;;  %v2486_v17 = vadd.f32 %v2485_v38, %v2437_v55  ;;  %v8653_v55 = vld [vmem:[#allocation10 + $0xd0] sm:$0xf]  ;;  %v9997_v37 = vld [vmem:[#allocation10 + $0xd4] sm:$0xf0] }
 0x263   : > { %2585 = vmatmul.bf16.gmra.mxu1 %v11958_v25  ;;  %3305 = vmatpush.bf16.msra.mxu2 %v8718_v56  ;;  %v8589_v25 = vld [vmem:[#allocation10 + $0x50] sm:$0xf] }
 0x264   : > { %v2391_v34 = vadd.f32 %v2390_v2, %v2342_v59  ;;  %2536 = vmatmul.bf16.gmra.mxu0 %v11956_v24  ;;  %v2725_v48 = vmax.f32 %v2486_v17, 0.0  ;;  %2634 = vmatmul.bf16.gmra.mxu2 %v11960_v26  ;;  %v8590_v26 = vor.u32 %v9981_v5, %v8589_v25  ;;  %v8654_v2 = vor.u32 %v9997_v37, %v8653_v55  ;;  %v9979_v55 = vld [vmem:[#allocation10 + $0x44] sm:$0xf0]  ;;  %v8645_v37 = vld [vmem:[#allocation10 + $0xc0] sm:$0xf] }
 0x265   : > { %2683 = vmatmul.bf16.gmra.mxu3 %v11962_v27  ;;  %v10029_v27 = vld [vmem:[#allocation10 + $0x1d4] sm:$0xf0] }
 0x266   : > { %v12240_v53 = vpack.c.bf16 %v2725_v48, %v2721_v16  ;;  %v8782_v38 = vor.u32 %v10029_v27, %v8781_v60  ;;  %3207 = vmatpush.bf16.msra.mxu0 %v8590_v26  ;;  %3256 = vmatpush.bf16.msra.mxu1 %v8654_v2  ;;  %v9995_v2 = vld [vmem:[#allocation10 + $0xc4] sm:$0xf0] }
 0x267   : > { %v2439_v54 = vpop.f32.mrf.mxu2 }
 0x268   : > { %v2440_v62 = vadd.f32 %v2439_v54, %v2391_v34  ;;  %v2488_v57 = vpop.f32.mrf.mxu3  ;;  %v2392_v36 = vpop.f32.mrf.mxu1  ;;  %3354 = vmatpush.bf16.msra.mxu3 %v8782_v38  ;;  %v8773_v38 = vld [vmem:[#allocation10 + $0x1c0] sm:$0xf] }
 0x269   : > { %v2343_v61 = vpop.f32.mrf.mxu0 }
 0x26a   : > { %v2344_v24 = vadd.f32 %v2343_v61, %v12225_v3  ;;  %v2489_v33 = vadd.f32 %v2488_v57, %v2440_v62  ;;  %v8709_v57 = vld [vmem:[#allocation10 + $0x140] sm:$0xf]  ;;  %v10011_v61 = vld [vmem:[#allocation10 + $0x144] sm:$0xf0] }
 0x26c   : > { %v2393_v39 = vadd.f32 %v2392_v36, %v2344_v24  ;;  %v2729_v54 = vmax.f32 %v2489_v33, 0.0  ;;  %v8710_v24 = vor.u32 %v10011_v61, %v8709_v57 }
 0x26e   : > { %3306 = vmatpush.bf16.msra.mxu2 %v8710_v24  ;;  %v8701_v24 = vld [vmem:[#allocation10 + $0x130] sm:$0xf] }
 0x26f   : > { %v2441_v59 = vpop.f32.mrf.mxu2 }
 0x270   : > { %v2442_v17 = vadd.f32 %v2441_v59, %v2393_v39  ;;  %v2490_v34 = vpop.f32.mrf.mxu3  ;;  %v2395_v63 = vpop.f32.mrf.mxu1 }
 0x271   : > { %v2346_v16 = vpop.f32.mrf.mxu0 }
 0x272   : > { %v2347_v48 = vadd.f32 %v2346_v16, %v12225_v3  ;;  %v2491_v35 = vadd.f32 %v2490_v34, %v2442_v17  ;;  %v8646_v34 = vor.u32 %v9995_v2, %v8645_v37 }
 0x273   : > { %2590 = vmatmul.bf16.gmra.mxu1 %v11978_v50  ;;  %v8581_v50 = vld [vmem:[#allocation10 + $0x40] sm:$0xf] }
 0x274   : > { %v2396_v56 = vadd.f32 %v2395_v63, %v2347_v48  ;;  %2541 = vmatmul.bf16.gmra.mxu0 %v11976_v49  ;;  %v2733_v62 = vmax.f32 %v2491_v35, 0.0  ;;  %2639 = vmatmul.bf16.gmra.mxu2 %v11980_v51  ;;  %v8582_v51 = vor.u32 %v9979_v55, %v8581_v50 }
 0x275   : > { %2688 = vmatmul.bf16.gmra.mxu3 %v11982_v52  ;;  %v10027_v52 = vld [vmem:[#allocation10 + $0x1c4] sm:$0xf0]  ;;  %3257 = vmatpush.bf16.msra.mxu1 %v8646_v34 }
 0x276   : > { %v12248_v36 = vpack.c.bf16 %v2733_v62, %v2729_v54  ;;  %v8774_v59 = vor.u32 %v10027_v52, %v8773_v38  ;;  %3208 = vmatpush.bf16.msra.mxu0 %v8582_v51  ;;  %v9977_v51 = vld [vmem:[#allocation10 + $0x34] sm:$0xf0]  ;;  %v8765_v38 = vld [vmem:[#allocation10 + $0x1b0] sm:$0xf] }
 0x277   : > { %v2444_v39 = vpop.f32.mrf.mxu2  ;;  %v8637_v52 = vld [vmem:[#allocation10 + $0xb0] sm:$0xf] }
 0x278   : > { %v2445_v25 = vadd.f32 %v2444_v39, %v2396_v56  ;;  %v2493_v5 = vpop.f32.mrf.mxu3  ;;  %v2397_v33 = vpop.f32.mrf.mxu1  ;;  %3355 = vmatpush.bf16.msra.mxu3 %v8774_v59  ;;  %v10009_v39 = vld [vmem:[#allocation10 + $0x134] sm:$0xf0] }
 0x279   : > { %v2348_v26 = vpop.f32.mrf.mxu0  ;;  %v9993_v59 = vld [vmem:[#allocation10 + $0xb4] sm:$0xf0] }
 0x27a   : > { %v2349_v49 = vadd.f32 %v2348_v26, %v12225_v3  ;;  %v2494_v60 = vadd.f32 %v2493_v5, %v2445_v25  ;;  %v8702_v25 = vor.u32 %v10009_v39, %v8701_v24  ;;  %v10007_v24 = vld [vmem:[#allocation10 + $0x124] sm:$0xf0] }
 0x27c   : > { %v2398_v27 = vadd.f32 %v2397_v33, %v2349_v49  ;;  %v2737_v57 = vmax.f32 %v2494_v60, 0.0  ;;  %3307 = vmatpush.bf16.msra.mxu2 %v8702_v25 }
 0x27f   : > { %v2446_v17 = vpop.f32.mrf.mxu2 }
 0x280   : > { %v2447_v16 = vadd.f32 %v2446_v17, %v2398_v27  ;;  %v2495_v48 = vpop.f32.mrf.mxu3  ;;  %v2400_v56 = vpop.f32.mrf.mxu1  ;;  %v8638_v17 = vor.u32 %v9993_v59, %v8637_v52 }
 0x281   : > { %v2351_v63 = vpop.f32.mrf.mxu0 }
 0x282   : > { %v2352_v35 = vadd.f32 %v2351_v63, %v12225_v3  ;;  %v2496_v54 = vadd.f32 %v2495_v48, %v2447_v16  ;;  %3258 = vmatpush.bf16.msra.mxu1 %v8638_v17 }
 0x283   : > { %2595 = vmatmul.bf16.gmra.mxu1 %v11998_v13  ;;  %v8573_v13 = vld [vmem:[#allocation10 + $0x30] sm:$0xf] }
 0x284   : > { %v2401_v62 = vadd.f32 %v2400_v56, %v2352_v35  ;;  %2546 = vmatmul.bf16.gmra.mxu0 %v11996_v12  ;;  %v2741_v61 = vmax.f32 %v2496_v54, 0.0  ;;  %2644 = vmatmul.bf16.gmra.mxu2 %v12000_v14  ;;  %v8574_v14 = vor.u32 %v9977_v51, %v8573_v13  ;;  %v8757_v13 = vld [vmem:[#allocation10 + $0x1a0] sm:$0xf] }
 0x285   : > { %2693 = vmatmul.bf16.gmra.mxu3 %v12002_v15  ;;  %v10025_v15 = vld [vmem:[#allocation10 + $0x1b4] sm:$0xf0]  ;;  %v8629_v51 = vld [vmem:[#allocation10 + $0xa0] sm:$0xf] }
 0x286   : > { %v12256_v5 = vpack.c.bf16 %v2741_v61, %v2737_v57  ;;  %v8766_v37 = vor.u32 %v10025_v15, %v8765_v38  ;;  %3209 = vmatpush.bf16.msra.mxu0 %v8574_v14  ;;  %v8693_v61 = vld [vmem:[#allocation10 + $0x120] sm:$0xf]  ;;  %v9991_v38 = vld [vmem:[#allocation10 + $0xa4] sm:$0xf0] }
 0x287   : > { %v2449_v26 = vpop.f32.mrf.mxu2  ;;  %v8694_v39 = vor.u32 %v10007_v24, %v8693_v61  ;;  %v8630_v52 = vor.u32 %v9991_v38, %v8629_v51  ;;  %v8613_v51 = vld [vmem:[#allocation10 + $0x80] sm:$0xf] }
 0x288   : > { %v2450_v49 = vadd.f32 %v2449_v26, %v2401_v62  ;;  %v2498_v33 = vpop.f32.mrf.mxu3  ;;  %v2402_v60 = vpop.f32.mrf.mxu1  ;;  %3356 = vmatpush.bf16.msra.mxu3 %v8766_v37 }
 0x289   : > { %v2353_v27 = vpop.f32.mrf.mxu0  ;;  %3308 = vmatpush.bf16.msra.mxu2 %v8694_v39  ;;  %3259 = vmatpush.bf16.msra.mxu1 %v8630_v52 }
 0x28a   : > { %v2354_v12 = vadd.f32 %v2353_v27, %v12225_v3  ;;  %v2499_v50 = vadd.f32 %v2498_v33, %v2450_v49 }
 0x28c   : > { %v2403_v55 = vadd.f32 %v2402_v60, %v2354_v12  ;;  %v2745_v62 = vmax.f32 %v2499_v50, 0.0 }
 0x28f   : > { %v2451_v2 = vpop.f32.mrf.mxu2 }
 0x290   : > { %v2452_v34 = vadd.f32 %v2451_v2, %v2403_v55  ;;  %v2500_v16 = vpop.f32.mrf.mxu3  ;;  %v2405_v35 = vpop.f32.mrf.mxu1  ;;  %v9975_v55 = vld [vmem:[#allocation10 + $0x24] sm:$0xf0] }
 0x291   : > { %v2356_v48 = vpop.f32.mrf.mxu0 }
 0x292   : > { %v2357_v63 = vadd.f32 %v2356_v48, %v12225_v3  ;;  %v2501_v56 = vadd.f32 %v2500_v16, %v2452_v34 }
 0x293   : > { %2600 = vmatmul.bf16.gmra.mxu1 %v12018_v41  ;;  %v8565_v41 = vld [vmem:[#allocation10 + $0x20] sm:$0xf] }
 0x294   : > { %v2406_v54 = vadd.f32 %v2405_v35, %v2357_v63  ;;  %2551 = vmatmul.bf16.gmra.mxu0 %v12016_v40  ;;  %v2749_v57 = vmax.f32 %v2501_v56, 0.0  ;;  %2649 = vmatmul.bf16.gmra.mxu2 %v12020_v42  ;;  %v8566_v42 = vor.u32 %v9975_v55, %v8565_v41  ;;  %v8685_v56 = vld [vmem:[#allocation10 + $0x110] sm:$0xf]  ;;  %v9989_v41 = vld [vmem:[#allocation10 + $0x94] sm:$0xf0] }
 0x295   : > { %2698 = vmatmul.bf16.gmra.mxu3 %v12022_v43  ;;  %v10023_v43 = vld [vmem:[#allocation10 + $0x1a4] sm:$0xf0] }
 0x296   : > { %v12264_v25 = vpack.c.bf16 %v2749_v57, %v2745_v62  ;;  %v8758_v14 = vor.u32 %v10023_v43, %v8757_v13  ;;  %3210 = vmatpush.bf16.msra.mxu0 %v8566_v42  ;;  %v8549_v13 = vld [vmem:[#allocation10] sm:$0xf]  ;;  %v9971_v43 = vld [vmem:[#allocation10 + $0x4] sm:$0xf0] }
 0x297   : > { %v2454_v26 = vpop.f32.mrf.mxu2  ;;  %v8550_v52 = vor.u32 %v9971_v43, %v8549_v13  ;;  %v8735_v13 = vld [vmem:[#allocation10 + $0x178] sm:$0xf0] }
 0x298   : > { %v2455_v49 = vadd.f32 %v2454_v26, %v2406_v54  ;;  %v2503_v33 = vpop.f32.mrf.mxu3  ;;  %v2407_v12 = vpop.f32.mrf.mxu1  ;;  %3357 = vmatpush.bf16.msra.mxu3 %v8758_v14  ;;  %v10005_v54 = vld [vmem:[#allocation10 + $0x114] sm:$0xf0] }
 0x299   : > { %v2358_v27 = vpop.f32.mrf.mxu0  ;;  %v8686_v62 = vor.u32 %v10005_v54, %v8685_v56 }
 0x29a   : > { %v2359_v40 = vadd.f32 %v2358_v27, %v12225_v3  ;;  %v2504_v60 = vadd.f32 %v2503_v33, %v2455_v49 }
 0x29b   : > { %3309 = vmatpush.bf16.msra.mxu2 %v8686_v62 }
 0x29c   : > { %v2408_v50 = vadd.f32 %v2407_v12, %v2359_v40  ;;  %v2753_v63 = vmax.f32 %v2504_v60, 0.0  ;;  %v9973_v40 = vld [vmem:[#allocation10 + $0x14] sm:$0xf0] }
 0x29d   : > { %v10021_v60 = vld [vmem:[#allocation10 + $0x194] sm:$0xf0] }
 0x29f   : > { %v2456_v15 = vpop.f32.mrf.mxu2 }
 0x2a0   : > { %v2457_v37 = vadd.f32 %v2456_v15, %v2408_v50  ;;  %v2505_v59 = vpop.f32.mrf.mxu3  ;;  %v2410_v34 = vpop.f32.mrf.mxu1 }
 0x2a1   : > { %v2361_v2 = vpop.f32.mrf.mxu0 }
 0x2a2   : > { %v2362_v17 = vadd.f32 %v2361_v2, %v12225_v3  ;;  %v2506_v16 = vadd.f32 %v2505_v59, %v2457_v37  ;;  %v9987_v37 = vld [vmem:[#allocation10 + $0x84] sm:$0xf0]  ;;  %v8677_v59 = vld [vmem:[#allocation10 + $0x100] sm:$0xf] }
 0x2a3   : > { %2605 = vmatmul.bf16.gmra.mxu1 %v12038_v9  ;;  %v8557_v9 = vld [vmem:[#allocation10 + $0x10] sm:$0xf]  ;;  %v10003_v2 = vld [vmem:[#allocation10 + $0x104] sm:$0xf0] }
 0x2a4   : > { %v2411_v48 = vadd.f32 %v2410_v34, %v2362_v17  ;;  %2556 = vmatmul.bf16.gmra.mxu0 %v12036_v8  ;;  %v2757_v35 = vmax.f32 %v2506_v16, 0.0  ;;  %2654 = vmatmul.bf16.gmra.mxu2 %v12040_v10  ;;  %v8621_v10 = vld [vmem:[#allocation10 + $0x90] sm:$0xf]  ;;  %v8558_v12 = vor.u32 %v9973_v40, %v8557_v9  ;;  %v8614_v16 = vor.u32 %v9987_v37, %v8613_v51  ;;  %v10019_v9 = vld [vmem:[#allocation10 + $0x184] sm:$0xf0] }
 0x2a5   : > { %2703 = vmatmul.bf16.gmra.mxu3 %v12042_v11  ;;  %v8749_v11 = vld [vmem:[#allocation10 + $0x190] sm:$0xf]  ;;  %v8622_v55 = vor.u32 %v9989_v41, %v8621_v10 }
 0x2a6   : > { %v12272_v57 = vpack.c.bf16 %v2757_v35, %v2753_v63  ;;  %v8750_v50 = vor.u32 %v10021_v60, %v8749_v11  ;;  %3211 = vmatpush.bf16.msra.mxu0 %v8558_v12 }
 0x2a7   : > { %v2459_v61 = vpop.f32.mrf.mxu2  ;;  %3260 = vmatpush.bf16.msra.mxu1 %v8622_v55 }
 0x2a8   : > { %v2460_v24 = vadd.f32 %v2459_v61, %v2411_v48  ;;  %v2508_v39 = vpop.f32.mrf.mxu3  ;;  %v2412_v49 = vpop.f32.mrf.mxu1  ;;  %3358 = vmatpush.bf16.msra.mxu3 %v8750_v50  ;;  %v8678_v48 = vor.u32 %v10003_v2, %v8677_v59 }
 0x2a9   : > { %v2363_v26 = vpop.f32.mrf.mxu0 }
 0x2aa   : > { %v2364_v8 = vadd.f32 %v2363_v26, %v12225_v3  ;;  %v2509_v33 = vadd.f32 %v2508_v39, %v2460_v24  ;;  %3212 = vmatpush.bf16.msra.mxu0 %v8550_v52  ;;  %3310 = vmatpush.bf16.msra.mxu2 %v8678_v48 }
 0x2ab   : > { %3261 = vmatpush.bf16.msra.mxu1 %v8614_v16  ;;  %v10000_v16 = vld [vmem:[#allocation10 + $0xf4] sm:$0xf] }
 0x2ac   : > { %v2413_v27 = vadd.f32 %v2412_v49, %v2364_v8  ;;  %v2761_v56 = vmax.f32 %v2509_v33, 0.0  ;;  %v8741_v33 = vld [vmem:[#allocation10 + $0x180] sm:$0xf] }
 0x2ad   : > { %v8742_v40 = vor.u32 %v10019_v9, %v8741_v33  ;;  %v8727_v33 = vld [vmem:[#allocation10 + $0x168] sm:$0xf0] }
 0x2af   : > { %v2461_v42 = vpop.f32.mrf.mxu2  ;;  %3359 = vmatpush.bf16.msra.mxu3 %v8742_v40 }
 0x2b0   : > { %v2462_v14 = vadd.f32 %v2461_v42, %v2413_v27  ;;  %v2510_v38 = vpop.f32.mrf.mxu3  ;;  %v2415_v34 = vpop.f32.mrf.mxu1  ;;  %v10016_v42 = vld [vmem:[#allocation10 + $0x174] sm:$0xf] }
 0x2b1   : > { %v2366_v15 = vpop.f32.mrf.mxu0 }
 0x2b2   : > { %v2367_v17 = vadd.f32 %v2366_v15, %v12225_v3  ;;  %v2511_v63 = vadd.f32 %v2510_v38, %v2462_v14  ;;  %v8738_v14 = vor.u32 %v10016_v42, %v8735_v13  ;;  %v8791_v42 = vld [vmem:[#allocation10 + $0x1e8] sm:$0xf0]  ;;  %v9998_v13 = vld [vmem:[#allocation10 + $0xe4] sm:$0xf] }
 0x2b3   : > { %2610 = vmatmul.bf16.gmra.mxu1 %v12058_v45 }
 0x2b4   : > { %v2416_v35 = vadd.f32 %v2415_v34, %v2367_v17  ;;  %2561 = vmatmul.bf16.gmra.mxu0 %v12056_v44  ;;  %v2765_v54 = vmax.f32 %v2511_v63, 0.0  ;;  %2659 = vmatmul.bf16.gmra.mxu2 %v12060_v46  ;;  %v8607_v17 = vld [vmem:[#allocation10 + $0x78] sm:$0xf0]  ;;  %v10032_v34 = vld [vmem:[#allocation10 + $0x1f4] sm:$0xf] }
 0x2b5   : > { %2708 = vmatmul.bf16.gmra.mxu3 %v12062_v47  ;;  %3499 = vmatpush.bf16.msrb.mxu2 %v8738_v14  ;;  %v8671_v63 = vld [vmem:[#allocation10 + $0xf8] sm:$0xf0] }
 0x2b6   : > { %v12280_v62 = vpack.c.bf16 %v2765_v54, %v2761_v56  ;;  %v8674_v56 = vor.u32 %v10000_v16, %v8671_v63  ;;  %v10012_v16 = vld [vmem:[#allocation10 + $0x154] sm:$0xf] }
 0x2b7   : > { %v2464_v61 = vpop.f32.mrf.mxu2 }
 0x2b8   : > { %v2465_v24 = vadd.f32 %v2464_v61, %v2416_v35  ;;  %v2513_v39 = vpop.f32.mrf.mxu3  ;;  %v2417_v49 = vpop.f32.mrf.mxu1  ;;  %3450 = vmatpush.bf16.msrb.mxu1 %v8674_v56 }
 0x2b9   : > { %v2368_v26 = vpop.f32.mrf.mxu0 }
 0x2ba   : > { %v2369_v8 = vadd.f32 %v2368_v26, %v12225_v3  ;;  %v2514_v44 = vadd.f32 %v2513_v39, %v2465_v24  ;;  %v12292_v24 = vperm.slane %v12222_v4, 3 }
 0x2bc   : > { %v2418_v27 = vadd.f32 %v2417_v49, %v2369_v8  ;;  %v2769_v41 = vmax.f32 %v2514_v44, 0.0 }
 0x2bf   : > { %v2466_v45 = vpop.f32.mrf.mxu2 }
 0x2c0   : > { %v2467_v46 = vadd.f32 %v2466_v45, %v2418_v27  ;;  %v2515_v10 = vpop.f32.mrf.mxu3  ;;  %v2420_v11 = vpop.f32.mrf.mxu1  ;;  %v10014_v27 = vld [vmem:[#allocation10 + $0x164] sm:$0xf] }
 0x2c1   : > { %v2371_v47 = vpop.f32.mrf.mxu0  ;;  %v8730_v9 = vor.u32 %v10014_v27, %v8727_v33  ;;  %v10028_v33 = vld [vmem:[#allocation10 + $0x1d4] sm:$0xf] }
 0x2c2   : > { %v2372_v12 = vadd.f32 %v2371_v47, %v12225_v3  ;;  %v2516_v60 = vadd.f32 %v2515_v10, %v2467_v46 }
 0x2c3   : > { %2615 = vmatmul.bf16.gmra.mxu1 %v12078_v21  ;;  %v9984_v21 = vld [vmem:[#allocation10 + $0x74] sm:$0xf]  ;;  %3500 = vmatpush.bf16.msrb.mxu2 %v8730_v9  ;;  %v8783_v9 = vld [vmem:[#allocation10 + $0x1d8] sm:$0xf0] }
 0x2c4   : > { %v2421_v50 = vadd.f32 %v2420_v11, %v2372_v12  ;;  %2566 = vmatmul.bf16.gmra.mxu0 %v12076_v20  ;;  %v2773_v55 = vmax.f32 %v2516_v60, 0.0  ;;  %2664 = vmatmul.bf16.gmra.mxu2 %v12080_v22  ;;  %v8610_v22 = vor.u32 %v9984_v21, %v8607_v17  ;;  %v9982_v60 = vld [vmem:[#allocation10 + $0x64] sm:$0xf] }
 0x2c5   : > { %2713 = vmatmul.bf16.gmra.mxu3 %v12082_v23  ;;  %v8799_v23 = vld [vmem:[#allocation10 + $0x1f8] sm:$0xf0] }
 0x2c6   : > { %v12288_v43 = vpack.c.bf16 %v2773_v55, %v2769_v41  ;;  %v8802_v48 = vor.u32 %v10032_v34, %v8799_v23  ;;  %3401 = vmatpush.bf16.msrb.mxu0 %v8610_v22  ;;  %v10030_v55 = vld [vmem:[#allocation10 + $0x1e4] sm:$0xf] }
 0x2c7   : > { %v2469_v51 = vpop.f32.mrf.mxu2  ;;  %v8794_v14 = vor.u32 %v10030_v55, %v8791_v42 }
 0x2c8   : > { %v2470_v38 = vadd.f32 %v2469_v51, %v2421_v50  ;;  %v2518_v15 = vpop.f32.mrf.mxu3  ;;  %v2422_v20 = vpop.f32.mrf.mxu1  ;;  %3548 = vmatpush.bf16.msrb.mxu3 %v8802_v48  ;;  %v8599_v50 = vld [vmem:[#allocation10 + $0x68] sm:$0xf0]  ;;  %v8719_v48 = vld [vmem:[#allocation10 + $0x158] sm:$0xf0] }
 0x2c9   : > { %v2373_v52 = vpop.f32.mrf.mxu0  ;;  %v8602_v41 = vor.u32 %v9982_v60, %v8599_v50  ;;  %v8722_v63 = vor.u32 %v10012_v16, %v8719_v48  ;;  %v8583_v16 = vld [vmem:[#allocation10 + $0x48] sm:$0xf0] }
 0x2ca   : > { %v2374_v37 = vadd.f32 %v2373_v52, %v12225_v3  ;;  %v2519_v59 = vadd.f32 %v2518_v15, %v2470_v38  ;;  %v8663_v38 = vld [vmem:[#allocation10 + $0xe8] sm:$0xf0] }
 0x2cb   : > { %3402 = vmatpush.bf16.msrb.mxu0 %v8602_v41  ;;  %v8666_v52 = vor.u32 %v9998_v13, %v8663_v38  ;;  %3501 = vmatpush.bf16.msrb.mxu2 %v8722_v63  ;;  %v10010_v38 = vld [vmem:[#allocation10 + $0x144] sm:$0xf] }
 0x2cc   : > { %v2423_v2 = vadd.f32 %v2422_v20, %v2374_v37  ;;  %v2777_v8 = vmax.f32 %v2519_v59, 0.0  ;;  %3549 = vmatpush.bf16.msrb.mxu3 %v8794_v14  ;;  %v10026_v63 = vld [vmem:[#allocation10 + $0x1c4] sm:$0xf] }
 0x2cd   : > { %3451 = vmatpush.bf16.msrb.mxu1 %v8666_v52 }
 0x2cf   : > { %v2471_v35 = vpop.f32.mrf.mxu2 }
 0x2d0   : > { %v2472_v54 = vadd.f32 %v2471_v35, %v2423_v2  ;;  %v2520_v61 = vpop.f32.mrf.mxu3  ;;  %v2581_v39 = vpop.f32.mrf.mxu1 }
 0x2d1   : > { %v2532_v3 = vpop.f32.mrf.mxu0 }
 0x2d2   : > { %v2521_v26 = vadd.f32 %v2520_v61, %v2472_v54  ;;  %v2533_v44 = vadd.f32 %v2532_v3, %v12292_v24 }
 0x2d3   : > { %3262 = vmatmul.bf16.vlgmr.msra.gmra.mxu1 %v12171_v32 }
 0x2d4   : > { %3213 = vmatmul.bf16.vlgmr.msra.gmra.mxu0 %v12104_v1  ;;  %v2781_v49 = vmax.f32 %v2521_v26, 0.0  ;;  %3311 = vmatmul.bf16.vlgmr.msra.gmra.mxu2 %v12240_v53  ;;  %v2582_v45 = vadd.f32 %v2581_v39, %v2533_v44  ;;  %v8591_v44 = vld [vmem:[#allocation10 + $0x58] sm:$0xf0] }
 0x2d6   : > { %v12298_v4 = vpack.c.bf16 %v2781_v49, %v2777_v8  ;;  %v9980_v49 = vld [vmem:[#allocation10 + $0x54] sm:$0xf] }
 0x2d7   : > { %v2630_v40 = vpop.f32.mrf.mxu2  ;;  %v8594_v27 = vor.u32 %v9980_v49, %v8591_v44 }
 0x2d8   : > { %v2679_v46 = vpop.f32.mrf.mxu3  ;;  %v2583_v47 = vpop.f32.mrf.mxu1  ;;  %v2631_v11 = vadd.f32 %v2630_v40, %v2582_v45  ;;  %v9996_v40 = vld [vmem:[#allocation10 + $0xd4] sm:$0xf] }
 0x2d9   : > { %v2534_v10 = vpop.f32.mrf.mxu0  ;;  %3403 = vmatpush.bf16.msrb.mxu0 %v8594_v27 }
 0x2da   : > { %v2535_v12 = vadd.f32 %v2534_v10, %v12292_v24  ;;  %v2680_v37 = vadd.f32 %v2679_v46, %v2631_v11  ;;  %v8786_v46 = vor.u32 %v10028_v33, %v8783_v9  ;;  %v8655_v10 = vld [vmem:[#allocation10 + $0xd8] sm:$0xf0] }
 0x2dc   : > { %v2584_v51 = vadd.f32 %v2583_v47, %v2535_v12  ;;  %v2722_v22 = vmax.f32 %v2680_v37, 0.0  ;;  %v8658_v12 = vor.u32 %v9996_v40, %v8655_v10  ;;  %3550 = vmatpush.bf16.msrb.mxu3 %v8786_v46 }
 0x2de   : > { %3452 = vmatpush.bf16.msrb.mxu1 %v8658_v12  ;;  %v8703_v12 = vld [vmem:[#allocation10 + $0x138] sm:$0xf0] }
 0x2df   : > { %v2632_v15 = vpop.f32.mrf.mxu2 }
 0x2e0   : > { %v2633_v20 = vadd.f32 %v2632_v15, %v2584_v51  ;;  %v2681_v59 = vpop.f32.mrf.mxu3  ;;  %v2586_v21 = vpop.f32.mrf.mxu1  ;;  %v8711_v15 = vld [vmem:[#allocation10 + $0x148] sm:$0xf0] }
 0x2e1   : > { %v2537_v2 = vpop.f32.mrf.mxu0  ;;  %v8714_v52 = vor.u32 %v10010_v38, %v8711_v15  ;;  %v9976_v38 = vld [vmem:[#allocation10 + $0x34] sm:$0xf]  ;;  %v8575_v15 = vld [vmem:[#allocation10 + $0x38] sm:$0xf0] }
 0x2e2   : > { %v2682_v17 = vadd.f32 %v2681_v59, %v2633_v20  ;;  %v2538_v23 = vadd.f32 %v2537_v2, %v12292_v24 }
 0x2e3   : > { %3267 = vmatmul.bf16.gmra.mxu1 %v12179_v0  ;;  %3502 = vmatpush.bf16.msrb.mxu2 %v8714_v52  ;;  %v8578_v52 = vor.u32 %v9976_v38, %v8575_v15  ;;  %v8631_v38 = vld [vmem:[#allocation10 + $0xa8] sm:$0xf0] }
 0x2e4   : > { %3218 = vmatmul.bf16.gmra.mxu0 %v12112_v7  ;;  %v2726_v34 = vmax.f32 %v2682_v17, 0.0  ;;  %3316 = vmatmul.bf16.gmra.mxu2 %v12248_v36  ;;  %v2587_v54 = vadd.f32 %v2586_v21, %v2538_v23  ;;  %v9978_v23 = vld [vmem:[#allocation10 + $0x44] sm:$0xf] }
 0x2e5   : > { %v8586_v48 = vor.u32 %v9978_v23, %v8583_v16 }
 0x2e6   : > { %v12305_v35 = vpack.c.bf16 %v2726_v34, %v2722_v22 }
 0x2e7   : > { %v2635_v56 = vpop.f32.mrf.mxu2  ;;  %3404 = vmatpush.bf16.msrb.mxu0 %v8586_v48 }
 0x2e8   : > { %v2684_v61 = vpop.f32.mrf.mxu3  ;;  %3360 = vmatmul.bf16.vlgmr.msra.gmra.mxu3 %v12305_v35  ;;  %v2588_v39 = vpop.f32.mrf.mxu1  ;;  %v2636_v8 = vadd.f32 %v2635_v56, %v2587_v54  ;;  %v8775_v56 = vld [vmem:[#allocation10 + $0x1c8] sm:$0xf0]  ;;  %v9994_v54 = vld [vmem:[#allocation10 + $0xc4] sm:$0xf] }
 0x2e9   : > { %v2539_v3 = vpop.f32.mrf.mxu0 }
 0x2ea   : > { %v2540_v26 = vadd.f32 %v2539_v3, %v12292_v24  ;;  %v2685_v11 = vadd.f32 %v2684_v61, %v2636_v8  ;;  %v8778_v3 = vor.u32 %v10026_v63, %v8775_v56 }
 0x2eb   : > { %3405 = vmatpush.bf16.msrb.mxu0 %v8578_v52 }
 0x2ec   : > { %v2589_v45 = vadd.f32 %v2588_v39, %v2540_v26  ;;  %v2730_v13 = vmax.f32 %v2685_v11, 0.0  ;;  %v8647_v39 = vld [vmem:[#allocation10 + $0xc8] sm:$0xf0]  ;;  %3551 = vmatpush.bf16.msrb.mxu3 %v8778_v3 }
 0x2ed   : > { %v8650_v8 = vor.u32 %v9994_v54, %v8647_v39  ;;  %v13544_v3 = vld [vmem:[#allocation45_spill] sm:$0xff] }
 0x2ef   : > { %v2637_v47 = vpop.f32.mrf.mxu2  ;;  %3453 = vmatpush.bf16.msrb.mxu1 %v8650_v8 }
 0x2f0   : > { %v2638_v60 = vadd.f32 %v2637_v47, %v2589_v45  ;;  %v2686_v50 = vpop.f32.mrf.mxu3  ;;  %v2591_v55 = vpop.f32.mrf.mxu1  ;;  %v10008_v47 = vld [vmem:[#allocation10 + $0x134] sm:$0xf] }
 0x2f1   : > { %v2542_v41 = vpop.f32.mrf.mxu0  ;;  %v8706_v11 = vor.u32 %v10008_v47, %v8703_v12 }
 0x2f2   : > { %v2687_v42 = vadd.f32 %v2686_v50, %v2638_v60  ;;  %v2543_v14 = vadd.f32 %v2542_v41, %v12292_v24 }
 0x2f3   : > { %3272 = vmatmul.bf16.gmra.mxu1 %v12187_v29  ;;  %3503 = vmatpush.bf16.msrb.mxu2 %v8706_v11  ;;  %v9974_v11 = vld [vmem:[#allocation10 + $0x24] sm:$0xf] }
 0x2f4   : > { %3223 = vmatmul.bf16.gmra.mxu0 %v12120_v18  ;;  %v2734_v51 = vmax.f32 %v2687_v42, 0.0  ;;  %3321 = vmatmul.bf16.gmra.mxu2 %v12256_v5  ;;  %v2592_v59 = vadd.f32 %v2591_v55, %v2543_v14 }
 0x2f6   : > { %v12313_v37 = vpack.c.bf16 %v2734_v51, %v2730_v13 }
 0x2f7   : > { %v2640_v20 = vpop.f32.mrf.mxu2 }
 0x2f8   : > { %v2689_v2 = vpop.f32.mrf.mxu3  ;;  %3365 = vmatmul.bf16.gmra.mxu3 %v12313_v37  ;;  %v2593_v17 = vpop.f32.mrf.mxu1  ;;  %v2641_v34 = vadd.f32 %v2640_v20, %v2592_v59  ;;  %v10024_v20 = vld [vmem:[#allocation10 + $0x1b4] sm:$0xf]  ;;  %v8767_v59 = vld [vmem:[#allocation10 + $0x1b8] sm:$0xf0] }
 0x2f9   : > { %v2544_v21 = vpop.f32.mrf.mxu0 }
 0x2fa   : > { %v2545_v22 = vadd.f32 %v2544_v21, %v12292_v24  ;;  %v2690_v49 = vadd.f32 %v2689_v2, %v2641_v34  ;;  %v9992_v2 = vld [vmem:[#allocation10 + $0xb4] sm:$0xf] }
 0x2fc   : > { %v2594_v61 = vadd.f32 %v2593_v17, %v2545_v22  ;;  %v2738_v45 = vmax.f32 %v2690_v49, 0.0  ;;  %v8770_v17 = vor.u32 %v10024_v20, %v8767_v59  ;;  %v8639_v22 = vld [vmem:[#allocation10 + $0xb8] sm:$0xf0]  ;;  %v10006_v49 = vld [vmem:[#allocation10 + $0x124] sm:$0xf] }
 0x2fd   : > { %v8642_v23 = vor.u32 %v9992_v2, %v8639_v22 }
 0x2fe   : > { %3552 = vmatpush.bf16.msrb.mxu3 %v8770_v17 }
 0x2ff   : > { %v2642_v26 = vpop.f32.mrf.mxu2  ;;  %3454 = vmatpush.bf16.msrb.mxu1 %v8642_v23 }
 0x300   : > { %v2643_v44 = vadd.f32 %v2642_v26, %v2594_v61  ;;  %v2691_v27 = vpop.f32.mrf.mxu3  ;;  %v2596_v9 = vpop.f32.mrf.mxu1 }
 0x301   : > { %v2547_v33 = vpop.f32.mrf.mxu0 }
 0x302   : > { %v2692_v40 = vadd.f32 %v2691_v27, %v2643_v44  ;;  %v2548_v10 = vadd.f32 %v2547_v33, %v12292_v24  ;;  %v8695_v44 = vld [vmem:[#allocation10 + $0x128] sm:$0xf0] }
 0x303   : > { %3277 = vmatmul.bf16.gmra.mxu1 %v12195_v58  ;;  %v8698_v27 = vor.u32 %v10006_v49, %v8695_v44 }
 0x304   : > { %3228 = vmatmul.bf16.gmra.mxu0 %v12128_v30  ;;  %v2742_v46 = vmax.f32 %v2692_v40, 0.0  ;;  %3326 = vmatmul.bf16.gmra.mxu2 %v12264_v25  ;;  %v2597_v41 = vadd.f32 %v2596_v9, %v2548_v10 }
 0x305   : > { %3504 = vmatpush.bf16.msrb.mxu2 %v8698_v27 }
 0x306   : > { %v12321_v60 = vpack.c.bf16 %v2742_v46, %v2738_v45 }
 0x307   : > { %v2645_v50 = vpop.f32.mrf.mxu2 }
 0x308   : > { %v2694_v55 = vpop.f32.mrf.mxu3  ;;  %3370 = vmatmul.bf16.gmra.mxu3 %v12321_v60  ;;  %v2598_v13 = vpop.f32.mrf.mxu1  ;;  %v2646_v14 = vadd.f32 %v2645_v50, %v2597_v41  ;;  %v8567_v50 = vld [vmem:[#allocation10 + $0x28] sm:$0xf0] }
 0x309   : > { %v2549_v42 = vpop.f32.mrf.mxu0  ;;  %v8570_v41 = vor.u32 %v9974_v11, %v8567_v50  ;;  %v8623_v50 = vld [vmem:[#allocation10 + $0x98] sm:$0xf0] }
 0x30a   : > { %v2550_v51 = vadd.f32 %v2549_v42, %v12292_v24  ;;  %v2695_v16 = vadd.f32 %v2694_v55, %v2646_v14  ;;  %v10022_v55 = vld [vmem:[#allocation10 + $0x1a4] sm:$0xf]  ;;  %v8759_v42 = vld [vmem:[#allocation10 + $0x1a8] sm:$0xf0] }
 0x30b   : > { %v8762_v14 = vor.u32 %v10022_v55, %v8759_v42  ;;  %3406 = vmatpush.bf16.msrb.mxu0 %v8570_v41 }
 0x30c   : > { %v2599_v21 = vadd.f32 %v2598_v13, %v2550_v51  ;;  %v2746_v39 = vmax.f32 %v2695_v16, 0.0  ;;  %v9990_v13 = vld [vmem:[#allocation10 + $0xa4] sm:$0xf] }
 0x30d   : > { %v8634_v52 = vor.u32 %v9990_v13, %v8631_v38  ;;  %3553 = vmatpush.bf16.msrb.mxu3 %v8762_v14  ;;  %v9970_v13 = vld [vmem:[#allocation10 + $0x4] sm:$0xf] }
 0x30e   : > { %v9986_v14 = vld [vmem:[#allocation10 + $0x84] sm:$0xf] }
 0x30f   : > { %v2647_v34 = vpop.f32.mrf.mxu2  ;;  %3455 = vmatpush.bf16.msrb.mxu1 %v8634_v52 }
 0x310   : > { %v2648_v48 = vadd.f32 %v2647_v34, %v2599_v21  ;;  %v2696_v63 = vpop.f32.mrf.mxu3  ;;  %v2601_v54 = vpop.f32.mrf.mxu1  ;;  %v13545_v34 = vld [vmem:[#allocation46_spill] sm:$0xff] }
 0x311   : > { %v2552_v56 = vpop.f32.mrf.mxu0 }
 0x312   : > { %v2697_v61 = vadd.f32 %v2696_v63, %v2648_v48  ;;  %v2553_v8 = vadd.f32 %v2552_v56, %v12292_v24  ;;  %v10004_v63 = vld [vmem:[#allocation10 + $0x114] sm:$0xf]  ;;  %v8687_v56 = vld [vmem:[#allocation10 + $0x118] sm:$0xf0] }
 0x313   : > { %3282 = vmatmul.bf16.gmra.mxu1 %v12203_v28 }
 0x314   : > { %3233 = vmatmul.bf16.gmra.mxu0 %v13544_v3  ;;  %v2750_v26 = vmax.f32 %v2697_v61, 0.0  ;;  %3331 = vmatmul.bf16.gmra.mxu2 %v12272_v57  ;;  %v2602_v40 = vadd.f32 %v2601_v54, %v2553_v8  ;;  %v8690_v54 = vor.u32 %v10004_v63, %v8687_v56  ;;  %v13546_v63 = vld [vmem:[#allocation47_spill] sm:$0xff] }
 0x316   : > { %v12329_v33 = vpack.c.bf16 %v2750_v26, %v2746_v39  ;;  %3505 = vmatpush.bf16.msrb.mxu2 %v8690_v54 }
 0x317   : > { %v2650_v9 = vpop.f32.mrf.mxu2 }
 0x318   : > { %v2699_v45 = vpop.f32.mrf.mxu3  ;;  %3375 = vmatmul.bf16.gmra.mxu3 %v12329_v33  ;;  %v2603_v10 = vpop.f32.mrf.mxu1  ;;  %v2651_v12 = vadd.f32 %v2650_v9, %v2602_v40  ;;  %v9972_v9 = vld [vmem:[#allocation10 + $0x14] sm:$0xf]  ;;  %v8559_v40 = vld [vmem:[#allocation10 + $0x18] sm:$0xf0] }
 0x319   : > { %v2554_v46 = vpop.f32.mrf.mxu0 }
 0x31a   : > { %v2555_v47 = vadd.f32 %v2554_v46, %v12292_v24  ;;  %v2700_v20 = vadd.f32 %v2699_v45, %v2651_v12  ;;  %v9988_v45 = vld [vmem:[#allocation10 + $0x94] sm:$0xf]  ;;  %v8751_v12 = vld [vmem:[#allocation10 + $0x198] sm:$0xf0] }
 0x31b   : > { %v8626_v55 = vor.u32 %v9988_v45, %v8623_v50 }
 0x31c   : > { %v2604_v51 = vadd.f32 %v2603_v10, %v2555_v47  ;;  %v2754_v23 = vmax.f32 %v2700_v20, 0.0  ;;  %v8562_v10 = vor.u32 %v9972_v9, %v8559_v40  ;;  %v10020_v47 = vld [vmem:[#allocation10 + $0x194] sm:$0xf]  ;;  %v10018_v9 = vld [vmem:[#allocation10 + $0x184] sm:$0xf] }
 0x31d   : > { %v8754_v11 = vor.u32 %v10020_v47, %v8751_v12  ;;  %3456 = vmatpush.bf16.msrb.mxu1 %v8626_v55  ;;  %v8743_v40 = vld [vmem:[#allocation10 + $0x188] sm:$0xf0] }
 0x31e   : > { %3407 = vmatpush.bf16.msrb.mxu0 %v8562_v10 }
 0x31f   : > { %v2652_v15 = vpop.f32.mrf.mxu2  ;;  %3554 = vmatpush.bf16.msrb.mxu3 %v8754_v11 }
 0x320   : > { %v2653_v59 = vadd.f32 %v2652_v15, %v2604_v51  ;;  %v2701_v2 = vpop.f32.mrf.mxu3  ;;  %v2606_v17 = vpop.f32.mrf.mxu1  ;;  %v8551_v51 = vld [vmem:[#allocation10 + $0x8] sm:$0xf0] }
 0x321   : > { %v2557_v21 = vpop.f32.mrf.mxu0 }
 0x322   : > { %v2702_v22 = vadd.f32 %v2701_v2, %v2653_v59  ;;  %v2558_v48 = vadd.f32 %v2557_v21, %v12292_v24  ;;  %v8554_v59 = vor.u32 %v9970_v13, %v8551_v51  ;;  %v8615_v2 = vld [vmem:[#allocation10 + $0x88] sm:$0xf0]  ;;  %v10002_v21 = vld [vmem:[#allocation10 + $0x104] sm:$0xf] }
 0x323   : > { %3287 = vmatmul.bf16.gmra.mxu1 %v12211_v31 }
 0x324   : > { %3238 = vmatmul.bf16.gmra.mxu0 %v13545_v34  ;;  %v2758_v16 = vmax.f32 %v2702_v22, 0.0  ;;  %3336 = vmatmul.bf16.gmra.mxu2 %v12280_v62  ;;  %v2607_v26 = vadd.f32 %v2606_v17, %v2558_v48  ;;  %v8618_v22 = vor.u32 %v9986_v14, %v8615_v2  ;;  %v13547_v14 = vld [vmem:[#allocation48_spill] sm:$0xff] }
 0x325   : > { %3408 = vmatpush.bf16.msrb.mxu0 %v8554_v59 }
 0x326   : > { %v12337_v61 = vpack.c.bf16 %v2758_v16, %v2754_v23  ;;  %v8679_v23 = vld [vmem:[#allocation10 + $0x108] sm:$0xf0]  ;;  %3457 = vmatpush.bf16.msrb.mxu1 %v8618_v22 }
 0x327   : > { %v2655_v39 = vpop.f32.mrf.mxu2  ;;  %v8682_v48 = vor.u32 %v10002_v21, %v8679_v23 }
 0x328   : > { %v2704_v8 = vpop.f32.mrf.mxu3  ;;  %3380 = vmatmul.bf16.gmra.mxu3 %v12337_v61  ;;  %v2608_v44 = vpop.f32.mrf.mxu1  ;;  %v2656_v46 = vadd.f32 %v2655_v39, %v2607_v26 }
 0x329   : > { %v2559_v49 = vpop.f32.mrf.mxu0  ;;  %3506 = vmatpush.bf16.msrb.mxu2 %v8682_v48 }
 0x32a   : > { %v2560_v27 = vadd.f32 %v2559_v49, %v12292_v24  ;;  %v2705_v38 = vadd.f32 %v2704_v8, %v2656_v46  ;;  %v8746_v46 = vor.u32 %v10018_v9, %v8743_v40 }
 0x32c   : > { %v2609_v41 = vadd.f32 %v2608_v44, %v2560_v27  ;;  %v2762_v56 = vmax.f32 %v2705_v38, 0.0  ;;  %3555 = vmatpush.bf16.msrb.mxu3 %v8746_v46 }
 0x32f   : > { %v2657_v42 = vpop.f32.mrf.mxu2 }
 0x330   : > { %v2658_v15 = vadd.f32 %v2657_v42, %v2609_v41  ;;  %v2706_v52 = vpop.f32.mrf.mxu3  ;;  %v2611_v17 = vpop.f32.mrf.mxu1 }
 0x331   : > { %v2562_v20 = vpop.f32.mrf.mxu0 }
 0x332   : > { %v2707_v16 = vadd.f32 %v2706_v52, %v2658_v15  ;;  %v2563_v39 = vadd.f32 %v2562_v20, %v12292_v24 }
 0x333   : > { %3292 = vmatmul.bf16.gmra.mxu1 %v12219_v19 }
 0x334   : > { %3243 = vmatmul.bf16.gmra.mxu0 %v13546_v63  ;;  %v2766_v54 = vmax.f32 %v2707_v16, 0.0  ;;  %3341 = vmatmul.bf16.gmra.mxu2 %v12288_v43  ;;  %v2612_v49 = vadd.f32 %v2611_v17, %v2563_v39  ;;  %v12357_v16 = vld [vmem:[#allocation11] sm:$0x3] }
 0x336   : > { %v12345_v26 = vpack.c.bf16 %v2766_v54, %v2762_v56  ;;  %v12360_v56 = vperm.slane %v12357_v16, 0 }
 0x337   : > { %v2660_v8 = vpop.f32.mrf.mxu2 }
 0x338   : > { %v2709_v44 = vpop.f32.mrf.mxu3  ;;  %3385 = vmatmul.bf16.gmra.mxu3 %v12345_v26  ;;  %v2613_v45 = vpop.f32.mrf.mxu1  ;;  %v2661_v47 = vadd.f32 %v2660_v8, %v2612_v49 }
 0x339   : > { %v2564_v27 = vpop.f32.mrf.mxu0 }
 0x33a   : > { %v2565_v10 = vadd.f32 %v2564_v27, %v12292_v24  ;;  %v2710_v50 = vadd.f32 %v2709_v44, %v2661_v47 }
 0x33c   : > { %v2614_v12 = vadd.f32 %v2613_v45, %v2565_v10  ;;  %v2770_v38 = vmax.f32 %v2710_v50, 0.0 }
 0x33f   : > { %v2662_v11 = vpop.f32.mrf.mxu2 }
 0x340   : > { %v2663_v41 = vadd.f32 %v2662_v11, %v2614_v12  ;;  %v2711_v55 = vpop.f32.mrf.mxu3  ;;  %v2616_v13 = vpop.f32.mrf.mxu1 }
 0x341   : > { %v2567_v42 = vpop.f32.mrf.mxu0 }
 0x342   : > { %v2712_v51 = vadd.f32 %v2711_v55, %v2663_v41  ;;  %v2568_v52 = vadd.f32 %v2567_v42, %v12292_v24  ;;  %v10041_v41 = vld [vmem:[#allocation13 + $0x38] sm:$0xff] }
 0x343   : > { %3297 = vmatmul.bf16.gmra.mxu1 %v12232_v6  ;;  %3777 = vmatpush.bf16.msra.mxu0 %v10041_v41 }
 0x344   : > { %3248 = vmatmul.bf16.gmra.mxu0 %v13547_v14  ;;  %v2774_v15 = vmax.f32 %v2712_v51, 0.0  ;;  %3346 = vmatmul.bf16.gmra.mxu2 %v12298_v4  ;;  %v2617_v2 = vadd.f32 %v2616_v13, %v2568_v52 }
 0x346   : > { %v12353_v20 = vpack.c.bf16 %v2774_v15, %v2770_v38 }
 0x347   : > { %v2665_v59 = vpop.f32.mrf.mxu2 }
 0x348   : > { %v2714_v21 = vpop.f32.mrf.mxu3  ;;  %3390 = vmatmul.bf16.gmra.mxu3 %v12353_v20  ;;  %v2618_v22 = vpop.f32.mrf.mxu1  ;;  %v2666_v48 = vadd.f32 %v2665_v59, %v2617_v2 }
 0x349   : > { %v2569_v17 = vpop.f32.mrf.mxu0 }
 0x34a   : > { %v2570_v23 = vadd.f32 %v2569_v17, %v12292_v24  ;;  %v2715_v8 = vadd.f32 %v2714_v21, %v2666_v48  ;;  %v10040_v17 = vld [vmem:[#allocation13 + $0x30] sm:$0xff] }
 0x34b   : > { %3778 = vmatpush.bf16.msra.mxu0 %v10040_v17  ;;  %v10038_v17 = vld [vmem:[#allocation13 + $0x20] sm:$0xff] }
 0x34c   : > { %v2619_v54 = vadd.f32 %v2618_v22, %v2570_v23  ;;  %v2778_v24 = vmax.f32 %v2715_v8, 0.0 }
 0x34f   : > { %v2667_v39 = vpop.f32.mrf.mxu2 }
 0x350   : > { %v2668_v49 = vadd.f32 %v2667_v39, %v2619_v54  ;;  %v2716_v27 = vpop.f32.mrf.mxu3  ;;  %v3263_v40 = vpop.f32.mrf.mxu1  ;;  %v10048_v39 = vld [vmem:[#allocation13 + $0x70] sm:$0xff] }
 0x351   : > { %v3214_v44 = vpop.f32.mrf.mxu0 }
 0x352   : > { %v3215_v9 = vadd.f32 %v3214_v44, %v12360_v56  ;;  %v2717_v45 = vadd.f32 %v2716_v27, %v2668_v49 }
 0x353   : > { %3458 = vmatmul.bf16.vlgmr.msrb.gmra.mxu1 %v12171_v32 }
 0x354   : > { %v3264_v46 = vadd.f32 %v3263_v40, %v3215_v9  ;;  %3409 = vmatmul.bf16.vlgmr.msrb.gmra.mxu0 %v12104_v1  ;;  %v2782_v10 = vmax.f32 %v2717_v45, 0.0  ;;  %3507 = vmatmul.bf16.vlgmr.msrb.gmra.mxu2 %v12240_v53  ;;  %v10049_v1 = vld [vmem:[#allocation13 + $0x78] sm:$0xff] }
 0x355   : > { %3826 = vmatpush.bf16.msra.mxu1 %v10049_v1 }
 0x356   : > { %v12366_v47 = vpack.c.bf16 %v2782_v10, %v2778_v24 }
 0x357   : > { %v3312_v12 = vpop.f32.mrf.mxu2 }
 0x358   : > { %v3313_v11 = vadd.f32 %v3312_v12, %v3264_v46  ;;  %3395 = vmatmul.bf16.gmra.mxu3 %v12366_v47  ;;  %v3265_v42 = vpop.f32.mrf.mxu1 }
 0x359   : > { %v3216_v50 = vpop.f32.mrf.mxu0  ;;  %3827 = vmatpush.bf16.msra.mxu1 %v10048_v39  ;;  %v10046_v39 = vld [vmem:[#allocation13 + $0x60] sm:$0xff] }
 0x35a   : > { %v3217_v55 = vadd.f32 %v3216_v50, %v12360_v56 }
 0x35c   : > { %v3266_v13 = vadd.f32 %v3265_v42, %v3217_v55  ;;  %v10047_v42 = vld [vmem:[#allocation13 + $0x68] sm:$0xff] }
 0x35d   : > { %3828 = vmatpush.bf16.msra.mxu1 %v10047_v42 }
 0x35f   : > { %v3314_v51 = vpop.f32.mrf.mxu2 }
 0x360   : > { %v3315_v38 = vadd.f32 %v3314_v51, %v3266_v13  ;;  %v3268_v15 = vpop.f32.mrf.mxu1 }
 0x361   : > { %v3219_v32 = vpop.f32.mrf.mxu0  ;;  %3829 = vmatpush.bf16.msra.mxu1 %v10046_v39 }
 0x362   : > { %v3220_v53 = vadd.f32 %v3219_v32, %v12360_v56 }
 0x363   : > { %3463 = vmatmul.bf16.gmra.mxu1 %v12179_v0 }
 0x364   : > { %v3269_v52 = vadd.f32 %v3268_v15, %v3220_v53  ;;  %3414 = vmatmul.bf16.gmra.mxu0 %v12112_v7  ;;  %3512 = vmatmul.bf16.gmra.mxu2 %v12248_v36 }
 0x367   : > { %v3317_v59 = vpop.f32.mrf.mxu2 }
 0x368   : > { %v3318_v2 = vadd.f32 %v3317_v59, %v3269_v52  ;;  %3556 = vmatmul.bf16.vlgmr.msrb.gmra.mxu3 %v12305_v35  ;;  %v3270_v23 = vpop.f32.mrf.mxu1 }
 0x369   : > { %v3221_v21 = vpop.f32.mrf.mxu0 }
 0x36a   : > { %v3222_v22 = vadd.f32 %v3221_v21, %v12360_v56 }
 0x36b   : > { %v3361_v54 = vpop.f32.mrf.mxu3 }
 0x36c   : > { %v3271_v48 = vadd.f32 %v3270_v23, %v3222_v22  ;;  %v3362_v8 = vadd.f32 %v3361_v54, %v3313_v11  ;;  %v10039_v11 = vld [vmem:[#allocation13 + $0x28] sm:$0xff] }
 0x36d   : > { %3779 = vmatpush.bf16.msra.mxu0 %v10039_v11 }
 0x36e   : > { %v3597_v40 = vmax.f32 %v3362_v8, 0.0 }
 0x36f   : > { %v3319_v7 = vpop.f32.mrf.mxu2 }
 0x370   : > { %v3320_v49 = vadd.f32 %v3319_v7, %v3271_v48  ;;  %v3273_v44 = vpop.f32.mrf.mxu1 }
 0x371   : > { %v3224_v0 = vpop.f32.mrf.mxu0  ;;  %3780 = vmatpush.bf16.msra.mxu0 %v10038_v17 }
 0x372   : > { %v3225_v36 = vadd.f32 %v3224_v0, %v12360_v56 }
 0x373   : > { %v3363_v9 = vpop.f32.mrf.mxu3  ;;  %3468 = vmatmul.bf16.gmra.mxu1 %v12187_v29 }
 0x374   : > { %v3274_v27 = vadd.f32 %v3273_v44, %v3225_v36  ;;  %3419 = vmatmul.bf16.gmra.mxu0 %v12120_v18  ;;  %v3364_v35 = vadd.f32 %v3363_v9, %v3315_v38  ;;  %3517 = vmatmul.bf16.gmra.mxu2 %v12256_v5 }
 0x376   : > { %v3599_v45 = vmax.f32 %v3364_v35, 0.0 }
 0x377   : > { %v3322_v46 = vpop.f32.mrf.mxu2 }
 0x378   : > { %v12380_v24 = vpack.c.bf16 %v3599_v45, %v3597_v40  ;;  %v3323_v10 = vadd.f32 %v3322_v46, %v3274_v27  ;;  %3561 = vmatmul.bf16.gmra.mxu3 %v12313_v37  ;;  %v3275_v41 = vpop.f32.mrf.mxu1  ;;  %v10037_v46 = vld [vmem:[#allocation13 + $0x18] sm:$0xff] }
 0x379   : > { %v3226_v12 = vpop.f32.mrf.mxu0  ;;  %3781 = vmatpush.bf16.msra.mxu0 %v10037_v46 }
 0x37a   : > { %v3227_v50 = vadd.f32 %v3226_v12, %v12360_v56 }
 0x37b   : > { %v3366_v55 = vpop.f32.mrf.mxu3 }
 0x37c   : > { %v3276_v18 = vadd.f32 %v3275_v41, %v3227_v50  ;;  %v3367_v29 = vadd.f32 %v3366_v55, %v3318_v2  ;;  %v10045_v50 = vld [vmem:[#allocation13 + $0x58] sm:$0xff] }
 0x37d   : > { %3830 = vmatpush.bf16.msra.mxu1 %v10045_v50 }
 0x37e   : > { %v3601_v15 = vmax.f32 %v3367_v29, 0.0 }
 0x37f   : > { %v3324_v5 = vpop.f32.mrf.mxu2 }
 0x380   : > { %v3325_v13 = vadd.f32 %v3324_v5, %v3276_v18  ;;  %v3278_v38 = vpop.f32.mrf.mxu1 }
 0x381   : > { %v3229_v1 = vpop.f32.mrf.mxu0 }
 0x382   : > { %v3230_v51 = vadd.f32 %v3229_v1, %v12360_v56 }
 0x383   : > { %v3368_v53 = vpop.f32.mrf.mxu3  ;;  %3473 = vmatmul.bf16.gmra.mxu1 %v12195_v58 }
 0x384   : > { %v3279_v32 = vadd.f32 %v3278_v38, %v3230_v51  ;;  %3424 = vmatmul.bf16.gmra.mxu0 %v12128_v30  ;;  %v3369_v37 = vadd.f32 %v3368_v53, %v3320_v49  ;;  %3522 = vmatmul.bf16.gmra.mxu2 %v12264_v25  ;;  %v10036_v38 = vld [vmem:[#allocation13 + $0x10] sm:$0xff] }
 0x385   : > { %3782 = vmatpush.bf16.msra.mxu0 %v10036_v38 }
 0x386   : > { %v3603_v52 = vmax.f32 %v3369_v37, 0.0 }
 0x387   : > { %v3327_v59 = vpop.f32.mrf.mxu2 }
 0x388   : > { %v3328_v2 = vadd.f32 %v3327_v59, %v3279_v32  ;;  %3566 = vmatmul.bf16.gmra.mxu3 %v12321_v60  ;;  %v12389_v22 = vpack.c.bf16 %v3603_v52, %v3601_v15  ;;  %v3280_v48 = vpop.f32.mrf.mxu1  ;;  %v10044_v15 = vld [vmem:[#allocation13 + $0x50] sm:$0xff] }
 0x389   : > { %v3231_v21 = vpop.f32.mrf.mxu0  ;;  %3831 = vmatpush.bf16.msra.mxu1 %v10044_v15 }
 0x38a   : > { %v3232_v23 = vadd.f32 %v3231_v21, %v12360_v56  ;;  %v10034_v21 = vld [vmem:[#allocation13] sm:$0xff] }
 0x38b   : > { %v3371_v54 = vpop.f32.mrf.mxu3 }
 0x38c   : > { %v3281_v30 = vadd.f32 %v3280_v48, %v3232_v23  ;;  %v3372_v58 = vadd.f32 %v3371_v54, %v3323_v10 }
 0x38e   : > { %v3605_v27 = vmax.f32 %v3372_v58, 0.0 }
 0x38f   : > { %v3329_v25 = vpop.f32.mrf.mxu2 }
 0x390   : > { %v3330_v8 = vadd.f32 %v3329_v25, %v3281_v30  ;;  %v3283_v0 = vpop.f32.mrf.mxu1 }
 0x391   : > { %v3234_v7 = vpop.f32.mrf.mxu0 }
 0x392   : > { %v3235_v49 = vadd.f32 %v3234_v7, %v12360_v56 }
 0x393   : > { %v3373_v36 = vpop.f32.mrf.mxu3  ;;  %3478 = vmatmul.bf16.gmra.mxu1 %v12203_v28 }
 0x394   : > { %v3284_v60 = vadd.f32 %v3283_v0, %v3235_v49  ;;  %3429 = vmatmul.bf16.gmra.mxu0 %v13544_v3  ;;  %v3374_v44 = vadd.f32 %v3373_v36, %v3325_v13  ;;  %3527 = vmatmul.bf16.gmra.mxu2 %v12272_v57  ;;  %v10043_v36 = vld [vmem:[#allocation13 + $0x48] sm:$0xff] }
 0x395   : > { %3832 = vmatpush.bf16.msra.mxu1 %v10043_v36 }
 0x396   : > { %v3607_v9 = vmax.f32 %v3374_v44, 0.0 }
 0x397   : > { %v3332_v35 = vpop.f32.mrf.mxu2 }
 0x398   : > { %v3333_v40 = vadd.f32 %v3332_v35, %v3284_v60  ;;  %3571 = vmatmul.bf16.gmra.mxu3 %v12329_v33  ;;  %v12397_v10 = vpack.c.bf16 %v3607_v9, %v3605_v27  ;;  %v3285_v12 = vpop.f32.mrf.mxu1 }
 0x399   : > { %v3236_v45 = vpop.f32.mrf.mxu0 }
 0x39b   : > { %v3376_v11 = vpop.f32.mrf.mxu3 }
 0x39c   : > { %v3377_v3 = vadd.f32 %v3376_v11, %v3328_v2 }
 0x39e   : > { %v3609_v29 = vmax.f32 %v3377_v3, 0.0 }
 0x39f   : > { %v3334_v41 = vpop.f32.mrf.mxu2 }
 0x3a0   : > { %v3288_v18 = vpop.f32.mrf.mxu1 }
 0x3a1   : > { %v3239_v28 = vpop.f32.mrf.mxu0 }
 0x3a2   : > { %v3240_v57 = vadd.f32 %v3239_v28, %v12360_v56 }
 0x3a3   : > { %v3378_v42 = vpop.f32.mrf.mxu3  ;;  %3483 = vmatmul.bf16.gmra.mxu1 %v12211_v31  ;;  %v10035_v31 = vld [vmem:[#allocation13 + $0x8] sm:$0xff] }
 0x3a4   : > { %v3289_v55 = vadd.f32 %v3288_v18, %v3240_v57  ;;  %3434 = vmatmul.bf16.gmra.mxu0 %v13545_v34  ;;  %v3379_v33 = vadd.f32 %v3378_v42, %v3330_v8  ;;  %3532 = vmatmul.bf16.gmra.mxu2 %v12280_v62  ;;  %v3237_v34 = vadd.f32 %v3236_v45, %v12360_v56 }
 0x3a5   : > { %3783 = vmatpush.bf16.msra.mxu0 %v10035_v31 }
 0x3a6   : > { %v3611_v5 = vmax.f32 %v3379_v33, 0.0  ;;  %v3286_v59 = vadd.f32 %v3285_v12, %v3237_v34 }
 0x3a7   : > { %v3337_v13 = vpop.f32.mrf.mxu2 }
 0x3a8   : > { %v3338_v1 = vadd.f32 %v3337_v13, %v3289_v55  ;;  %3576 = vmatmul.bf16.gmra.mxu3 %v12337_v61  ;;  %v12404_v32 = vpack.c.bf16 %v3611_v5, %v3609_v29  ;;  %v3290_v53 = vpop.f32.mrf.mxu1  ;;  %v3335_v23 = vadd.f32 %v3334_v41, %v3286_v59  ;;  %v10042_v55 = vld [vmem:[#allocation13 + $0x40] sm:$0xff] }
 0x3a9   : > { %v3241_v51 = vpop.f32.mrf.mxu0  ;;  %3784 = vmatpush.bf16.msra.mxu0 %v10034_v21  ;;  %3833 = vmatpush.bf16.msra.mxu1 %v10042_v55 }
 0x3aa   : > { %v3242_v44 = vadd.f32 %v3241_v51, %v12360_v56 }
 0x3ab   : > { %v3381_v37 = vpop.f32.mrf.mxu3 }
 0x3ac   : > { %v3382_v52 = vadd.f32 %v3381_v37, %v3333_v40 }
 0x3ae   : > { %v3613_v39 = vmax.f32 %v3382_v52, 0.0 }
 0x3af   : > { %v3339_v62 = vpop.f32.mrf.mxu2 }
 0x3b0   : > { %v3293_v17 = vpop.f32.mrf.mxu1 }
 0x3b1   : > { %v3244_v2 = vpop.f32.mrf.mxu0 }
 0x3b2   : > { %v3245_v61 = vadd.f32 %v3244_v2, %v12360_v56 }
 0x3b3   : > { %v3383_v30 = vpop.f32.mrf.mxu3  ;;  %3488 = vmatmul.bf16.gmra.mxu1 %v12219_v19  ;;  %v3291_v19 = vadd.f32 %v3290_v53, %v3242_v44 }
 0x3b4   : > { %v3294_v48 = vadd.f32 %v3293_v17, %v3245_v61  ;;  %3439 = vmatmul.bf16.gmra.mxu0 %v13546_v63  ;;  %v3384_v54 = vadd.f32 %v3383_v30, %v3335_v23  ;;  %3537 = vmatmul.bf16.gmra.mxu2 %v12288_v43  ;;  %v12430_v23 = vperm.slane %v12357_v16, 1  ;;  %v10057_v30 = vld [vmem:[#allocation16 + $0x38] sm:$0xff] }
 0x3b5   : > { %v3340_v40 = vadd.f32 %v3339_v62, %v3291_v19  ;;  %3967 = vmatpush.bf16.msra.mxu2 %v10057_v30 }
 0x3b6   : > { %v3615_v58 = vmax.f32 %v3384_v54, 0.0 }
 0x3b7   : > { %v3342_v25 = vpop.f32.mrf.mxu2 }
 0x3b8   : > { %v3343_v8 = vadd.f32 %v3342_v25, %v3294_v48  ;;  %3581 = vmatmul.bf16.gmra.mxu3 %v12345_v26  ;;  %v12412_v49 = vpack.c.bf16 %v3615_v58, %v3613_v39  ;;  %v3295_v0 = vpop.f32.mrf.mxu1 }
 0x3b9   : > { %v3246_v7 = vpop.f32.mrf.mxu0 }
 0x3ba   : > { %v3247_v42 = vadd.f32 %v3246_v7, %v12360_v56 }
 0x3bb   : > { %v3386_v60 = vpop.f32.mrf.mxu3 }
 0x3bc   : > { %v3387_v63 = vadd.f32 %v3386_v60, %v3338_v1 }
 0x3be   : > { %v3617_v12 = vmax.f32 %v3387_v63, 0.0 }
 0x3bf   : > { %v3344_v27 = vpop.f32.mrf.mxu2 }
 0x3c0   : > { %v3298_v35 = vpop.f32.mrf.mxu1 }
 0x3c1   : > { %v3249_v9 = vpop.f32.mrf.mxu0 }
 0x3c2   : > { %v3250_v43 = vadd.f32 %v3249_v9, %v12360_v56 }
 0x3c3   : > { %v3388_v46 = vpop.f32.mrf.mxu3  ;;  %3493 = vmatmul.bf16.gmra.mxu1 %v12232_v6  ;;  %v3296_v6 = vadd.f32 %v3295_v0, %v3247_v42 }
 0x3c4   : > { %v3299_v45 = vadd.f32 %v3298_v35, %v3250_v43  ;;  %3444 = vmatmul.bf16.gmra.mxu0 %v13547_v14  ;;  %v3389_v26 = vadd.f32 %v3388_v46, %v3340_v40  ;;  %3542 = vmatmul.bf16.gmra.mxu2 %v12298_v4  ;;  %v10056_v40 = vld [vmem:[#allocation16 + $0x30] sm:$0xff] }
 0x3c5   : > { %v3345_v5 = vadd.f32 %v3344_v27, %v3296_v6  ;;  %3968 = vmatpush.bf16.msra.mxu2 %v10056_v40 }
 0x3c6   : > { %v3619_v11 = vmax.f32 %v3389_v26, 0.0 }
 0x3c7   : > { %v3347_v50 = vpop.f32.mrf.mxu2 }
 0x3c8   : > { %v3348_v3 = vadd.f32 %v3347_v50, %v3299_v45  ;;  %3586 = vmatmul.bf16.gmra.mxu3 %v12353_v20  ;;  %v12420_v28 = vpack.c.bf16 %v3619_v11, %v3617_v12  ;;  %v3300_v57 = vpop.f32.mrf.mxu1 }
 0x3c9   : > { %v3251_v41 = vpop.f32.mrf.mxu0 }
 0x3ca   : > { %v3252_v52 = vadd.f32 %v3251_v41, %v12360_v56 }
 0x3cb   : > { %v3391_v18 = vpop.f32.mrf.mxu3 }
 0x3cc   : > { %v3392_v14 = vadd.f32 %v3391_v18, %v3343_v8  ;;  %v3301_v59 = vadd.f32 %v3300_v57, %v3252_v52 }
 0x3ce   : > { %v3621_v20 = vmax.f32 %v3392_v14, 0.0 }
 0x3cf   : > { %v3349_v33 = vpop.f32.mrf.mxu2 }
 0x3d0   : > { %v3459_v4 = vpop.f32.mrf.mxu1  ;;  %v3350_v61 = vadd.f32 %v3349_v33, %v3301_v59 }
 0x3d1   : > { %v3410_v29 = vpop.f32.mrf.mxu0 }
 0x3d2   : > { %v3411_v25 = vadd.f32 %v3410_v29, %v12430_v23 }
 0x3d3   : > { %v3393_v13 = vpop.f32.mrf.mxu3 }
 0x3d4   : > { %3785 = vmatmul.bf16.vlgmr.msra.gmra.mxu0 %v12380_v24  ;;  %v3394_v1 = vadd.f32 %v3393_v13, %v3345_v5  ;;  %v3460_v0 = vadd.f32 %v3459_v4, %v3411_v25  ;;  %v10055_v13 = vld [vmem:[#allocation16 + $0x28] sm:$0xff] }
 0x3d5   : > { %3969 = vmatpush.bf16.msra.mxu2 %v10055_v13 }
 0x3d6   : > { %v3623_v51 = vmax.f32 %v3394_v1, 0.0 }
 0x3d7   : > { %v3508_v38 = vpop.f32.mrf.mxu2 }
 0x3d8   : > { %3591 = vmatmul.bf16.gmra.mxu3 %v12366_v47  ;;  %v12425_v37 = vpack.c.bf16 %v3623_v51, %v3621_v20  ;;  %v3461_v15 = vpop.f32.mrf.mxu1  ;;  %v3509_v60 = vadd.f32 %v3508_v38, %v3460_v0 }
 0x3d9   : > { %v3412_v53 = vpop.f32.mrf.mxu0 }
 0x3da   : > { %v3413_v7 = vadd.f32 %v3412_v53, %v12430_v23 }
 0x3db   : > { %v3396_v34 = vpop.f32.mrf.mxu3 }
 0x3dc   : > { %v3397_v31 = vadd.f32 %v3396_v34, %v3348_v3  ;;  %v3462_v36 = vadd.f32 %v3461_v15, %v3413_v7 }
 0x3de   : > { %v3625_v47 = vmax.f32 %v3397_v31, 0.0 }
 0x3df   : > { %v3510_v62 = vpop.f32.mrf.mxu2 }
 0x3e0   : > { %v3464_v21 = vpop.f32.mrf.mxu1  ;;  %v3511_v63 = vadd.f32 %v3510_v62, %v3462_v36 }
 0x3e1   : > { %v3415_v2 = vpop.f32.mrf.mxu0 }
 0x3e2   : > { %v3416_v11 = vadd.f32 %v3415_v2, %v12430_v23 }
 0x3e3   : > { %v3398_v24 = vpop.f32.mrf.mxu3 }
 0x3e4   : > { %3790 = vmatmul.bf16.gmra.mxu0 %v12389_v22  ;;  %v3399_v17 = vadd.f32 %v3398_v24, %v3350_v61  ;;  %v3465_v41 = vadd.f32 %v3464_v21, %v3416_v11 }
 0x3e6   : > { %v3627_v48 = vmax.f32 %v3399_v17, 0.0 }
 0x3e7   : > { %v3513_v54 = vpop.f32.mrf.mxu2 }
 0x3e8   : > { %v12432_v56 = vpack.c.bf16 %v3627_v48, %v3625_v47  ;;  %v3466_v58 = vpop.f32.mrf.mxu1  ;;  %v3514_v18 = vadd.f32 %v3513_v54, %v3465_v41  ;;  %v10054_v48 = vld [vmem:[#allocation16 + $0x20] sm:$0xff] }
 0x3e9   : > { %v3417_v39 = vpop.f32.mrf.mxu0  ;;  %3970 = vmatpush.bf16.msra.mxu2 %v10054_v48 }
 0x3ea   : > { %v3418_v3 = vadd.f32 %v3417_v39, %v12430_v23 }
 0x3eb   : > { %v3557_v8 = vpop.f32.mrf.mxu3 }
 0x3ec   : > { %v3558_v27 = vadd.f32 %v3557_v8, %v3509_v60  ;;  %v3467_v55 = vadd.f32 %v3466_v58, %v3418_v3 }
 0x3ee   : > { %v3598_v43 = vmax.f32 %v3558_v27, 0.0 }
 0x3ef   : > { %v3515_v22 = vpop.f32.mrf.mxu2 }
 0x3f0   : > { %v3469_v44 = vpop.f32.mrf.mxu1  ;;  %v3516_v42 = vadd.f32 %v3515_v22, %v3467_v55 }
 0x3f1   : > { %v3420_v16 = vpop.f32.mrf.mxu0 }
 0x3f2   : > { %v3421_v38 = vadd.f32 %v3420_v16, %v12430_v23 }
 0x3f3   : > { %v3559_v19 = vpop.f32.mrf.mxu3 }
 0x3f4   : > { %3795 = vmatmul.bf16.gmra.mxu0 %v12397_v10  ;;  %v3560_v9 = vadd.f32 %v3559_v19, %v3511_v63  ;;  %v3470_v52 = vadd.f32 %v3469_v44, %v3421_v38 }
 0x3f6   : > { %v3600_v35 = vmax.f32 %v3560_v9, 0.0 }
 0x3f7   : > { %v3518_v45 = vpop.f32.mrf.mxu2 }
 0x3f8   : > { %v3630_v46 = vpack.c.bf16 %v3600_v35, %v3598_v43  ;;  %v3471_v12 = vpop.f32.mrf.mxu1  ;;  %v3519_v62 = vadd.f32 %v3518_v45, %v3470_v52  ;;  %v10053_v35 = vld [vmem:[#allocation16 + $0x18] sm:$0xff] }
 0x3f9   : > { %v3422_v26 = vpop.f32.mrf.mxu0  ;;  %3971 = vmatpush.bf16.msra.mxu2 %v10053_v35 }
 0x3fa   : > { %3834 = vmatmul.bf16.vlgmr.msra.gmra.mxu1 %v3630_v46  ;;  %v3423_v15 = vadd.f32 %v3422_v26, %v12430_v23 }
 0x3fb   : > { %v3562_v50 = vpop.f32.mrf.mxu3 }
 0x3fc   : > { %v3563_v14 = vadd.f32 %v3562_v50, %v3514_v18  ;;  %v3472_v59 = vadd.f32 %v3471_v12, %v3423_v15 }
 0x3fe   : > { %v3602_v4 = vmax.f32 %v3563_v14, 0.0 }
 0x3ff   : > { %v3520_v57 = vpop.f32.mrf.mxu2 }
 0x400   : > { %v3474_v33 = vpop.f32.mrf.mxu1  ;;  %v3521_v2 = vadd.f32 %v3520_v57, %v3472_v59 }
 0x401   : > { %v3425_v10 = vpop.f32.mrf.mxu0 }
 0x402   : > { %v3426_v25 = vadd.f32 %v3425_v10, %v12430_v23 }
 0x403   : > { %v3564_v6 = vpop.f32.mrf.mxu3 }
 0x404   : > { %3800 = vmatmul.bf16.gmra.mxu0 %v12404_v32  ;;  %v3565_v29 = vadd.f32 %v3564_v6, %v3516_v42  ;;  %v3475_v0 = vadd.f32 %v3474_v33, %v3426_v25 }
 0x406   : > { %v3604_v5 = vmax.f32 %v3565_v29, 0.0 }
 0x407   : > { %v3523_v1 = vpop.f32.mrf.mxu2 }
 0x408   : > { %v3632_v51 = vpack.c.bf16 %v3604_v5, %v3602_v4  ;;  %v3476_v34 = vpop.f32.mrf.mxu1  ;;  %v3524_v22 = vadd.f32 %v3523_v1, %v3475_v0  ;;  %v10052_v4 = vld [vmem:[#allocation16 + $0x10] sm:$0xff] }
 0x409   : > { %v3427_v20 = vpop.f32.mrf.mxu0  ;;  %3972 = vmatpush.bf16.msra.mxu2 %v10052_v4 }
 0x40a   : > { %3839 = vmatmul.bf16.gmra.mxu1 %v3632_v51  ;;  %v3428_v7 = vadd.f32 %v3427_v20, %v12430_v23 }
 0x40b   : > { %v3567_v53 = vpop.f32.mrf.mxu3 }
 0x40c   : > { %v3568_v21 = vadd.f32 %v3567_v53, %v3519_v62  ;;  %v3477_v60 = vadd.f32 %v3476_v34, %v3428_v7  ;;  %v10050_v7 = vld [vmem:[#allocation16] sm:$0xff] }
 0x40e   : > { %v3606_v17 = vmax.f32 %v3568_v21, 0.0 }
 0x40f   : > { %v3525_v31 = vpop.f32.mrf.mxu2 }
 0x410   : > { %v3479_v30 = vpop.f32.mrf.mxu1 }
 0x411   : > { %v3430_v32 = vpop.f32.mrf.mxu0 }
 0x412   : > { %v3431_v46 = vadd.f32 %v3430_v32, %v12430_v23 }
 0x413   : > { %v3569_v61 = vpop.f32.mrf.mxu3 }
 0x414   : > { %3805 = vmatmul.bf16.gmra.mxu0 %v12412_v49  ;;  %v3570_v24 = vadd.f32 %v3569_v61, %v3521_v2  ;;  %v3526_v49 = vadd.f32 %v3525_v31, %v3477_v60  ;;  %v3480_v3 = vadd.f32 %v3479_v30, %v3431_v46  ;;  %v10051_v61 = vld [vmem:[#allocation16 + $0x8] sm:$0xff] }
 0x415   : > { %3973 = vmatpush.bf16.msra.mxu2 %v10051_v61  ;;  %v10064_v61 = vld [vmem:[#allocation19 + $0x30] sm:$0xff] }
 0x416   : > { %v3608_v47 = vmax.f32 %v3570_v24, 0.0 }
 0x417   : > { %v3528_v54 = vpop.f32.mrf.mxu2 }
 0x418   : > { %v3634_v58 = vpack.c.bf16 %v3608_v47, %v3606_v17  ;;  %v3481_v16 = vpop.f32.mrf.mxu1  ;;  %v3529_v41 = vadd.f32 %v3528_v54, %v3480_v3 }
 0x419   : > { %v3432_v39 = vpop.f32.mrf.mxu0  ;;  %3974 = vmatpush.bf16.msra.mxu2 %v10050_v7 }
 0x41a   : > { %3844 = vmatmul.bf16.gmra.mxu1 %v3634_v58  ;;  %v3433_v12 = vadd.f32 %v3432_v39, %v12430_v23 }
 0x41b   : > { %v3572_v8 = vpop.f32.mrf.mxu3 }
 0x41c   : > { %v3573_v44 = vadd.f32 %v3572_v8, %v3524_v22  ;;  %v3482_v57 = vadd.f32 %v3481_v16, %v3433_v12 }
 0x41e   : > { %v3610_v9 = vmax.f32 %v3573_v44, 0.0 }
 0x41f   : > { %v3530_v63 = vpop.f32.mrf.mxu2 }
 0x420   : > { %v3484_v11 = vpop.f32.mrf.mxu1 }
 0x421   : > { %v3435_v36 = vpop.f32.mrf.mxu0 }
 0x422   : > { %v3436_v1 = vadd.f32 %v3435_v36, %v12430_v23 }
 0x423   : > { %v3574_v27 = vpop.f32.mrf.mxu3 }
 0x424   : > { %3810 = vmatmul.bf16.gmra.mxu0 %v12420_v28  ;;  %v3575_v19 = vadd.f32 %v3574_v27, %v3526_v49  ;;  %v3531_v28 = vadd.f32 %v3530_v63, %v3482_v57  ;;  %v3485_v38 = vadd.f32 %v3484_v11, %v3436_v1 }
 0x426   : > { %v3612_v43 = vmax.f32 %v3575_v19, 0.0 }
 0x427   : > { %v3533_v50 = vpop.f32.mrf.mxu2 }
 0x428   : > { %v3636_v45 = vpack.c.bf16 %v3612_v43, %v3610_v9  ;;  %v3486_v14 = vpop.f32.mrf.mxu1  ;;  %v3534_v53 = vadd.f32 %v3533_v50, %v3485_v38 }
 0x429   : > { %v3437_v40 = vpop.f32.mrf.mxu0 }
 0x42a   : > { %3849 = vmatmul.bf16.gmra.mxu1 %v3636_v45  ;;  %v3438_v51 = vadd.f32 %v3437_v40, %v12430_v23 }
 0x42b   : > { %v3577_v26 = vpop.f32.mrf.mxu3 }
 0x42c   : > { %v3578_v55 = vadd.f32 %v3577_v26, %v3529_v41  ;;  %v3487_v15 = vadd.f32 %v3486_v14, %v3438_v51  ;;  %v12456_v14 = vld [vmem:[#allocation14] ss:$0 sm:$0xff] }
 0x42d   : > { %v10065_v51 = vld [vmem:[#allocation19 + $0x38] sm:$0xff] }
 0x42e   : > { %v3614_v33 = vmax.f32 %v3578_v55, 0.0  ;;  %4108 = vmatpush.bf16.msra.mxu3 %v10065_v51  ;;  %v10060_v51 = vld [vmem:[#allocation19 + $0x10] sm:$0xff] }
 0x42f   : > { %v3535_v6 = vpop.f32.mrf.mxu2 }
 0x430   : > { %v3489_v34 = vpop.f32.mrf.mxu1  ;;  %v3536_v31 = vadd.f32 %v3535_v6, %v3487_v15 }
 0x431   : > { %v3440_v18 = vpop.f32.mrf.mxu0 }
 0x432   : > { %v3441_v17 = vadd.f32 %v3440_v18, %v12430_v23  ;;  %4109 = vmatpush.bf16.msra.mxu3 %v10064_v61 }
 0x433   : > { %v3579_v10 = vpop.f32.mrf.mxu3 }
 0x434   : > { %3815 = vmatmul.bf16.gmra.mxu0 %v12425_v37  ;;  %v3580_v42 = vadd.f32 %v3579_v10, %v3531_v28  ;;  %v3490_v58 = vadd.f32 %v3489_v34, %v3441_v17  ;;  %v10072_v34 = vld [vmem:[#allocation22 + $0x30] sm:$0xff] }
 0x436   : > { %v3616_v29 = vmax.f32 %v3580_v42, 0.0 }
 0x437   : > { %v3538_v37 = vpop.f32.mrf.mxu2 }
 0x438   : > { %v3638_v13 = vpack.c.bf16 %v3616_v29, %v3614_v33  ;;  %v3491_v47 = vpop.f32.mrf.mxu1  ;;  %v3539_v25 = vadd.f32 %v3538_v37, %v3490_v58 }
 0x439   : > { %v3442_v5 = vpop.f32.mrf.mxu0 }
 0x43a   : > { %3854 = vmatmul.bf16.gmra.mxu1 %v3638_v13  ;;  %v3443_v39 = vadd.f32 %v3442_v5, %v12430_v23 }
 0x43b   : > { %v3582_v20 = vpop.f32.mrf.mxu3 }
 0x43c   : > { %v3583_v62 = vadd.f32 %v3582_v20, %v3534_v53  ;;  %v3492_v8 = vadd.f32 %v3491_v47, %v3443_v39  ;;  %v10071_v47 = vld [vmem:[#allocation22 + $0x28] sm:$0xff] }
 0x43e   : > { %v3618_v2 = vmax.f32 %v3583_v62, 0.0 }
 0x43f   : > { %v3540_v48 = vpop.f32.mrf.mxu2 }
 0x440   : > { %v3494_v60 = vpop.f32.mrf.mxu1 }
 0x441   : > { %v3445_v52 = vpop.f32.mrf.mxu0 }
 0x442   : > { %v3446_v19 = vadd.f32 %v3445_v52, %v12430_v23 }
 0x443   : > { %v3584_v59 = vpop.f32.mrf.mxu3 }
 0x444   : > { %3820 = vmatmul.bf16.gmra.mxu0 %v12432_v56  ;;  %v3585_v32 = vadd.f32 %v3584_v59, %v3536_v31  ;;  %v3541_v56 = vadd.f32 %v3540_v48, %v3492_v8  ;;  %v3495_v35 = vadd.f32 %v3494_v60, %v3446_v19 }
 0x446   : > { %v3620_v21 = vmax.f32 %v3585_v32, 0.0 }
 0x447   : > { %v3543_v49 = vpop.f32.mrf.mxu2 }
 0x448   : > { %v3640_v24 = vpack.c.bf16 %v3620_v21, %v3618_v2  ;;  %v3496_v40 = vpop.f32.mrf.mxu1  ;;  %v3544_v26 = vadd.f32 %v3543_v49, %v3495_v35  ;;  %v10062_v35 = vld [vmem:[#allocation19 + $0x20] sm:$0xff] }
 0x449   : > { %v3447_v30 = vpop.f32.mrf.mxu0 }
 0x44a   : > { %3859 = vmatmul.bf16.gmra.mxu1 %v3640_v24  ;;  %v3448_v43 = vadd.f32 %v3447_v30, %v12430_v23  ;;  %v10073_v23 = vld [vmem:[#allocation22 + $0x38] sm:$0xff] }
 0x44b   : > { %v3587_v54 = vpop.f32.mrf.mxu3  ;;  %4225 = vmatpush.bf16.msrb.mxu0 %v10073_v23  ;;  %v10068_v23 = vld [vmem:[#allocation22 + $0x10] sm:$0xff] }
 0x44c   : > { %v3588_v0 = vadd.f32 %v3587_v54, %v3539_v25  ;;  %v3497_v12 = vadd.f32 %v3496_v40, %v3448_v43 }
 0x44e   : > { %v3622_v44 = vmax.f32 %v3588_v0, 0.0 }
 0x44f   : > { %v3545_v45 = vpop.f32.mrf.mxu2  ;;  %4226 = vmatpush.bf16.msrb.mxu0 %v10072_v34 }
 0x450   : > { %v3546_v11 = vadd.f32 %v3545_v45, %v3497_v12 }
 0x451   : > { %v3786_v16 = vpop.f32.mrf.mxu0 }
 0x452   : > { %v3787_v33 = vadd.f32 %v12456_v14, %v3786_v16 }
 0x453   : > { %v3589_v22 = vpop.f32.mrf.mxu3  ;;  %4227 = vmatpush.bf16.msrb.mxu0 %v10071_v47 }
 0x454   : > { %v3590_v36 = vadd.f32 %v3589_v22, %v3541_v56  ;;  %v10063_v56 = vld [vmem:[#allocation19 + $0x28] sm:$0xff] }
 0x455   : > { %4110 = vmatpush.bf16.msra.mxu3 %v10063_v56 }
 0x456   : > { %v3624_v63 = vmax.f32 %v3590_v36, 0.0  ;;  %v10070_v36 = vld [vmem:[#allocation22 + $0x20] sm:$0xff] }
 0x457   : > { %4228 = vmatpush.bf16.msrb.mxu0 %v10070_v36 }
 0x458   : > { %v3642_v27 = vpack.c.bf16 %v3624_v63, %v3622_v44 }
 0x459   : > { %v3788_v46 = vpop.f32.mrf.mxu0  ;;  %4111 = vmatpush.bf16.msra.mxu3 %v10062_v35 }
 0x45a   : > { %3864 = vmatmul.bf16.gmra.mxu1 %v3642_v27  ;;  %v3789_v29 = vadd.f32 %v12456_v14, %v3788_v46 }
 0x45b   : > { %v3592_v9 = vpop.f32.mrf.mxu3 }
 0x45c   : > { %v3593_v50 = vadd.f32 %v3592_v9, %v3544_v26  ;;  %v10069_v26 = vld [vmem:[#allocation22 + $0x18] sm:$0xff] }
 0x45d   : > { %4229 = vmatpush.bf16.msrb.mxu0 %v10069_v26 }
 0x45e   : > { %v3626_v57 = vmax.f32 %v3593_v50, 0.0 }
 0x461   : > { %v3791_v55 = vpop.f32.mrf.mxu0  ;;  %4230 = vmatpush.bf16.msrb.mxu0 %v10068_v23 }
 0x462   : > { %v3792_v37 = vadd.f32 %v12456_v14, %v3791_v55 }
 0x463   : > { %v3594_v3 = vpop.f32.mrf.mxu3 }
 0x464   : > { %v3595_v41 = vadd.f32 %v3594_v3, %v3546_v11 }
 0x466   : > { %v3628_v18 = vmax.f32 %v3595_v41, 0.0 }
 0x468   : > { %v3644_v28 = vpack.c.bf16 %v3628_v18, %v3626_v57 }
 0x469   : > { %v3793_v10 = vpop.f32.mrf.mxu0 }
 0x46a   : > { %3869 = vmatmul.bf16.gmra.mxu1 %v3644_v28  ;;  %v3794_v52 = vadd.f32 %v12456_v14, %v3793_v10  ;;  %v10061_v28 = vld [vmem:[#allocation19 + $0x18] sm:$0xff] }
 0x46b   : > { %4112 = vmatpush.bf16.msra.mxu3 %v10061_v28 }
 0x46f   : > { %4113 = vmatpush.bf16.msra.mxu3 %v10060_v51 }
 0x471   : > { %v3796_v6 = vpop.f32.mrf.mxu0 }
 0x472   : > { %v3797_v30 = vadd.f32 %v12456_v14, %v3796_v6 }
 0x477   : > { %v3835_v42 = vpop.f32.mrf.mxu1 }
 0x478   : > { %v3836_v4 = vadd.f32 %v3835_v42, %v3787_v33 }
 0x479   : > { %v3798_v53 = vpop.f32.mrf.mxu0 }
 0x47a   : > { %v3875_v1 = vmax.f32 %v3836_v4, 0.0  ;;  %v3799_v54 = vadd.f32 %v12456_v14, %v3798_v53  ;;  %v10067_v53 = vld [vmem:[#allocation22 + $0x8] sm:$0xff] }
 0x47b   : > { %4231 = vmatpush.bf16.msrb.mxu0 %v10067_v53  ;;  %v10077_v53 = vld [vmem:[#allocation23 + $0x18] sm:$0xff] }
 0x47f   : > { %v3837_v5 = vpop.f32.mrf.mxu1 }
 0x480   : > { %v3838_v13 = vadd.f32 %v3837_v5, %v3789_v29 }
 0x481   : > { %v3801_v32 = vpop.f32.mrf.mxu0 }
 0x482   : > { %v3876_v20 = vmax.f32 %v3838_v13, 0.0  ;;  %v3802_v49 = vadd.f32 %v12456_v14, %v3801_v32 }
 0x484   : > { %v3891_v38 = vpack.c.bf16 %v3876_v20, %v3875_v1 }
 0x486   : > { %3975 = vmatmul.bf16.vlgmr.msra.gmra.mxu2 %v3891_v38 }
 0x487   : > { %v3840_v15 = vpop.f32.mrf.mxu1 }
 0x488   : > { %v3841_v31 = vadd.f32 %v3840_v15, %v3792_v37  ;;  %v10059_v15 = vld [vmem:[#allocation19 + $0x8] sm:$0xff] }
 0x489   : > { %v3803_v48 = vpop.f32.mrf.mxu0  ;;  %4114 = vmatpush.bf16.msra.mxu3 %v10059_v15 }
 0x48a   : > { %v3877_v2 = vmax.f32 %v3841_v31, 0.0  ;;  %v3804_v16 = vadd.f32 %v12456_v14, %v3803_v48 }
 0x48f   : > { %v3842_v62 = vpop.f32.mrf.mxu1 }
 0x490   : > { %v3843_v59 = vadd.f32 %v3842_v62, %v3794_v52  ;;  %v10066_v52 = vld [vmem:[#allocation22] sm:$0xff] }
 0x491   : > { %v3806_v22 = vpop.f32.mrf.mxu0  ;;  %4232 = vmatpush.bf16.msrb.mxu0 %v10066_v52 }
 0x492   : > { %v3878_v21 = vmax.f32 %v3843_v59, 0.0  ;;  %v3807_v12 = vadd.f32 %v12456_v14, %v3806_v22 }
 0x494   : > { %v3892_v24 = vpack.c.bf16 %v3878_v21, %v3877_v2 }
 0x496   : > { %3980 = vmatmul.bf16.gmra.mxu2 %v3892_v24 }
 0x497   : > { %v3845_v17 = vpop.f32.mrf.mxu1 }
 0x498   : > { %v3846_v39 = vadd.f32 %v3845_v17, %v3797_v30 }
 0x499   : > { %v3808_v63 = vpop.f32.mrf.mxu0 }
 0x49a   : > { %v3879_v8 = vmax.f32 %v3846_v39, 0.0  ;;  %v3809_v11 = vadd.f32 %v12456_v14, %v3808_v63 }
 0x49f   : > { %v3847_v58 = vpop.f32.mrf.mxu1 }
 0x4a0   : > { %v3848_v25 = vadd.f32 %v3847_v58, %v3799_v54  ;;  %v10058_v54 = vld [vmem:[#allocation19] sm:$0xff] }
 0x4a1   : > { %v3811_v46 = vpop.f32.mrf.mxu0  ;;  %4115 = vmatpush.bf16.msra.mxu3 %v10058_v54 }
 0x4a2   : > { %v3880_v7 = vmax.f32 %v3848_v25, 0.0  ;;  %v3812_v33 = vadd.f32 %v12456_v14, %v3811_v46  ;;  %v10080_v46 = vld [vmem:[#allocation23 + $0x30] sm:$0xff] }
 0x4a4   : > { %v3893_v0 = vpack.c.bf16 %v3880_v7, %v3879_v8 }
 0x4a6   : > { %3985 = vmatmul.bf16.gmra.mxu2 %v3893_v0 }
 0x4a7   : > { %v3850_v60 = vpop.f32.mrf.mxu1 }
 0x4a8   : > { %v3851_v44 = vadd.f32 %v3850_v60, %v3802_v49  ;;  %v12474_v60 = vld [vmem:[#allocation17] ss:$0 sm:$0xff] }
 0x4a9   : > { %v3813_v55 = vpop.f32.mrf.mxu0 }
 0x4aa   : > { %v3881_v9 = vmax.f32 %v3851_v44, 0.0  ;;  %v3814_v29 = vadd.f32 %v12456_v14, %v3813_v55 }
 0x4af   : > { %v3852_v27 = vpop.f32.mrf.mxu1 }
 0x4b0   : > { %v3853_v19 = vadd.f32 %v3852_v27, %v3804_v16  ;;  %v10081_v27 = vld [vmem:[#allocation23 + $0x38] sm:$0xff] }
 0x4b1   : > { %v3816_v6 = vpop.f32.mrf.mxu0  ;;  %4478 = vmatpush.bf16.msrb.mxu1 %v10081_v27 }
 0x4b2   : > { %v3882_v43 = vmax.f32 %v3853_v19, 0.0  ;;  %v3817_v31 = vadd.f32 %v12456_v14, %v3816_v6 }
 0x4b4   : > { %v3894_v40 = vpack.c.bf16 %v3882_v43, %v3881_v9 }
 0x4b5   : > { %4479 = vmatpush.bf16.msrb.mxu1 %v10080_v46 }
 0x4b6   : > { %3990 = vmatmul.bf16.gmra.mxu2 %v3894_v40 }
 0x4b7   : > { %v3855_v45 = vpop.f32.mrf.mxu1 }
 0x4b8   : > { %v3856_v50 = vadd.f32 %v3855_v45, %v3807_v12 }
 0x4b9   : > { %v3818_v34 = vpop.f32.mrf.mxu0 }
 0x4ba   : > { %v3883_v57 = vmax.f32 %v3856_v50, 0.0  ;;  %v3819_v62 = vadd.f32 %v12456_v14, %v3818_v34 }
 0x4bf   : > { %v3857_v3 = vpop.f32.mrf.mxu1 }
 0x4c0   : > { %v3858_v41 = vadd.f32 %v3857_v3, %v3809_v11 }
 0x4c1   : > { %v3821_v21 = vpop.f32.mrf.mxu0 }
 0x4c2   : > { %v3884_v18 = vmax.f32 %v3858_v41, 0.0  ;;  %v3822_v30 = vadd.f32 %v12456_v14, %v3821_v21  ;;  %v10075_v21 = vld [vmem:[#allocation23 + $0x8] sm:$0xff] }
 0x4c4   : > { %v3895_v10 = vpack.c.bf16 %v3884_v18, %v3883_v57  ;;  %v10079_v18 = vld [vmem:[#allocation23 + $0x28] sm:$0xff] }
 0x4c5   : > { %4480 = vmatpush.bf16.msrb.mxu1 %v10079_v18  ;;  %v9055_v18 = vld [vmem:[#allocation25 + $0x78] sm:$0xf0] }
 0x4c6   : > { %3995 = vmatmul.bf16.gmra.mxu2 %v3895_v10 }
 0x4c7   : > { %v3860_v42 = vpop.f32.mrf.mxu1 }
 0x4c8   : > { %v3861_v4 = vadd.f32 %v3860_v42, %v3812_v33 }
 0x4c9   : > { %v3823_v48 = vpop.f32.mrf.mxu0 }
 0x4ca   : > { %v3885_v1 = vmax.f32 %v3861_v4, 0.0  ;;  %v3824_v39 = vadd.f32 %v12456_v14, %v3823_v48 }
 0x4cf   : > { %v3862_v5 = vpop.f32.mrf.mxu1 }
 0x4d0   : > { %v3863_v13 = vadd.f32 %v3862_v5, %v3814_v29  ;;  %v10078_v29 = vld [vmem:[#allocation23 + $0x20] sm:$0xff] }
 0x4d1   : > { %4481 = vmatpush.bf16.msrb.mxu1 %v10078_v29 }
 0x4d2   : > { %v3886_v20 = vmax.f32 %v3863_v13, 0.0 }
 0x4d4   : > { %v3896_v38 = vpack.c.bf16 %v3886_v20, %v3885_v1 }
 0x4d5   : > { %4482 = vmatpush.bf16.msrb.mxu1 %v10077_v53 }
 0x4d6   : > { %4000 = vmatmul.bf16.gmra.mxu2 %v3896_v38 }
 0x4d7   : > { %v3865_v37 = vpop.f32.mrf.mxu1 }
 0x4d8   : > { %v3866_v59 = vadd.f32 %v3865_v37, %v3817_v31 }
 0x4da   : > { %v3887_v61 = vmax.f32 %v3866_v59, 0.0 }
 0x4df   : > { %v3867_v32 = vpop.f32.mrf.mxu1 }
 0x4e0   : > { %v3868_v2 = vadd.f32 %v3867_v32, %v3819_v62  ;;  %v10076_v32 = vld [vmem:[#allocation23 + $0x10] sm:$0xff] }
 0x4e1   : > { %4483 = vmatpush.bf16.msrb.mxu1 %v10076_v32  ;;  %v4308_v32 = vld [vmem:[%s11890_s2 + $0x10] sm:$0xff] }
 0x4e2   : > { %v3888_v24 = vmax.f32 %v3868_v2, 0.0 }
 0x4e4   : > { %v3897_v17 = vpack.c.bf16 %v3888_v24, %v3887_v61 }
 0x4e5   : > { %4484 = vmatpush.bf16.msrb.mxu1 %v10075_v21 }
 0x4e6   : > { %4005 = vmatmul.bf16.gmra.mxu2 %v3897_v17 }
 0x4e7   : > { %v3870_v47 = vpop.f32.mrf.mxu1 }
 0x4e8   : > { %v3871_v58 = vadd.f32 %v3870_v47, %v3822_v30 }
 0x4ea   : > { %v3889_v7 = vmax.f32 %v3871_v58, 0.0 }
 0x4ef   : > { %v3872_v25 = vpop.f32.mrf.mxu1 }
 0x4f0   : > { %v3873_v8 = vadd.f32 %v3872_v25, %v3824_v39 }
 0x4f2   : > { %v3890_v56 = vmax.f32 %v3873_v8, 0.0 }
 0x4f4   : > { %v3898_v0 = vpack.c.bf16 %v3890_v56, %v3889_v7 }
 0x4f6   : > { %4010 = vmatmul.bf16.gmra.mxu2 %v3898_v0  ;;  %v10074_v0 = vld [vmem:[#allocation23] sm:$0xff] }
 0x4f7   : > { %4485 = vmatpush.bf16.msrb.mxu1 %v10074_v0 }
 0x509   : > { %v3976_v22 = vpop.f32.mrf.mxu2 }
 0x50a   : > { %v3977_v36 = vadd.f32 %v12474_v60, %v3976_v22 }
 0x50c   : > { %v4016_v44 = vmax.f32 %v3977_v36, 0.0  ;;  %v12495_v36 = vld [vmem:[%s13548_s11] ss:$0 sm:$0xff]  ;;  %s11343_s11 = scalar_lea.hbm %s13553_s10, 256 }
 0x511   : > { %v3978_v49 = vpop.f32.mrf.mxu2 }
 0x512   : > { %v3979_v16 = vadd.f32 %v12474_v60, %v3978_v49 }
 0x514   : > { %v4017_v63 = vmax.f32 %v3979_v16, 0.0 }
 0x516   : > { %v4032_v14 = vpack.c.bf16 %v4017_v63, %v4016_v44  ;;  %v12502_v44 = vld [vmem:[#allocation20] ss:$0 sm:$0xff] }
 0x518   : > { %4116 = vmatmul.bf16.vlgmr.msra.gmra.mxu3 %v4032_v14  ;;  %4233 = vmatmul.bf16.vlgmr.msrb.gmra.mxu0 %v4032_v14 }
 0x519   : > { %v3981_v19 = vpop.f32.mrf.mxu2 }
 0x51a   : > { %v3982_v9 = vadd.f32 %v12474_v60, %v3981_v19 }
 0x51c   : > { %v4018_v40 = vmax.f32 %v3982_v9, 0.0 }
 0x521   : > { %v3983_v43 = vpop.f32.mrf.mxu2 }
 0x522   : > { %v3984_v35 = vadd.f32 %v12474_v60, %v3983_v43 }
 0x524   : > { %v4019_v45 = vmax.f32 %v3984_v35, 0.0 }
 0x526   : > { %v4033_v26 = vpack.c.bf16 %v4019_v45, %v4018_v40 }
 0x528   : > { %4121 = vmatmul.bf16.gmra.mxu3 %v4033_v26  ;;  %4238 = vmatmul.bf16.gmra.mxu0 %v4033_v26  ;;  %v9053_v26 = vld [vmem:[#allocation25 + $0x70] sm:$0xf] }
 0x529   : > { %v3986_v12 = vpop.f32.mrf.mxu2 }
 0x52a   : > { %v3987_v11 = vadd.f32 %v12474_v60, %v3986_v12  ;;  %v10097_v12 = vld [vmem:[#allocation25 + $0x74] sm:$0xf0] }
 0x52c   : > { %v4020_v41 = vmax.f32 %v3987_v11, 0.0  ;;  %v10096_v11 = vld [vmem:[#allocation25 + $0x74] sm:$0xf] }
 0x531   : > { %v3988_v50 = vpop.f32.mrf.mxu2 }
 0x532   : > { %v3989_v3 = vadd.f32 %v12474_v60, %v3988_v50 }
 0x534   : > { %v4021_v57 = vmax.f32 %v3989_v3, 0.0  ;;  %v4306_v3 = vld [vmem:[%s11890_s2] sm:$0xff] }
 0x536   : > { %v4034_v28 = vpack.c.bf16 %v4021_v57, %v4020_v41  ;;  %v9054_v57 = vor.u32 %v10097_v12, %v9053_v26  ;;  %v4311_v12 = vld [vmem:[%s11890_s2 + $0x28] sm:$0xff] }
 0x538   : > { %4126 = vmatmul.bf16.gmra.mxu3 %v4034_v28  ;;  %4243 = vmatmul.bf16.gmra.mxu0 %v4034_v28  ;;  %v9058_v28 = vor.u32 %v10096_v11, %v9055_v18 }
 0x539   : > { %v3991_v55 = vpop.f32.mrf.mxu2  ;;  %4653 = vmatpush.bf16.msrb.mxu2 %v9054_v57 }
 0x53a   : > { %v3992_v10 = vadd.f32 %v12474_v60, %v3991_v55  ;;  %v4307_v55 = vld [vmem:[%s11890_s2 + $0x8] sm:$0xff]  ;;  %4702 = vmatpush.bf16.msrb.mxu3 %v9058_v28 }
 0x53c   : > { %v4022_v33 = vmax.f32 %v3992_v10, 0.0 }
 0x541   : > { %v3993_v42 = vpop.f32.mrf.mxu2 }
 0x542   : > { %v3994_v23 = vadd.f32 %v12474_v60, %v3993_v42 }
 0x544   : > { %v4023_v6 = vmax.f32 %v3994_v23, 0.0 }
 0x546   : > { %v4035_v4 = vpack.c.bf16 %v4023_v6, %v4022_v33 }
 0x548   : > { %4131 = vmatmul.bf16.gmra.mxu3 %v4035_v4  ;;  %4248 = vmatmul.bf16.gmra.mxu0 %v4035_v4 }
 0x549   : > { %v3996_v5 = vpop.f32.mrf.mxu2 }
 0x54a   : > { %v3997_v13 = vadd.f32 %v12474_v60, %v3996_v5 }
 0x54c   : > { %v4024_v51 = vmax.f32 %v3997_v13, 0.0 }
 0x551   : > { %v3998_v1 = vpop.f32.mrf.mxu2 }
 0x552   : > { %v3999_v20 = vadd.f32 %v12474_v60, %v3998_v1 }
 0x554   : > { %v4025_v38 = vmax.f32 %v3999_v20, 0.0 }
 0x556   : > { %v4036_v15 = vpack.c.bf16 %v4025_v38, %v4024_v51 }
 0x558   : > { %4136 = vmatmul.bf16.gmra.mxu3 %v4036_v15  ;;  %4253 = vmatmul.bf16.gmra.mxu0 %v4036_v15 }
 0x559   : > { %v4001_v34 = vpop.f32.mrf.mxu2 }
 0x55a   : > { %v4002_v37 = vadd.f32 %v12474_v60, %v4001_v34 }
 0x55c   : > { %v4026_v62 = vmax.f32 %v4002_v37, 0.0 }
 0x561   : > { %v4003_v52 = vpop.f32.mrf.mxu2 }
 0x562   : > { %v4004_v31 = vadd.f32 %v12474_v60, %v4003_v52  ;;  %v9045_v52 = vld [vmem:[#allocation25 + $0x60] sm:$0xf] }
 0x564   : > { %v4027_v59 = vmax.f32 %v4004_v31, 0.0  ;;  %v10095_v31 = vld [vmem:[#allocation25 + $0x64] sm:$0xf0] }
 0x565   : > { %v9046_v21 = vor.u32 %v10095_v31, %v9045_v52  ;;  %v4313_v31 = vld [vmem:[%s11890_s2 + $0x38] sm:$0xff] }
 0x566   : > { %v4037_v2 = vpack.c.bf16 %v4027_v59, %v4026_v62  ;;  %v10094_v62 = vld [vmem:[#allocation25 + $0x64] sm:$0xf] }
 0x567   : > { %4654 = vmatpush.bf16.msrb.mxu2 %v9046_v21 }
 0x568   : > { %4141 = vmatmul.bf16.gmra.mxu3 %v4037_v2  ;;  %4258 = vmatmul.bf16.gmra.mxu0 %v4037_v2 }
 0x569   : > { %v4006_v61 = vpop.f32.mrf.mxu2 }
 0x56a   : > { %v4007_v24 = vadd.f32 %v12474_v60, %v4006_v61  ;;  %v9047_v61 = vld [vmem:[#allocation25 + $0x68] sm:$0xf0] }
 0x56c   : > { %v4028_v48 = vmax.f32 %v4007_v24, 0.0  ;;  %v9050_v24 = vor.u32 %v10094_v62, %v9047_v61 }
 0x56e   : > { %4703 = vmatpush.bf16.msrb.mxu3 %v9050_v24 }
 0x571   : > { %v4008_v17 = vpop.f32.mrf.mxu2 }
 0x572   : > { %v4009_v47 = vadd.f32 %v12474_v60, %v4008_v17  ;;  %v4309_v17 = vld [vmem:[%s11890_s2 + $0x18] sm:$0xff] }
 0x574   : > { %v4029_v30 = vmax.f32 %v4009_v47, 0.0 }
 0x576   : > { %v4038_v54 = vpack.c.bf16 %v4029_v30, %v4028_v48 }
 0x578   : > { %4146 = vmatmul.bf16.gmra.mxu3 %v4038_v54  ;;  %4263 = vmatmul.bf16.gmra.mxu0 %v4038_v54 }
 0x579   : > { %v4011_v39 = vpop.f32.mrf.mxu2 }
 0x57a   : > { %v4012_v58 = vadd.f32 %v12474_v60, %v4011_v39 }
 0x57c   : > { %v4030_v7 = vmax.f32 %v4012_v58, 0.0 }
 0x581   : > { %v4013_v25 = vpop.f32.mrf.mxu2 }
 0x582   : > { %v4014_v8 = vadd.f32 %v12474_v60, %v4013_v25 }
 0x584   : > { %v4031_v56 = vmax.f32 %v4014_v8, 0.0 }
 0x586   : > { %v4039_v22 = vpack.c.bf16 %v4031_v56, %v4030_v7 }
 0x588   : > { %4151 = vmatmul.bf16.gmra.mxu3 %v4039_v22  ;;  %4268 = vmatmul.bf16.gmra.mxu0 %v4039_v22 }
 0x595   : > { %v4234_v49 = vpop.f32.mrf.mxu0 }
 0x596   : > { %v4235_v16 = vadd.f32 %v12495_v36, %v4234_v49 }
 0x598   : > { %4290 = vst [vmem:[%s12499_s12] sm:$0xff] %v4235_v16  ;;  %v4322_v60 = vmul.f32 0.5, %v4235_v16 }
 0x59a   : > { %v4338_v27 = vmul.f32 1.442695, %v4322_v60 }
 0x59b   : > { %v4117_v63 = vpop.f32.mrf.mxu3 }
 0x59c   : > { %v4118_v14 = vadd.f32 %v12502_v44, %v4117_v63  ;;  %10523 = vpow2.f32 %v4338_v27 }
 0x59d   : > { %v4236_v19 = vpop.f32.mrf.mxu0 }
 0x59e   : > { %4274 = vst [vmem:[%s12506_s6] sm:$0xff] %v4118_v14  ;;  %v4237_v9 = vadd.f32 %v12495_v36, %v4236_v19  ;;  %v10093_v19 = vld [vmem:[#allocation25 + $0x54] sm:$0xf0] }
 0x5a0   : > { %4291 = vst [vmem:[%s12499_s12 + $0x8] sm:$0xff] %v4237_v9  ;;  %v4323_v43 = vmul.f32 0.5, %v4237_v9  ;;  %v10092_v9 = vld [vmem:[#allocation25 + $0x54] sm:$0xf] }
 0x5a2   : > { %v4340_v35 = vmul.f32 1.442695, %v4323_v43  ;;  %v10524_v50 = vpop.eup %10523 }
 0x5a3   : > { %v4119_v40 = vpop.f32.mrf.mxu3  ;;  %v4370_v42 = vmul.f32 %v10524_v50, %v4306_v3 }
 0x5a4   : > { %10525 = vpow2.f32 %v4340_v35  ;;  %v4120_v45 = vadd.f32 %v12502_v44, %v4119_v40  ;;  %v4310_v35 = vld [vmem:[%s11890_s2 + $0x20] sm:$0xff] }
 0x5a5   : > { %v4239_v46 = vpop.f32.mrf.mxu0  ;;  %v4386_v5 = vadd.f32 %v4370_v42, %v4118_v14  ;;  %v9037_v14 = vld [vmem:[#allocation25 + $0x50] sm:$0xf] }
 0x5a6   : > { %4275 = vst [vmem:[%s12506_s6 + $0x8] sm:$0xff] %v4120_v45  ;;  %v4240_v41 = vadd.f32 %v12495_v36, %v4239_v46  ;;  %v9039_v46 = vld [vmem:[#allocation25 + $0x58] sm:$0xf0] }
 0x5a7   : > { %v9042_v26 = vor.u32 %v10092_v9, %v9039_v46 }
 0x5a8   : > { %4292 = vst [vmem:[%s12499_s12 + $0x10] sm:$0xff] %v4240_v41  ;;  %v4324_v10 = vmul.f32 0.5, %v4240_v41 }
 0x5a9   : > { %4704 = vmatpush.bf16.msrb.mxu3 %v9042_v26 }
 0x5aa   : > { %v10526_v23 = vpop.eup %10525  ;;  %v4342_v29 = vmul.f32 1.442695, %v4324_v10 }
 0x5ab   : > { %v4371_v33 = vmul.f32 %v10526_v23, %v4307_v55  ;;  %v4122_v6 = vpop.f32.mrf.mxu3 }
 0x5ac   : > { %v4123_v4 = vadd.f32 %v12502_v44, %v4122_v6  ;;  %10527 = vpow2.f32 %v4342_v29 }
 0x5ad   : > { %v4387_v13 = vadd.f32 %v4371_v33, %v4120_v45  ;;  %v4241_v1 = vpop.f32.mrf.mxu0  ;;  %v9038_v45 = vor.u32 %v10093_v19, %v9037_v14  ;;  %v4315_v19 = vld [vmem:[%s11890_s2 + $0x48] sm:$0xff] }
 0x5ae   : > { %4276 = vst [vmem:[%s12506_s6 + $0x10] sm:$0xff] %v4123_v4  ;;  %v4242_v20 = vadd.f32 %v12495_v36, %v4241_v1  ;;  %v9029_v1 = vld [vmem:[#allocation25 + $0x40] sm:$0xf] }
 0x5af   : > { %v4402_v51 = vpack.c.bf16 %v4387_v13, %v4386_v5  ;;  %4655 = vmatpush.bf16.msrb.mxu2 %v9038_v45 }
 0x5b0   : > { %4293 = vst [vmem:[%s12499_s12 + $0x18] sm:$0xff] %v4242_v20  ;;  %v4325_v38 = vmul.f32 0.5, %v4242_v20  ;;  %v10091_v20 = vld [vmem:[#allocation25 + $0x44] sm:$0xf0] }
 0x5b1   : > { %4486 = vmatmul.bf16.vlgmr.msrb.gmra.mxu1 %v4402_v51  ;;  %v10090_v51 = vld [vmem:[#allocation25 + $0x44] sm:$0xf] }
 0x5b2   : > { %v4344_v53 = vmul.f32 1.442695, %v4325_v38  ;;  %v10528_v59 = vpop.eup %10527 }
 0x5b3   : > { %v4124_v15 = vpop.f32.mrf.mxu3  ;;  %v4372_v48 = vmul.f32 %v10528_v59, %v4308_v32 }
 0x5b4   : > { %10529 = vpow2.f32 %v4344_v53  ;;  %v4125_v34 = vadd.f32 %v12502_v44, %v4124_v15  ;;  %v4312_v53 = vld [vmem:[%s11890_s2 + $0x30] sm:$0xff] }
 0x5b5   : > { %v4244_v37 = vpop.f32.mrf.mxu0  ;;  %v4388_v8 = vadd.f32 %v4372_v48, %v4123_v4 }
 0x5b6   : > { %4277 = vst [vmem:[%s12506_s6 + $0x18] sm:$0xff] %v4125_v34  ;;  %v4245_v2 = vadd.f32 %v12495_v36, %v4244_v37  ;;  %v9031_v37 = vld [vmem:[#allocation25 + $0x48] sm:$0xf0] }
 0x5b7   : > { %v9034_v52 = vor.u32 %v10090_v51, %v9031_v37 }
 0x5b8   : > { %4294 = vst [vmem:[%s12499_s12 + $0x20] sm:$0xff] %v4245_v2  ;;  %v4326_v47 = vmul.f32 0.5, %v4245_v2 }
 0x5b9   : > { %4705 = vmatpush.bf16.msrb.mxu3 %v9034_v52 }
 0x5ba   : > { %v10530_v30 = vpop.eup %10529  ;;  %v4346_v58 = vmul.f32 1.442695, %v4326_v47 }
 0x5bb   : > { %v4373_v54 = vmul.f32 %v10530_v30, %v4309_v17  ;;  %v4127_v39 = vpop.f32.mrf.mxu3 }
 0x5bc   : > { %v4128_v25 = vadd.f32 %v12502_v44, %v4127_v39  ;;  %10531 = vpow2.f32 %v4346_v58 }
 0x5bd   : > { %v4389_v7 = vadd.f32 %v4373_v54, %v4125_v34  ;;  %v4246_v56 = vpop.f32.mrf.mxu0  ;;  %v9030_v34 = vor.u32 %v10091_v20, %v9029_v1  ;;  %v4317_v20 = vld [vmem:[%s11890_s2 + $0x58] sm:$0xff] }
 0x5be   : > { %4278 = vst [vmem:[%s12506_s6 + $0x20] sm:$0xff] %v4128_v25  ;;  %v4247_v0 = vadd.f32 %v12495_v36, %v4246_v56  ;;  %v9021_v56 = vld [vmem:[#allocation25 + $0x30] sm:$0xf] }
 0x5bf   : > { %v4403_v22 = vpack.c.bf16 %v4389_v7, %v4388_v8  ;;  %4656 = vmatpush.bf16.msrb.mxu2 %v9030_v34 }
 0x5c0   : > { %4295 = vst [vmem:[%s12499_s12 + $0x28] sm:$0xff] %v4247_v0  ;;  %v4327_v49 = vmul.f32 0.5, %v4247_v0  ;;  %v10089_v0 = vld [vmem:[#allocation25 + $0x34] sm:$0xf0] }
 0x5c1   : > { %4491 = vmatmul.bf16.gmra.mxu1 %v4403_v22  ;;  %v10088_v22 = vld [vmem:[#allocation25 + $0x34] sm:$0xf] }
 0x5c2   : > { %v4348_v16 = vmul.f32 1.442695, %v4327_v49  ;;  %v10532_v43 = vpop.eup %10531 }
 0x5c3   : > { %v4129_v60 = vpop.f32.mrf.mxu3  ;;  %v4374_v50 = vmul.f32 %v10532_v43, %v4310_v35 }
 0x5c4   : > { %10533 = vpow2.f32 %v4348_v16  ;;  %v4130_v63 = vadd.f32 %v12502_v44, %v4129_v60  ;;  %v4314_v16 = vld [vmem:[%s11890_s2 + $0x40] sm:$0xff] }
 0x5c5   : > { %v4249_v27 = vpop.f32.mrf.mxu0  ;;  %v4390_v55 = vadd.f32 %v4374_v50, %v4128_v25 }
 0x5c6   : > { %4279 = vst [vmem:[%s12506_s6 + $0x28] sm:$0xff] %v4130_v63  ;;  %v4250_v40 = vadd.f32 %v12495_v36, %v4249_v27  ;;  %v9023_v27 = vld [vmem:[#allocation25 + $0x38] sm:$0xf0] }
 0x5c7   : > { %v9026_v14 = vor.u32 %v10088_v22, %v9023_v27  ;;  %v4318_v22 = vld [vmem:[%s11890_s2 + $0x60] sm:$0xff] }
 0x5c8   : > { %4296 = vst [vmem:[%s12499_s12 + $0x30] sm:$0xff] %v4250_v40  ;;  %v4328_v11 = vmul.f32 0.5, %v4250_v40 }
 0x5c9   : > { %4706 = vmatpush.bf16.msrb.mxu3 %v9026_v14 }
 0x5ca   : > { %v10534_v3 = vpop.eup %10533  ;;  %v4350_v18 = vmul.f32 1.442695, %v4328_v11 }
 0x5cb   : > { %v4375_v41 = vmul.f32 %v10534_v3, %v4311_v12  ;;  %v4132_v57 = vpop.f32.mrf.mxu3 }
 0x5cc   : > { %v4133_v28 = vadd.f32 %v12502_v44, %v4132_v57  ;;  %10535 = vpow2.f32 %v4350_v18 }
 0x5cd   : > { %v4391_v10 = vadd.f32 %v4375_v41, %v4130_v63  ;;  %v4251_v42 = vpop.f32.mrf.mxu0  ;;  %v9022_v63 = vor.u32 %v10089_v0, %v9021_v56 }
 0x5ce   : > { %4280 = vst [vmem:[%s12506_s6 + $0x30] sm:$0xff] %v4133_v28  ;;  %v4252_v23 = vadd.f32 %v12495_v36, %v4251_v42  ;;  %v9013_v42 = vld [vmem:[#allocation25 + $0x20] sm:$0xf] }
 0x5cf   : > { %v4404_v33 = vpack.c.bf16 %v4391_v10, %v4390_v55  ;;  %4657 = vmatpush.bf16.msrb.mxu2 %v9022_v63 }
 0x5d0   : > { %4297 = vst [vmem:[%s12499_s12 + $0x38] sm:$0xff] %v4252_v23  ;;  %v4329_v6 = vmul.f32 0.5, %v4252_v23  ;;  %v10087_v23 = vld [vmem:[#allocation25 + $0x24] sm:$0xf0] }
 0x5d1   : > { %4496 = vmatmul.bf16.gmra.mxu1 %v4404_v33  ;;  %v10086_v33 = vld [vmem:[#allocation25 + $0x24] sm:$0xf] }
 0x5d2   : > { %v4352_v29 = vmul.f32 1.442695, %v4329_v6  ;;  %v10536_v38 = vpop.eup %10535 }
 0x5d3   : > { %v4134_v4 = vpop.f32.mrf.mxu3  ;;  %v4376_v59 = vmul.f32 %v10536_v38, %v4312_v53 }
 0x5d4   : > { %10537 = vpow2.f32 %v4352_v29  ;;  %v4135_v5 = vadd.f32 %v12502_v44, %v4134_v4  ;;  %v4316_v29 = vld [vmem:[%s11890_s2 + $0x50] sm:$0xff] }
 0x5d5   : > { %v4254_v13 = vpop.f32.mrf.mxu0  ;;  %v4392_v17 = vadd.f32 %v4376_v59, %v4133_v28 }
 0x5d6   : > { %4281 = vst [vmem:[%s12506_s6 + $0x38] sm:$0xff] %v4135_v5  ;;  %v4255_v15 = vadd.f32 %v12495_v36, %v4254_v13  ;;  %v9015_v13 = vld [vmem:[#allocation25 + $0x28] sm:$0xf0] }
 0x5d7   : > { %v9018_v1 = vor.u32 %v10086_v33, %v9015_v13  ;;  %v10126_v13 = vld [vmem:[#allocation26 + $0xe4] sm:$0xf] }
 0x5d8   : > { %4298 = vst [vmem:[%s12499_s12 + $0x40] sm:$0xff] %v4255_v15  ;;  %v4330_v62 = vmul.f32 0.5, %v4255_v15 }
 0x5d9   : > { %4707 = vmatpush.bf16.msrb.mxu3 %v9018_v1 }
 0x5da   : > { %v10538_v32 = vpop.eup %10537  ;;  %v4354_v61 = vmul.f32 1.442695, %v4330_v62 }
 0x5db   : > { %v4377_v2 = vmul.f32 %v10538_v32, %v4313_v31  ;;  %v4137_v21 = vpop.f32.mrf.mxu3  ;;  %v9005_v32 = vld [vmem:[#allocation25 + $0x10] sm:$0xf] }
 0x5dc   : > { %v4138_v24 = vadd.f32 %v12502_v44, %v4137_v21  ;;  %10539 = vpow2.f32 %v4354_v61  ;;  %v10084_v21 = vld [vmem:[#allocation25 + $0x14] sm:$0xf] }
 0x5dd   : > { %v4393_v47 = vadd.f32 %v4377_v2, %v4135_v5  ;;  %v4256_v48 = vpop.f32.mrf.mxu0  ;;  %v9014_v5 = vor.u32 %v10087_v23, %v9013_v42  ;;  %v10085_v2 = vld [vmem:[#allocation25 + $0x14] sm:$0xf0] }
 0x5de   : > { %4282 = vst [vmem:[%s12506_s6 + $0x40] sm:$0xff] %v4138_v24  ;;  %v4257_v30 = vadd.f32 %v12495_v36, %v4256_v48 }
 0x5df   : > { %v4405_v54 = vpack.c.bf16 %v4393_v47, %v4392_v17  ;;  %4658 = vmatpush.bf16.msrb.mxu2 %v9014_v5  ;;  %v9007_v17 = vld [vmem:[#allocation25 + $0x18] sm:$0xf0]  ;;  %v12588_v5 = vld [vmem:[%s13549_s25] ss:$0 sm:$0xff]  ;;  %s7667_s25 = scalar_lea.hbm %s13553_s10, %s10292_s21 }
 0x5e0   : > { %4299 = vst [vmem:[%s12499_s12 + $0x48] sm:$0xff] %v4257_v30  ;;  %v4331_v39 = vmul.f32 0.5, %v4257_v30  ;;  %v9010_v48 = vor.u32 %v10084_v21, %v9007_v17  ;;  %v10122_v17 = vld [vmem:[#allocation26 + $0xc4] sm:$0xf]  ;;  %s7670_s29 = sshll.u32 %s7667_s25, 4  ;;  %s7671_s29 = int_to_ptr.hbm [resolvable:$true] %s7670_s29 }
 0x5e1   : > { %4501 = vmatmul.bf16.gmra.mxu1 %v4405_v54  ;;  %v8997_v54 = vld [vmem:[#allocation25] sm:$0xf]  ;;  %s11337_s23 = sshra.s32 %s7671_s29, 4  ;;  %s11338_s23 = int_to_ptr.hbm [resolvable:$true] %s11337_s23 }
 0x5e2   : > { %v4356_v58 = vmul.f32 1.442695, %v4331_v39  ;;  %v10540_v49 = vpop.eup %10539  ;;  %4708 = vmatpush.bf16.msrb.mxu3 %v9010_v48  ;;  %v10083_v39 = vld [vmem:[#allocation25 + $0x4] sm:$0xf0]  ;;  %s11339_s19 = scalar_lea.hbm %s11338_s23, 128  ;;  %p11344_p7 = scmp.lt.s32.totalorder %s11338_s23, %s13553_s10 }
 0x5e3   : > { %v4139_v25 = vpop.f32.mrf.mxu3  ;;  %v4378_v43 = vmul.f32 %v10540_v49, %v4314_v16  ;;  %v4319_v16 = vld [vmem:[%s11890_s2 + $0x68] sm:$0xff]  ;;  %p11340_p1 = scmp.ne.s32.totalorder %s11338_s23, %s11339_s19  ;;  %p11345_p9 = scmp.lt.s32.totalorder %s11343_s11, %s11339_s19 }
 0x5e4   : > { %10541 = vpow2.f32 %v4356_v58  ;;  %v4140_v8 = vadd.f32 %v12502_v44, %v4139_v25  ;;  %v8998_v25 = vor.u32 %v10083_v39, %v8997_v54  ;;  %v9287_v54 = vld [vmem:[#allocation26 + $0x1d0] sm:$0xf0]  ;;  %v9157_v39 = vld [vmem:[#allocation26 + $0xc0] sm:$0xf] }
 0x5e5   : > { %v4259_v7 = vpop.f32.mrf.mxu0  ;;  %v4394_v12 = vadd.f32 %v4378_v43, %v4138_v24  ;;  %v9006_v24 = vor.u32 %v10085_v2, %v9005_v32  ;;  %p11341_p3 = pnand %p11340_p1, %p11809_p0  ;;  %p11346_p5 = por %p11345_p9, %p11344_p7 }
 0x5e6   : > { %4283 = vst [vmem:[%s12506_s6 + $0x48] sm:$0xff] %v4140_v8  ;;  %v4260_v60 = vadd.f32 %v12495_v36, %v4259_v7 }
 0x5e7   : > { %4659 = vmatpush.bf16.msrb.mxu2 %v9006_v24  ;;  %p11342_p13 = pneg %p11341_p3 }
 0x5e8   : > { %4300 = vst [vmem:[%s12499_s12 + $0x50] sm:$0xff] %v4260_v60  ;;  %v4332_v9 = vmul.f32 0.5, %v4260_v60 }
 0x5e9   : > { %p11347_p8 = pnand %p11346_p5, %p11342_p13 }
 0x5ea   : > { %v10542_v35 = vpop.eup %10541  ;;  %v4358_v46 = vmul.f32 1.442695, %v4332_v9 }
 0x5eb   : > { %v4379_v40 = vmul.f32 %v10542_v35, %v4315_v19  ;;  %v4142_v45 = vpop.f32.mrf.mxu3  ;;  %4660 = vmatpush.bf16.msrb.mxu2 %v8998_v25  ;;  %v10124_v25 = vld [vmem:[#allocation26 + $0xcc] sm:$0xf0] }
 0x5ec   : > { %v4143_v26 = vadd.f32 %v12502_v44, %v4142_v45  ;;  %10543 = vpow2.f32 %v4358_v46 }
 0x5ed   : > { %v4395_v11 = vadd.f32 %v4379_v40, %v4140_v8  ;;  %v4261_v50 = vpop.f32.mrf.mxu0 }
 0x5ee   : > { %4284 = vst [vmem:[%s12506_s6 + $0x50] sm:$0xff] %v4143_v26  ;;  %v4262_v3 = vadd.f32 %v12495_v36, %v4261_v50  ;;  %v8999_v50 = vld [vmem:[#allocation25 + $0x8] sm:$0xf0] }
 0x5ef   : > { %v4406_v41 = vpack.c.bf16 %v4395_v11, %v4394_v12  ;;  %v10082_v11 = vld [vmem:[#allocation25 + $0x4] sm:$0xf] }
 0x5f0   : > { %4301 = vst [vmem:[%s12499_s12 + $0x58] sm:$0xff] %v4262_v3  ;;  %v4333_v57 = vmul.f32 0.5, %v4262_v3 }
 0x5f1   : > { %4506 = vmatmul.bf16.gmra.mxu1 %v4406_v41  ;;  %v9002_v41 = vor.u32 %v10082_v11, %v8999_v50  ;;  %v10152_v11 = vld [vmem:[#allocation26 + $0x1ac] sm:$0xf0] }
 0x5f2   : > { %v4360_v18 = vmul.f32 1.442695, %v4333_v57  ;;  %v10544_v6 = vpop.eup %10543 }
 0x5f3   : > { %v4144_v28 = vpop.f32.mrf.mxu3  ;;  %v4380_v38 = vmul.f32 %v10544_v6, %v4316_v29  ;;  %4709 = vmatpush.bf16.msrb.mxu3 %v9002_v41 }
 0x5f4   : > { %10545 = vpow2.f32 %v4360_v18  ;;  %v4145_v55 = vadd.f32 %v12502_v44, %v4144_v28 }
 0x5f5   : > { %v4264_v10 = vpop.f32.mrf.mxu0  ;;  %v4396_v31 = vadd.f32 %v4380_v38, %v4143_v26  ;;  %v9173_v38 = vld [vmem:[#allocation26 + $0xe0] sm:$0xf] }
 0x5f6   : > { %4285 = vst [vmem:[%s12506_s6 + $0x58] sm:$0xff] %v4145_v55  ;;  %v4265_v4 = vadd.f32 %v12495_v36, %v4264_v10 }
 0x5f8   : > { %4302 = vst [vmem:[%s12499_s12 + $0x60] sm:$0xff] %v4265_v4  ;;  %v4334_v51 = vmul.f32 0.5, %v4265_v4 }
 0x5fa   : > { %v10546_v53 = vpop.eup %10545  ;;  %v4362_v37 = vmul.f32 1.442695, %v4334_v51  ;;  %v9303_v51 = vld [vmem:[#allocation26 + $0x1f0] sm:$0xf0] }
 0x5fb   : > { %v4381_v15 = vmul.f32 %v10546_v53, %v4317_v20  ;;  %v4147_v34 = vpop.f32.mrf.mxu3  ;;  %v10158_v20 = vld [vmem:[#allocation26 + $0x1e4] sm:$0xf] }
 0x5fc   : > { %v4148_v52 = vadd.f32 %v12502_v44, %v4147_v34  ;;  %10547 = vpow2.f32 %v4362_v37  ;;  %v9306_v53 = vor.u32 %v10158_v20, %v9303_v51  ;;  %v9301_v34 = vld [vmem:[#allocation26 + $0x1e0] sm:$0xf]  ;;  %v10160_v37 = vld [vmem:[#allocation26 + $0x1ec] sm:$0xf0] }
 0x5fd   : > { %v4397_v62 = vadd.f32 %v4381_v15, %v4145_v55  ;;  %v4266_v59 = vpop.f32.mrf.mxu0  ;;  %v4320_v55 = vld [vmem:[%s11890_s2 + $0x70] sm:$0xff]  ;;  %v10128_v15 = vld [vmem:[#allocation26 + $0xec] sm:$0xf0] }
 0x5fe   : > { %4286 = vst [vmem:[%s12506_s6 + $0x60] sm:$0xff] %v4148_v52  ;;  %v4267_v61 = vadd.f32 %v12495_v36, %v4266_v59  ;;  %5340 = vmatpush.bf16.msra.mxu3 %v9306_v53  ;;  %v10148_v20 = vld [vmem:[#allocation26 + $0x18c] sm:$0xf0] }
 0x5ff   : > { %v4407_v47 = vpack.c.bf16 %v4397_v62, %v4396_v31  ;;  %v9302_v31 = vor.u32 %v10160_v37, %v9301_v34 }
 0x600   : > { %4303 = vst [vmem:[%s12499_s12 + $0x68] sm:$0xff] %v4267_v61  ;;  %v4335_v30 = vmul.f32 0.5, %v4267_v61 }
 0x601   : > { %4511 = vmatmul.bf16.gmra.mxu1 %v4407_v47  ;;  %v9159_v47 = vld [vmem:[#allocation26 + $0xd0] sm:$0xf0] }
 0x602   : > { %v4364_v58 = vmul.f32 1.442695, %v4335_v30  ;;  %v10548_v0 = vpop.eup %10547  ;;  %5242 = vmatpush.bf16.msra.mxu1 %v9302_v31  ;;  %v9162_v48 = vor.u32 %v10122_v17, %v9159_v47  ;;  %v10154_v30 = vld [vmem:[#allocation26 + $0x1c4] sm:$0xf]  ;;  %v10112_v47 = vld [vmem:[#allocation26 + $0x6c] sm:$0xf0] }
 0x603   : > { %v4149_v8 = vpop.f32.mrf.mxu3  ;;  %v4382_v63 = vmul.f32 %v10548_v0, %v4318_v22 }
 0x604   : > { %10549 = vpow2.f32 %v4364_v58  ;;  %v4150_v7 = vadd.f32 %v12502_v44, %v4149_v8  ;;  %v9290_v58 = vor.u32 %v10154_v30, %v9287_v54  ;;  %v9285_v8 = vld [vmem:[#allocation26 + $0x1c0] sm:$0xf]  ;;  %v10144_v30 = vld [vmem:[#allocation26 + $0x16c] sm:$0xf0] }
 0x605   : > { %v4269_v56 = vpop.f32.mrf.mxu0  ;;  %v4398_v35 = vadd.f32 %v4382_v63, %v4148_v52  ;;  %v9174_v52 = vor.u32 %v10128_v15, %v9173_v38 }
 0x606   : > { %4287 = vst [vmem:[%s12506_s6 + $0x68] sm:$0xff] %v4150_v7  ;;  %v4270_v49 = vadd.f32 %v12495_v36, %v4269_v56  ;;  %v9158_v56 = vor.u32 %v10124_v25, %v9157_v39  ;;  %5341 = vmatpush.bf16.msra.mxu3 %v9290_v58 }
 0x607   : > { %5193 = vmatpush.bf16.msra.mxu0 %v9174_v52 }
 0x608   : > { %4304 = vst [vmem:[%s12499_s12 + $0x70] sm:$0xff] %v4270_v49  ;;  %v4336_v60 = vmul.f32 0.5, %v4270_v49 }
 0x60a   : > { %v10550_v27 = vpop.eup %10549  ;;  %v4366_v9 = vmul.f32 1.442695, %v4336_v60 }
 0x60b   : > { %v4383_v14 = vmul.f32 %v10550_v27, %v4319_v16  ;;  %v4152_v19 = vpop.f32.mrf.mxu3  ;;  %5194 = vmatpush.bf16.msra.mxu0 %v9158_v56 }
 0x60c   : > { %v4153_v43 = vadd.f32 %v12502_v44, %v4152_v19  ;;  %10551 = vpow2.f32 %v4366_v9  ;;  %v10118_v19 = vld [vmem:[#allocation26 + $0xa4] sm:$0xf]  ;;  %v9143_v9 = vld [vmem:[#allocation26 + $0xb0] sm:$0xf0] }
 0x60d   : > { %v4399_v40 = vadd.f32 %v4383_v14, %v4150_v7  ;;  %v4271_v45 = vpop.f32.mrf.mxu0  ;;  %v10156_v7 = vld [vmem:[#allocation26 + $0x1cc] sm:$0xf0] }
 0x60e   : > { %4288 = vst [vmem:[%s12506_s6 + $0x70] sm:$0xff] %v4153_v43  ;;  %v4272_v46 = vadd.f32 %v12495_v36, %v4271_v45  ;;  %v4321_v36 = vld [vmem:[%s11890_s2 + $0x78] sm:$0xff]  ;;  %v9286_v0 = vor.u32 %v10156_v7, %v9285_v8  ;;  %v9141_v45 = vld [vmem:[#allocation26 + $0xa0] sm:$0xf]  ;;  %s12992_s2 = scalar_lea.vmem [#allocation29], %s8015_s4 }
 0x60f   : > { %v4408_v26 = vpack.c.bf16 %v4399_v40, %v4398_v35  ;;  %v10150_v35 = vld [vmem:[#allocation26 + $0x1a4] sm:$0xf]  ;;  %v9271_v40 = vld [vmem:[#allocation26 + $0x1b0] sm:$0xf0] }
 0x610   : > { %4305 = vst [vmem:[%s12499_s12 + $0x78] sm:$0xff] %v4272_v46  ;;  %v4337_v12 = vmul.f32 0.5, %v4272_v46  ;;  %5243 = vmatpush.bf16.msra.mxu1 %v9286_v0  ;;  %v9274_v46 = vor.u32 %v10150_v35, %v9271_v40  ;;  %v10140_v35 = vld [vmem:[#allocation26 + $0x14c] sm:$0xf0] }
 0x611   : > { %4516 = vmatmul.bf16.gmra.mxu1 %v4408_v26  ;;  %v10120_v26 = vld [vmem:[#allocation26 + $0xac] sm:$0xf0] }
 0x612   : > { %v4368_v3 = vmul.f32 1.442695, %v4337_v12  ;;  %v10552_v28 = vpop.eup %10551  ;;  %v9269_v12 = vld [vmem:[#allocation26 + $0x1a0] sm:$0xf]  ;;  %v9142_v50 = vor.u32 %v10120_v26, %v9141_v45  ;;  %5342 = vmatpush.bf16.msra.mxu3 %v9274_v46 }
 0x613   : > { %v4154_v57 = vpop.f32.mrf.mxu3  ;;  %v4384_v10 = vmul.f32 %v10552_v28, %v4320_v55 }
 0x614   : > { %10553 = vpow2.f32 %v4368_v3  ;;  %v4155_v18 = vadd.f32 %v12502_v44, %v4154_v57  ;;  %v9175_v44 = vld [vmem:[#allocation26 + $0xf0] sm:$0xf0]  ;;  %v9270_v3 = vor.u32 %v10152_v11, %v9269_v12  ;;  %5195 = vmatpush.bf16.msra.mxu0 %v9142_v50 }
 0x615   : > { %v4400_v33 = vadd.f32 %v4384_v10, %v4153_v43  ;;  %v9178_v1 = vor.u32 %v10126_v13, %v9175_v44  ;;  %v9146_v43 = vor.u32 %v10118_v19, %v9143_v9  ;;  %v10116_v44 = vld [vmem:[#allocation26 + $0x8c] sm:$0xf0] }
 0x616   : > { %4289 = vst [vmem:[%s12506_s6 + $0x78] sm:$0xff] %v4155_v18  ;;  %5244 = vmatpush.bf16.msra.mxu1 %v9270_v3  ;;  %v10108_v9 = vld [vmem:[#allocation26 + $0x4c] sm:$0xf0]  ;;  %s13339_s6 = scalar_lea.sflag [#allocation31], %s896_s30 }
 0x617   : > { %5291 = vmatpush.bf16.msra.mxu2 %v9178_v1  ;;  %v9253_v1 = vld [vmem:[#allocation26 + $0x180] sm:$0xf] }
 0x618   : > { %v9254_v38 = vor.u32 %v10148_v20, %v9253_v1 }
 0x61a   : > { %v10554_v42 = vpop.eup %10553  ;;  %5245 = vmatpush.bf16.msra.mxu1 %v9254_v38 }
 0x61b   : > { %v4385_v23 = vmul.f32 %v10554_v42, %v4321_v36  ;;  %5292 = vmatpush.bf16.msra.mxu2 %v9162_v48  ;;  %v10114_v42 = vld [vmem:[#allocation26 + $0x84] sm:$0xf]  ;;  %v9237_v48 = vld [vmem:[#allocation26 + $0x160] sm:$0xf] }
 0x61c   : > { %v9238_v39 = vor.u32 %v10144_v30, %v9237_v48 }
 0x61d   : > { %v4401_v6 = vadd.f32 %v4385_v23, %v4155_v18  ;;  %v9127_v23 = vld [vmem:[#allocation26 + $0x90] sm:$0xf0] }
 0x61e   : > { %5246 = vmatpush.bf16.msra.mxu1 %v9238_v39 }
 0x61f   : > { %v4409_v29 = vpack.c.bf16 %v4401_v6, %v4400_v33  ;;  %5293 = vmatpush.bf16.msra.mxu2 %v9146_v43  ;;  %v9130_v33 = vor.u32 %v10114_v42, %v9127_v23  ;;  %v10146_v6 = vld [vmem:[#allocation26 + $0x184] sm:$0xf]  ;;  %v9221_v43 = vld [vmem:[#allocation26 + $0x140] sm:$0xf]  ;;  %v10104_v42 = vld [vmem:[#allocation26 + $0x2c] sm:$0xf0] }
 0x620   : > { %v9222_v45 = vor.u32 %v10140_v35, %v9221_v43  ;;  %v9167_v43 = vld [vmem:[#allocation26 + $0xd8] sm:$0xf0] }
 0x621   : > { %4521 = vmatmul.bf16.gmra.mxu1 %v4409_v29  ;;  %v9255_v29 = vld [vmem:[#allocation26 + $0x190] sm:$0xf0] }
 0x622   : > { %v9258_v13 = vor.u32 %v10146_v6, %v9255_v29  ;;  %5247 = vmatpush.bf16.msra.mxu1 %v9222_v45  ;;  %v9205_v6 = vld [vmem:[#allocation26 + $0x120] sm:$0xf]  ;;  %v10136_v29 = vld [vmem:[#allocation26 + $0x12c] sm:$0xf0] }
 0x623   : > { %5294 = vmatpush.bf16.msra.mxu2 %v9130_v33 }
 0x624   : > { %5343 = vmatpush.bf16.msra.mxu3 %v9258_v13  ;;  %v9206_v13 = vor.u32 %v10136_v29, %v9205_v6 }
 0x626   : > { %5248 = vmatpush.bf16.msra.mxu1 %v9206_v13 }
 0x62e   : > { %v4487_v4 = vpop.f32.mrf.mxu1 }
 0x62f   : > { %v4488_v62 = vadd.f32 %v12588_v5, %v4487_v4  ;;  %v9125_v4 = vld [vmem:[#allocation26 + $0x80] sm:$0xf] }
 0x630   : > { %v9126_v51 = vor.u32 %v10116_v44, %v9125_v4  ;;  %v10098_v4 = vld [vmem:[#allocation26 + $0x4] sm:$0xf]  ;;  %v9063_v44 = vld [vmem:[#allocation26 + $0x10] sm:$0xf0] }
 0x631   : > { %v4527_v2 = vmax.f32 %v4488_v62, 0.0  ;;  %v9066_v1 = vor.u32 %v10098_v4, %v9063_v44 }
 0x632   : > { %5196 = vmatpush.bf16.msra.mxu0 %v9126_v51 }
 0x636   : > { %v4489_v59 = vpop.f32.mrf.mxu1 }
 0x637   : > { %v4490_v32 = vadd.f32 %v12588_v5, %v4489_v59  ;;  %v10110_v59 = vld [vmem:[#allocation26 + $0x64] sm:$0xf] }
 0x639   : > { %v4528_v21 = vmax.f32 %v4490_v32, 0.0  ;;  %v9111_v32 = vld [vmem:[#allocation26 + $0x70] sm:$0xf0] }
 0x63b   : > { %v4543_v61 = vpack.c.bf16 %v4528_v21, %v4527_v2  ;;  %v9114_v2 = vor.u32 %v10110_v59, %v9111_v32  ;;  %v10142_v21 = vld [vmem:[#allocation26 + $0x164] sm:$0xf]  ;;  %v10100_v32 = vld [vmem:[#allocation26 + $0xc] sm:$0xf0] }
 0x63d   : > { %4661 = vmatmul.bf16.vlgmr.msrb.gmra.mxu2 %v4543_v61  ;;  %4710 = vmatmul.bf16.vlgmr.msrb.gmra.mxu3 %v4543_v61  ;;  %v9239_v61 = vld [vmem:[#allocation26 + $0x170] sm:$0xf0] }
 0x63e   : > { %v4492_v24 = vpop.f32.mrf.mxu1  ;;  %v9242_v17 = vor.u32 %v10142_v21, %v9239_v61  ;;  %5295 = vmatpush.bf16.msra.mxu2 %v9114_v2  ;;  %v9189_v2 = vld [vmem:[#allocation26 + $0x100] sm:$0xf]  ;;  %v10132_v21 = vld [vmem:[#allocation26 + $0x10c] sm:$0xf0] }
 0x63f   : > { %v4493_v22 = vadd.f32 %v12588_v5, %v4492_v24  ;;  %v9109_v24 = vld [vmem:[#allocation26 + $0x60] sm:$0xf] }
 0x640   : > { %v9110_v54 = vor.u32 %v10112_v47, %v9109_v24  ;;  %5344 = vmatpush.bf16.msra.mxu3 %v9242_v17  ;;  %v9190_v17 = vor.u32 %v10132_v21, %v9189_v2 }
 0x641   : > { %v4529_v60 = vmax.f32 %v4493_v22, 0.0 }
 0x642   : > { %5197 = vmatpush.bf16.msra.mxu0 %v9110_v54  ;;  %5249 = vmatpush.bf16.msra.mxu1 %v9190_v17 }
 0x646   : > { %v4494_v49 = vpop.f32.mrf.mxu1 }
 0x647   : > { %v4495_v16 = vadd.f32 %v12588_v5, %v4494_v49  ;;  %v10106_v49 = vld [vmem:[#allocation26 + $0x44] sm:$0xf] }
 0x649   : > { %v4530_v63 = vmax.f32 %v4495_v16, 0.0  ;;  %v9095_v16 = vld [vmem:[#allocation26 + $0x50] sm:$0xf0] }
 0x64b   : > { %v4544_v27 = vpack.c.bf16 %v4530_v63, %v4529_v60  ;;  %v9098_v60 = vor.u32 %v10106_v49, %v9095_v16  ;;  %v10138_v63 = vld [vmem:[#allocation26 + $0x144] sm:$0xf]  ;;  %v10129_v49 = vld [vmem:[#allocation26 + $0xf4] sm:$0xf0]  ;;  %v9309_v16 = vld [vmem:[#allocation26 + $0x1e8] sm:$0xf] }
 0x64d   : > { %4666 = vmatmul.bf16.gmra.mxu2 %v4544_v27  ;;  %4715 = vmatmul.bf16.gmra.mxu3 %v4544_v27  ;;  %v9223_v27 = vld [vmem:[#allocation26 + $0x150] sm:$0xf0] }
 0x64e   : > { %v4497_v14 = vpop.f32.mrf.mxu1  ;;  %v9226_v19 = vor.u32 %v10138_v63, %v9223_v27  ;;  %5296 = vmatpush.bf16.msra.mxu2 %v9098_v60  ;;  %v10161_v60 = vld [vmem:[#allocation26 + $0x1f4] sm:$0xf0]  ;;  %v4567_v27 = vld [vmem:[%s13550_s16] sm:$0x3] }
 0x64f   : > { %v4498_v41 = vadd.f32 %v12588_v5, %v4497_v14  ;;  %v9093_v14 = vld [vmem:[#allocation26 + $0x40] sm:$0xf]  ;;  %v12611_v45 = vperm.slane %v4567_v27, 1 }
 0x650   : > { %v9094_v40 = vor.u32 %v10108_v9, %v9093_v14  ;;  %5345 = vmatpush.bf16.msra.mxu3 %v9226_v19  ;;  %v10123_v9 = vld [vmem:[#allocation26 + $0xcc] sm:$0xf] }
 0x651   : > { %v4531_v28 = vmax.f32 %v4498_v41, 0.0  ;;  %v10102_v41 = vld [vmem:[#allocation26 + $0x24] sm:$0xf]  ;;  %v9170_v35 = vor.u32 %v10123_v9, %v9167_v43  ;;  %v10149_v9 = vld [vmem:[#allocation26 + $0x194] sm:$0xf0] }
 0x652   : > { %5198 = vmatpush.bf16.msra.mxu0 %v9094_v40  ;;  %v12609_v40 = vperm.slane %v4567_v27, 0  ;;  %v10117_v27 = vld [vmem:[#allocation26 + $0x94] sm:$0xf0] }
 0x656   : > { %v4499_v57 = vpop.f32.mrf.mxu1 }
 0x657   : > { %v4500_v18 = vadd.f32 %v12588_v5, %v4499_v57  ;;  %v9079_v57 = vld [vmem:[#allocation26 + $0x30] sm:$0xf0] }
 0x659   : > { %v4532_v55 = vmax.f32 %v4500_v18, 0.0  ;;  %v10134_v18 = vld [vmem:[#allocation26 + $0x124] sm:$0xf] }
 0x65b   : > { %v4545_v36 = vpack.c.bf16 %v4532_v55, %v4531_v28  ;;  %v9082_v55 = vor.u32 %v10102_v41, %v9079_v57  ;;  %v10157_v57 = vld [vmem:[#allocation26 + $0x1d4] sm:$0xf0] }
 0x65d   : > { %4671 = vmatmul.bf16.gmra.mxu2 %v4545_v36  ;;  %4720 = vmatmul.bf16.gmra.mxu3 %v4545_v36  ;;  %v9207_v36 = vld [vmem:[#allocation26 + $0x130] sm:$0xf0] }
 0x65e   : > { %v4502_v10 = vpop.f32.mrf.mxu1  ;;  %v9210_v23 = vor.u32 %v10134_v18, %v9207_v36  ;;  %5297 = vmatpush.bf16.msra.mxu2 %v9082_v55 }
 0x65f   : > { %v4503_v53 = vadd.f32 %v12588_v5, %v4502_v10  ;;  %v9077_v10 = vld [vmem:[#allocation26 + $0x20] sm:$0xf] }
 0x660   : > { %v9078_v33 = vor.u32 %v10104_v42, %v9077_v10  ;;  %5346 = vmatpush.bf16.msra.mxu3 %v9210_v23 }
 0x661   : > { %v4533_v37 = vmax.f32 %v4503_v53, 0.0 }
 0x662   : > { %5199 = vmatpush.bf16.msra.mxu0 %v9078_v33  ;;  %5298 = vmatpush.bf16.msra.mxu2 %v9066_v1 }
 0x666   : > { %v4504_v15 = vpop.f32.mrf.mxu1 }
 0x667   : > { %v4505_v34 = vadd.f32 %v12588_v5, %v4504_v15 }
 0x669   : > { %v4534_v52 = vmax.f32 %v4505_v34, 0.0 }
 0x66b   : > { %v4546_v31 = vpack.c.bf16 %v4534_v52, %v4533_v37  ;;  %v10130_v52 = vld [vmem:[#allocation26 + $0x104] sm:$0xf] }
 0x66d   : > { %4676 = vmatmul.bf16.gmra.mxu2 %v4546_v31  ;;  %4725 = vmatmul.bf16.gmra.mxu3 %v4546_v31  ;;  %v9191_v31 = vld [vmem:[#allocation26 + $0x110] sm:$0xf0] }
 0x66e   : > { %v4507_v62 = vpop.f32.mrf.mxu1  ;;  %v9194_v59 = vor.u32 %v10130_v52, %v9191_v31  ;;  %v9149_v52 = vld [vmem:[#allocation26 + $0xa8] sm:$0xf]  ;;  %v10121_v31 = vld [vmem:[#allocation26 + $0xb4] sm:$0xf0] }
 0x66f   : > { %v4508_v58 = vadd.f32 %v12588_v5, %v4507_v62  ;;  %v9061_v62 = vld [vmem:[#allocation26] sm:$0xf] }
 0x670   : > { %v9062_v24 = vor.u32 %v10100_v32, %v9061_v62  ;;  %5347 = vmatpush.bf16.msra.mxu3 %v9194_v59  ;;  %v9277_v62 = vld [vmem:[#allocation26 + $0x1a8] sm:$0xf]  ;;  %v9150_v59 = vor.u32 %v10121_v31, %v9149_v52  ;;  %v10153_v32 = vld [vmem:[#allocation26 + $0x1b4] sm:$0xf0] }
 0x671   : > { %v4535_v7 = vmax.f32 %v4508_v58, 0.0  ;;  %v10127_v58 = vld [vmem:[#allocation26 + $0xec] sm:$0xf]  ;;  %v9278_v2 = vor.u32 %v10153_v32, %v9277_v62 }
 0x672   : > { %5200 = vmatpush.bf16.msra.mxu0 %v9062_v24 }
 0x676   : > { %v4509_v25 = vpop.f32.mrf.mxu1 }
 0x677   : > { %v4510_v8 = vadd.f32 %v12588_v5, %v4509_v25  ;;  %v9183_v25 = vld [vmem:[#allocation26 + $0xf8] sm:$0xf0] }
 0x679   : > { %v4536_v56 = vmax.f32 %v4510_v8, 0.0  ;;  %v9186_v8 = vor.u32 %v10127_v58, %v9183_v25 }
 0x67b   : > { %v4547_v0 = vpack.c.bf16 %v4536_v56, %v4535_v7  ;;  %5487 = vmatpush.bf16.msrb.mxu2 %v9186_v8  ;;  %v10159_v7 = vld [vmem:[#allocation26 + $0x1ec] sm:$0xf]  ;;  %v9311_v56 = vld [vmem:[#allocation26 + $0x1f8] sm:$0xf0] }
 0x67d   : > { %4681 = vmatmul.bf16.gmra.mxu2 %v4547_v0  ;;  %4730 = vmatmul.bf16.gmra.mxu3 %v4547_v0  ;;  %v9181_v0 = vld [vmem:[#allocation26 + $0xe8] sm:$0xf] }
 0x67e   : > { %v4512_v22 = vpop.f32.mrf.mxu1  ;;  %v9182_v63 = vor.u32 %v10129_v49, %v9181_v0  ;;  %v10115_v0 = vld [vmem:[#allocation26 + $0x8c] sm:$0xf] }
 0x67f   : > { %v4513_v46 = vadd.f32 %v12588_v5, %v4512_v22  ;;  %v9314_v22 = vor.u32 %v10159_v7, %v9311_v56  ;;  %5488 = vmatpush.bf16.msrb.mxu2 %v9170_v35 }
 0x680   : > { %5389 = vmatpush.bf16.msrb.mxu0 %v9182_v63 }
 0x681   : > { %v4537_v11 = vmax.f32 %v4513_v46, 0.0  ;;  %5536 = vmatpush.bf16.msrb.mxu3 %v9314_v22  ;;  %v10155_v46 = vld [vmem:[#allocation26 + $0x1cc] sm:$0xf]  ;;  %v9135_v22 = vld [vmem:[#allocation26 + $0x98] sm:$0xf0] }
 0x682   : > { %v9138_v49 = vor.u32 %v10115_v0, %v9135_v22  ;;  %v9101_v0 = vld [vmem:[#allocation26 + $0x48] sm:$0xf]  ;;  %v10109_v22 = vld [vmem:[#allocation26 + $0x54] sm:$0xf0] }
 0x686   : > { %v4514_v26 = vpop.f32.mrf.mxu1 }
 0x687   : > { %v4515_v12 = vadd.f32 %v12588_v5, %v4514_v26  ;;  %v9295_v26 = vld [vmem:[#allocation26 + $0x1d8] sm:$0xf0] }
 0x689   : > { %v4538_v50 = vmax.f32 %v4515_v12, 0.0  ;;  %v9298_v12 = vor.u32 %v10155_v46, %v9295_v26 }
 0x68b   : > { %v4548_v3 = vpack.c.bf16 %v4538_v50, %v4537_v11  ;;  %v9165_v11 = vld [vmem:[#allocation26 + $0xc8] sm:$0xf]  ;;  %v10125_v50 = vld [vmem:[#allocation26 + $0xd4] sm:$0xf0]  ;;  %5537 = vmatpush.bf16.msrb.mxu3 %v9298_v12 }
 0x68c   : > { %v9166_v41 = vor.u32 %v10125_v50, %v9165_v11 }
 0x68d   : > { %4686 = vmatmul.bf16.gmra.mxu2 %v4548_v3  ;;  %4735 = vmatmul.bf16.gmra.mxu3 %v4548_v3  ;;  %v9293_v3 = vld [vmem:[#allocation26 + $0x1c8] sm:$0xf] }
 0x68e   : > { %v4517_v28 = vpop.f32.mrf.mxu1  ;;  %v9294_v18 = vor.u32 %v10157_v57, %v9293_v3  ;;  %5390 = vmatpush.bf16.msrb.mxu0 %v9166_v41 }
 0x68f   : > { %v4518_v20 = vadd.f32 %v12588_v5, %v4517_v28 }
 0x691   : > { %v4539_v53 = vmax.f32 %v4518_v20, 0.0 }
 0x692   : > { %5391 = vmatpush.bf16.msrb.mxu0 %v9150_v59 }
 0x696   : > { %v4519_v51 = vpop.f32.mrf.mxu1 }
 0x697   : > { %v4520_v38 = vadd.f32 %v12588_v5, %v4519_v51  ;;  %v10119_v51 = vld [vmem:[#allocation26 + $0xac] sm:$0xf] }
 0x699   : > { %v4540_v15 = vmax.f32 %v4520_v38, 0.0  ;;  %v9151_v38 = vld [vmem:[#allocation26 + $0xb8] sm:$0xf0] }
 0x69b   : > { %v4549_v34 = vpack.c.bf16 %v4540_v15, %v4539_v53  ;;  %v9154_v53 = vor.u32 %v10119_v51, %v9151_v38  ;;  %v10151_v15 = vld [vmem:[#allocation26 + $0x1ac] sm:$0xf]  ;;  %v9245_v51 = vld [vmem:[#allocation26 + $0x168] sm:$0xf] }
 0x69d   : > { %4691 = vmatmul.bf16.gmra.mxu2 %v4549_v34  ;;  %4740 = vmatmul.bf16.gmra.mxu3 %v4549_v34  ;;  %v9279_v34 = vld [vmem:[#allocation26 + $0x1b8] sm:$0xf0] }
 0x69e   : > { %v4522_v37 = vpop.f32.mrf.mxu1  ;;  %5489 = vmatpush.bf16.msrb.mxu2 %v9154_v53  ;;  %v10145_v53 = vld [vmem:[#allocation26 + $0x174] sm:$0xf0] }
 0x69f   : > { %v4523_v61 = vadd.f32 %v12588_v5, %v4522_v37  ;;  %v9282_v37 = vor.u32 %v10151_v15, %v9279_v34  ;;  %v9246_v15 = vor.u32 %v10145_v53, %v9245_v51 }
 0x6a1   : > { %v4541_v30 = vmax.f32 %v4523_v61, 0.0  ;;  %5538 = vmatpush.bf16.msrb.mxu3 %v9282_v37 }
 0x6a2   : > { %5490 = vmatpush.bf16.msrb.mxu2 %v9138_v49  ;;  %v9229_v49 = vld [vmem:[#allocation26 + $0x148] sm:$0xf] }
 0x6a6   : > { %v4524_v47 = vpop.f32.mrf.mxu1 }
 0x6a7   : > { %v4525_v48 = vadd.f32 %v12588_v5, %v4524_v47  ;;  %v9310_v5 = vor.u32 %v10161_v60, %v9309_v16  ;;  %v10147_v16 = vld [vmem:[#allocation26 + $0x18c] sm:$0xf]  ;;  %v9263_v60 = vld [vmem:[#allocation26 + $0x198] sm:$0xf0] }
 0x6a8   : > { %v9266_v63 = vor.u32 %v10147_v16, %v9263_v60  ;;  %v9102_v16 = vor.u32 %v10109_v22, %v9101_v0  ;;  %v10141_v60 = vld [vmem:[#allocation26 + $0x154] sm:$0xf0]  ;;  %v9197_v22 = vld [vmem:[#allocation26 + $0x108] sm:$0xf] }
 0x6a9   : > { %v4542_v54 = vmax.f32 %v4525_v48, 0.0  ;;  %5438 = vmatpush.bf16.msrb.mxu1 %v9310_v5  ;;  %v9133_v5 = vld [vmem:[#allocation26 + $0x88] sm:$0xf] }
 0x6aa   : > { %5539 = vmatpush.bf16.msrb.mxu3 %v9266_v63  ;;  %v9230_v63 = vor.u32 %v10141_v60, %v9229_v49  ;;  %v10133_v49 = vld [vmem:[#allocation26 + $0x114] sm:$0xf0] }
 0x6ab   : > { %v4550_v39 = vpack.c.bf16 %v4542_v54, %v4541_v30 }
 0x6ad   : > { %4696 = vmatmul.bf16.gmra.mxu2 %v4550_v39  ;;  %4745 = vmatmul.bf16.gmra.mxu3 %v4550_v39 }
 0x6ae   : > { %5439 = vmatpush.bf16.msrb.mxu1 %v9294_v18 }
 0x6b2   : > { %5440 = vmatpush.bf16.msrb.mxu1 %v9278_v2 }
 0x6c0   : > { %v4662_v14 = vpop.f32.mrf.mxu2  ;;  %v4711_v19 = vpop.f32.mrf.mxu3 }
 0x6c1   : > { %v4663_v28 = vadd.f32 %v4662_v14, %v12609_v40  ;;  %v4712_v55 = vadd.f32 %v4711_v19, %v12611_v45  ;;  %v9261_v14 = vld [vmem:[#allocation26 + $0x188] sm:$0xf]  ;;  %v9134_v19 = vor.u32 %v10117_v27, %v9133_v5 }
 0x6c2   : > { %v9262_v43 = vor.u32 %v10149_v9, %v9261_v14 }
 0x6c3   : > { %v4751_v33 = vmax.f32 %v4663_v28, 0.0  ;;  %v4752_v6 = vmax.f32 %v4712_v55, 0.0  ;;  %5392 = vmatpush.bf16.msrb.mxu0 %v9134_v19 }
 0x6c4   : > { %5441 = vmatpush.bf16.msrb.mxu1 %v9262_v43 }
 0x6c8   : > { %v4664_v36 = vpop.f32.mrf.mxu2  ;;  %v4713_v10 = vpop.f32.mrf.mxu3  ;;  %5442 = vmatpush.bf16.msrb.mxu1 %v9246_v15 }
 0x6c9   : > { %v4665_v42 = vadd.f32 %v4664_v36, %v12609_v40  ;;  %v4714_v23 = vadd.f32 %v4713_v10, %v12611_v45 }
 0x6cb   : > { %v4753_v29 = vmax.f32 %v4665_v42, 0.0  ;;  %v4754_v4 = vmax.f32 %v4714_v23, 0.0  ;;  %v10111_v42 = vld [vmem:[#allocation26 + $0x6c] sm:$0xf]  ;;  %v9119_v23 = vld [vmem:[#allocation26 + $0x78] sm:$0xf0] }
 0x6cc   : > { %5443 = vmatpush.bf16.msrb.mxu1 %v9230_v63 }
 0x6cd   : > { %v12617_v13 = vpack.c.bf16 %v4753_v29, %v4751_v33  ;;  %v12619_v44 = vpack.c.bf16 %v4754_v4, %v4752_v6  ;;  %v9122_v33 = vor.u32 %v10111_v42, %v9119_v23  ;;  %v10143_v6 = vld [vmem:[#allocation26 + $0x16c] sm:$0xf]  ;;  %v9247_v29 = vld [vmem:[#allocation26 + $0x178] sm:$0xf0] }
 0x6ce   : > { %v9250_v4 = vor.u32 %v10143_v6, %v9247_v29  ;;  %v9215_v42 = vld [vmem:[#allocation26 + $0x138] sm:$0xf0]  ;;  %v10105_v6 = vld [vmem:[#allocation26 + $0x34] sm:$0xf0]  ;;  %v9213_v29 = vld [vmem:[#allocation26 + $0x128] sm:$0xf] }
 0x6cf   : > { %5201 = vmatmul.bf16.vlgmr.msra.gmra.mxu0 %v12617_v13  ;;  %5250 = vmatmul.bf16.vlgmr.msra.gmra.mxu1 %v12619_v44 }
 0x6d0   : > { %5299 = vmatmul.bf16.vlgmr.msra.gmra.mxu2 %v12617_v13  ;;  %5348 = vmatmul.bf16.vlgmr.msra.gmra.mxu3 %v12619_v44  ;;  %v4667_v1 = vpop.f32.mrf.mxu2  ;;  %v4716_v20 = vpop.f32.mrf.mxu3 }
 0x6d1   : > { %v4668_v21 = vadd.f32 %v4667_v1, %v12609_v40  ;;  %v4717_v61 = vadd.f32 %v4716_v20, %v12611_v45  ;;  %5491 = vmatpush.bf16.msrb.mxu2 %v9122_v33  ;;  %v9117_v1 = vld [vmem:[#allocation26 + $0x68] sm:$0xf]  ;;  %v10113_v20 = vld [vmem:[#allocation26 + $0x74] sm:$0xf0]  ;;  %5540 = vmatpush.bf16.msrb.mxu3 %v9250_v4 }
 0x6d2   : > { %v9118_v38 = vor.u32 %v10113_v20, %v9117_v1  ;;  %v9085_v33 = vld [vmem:[#allocation26 + $0x28] sm:$0xf]  ;;  %v10137_v1 = vld [vmem:[#allocation26 + $0x134] sm:$0xf0] }
 0x6d3   : > { %v4755_v30 = vmax.f32 %v4668_v21, 0.0  ;;  %v4756_v54 = vmax.f32 %v4717_v61, 0.0  ;;  %v9086_v4 = vor.u32 %v10105_v6, %v9085_v33  ;;  %v9214_v20 = vor.u32 %v10137_v1, %v9213_v29 }
 0x6d4   : > { %5393 = vmatpush.bf16.msrb.mxu0 %v9118_v38 }
 0x6d5   : > { %5444 = vmatpush.bf16.msrb.mxu1 %v9214_v20 }
 0x6d8   : > { %v4669_v24 = vpop.f32.mrf.mxu2  ;;  %v4718_v17 = vpop.f32.mrf.mxu3  ;;  %5394 = vmatpush.bf16.msrb.mxu0 %v9102_v16  ;;  %v9198_v16 = vor.u32 %v10133_v49, %v9197_v22 }
 0x6d9   : > { %v4670_v47 = vadd.f32 %v4669_v24, %v12609_v40  ;;  %v4719_v48 = vadd.f32 %v4718_v17, %v12611_v45 }
 0x6da   : > { %5445 = vmatpush.bf16.msrb.mxu1 %v9198_v16 }
 0x6db   : > { %v4757_v39 = vmax.f32 %v4670_v47, 0.0  ;;  %v4758_v58 = vmax.f32 %v4719_v48, 0.0 }
 0x6dc   : > { %5395 = vmatpush.bf16.msrb.mxu0 %v9086_v4 }
 0x6dd   : > { %v12629_v25 = vpack.c.bf16 %v4757_v39, %v4755_v30  ;;  %v12631_v8 = vpack.c.bf16 %v4758_v58, %v4756_v54  ;;  %v10107_v30 = vld [vmem:[#allocation26 + $0x4c] sm:$0xf]  ;;  %v9103_v54 = vld [vmem:[#allocation26 + $0x58] sm:$0xf0] }
 0x6de   : > { %v9106_v39 = vor.u32 %v10107_v30, %v9103_v54  ;;  %v10139_v58 = vld [vmem:[#allocation26 + $0x14c] sm:$0xf] }
 0x6df   : > { %5206 = vmatmul.bf16.gmra.mxu0 %v12629_v25  ;;  %5255 = vmatmul.bf16.gmra.mxu1 %v12631_v8  ;;  %v10131_v30 = vld [vmem:[#allocation26 + $0x10c] sm:$0xf] }
 0x6e0   : > { %5304 = vmatmul.bf16.gmra.mxu2 %v12629_v25  ;;  %5353 = vmatmul.bf16.gmra.mxu3 %v12631_v8  ;;  %v4672_v7 = vpop.f32.mrf.mxu2  ;;  %v4721_v56 = vpop.f32.mrf.mxu3 }
 0x6e1   : > { %v4673_v35 = vadd.f32 %v4672_v7, %v12609_v40  ;;  %v4722_v46 = vadd.f32 %v4721_v56, %v12611_v45  ;;  %5492 = vmatpush.bf16.msrb.mxu2 %v9106_v39  ;;  %v9231_v7 = vld [vmem:[#allocation26 + $0x158] sm:$0xf0] }
 0x6e2   : > { %v9234_v56 = vor.u32 %v10139_v58, %v9231_v7  ;;  %v9199_v39 = vld [vmem:[#allocation26 + $0x118] sm:$0xf0]  ;;  %v9069_v58 = vld [vmem:[#allocation26 + $0x8] sm:$0xf]  ;;  %v10101_v7 = vld [vmem:[#allocation26 + $0x14] sm:$0xf0] }
 0x6e3   : > { %v4759_v3 = vmax.f32 %v4673_v35, 0.0  ;;  %v4760_v41 = vmax.f32 %v4722_v46, 0.0  ;;  %v9070_v0 = vor.u32 %v10101_v7, %v9069_v58  ;;  %v9669_v58 = vld [vmem:[#allocation28 + $0x2c0] sm:$0xf]  ;;  %v10252_v7 = vld [vmem:[#allocation28 + $0x2cc] sm:$0xf0] }
 0x6e4   : > { %5541 = vmatpush.bf16.msrb.mxu3 %v9234_v56  ;;  %v9202_v56 = vor.u32 %v10131_v30, %v9199_v39  ;;  %v9670_v22 = vor.u32 %v10252_v7, %v9669_v58  ;;  %v9781_v7 = vld [vmem:[#allocation28 + $0x3a0] sm:$0xf] }
 0x6e5   : > { %5396 = vmatpush.bf16.msrb.mxu0 %v9070_v0 }
 0x6e8   : > { %v4674_v26 = vpop.f32.mrf.mxu2  ;;  %v4723_v12 = vpop.f32.mrf.mxu3 }
 0x6e9   : > { %v4675_v11 = vadd.f32 %v4674_v26, %v12609_v40  ;;  %v4724_v50 = vadd.f32 %v4723_v12, %v12611_v45 }
 0x6eb   : > { %v4761_v57 = vmax.f32 %v4675_v11, 0.0  ;;  %v4762_v18 = vmax.f32 %v4724_v50, 0.0 }
 0x6ed   : > { %v12641_v28 = vpack.c.bf16 %v4761_v57, %v4759_v3  ;;  %v12643_v55 = vpack.c.bf16 %v4762_v18, %v4760_v41  ;;  %v10103_v57 = vld [vmem:[#allocation26 + $0x2c] sm:$0xf]  ;;  %v9087_v18 = vld [vmem:[#allocation26 + $0x38] sm:$0xf0] }
 0x6ef   : > { %5211 = vmatmul.bf16.gmra.mxu0 %v12641_v28  ;;  %5260 = vmatmul.bf16.gmra.mxu1 %v12643_v55 }
 0x6f0   : > { %5309 = vmatmul.bf16.gmra.mxu2 %v12641_v28  ;;  %5358 = vmatmul.bf16.gmra.mxu3 %v12643_v55  ;;  %v4677_v36 = vpop.f32.mrf.mxu2  ;;  %v4726_v10 = vpop.f32.mrf.mxu3 }
 0x6f1   : > { %v4678_v34 = vadd.f32 %v4677_v36, %v12609_v40  ;;  %v4727_v37 = vadd.f32 %v4726_v10, %v12611_v45  ;;  %v9090_v36 = vor.u32 %v10103_v57, %v9087_v18  ;;  %v10135_v10 = vld [vmem:[#allocation26 + $0x12c] sm:$0xf] }
 0x6f2   : > { %v9218_v23 = vor.u32 %v10135_v10, %v9215_v42 }
 0x6f3   : > { %v4763_v32 = vmax.f32 %v4678_v34, 0.0  ;;  %v4764_v2 = vmax.f32 %v4727_v37, 0.0  ;;  %5493 = vmatpush.bf16.msrb.mxu2 %v9090_v36 }
 0x6f4   : > { %5542 = vmatpush.bf16.msrb.mxu3 %v9218_v23 }
 0x6f8   : > { %v4679_v52 = vpop.f32.mrf.mxu2  ;;  %v4728_v31 = vpop.f32.mrf.mxu3  ;;  %5543 = vmatpush.bf16.msrb.mxu3 %v9202_v56 }
 0x6f9   : > { %v4680_v62 = vadd.f32 %v4679_v52, %v12609_v40  ;;  %v4729_v59 = vadd.f32 %v4728_v31, %v12611_v45 }
 0x6fb   : > { %v4765_v21 = vmax.f32 %v4680_v62, 0.0  ;;  %v4766_v61 = vmax.f32 %v4729_v59, 0.0 }
 0x6fd   : > { %v12653_v24 = vpack.c.bf16 %v4765_v21, %v4763_v32  ;;  %v12655_v17 = vpack.c.bf16 %v4766_v61, %v4764_v2 }
 0x6ff   : > { %5216 = vmatmul.bf16.gmra.mxu0 %v12653_v24  ;;  %5265 = vmatmul.bf16.gmra.mxu1 %v12655_v17 }
 0x700   : > { %5314 = vmatmul.bf16.gmra.mxu2 %v12653_v24  ;;  %5363 = vmatmul.bf16.gmra.mxu3 %v12655_v17  ;;  %v4682_v47 = vpop.f32.mrf.mxu2  ;;  %v4731_v48 = vpop.f32.mrf.mxu3 }
 0x701   : > { %v4683_v5 = vadd.f32 %v4682_v47, %v12609_v40  ;;  %v4732_v27 = vadd.f32 %v4731_v48, %v12611_v45  ;;  %v10099_v47 = vld [vmem:[#allocation26 + $0xc] sm:$0xf]  ;;  %v9071_v48 = vld [vmem:[#allocation26 + $0x18] sm:$0xf0] }
 0x702   : > { %v9074_v54 = vor.u32 %v10099_v47, %v9071_v48 }
 0x703   : > { %v4767_v35 = vmax.f32 %v4683_v5, 0.0  ;;  %v4768_v46 = vmax.f32 %v4732_v27, 0.0 }
 0x704   : > { %5494 = vmatpush.bf16.msrb.mxu2 %v9074_v54 }
 0x708   : > { %v4684_v14 = vpop.f32.mrf.mxu2  ;;  %v4733_v19 = vpop.f32.mrf.mxu3 }
 0x709   : > { %v4685_v9 = vadd.f32 %v4684_v14, %v12609_v40  ;;  %v4734_v43 = vadd.f32 %v4733_v19, %v12611_v45 }
 0x70b   : > { %v4769_v26 = vmax.f32 %v4685_v9, 0.0  ;;  %v4770_v12 = vmax.f32 %v4734_v43, 0.0 }
 0x70d   : > { %v12665_v11 = vpack.c.bf16 %v4769_v26, %v4767_v35  ;;  %v12667_v50 = vpack.c.bf16 %v4770_v12, %v4768_v46 }
 0x70f   : > { %5221 = vmatmul.bf16.gmra.mxu0 %v12665_v11  ;;  %5270 = vmatmul.bf16.gmra.mxu1 %v12667_v50 }
 0x710   : > { %5319 = vmatmul.bf16.gmra.mxu2 %v12665_v11  ;;  %5368 = vmatmul.bf16.gmra.mxu3 %v12667_v50  ;;  %v4687_v3 = vpop.f32.mrf.mxu2  ;;  %v4736_v41 = vpop.f32.mrf.mxu3 }
 0x711   : > { %v4688_v51 = vadd.f32 %v4687_v3, %v12609_v40  ;;  %v4737_v38 = vadd.f32 %v4736_v41, %v12611_v45 }
 0x713   : > { %v4771_v52 = vmax.f32 %v4688_v51, 0.0  ;;  %v4772_v31 = vmax.f32 %v4737_v38, 0.0  ;;  %v9685_v51 = vld [vmem:[#allocation28 + $0x2e0] sm:$0xf] }
 0x718   : > { %v4689_v53 = vpop.f32.mrf.mxu2  ;;  %v4738_v15 = vpop.f32.mrf.mxu3 }
 0x719   : > { %v4690_v34 = vadd.f32 %v4689_v53, %v12609_v40  ;;  %v4739_v37 = vadd.f32 %v4738_v15, %v12611_v45  ;;  %v9429_v53 = vld [vmem:[#allocation28 + $0xe0] sm:$0xf]  ;;  %v10192_v15 = vld [vmem:[#allocation28 + $0xec] sm:$0xf0] }
 0x71b   : > { %v4773_v62 = vmax.f32 %v4690_v34, 0.0  ;;  %v4774_v59 = vmax.f32 %v4739_v37, 0.0  ;;  %v9813_v34 = vld [vmem:[#allocation28 + $0x3e0] sm:$0xf] }
 0x71d   : > { %v12677_v32 = vpack.c.bf16 %v4773_v62, %v4771_v52  ;;  %v12679_v2 = vpack.c.bf16 %v4774_v59, %v4772_v31  ;;  %v9430_v52 = vor.u32 %v10192_v15, %v9429_v53  ;;  %v10288_v31 = vld [vmem:[#allocation28 + $0x3ec] sm:$0xf0]  ;;  %v9557_v59 = vld [vmem:[#allocation28 + $0x1e0] sm:$0xf] }
 0x71e   : > { %v9814_v62 = vor.u32 %v10288_v31, %v9813_v34  ;;  %v9653_v53 = vld [vmem:[#allocation28 + $0x2a0] sm:$0xf]  ;;  %v10248_v15 = vld [vmem:[#allocation28 + $0x2ac] sm:$0xf0] }
 0x71f   : > { %5226 = vmatmul.bf16.gmra.mxu0 %v12677_v32  ;;  %5275 = vmatmul.bf16.gmra.mxu1 %v12679_v2  ;;  %v9654_v31 = vor.u32 %v10248_v15, %v9653_v53  ;;  %v9765_v15 = vld [vmem:[#allocation28 + $0x380] sm:$0xf] }
 0x720   : > { %5324 = vmatmul.bf16.gmra.mxu2 %v12677_v32  ;;  %5373 = vmatmul.bf16.gmra.mxu3 %v12679_v2  ;;  %v4692_v21 = vpop.f32.mrf.mxu2  ;;  %v4741_v61 = vpop.f32.mrf.mxu3 }
 0x721   : > { %v4693_v60 = vadd.f32 %v4692_v21, %v12609_v40  ;;  %v4742_v63 = vadd.f32 %v4741_v61, %v12611_v45  ;;  %6459 = vmatpush.bf16.msra.mxu0 %v9430_v52  ;;  %v10224_v21 = vld [vmem:[#allocation28 + $0x1ec] sm:$0xf0]  ;;  %6606 = vmatpush.bf16.msra.mxu3 %v9814_v62 }
 0x722   : > { %v9558_v48 = vor.u32 %v10224_v21, %v9557_v59 }
 0x723   : > { %v4775_v9 = vmax.f32 %v4693_v60, 0.0  ;;  %v4776_v43 = vmax.f32 %v4742_v63, 0.0 }
 0x724   : > { %6508 = vmatpush.bf16.msra.mxu1 %v9558_v48 }
 0x728   : > { %v4694_v5 = vpop.f32.mrf.mxu2  ;;  %v4743_v27 = vpop.f32.mrf.mxu3 }
 0x729   : > { %v4695_v14 = vadd.f32 %v4694_v5, %v12609_v40  ;;  %v4744_v19 = vadd.f32 %v4743_v27, %v12611_v45 }
 0x72b   : > { %v4777_v35 = vmax.f32 %v4695_v14, 0.0  ;;  %v4778_v46 = vmax.f32 %v4744_v19, 0.0  ;;  %v10188_v14 = vld [vmem:[#allocation28 + $0xcc] sm:$0xf0] }
 0x72d   : > { %v12689_v26 = vpack.c.bf16 %v4777_v35, %v4775_v9  ;;  %v12691_v12 = vpack.c.bf16 %v4778_v46, %v4776_v43  ;;  %v9797_v43 = vld [vmem:[#allocation28 + $0x3c0] sm:$0xf]  ;;  %v10284_v35 = vld [vmem:[#allocation28 + $0x3cc] sm:$0xf0] }
 0x72e   : > { %v9798_v46 = vor.u32 %v10284_v35, %v9797_v43 }
 0x72f   : > { %5231 = vmatmul.bf16.gmra.mxu0 %v12689_v26  ;;  %5280 = vmatmul.bf16.gmra.mxu1 %v12691_v12 }
 0x730   : > { %5329 = vmatmul.bf16.gmra.mxu2 %v12689_v26  ;;  %5378 = vmatmul.bf16.gmra.mxu3 %v12691_v12  ;;  %v4697_v3 = vpop.f32.mrf.mxu2  ;;  %v4746_v41 = vpop.f32.mrf.mxu3 }
 0x731   : > { %v4698_v57 = vadd.f32 %v4697_v3, %v12609_v40  ;;  %v4747_v18 = vadd.f32 %v4746_v41, %v12611_v45  ;;  %6607 = vmatpush.bf16.msra.mxu3 %v9798_v46 }
 0x733   : > { %v4779_v33 = vmax.f32 %v4698_v57, 0.0  ;;  %v4780_v6 = vmax.f32 %v4747_v18, 0.0  ;;  %v9541_v18 = vld [vmem:[#allocation28 + $0x1c0] sm:$0xf] }
 0x738   : > { %v4699_v36 = vpop.f32.mrf.mxu2  ;;  %v4748_v10 = vpop.f32.mrf.mxu3 }
 0x739   : > { %v4700_v42 = vadd.f32 %v4699_v36, %v12609_v40  ;;  %v4749_v23 = vadd.f32 %v4748_v10, %v12611_v45  ;;  %v10256_v40 = vld [vmem:[#allocation28 + $0x2ec] sm:$0xf0]  ;;  %v12712_v45 = vld [vmem:[%s13551_s1] sm:$0xf]  ;;  %s7684_s1 = scalar_lea.hbm %s13554_s14, %s10292_s21 }
 0x73a   : > { %v9686_v38 = vor.u32 %v10256_v40, %v9685_v51  ;;  %v12715_v37 = vperm.slane %v12712_v45, 0  ;;  %v12723_v39 = vperm.slane %v12712_v45, 1  ;;  %v10220_v36 = vld [vmem:[#allocation28 + $0x1cc] sm:$0xf0] }
 0x73b   : > { %v4781_v29 = vmax.f32 %v4700_v42, 0.0  ;;  %v4782_v4 = vmax.f32 %v4749_v23, 0.0 }
 0x73c   : > { %6557 = vmatpush.bf16.msra.mxu2 %v9686_v38 }
 0x73d   : > { %v12701_v1 = vpack.c.bf16 %v4781_v29, %v4779_v33  ;;  %v12703_v20 = vpack.c.bf16 %v4782_v4, %v4780_v6  ;;  %v9542_v33 = vor.u32 %v10220_v36, %v9541_v18 }
 0x73f   : > { %5236 = vmatmul.bf16.gmra.mxu0 %v12701_v1  ;;  %5285 = vmatmul.bf16.gmra.mxu1 %v12703_v20 }
 0x740   : > { %5334 = vmatmul.bf16.gmra.mxu2 %v12701_v1  ;;  %5383 = vmatmul.bf16.gmra.mxu3 %v12703_v20 }
 0x741   : > { %6558 = vmatpush.bf16.msra.mxu2 %v9670_v22  ;;  %6509 = vmatpush.bf16.msra.mxu1 %v9542_v33 }
 0x745   : > { %6559 = vmatpush.bf16.msra.mxu2 %v9654_v31 }
 0x74c   : > { %v5202_v61 = vpop.f32.mrf.mxu0  ;;  %v5251_v47 = vpop.f32.mrf.mxu1 }
 0x74d   : > { %v5203_v30 = vadd.f32 %v5202_v61, %v12715_v37 }
 0x74f   : > { %v5252_v54 = vadd.f32 %v5251_v47, %v5203_v30  ;;  %5397 = vmatmul.bf16.vlgmr.msrb.gmra.mxu0 %v12617_v13  ;;  %5446 = vmatmul.bf16.vlgmr.msrb.gmra.mxu1 %v12619_v44  ;;  %v9397_v30 = vld [vmem:[#allocation28 + $0xa0] sm:$0xf] }
 0x750   : > { %5495 = vmatmul.bf16.vlgmr.msrb.gmra.mxu2 %v12617_v13  ;;  %5544 = vmatmul.bf16.vlgmr.msrb.gmra.mxu3 %v12619_v44  ;;  %v9413_v13 = vld [vmem:[#allocation28 + $0xc0] sm:$0xf] }
 0x751   : > { %v5585_v44 = vmax.f32 %v5252_v54, 0.0  ;;  %v9414_v9 = vor.u32 %v10188_v14, %v9413_v13 }
 0x753   : > { %v5300_v56 = vpop.f32.mrf.mxu2  ;;  %v5349_v0 = vpop.f32.mrf.mxu3  ;;  %6460 = vmatpush.bf16.msra.mxu0 %v9414_v9 }
 0x754   : > { %v5301_v49 = vadd.f32 %v5300_v56, %v12723_v39  ;;  %v5204_v16 = vpop.f32.mrf.mxu0  ;;  %v5253_v60 = vpop.f32.mrf.mxu1  ;;  %v10280_v56 = vld [vmem:[#allocation28 + $0x3ac] sm:$0xf0] }
 0x755   : > { %v5205_v63 = vadd.f32 %v5204_v16, %v12715_v37 }
 0x756   : > { %v5350_v5 = vadd.f32 %v5349_v0, %v5301_v49  ;;  %v9782_v0 = vor.u32 %v10280_v56, %v9781_v7 }
 0x757   : > { %v5254_v27 = vadd.f32 %v5253_v60, %v5205_v63  ;;  %v9525_v60 = vld [vmem:[#allocation28 + $0x1a0] sm:$0xf]  ;;  %v10216_v63 = vld [vmem:[#allocation28 + $0x1ac] sm:$0xf0] }
 0x758   : > { %v5586_v51 = vmax.f32 %v5350_v5, 0.0  ;;  %6608 = vmatpush.bf16.msra.mxu3 %v9782_v0  ;;  %v9526_v14 = vor.u32 %v10216_v63, %v9525_v60 }
 0x759   : > { %v5589_v19 = vmax.f32 %v5254_v27, 0.0 }
 0x75a   : > { %6510 = vmatpush.bf16.msra.mxu1 %v9526_v14 }
 0x75b   : > { %v12727_v3 = vpack.c.bf16 %v5589_v19, %v5585_v44  ;;  %v5302_v41 = vpop.f32.mrf.mxu2  ;;  %v5351_v57 = vpop.f32.mrf.mxu3 }
 0x75c   : > { %v5303_v10 = vadd.f32 %v5302_v41, %v12723_v39  ;;  %v5207_v42 = vpop.f32.mrf.mxu0  ;;  %v5256_v23 = vpop.f32.mrf.mxu1  ;;  %v9637_v41 = vld [vmem:[#allocation28 + $0x280] sm:$0xf] }
 0x75d   : > { %v5208_v6 = vadd.f32 %v5207_v42, %v12715_v37 }
 0x75e   : > { %v5352_v29 = vadd.f32 %v5351_v57, %v5303_v10  ;;  %v10244_v57 = vld [vmem:[#allocation28 + $0x28c] sm:$0xf0] }
 0x75f   : > { %v5257_v4 = vadd.f32 %v5256_v23, %v5208_v6  ;;  %5402 = vmatmul.bf16.gmra.mxu0 %v12629_v25  ;;  %5451 = vmatmul.bf16.gmra.mxu1 %v12631_v8  ;;  %v9638_v10 = vor.u32 %v10244_v57, %v9637_v41  ;;  %v9749_v57 = vld [vmem:[#allocation28 + $0x360] sm:$0xf] }
 0x760   : > { %v5590_v40 = vmax.f32 %v5352_v29, 0.0  ;;  %5500 = vmatmul.bf16.gmra.mxu2 %v12629_v25  ;;  %5549 = vmatmul.bf16.gmra.mxu3 %v12631_v8  ;;  %v10184_v25 = vld [vmem:[#allocation28 + $0xac] sm:$0xf0] }
 0x761   : > { %v5593_v54 = vmax.f32 %v5257_v4, 0.0  ;;  %v9398_v58 = vor.u32 %v10184_v25, %v9397_v30  ;;  %6560 = vmatpush.bf16.msra.mxu2 %v9638_v10 }
 0x762   : > { %v12735_v38 = vpack.c.bf16 %v5590_v40, %v5586_v51  ;;  %v9381_v51 = vld [vmem:[#allocation28 + $0x80] sm:$0xf] }
 0x763   : > { %v5305_v34 = vpop.f32.mrf.mxu2  ;;  %v5354_v52 = vpop.f32.mrf.mxu3  ;;  %6461 = vmatpush.bf16.msra.mxu0 %v9398_v58 }
 0x764   : > { %v5306_v62 = vadd.f32 %v5305_v34, %v12723_v39  ;;  %v5209_v59 = vpop.f32.mrf.mxu0  ;;  %v5258_v21 = vpop.f32.mrf.mxu1  ;;  %v10276_v34 = vld [vmem:[#allocation28 + $0x38c] sm:$0xf0] }
 0x765   : > { %v5210_v61 = vadd.f32 %v5209_v59, %v12715_v37 }
 0x766   : > { %v5355_v47 = vadd.f32 %v5354_v52, %v5306_v62  ;;  %v9766_v52 = vor.u32 %v10276_v34, %v9765_v15 }
 0x767   : > { %v5259_v48 = vadd.f32 %v5258_v21, %v5210_v61  ;;  %v9509_v21 = vld [vmem:[#allocation28 + $0x180] sm:$0xf]  ;;  %v10212_v61 = vld [vmem:[#allocation28 + $0x18c] sm:$0xf0] }
 0x768   : > { %v5594_v43 = vmax.f32 %v5355_v47, 0.0  ;;  %6609 = vmatpush.bf16.msra.mxu3 %v9766_v52  ;;  %v9510_v25 = vor.u32 %v10212_v61, %v9509_v21 }
 0x769   : > { %v5597_v8 = vmax.f32 %v5259_v48, 0.0 }
 0x76a   : > { %6511 = vmatpush.bf16.msra.mxu1 %v9510_v25 }
 0x76b   : > { %v12739_v22 = vpack.c.bf16 %v5597_v8, %v5593_v54  ;;  %v5307_v49 = vpop.f32.mrf.mxu2  ;;  %v5356_v16 = vpop.f32.mrf.mxu3 }
 0x76c   : > { %v5308_v5 = vadd.f32 %v5307_v49, %v12723_v39  ;;  %v5212_v27 = vpop.f32.mrf.mxu0  ;;  %v5261_v13 = vpop.f32.mrf.mxu1  ;;  %v9621_v49 = vld [vmem:[#allocation28 + $0x260] sm:$0xf] }
 0x76d   : > { %v5213_v44 = vadd.f32 %v5212_v27, %v12715_v37 }
 0x76e   : > { %v5357_v19 = vadd.f32 %v5356_v16, %v5308_v5  ;;  %v10240_v16 = vld [vmem:[#allocation28 + $0x26c] sm:$0xf0] }
 0x76f   : > { %v5262_v9 = vadd.f32 %v5261_v13, %v5213_v44  ;;  %5407 = vmatmul.bf16.gmra.mxu0 %v12641_v28  ;;  %5456 = vmatmul.bf16.gmra.mxu1 %v12643_v55  ;;  %v9622_v5 = vor.u32 %v10240_v16, %v9621_v49  ;;  %v9733_v16 = vld [vmem:[#allocation28 + $0x340] sm:$0xf] }
 0x770   : > { %v5598_v35 = vmax.f32 %v5357_v19, 0.0  ;;  %5505 = vmatmul.bf16.gmra.mxu2 %v12641_v28  ;;  %5554 = vmatmul.bf16.gmra.mxu3 %v12643_v55  ;;  %v10180_v28 = vld [vmem:[#allocation28 + $0x8c] sm:$0xf0] }
 0x771   : > { %v5601_v40 = vmax.f32 %v5262_v9, 0.0  ;;  %v9382_v53 = vor.u32 %v10180_v28, %v9381_v51  ;;  %6561 = vmatpush.bf16.msra.mxu2 %v9622_v5 }
 0x772   : > { %v12747_v46 = vpack.c.bf16 %v5598_v35, %v5594_v43  ;;  %v9365_v43 = vld [vmem:[#allocation28 + $0x60] sm:$0xf] }
 0x773   : > { %v5310_v18 = vpop.f32.mrf.mxu2  ;;  %v5359_v36 = vpop.f32.mrf.mxu3  ;;  %6462 = vmatpush.bf16.msra.mxu0 %v9382_v53 }
 0x774   : > { %v5311_v42 = vadd.f32 %v5310_v18, %v12723_v39  ;;  %v5214_v23 = vpop.f32.mrf.mxu0  ;;  %v5263_v33 = vpop.f32.mrf.mxu1  ;;  %v10272_v18 = vld [vmem:[#allocation28 + $0x36c] sm:$0xf0] }
 0x775   : > { %v5215_v6 = vadd.f32 %v5214_v23, %v12715_v37 }
 0x776   : > { %v5360_v29 = vadd.f32 %v5359_v36, %v5311_v42  ;;  %v9750_v36 = vor.u32 %v10272_v18, %v9749_v57 }
 0x777   : > { %v5264_v4 = vadd.f32 %v5263_v33, %v5215_v6  ;;  %v9493_v33 = vld [vmem:[#allocation28 + $0x160] sm:$0xf]  ;;  %v10208_v6 = vld [vmem:[#allocation28 + $0x16c] sm:$0xf0] }
 0x778   : > { %v5602_v7 = vmax.f32 %v5360_v29, 0.0  ;;  %6610 = vmatpush.bf16.msra.mxu3 %v9750_v36  ;;  %v9494_v28 = vor.u32 %v10208_v6, %v9493_v33 }
 0x779   : > { %v5605_v55 = vmax.f32 %v5264_v4, 0.0 }
 0x77a   : > { %6512 = vmatpush.bf16.msra.mxu1 %v9494_v28  ;;  %v9461_v28 = vld [vmem:[#allocation28 + $0x120] sm:$0xf] }
 0x77b   : > { %v12751_v31 = vpack.c.bf16 %v5605_v55, %v5601_v40  ;;  %v5312_v62 = vpop.f32.mrf.mxu2  ;;  %v5361_v59 = vpop.f32.mrf.mxu3 }
 0x77c   : > { %v5313_v47 = vadd.f32 %v5312_v62, %v12723_v39  ;;  %v5217_v48 = vpop.f32.mrf.mxu0  ;;  %v5266_v30 = vpop.f32.mrf.mxu1  ;;  %v9605_v62 = vld [vmem:[#allocation28 + $0x240] sm:$0xf] }
 0x77d   : > { %v5218_v54 = vadd.f32 %v5217_v48, %v12715_v37 }
 0x77e   : > { %v5362_v8 = vadd.f32 %v5361_v59, %v5313_v47  ;;  %v10236_v59 = vld [vmem:[#allocation28 + $0x24c] sm:$0xf0] }
 0x77f   : > { %v5267_v58 = vadd.f32 %v5266_v30, %v5218_v54  ;;  %5412 = vmatmul.bf16.gmra.mxu0 %v12653_v24  ;;  %5461 = vmatmul.bf16.gmra.mxu1 %v12655_v17  ;;  %v9606_v47 = vor.u32 %v10236_v59, %v9605_v62 }
 0x780   : > { %v5606_v56 = vmax.f32 %v5362_v8, 0.0  ;;  %5510 = vmatmul.bf16.gmra.mxu2 %v12653_v24  ;;  %5559 = vmatmul.bf16.gmra.mxu3 %v12655_v17  ;;  %v10176_v24 = vld [vmem:[#allocation28 + $0x6c] sm:$0xf0] }
 0x781   : > { %v5609_v35 = vmax.f32 %v5267_v58, 0.0  ;;  %v9366_v41 = vor.u32 %v10176_v24, %v9365_v43  ;;  %6562 = vmatpush.bf16.msra.mxu2 %v9606_v47  ;;  %v9445_v47 = vld [vmem:[#allocation28 + $0x100] sm:$0xf] }
 0x782   : > { %v12759_v0 = vpack.c.bf16 %v5606_v56, %v5602_v7  ;;  %v10172_v7 = vld [vmem:[#allocation28 + $0x4c] sm:$0xf0] }
 0x783   : > { %v5315_v60 = vpop.f32.mrf.mxu2  ;;  %v5364_v63 = vpop.f32.mrf.mxu3  ;;  %6463 = vmatpush.bf16.msra.mxu0 %v9366_v41  ;;  %v10232_v41 = vld [vmem:[#allocation28 + $0x22c] sm:$0xf0] }
 0x784   : > { %v5316_v27 = vadd.f32 %v5315_v60, %v12723_v39  ;;  %v5219_v13 = vpop.f32.mrf.mxu0  ;;  %v5268_v14 = vpop.f32.mrf.mxu1  ;;  %v10268_v60 = vld [vmem:[#allocation28 + $0x34c] sm:$0xf0] }
 0x785   : > { %v5220_v44 = vadd.f32 %v5219_v13, %v12715_v37 }
 0x786   : > { %v5365_v19 = vadd.f32 %v5364_v63, %v5316_v27  ;;  %v9734_v63 = vor.u32 %v10268_v60, %v9733_v16  ;;  %v9573_v16 = vld [vmem:[#allocation28 + $0x200] sm:$0xf]  ;;  %v10228_v60 = vld [vmem:[#allocation28 + $0x20c] sm:$0xf0] }
 0x787   : > { %v5269_v9 = vadd.f32 %v5268_v14, %v5220_v44  ;;  %v9477_v14 = vld [vmem:[#allocation28 + $0x140] sm:$0xf]  ;;  %v10204_v44 = vld [vmem:[#allocation28 + $0x14c] sm:$0xf0] }
 0x788   : > { %v5610_v15 = vmax.f32 %v5365_v19, 0.0  ;;  %6611 = vmatpush.bf16.msra.mxu3 %v9734_v63  ;;  %v9478_v43 = vor.u32 %v10204_v44, %v9477_v14  ;;  %v9574_v44 = vor.u32 %v10228_v60, %v9573_v16  ;;  %v9559_v16 = vld [vmem:[#allocation28 + $0x1f0] sm:$0xf0] }
 0x789   : > { %v5613_v17 = vmax.f32 %v5269_v9, 0.0 }
 0x78a   : > { %6513 = vmatpush.bf16.msra.mxu1 %v9478_v43 }
 0x78b   : > { %v12763_v10 = vpack.c.bf16 %v5613_v17, %v5609_v35  ;;  %v5317_v42 = vpop.f32.mrf.mxu2  ;;  %v5366_v23 = vpop.f32.mrf.mxu3  ;;  %v9589_v17 = vld [vmem:[#allocation28 + $0x220] sm:$0xf] }
 0x78c   : > { %v5318_v29 = vadd.f32 %v5317_v42, %v12723_v39  ;;  %v5222_v4 = vpop.f32.mrf.mxu0  ;;  %v5271_v51 = vpop.f32.mrf.mxu1  ;;  %v9590_v36 = vor.u32 %v10232_v41, %v9589_v17  ;;  %v9701_v41 = vld [vmem:[#allocation28 + $0x300] sm:$0xf] }
 0x78d   : > { %v5223_v40 = vadd.f32 %v5222_v4, %v12715_v37  ;;  %v9333_v4 = vld [vmem:[#allocation28 + $0x20] sm:$0xf] }
 0x78e   : > { %v5367_v55 = vadd.f32 %v5366_v23, %v5318_v29  ;;  %6563 = vmatpush.bf16.msra.mxu2 %v9590_v36 }
 0x78f   : > { %v5272_v53 = vadd.f32 %v5271_v51, %v5223_v40  ;;  %5417 = vmatmul.bf16.gmra.mxu0 %v12665_v11  ;;  %5466 = vmatmul.bf16.gmra.mxu1 %v12667_v50  ;;  %v10168_v51 = vld [vmem:[#allocation28 + $0x2c] sm:$0xf0] }
 0x790   : > { %v5614_v34 = vmax.f32 %v5367_v55, 0.0  ;;  %5515 = vmatmul.bf16.gmra.mxu2 %v12665_v11  ;;  %5564 = vmatmul.bf16.gmra.mxu3 %v12667_v50  ;;  %v9349_v11 = vld [vmem:[#allocation28 + $0x40] sm:$0xf]  ;;  %v9334_v40 = vor.u32 %v10168_v51, %v9333_v4 }
 0x791   : > { %v5617_v50 = vmax.f32 %v5272_v53, 0.0  ;;  %v9350_v49 = vor.u32 %v10172_v7, %v9349_v11  ;;  %v9717_v55 = vld [vmem:[#allocation28 + $0x320] sm:$0xf]  ;;  %v10264_v53 = vld [vmem:[#allocation28 + $0x32c] sm:$0xf0] }
 0x792   : > { %v12771_v52 = vpack.c.bf16 %v5614_v34, %v5610_v15  ;;  %v9718_v59 = vor.u32 %v10264_v53, %v9717_v55  ;;  %6564 = vmatpush.bf16.msra.mxu2 %v9574_v44  ;;  %v12829_v44 = vperm.slane %v12712_v45, 2 }
 0x793   : > { %v5320_v21 = vpop.f32.mrf.mxu2  ;;  %v5369_v61 = vpop.f32.mrf.mxu3  ;;  %6464 = vmatpush.bf16.msra.mxu0 %v9350_v49 }
 0x794   : > { %v5321_v48 = vadd.f32 %v5320_v21, %v12723_v39  ;;  %v5224_v30 = vpop.f32.mrf.mxu0  ;;  %v5273_v25 = vpop.f32.mrf.mxu1  ;;  %v9317_v21 = vld [vmem:[#allocation28] sm:$0xf]  ;;  %6612 = vmatpush.bf16.msra.mxu3 %v9718_v59 }
 0x795   : > { %v5225_v54 = vadd.f32 %v5224_v30, %v12715_v37 }
 0x796   : > { %v12775_v8 = vadd.f32 %v5369_v61, %v5321_v48  ;;  %v10164_v61 = vld [vmem:[#allocation28 + $0xc] sm:$0xf0] }
 0x797   : > { %v5274_v58 = vadd.f32 %v5273_v25, %v5225_v54  ;;  %6465 = vmatpush.bf16.msra.mxu0 %v9334_v40  ;;  %v9318_v54 = vor.u32 %v10164_v61, %v9317_v21  ;;  %v10190_v61 = vld [vmem:[#allocation28 + $0xe4] sm:$0xf] }
 0x799   : > { %v5621_v56 = vmax.f32 %v5274_v58, 0.0  ;;  %v10196_v58 = vld [vmem:[#allocation28 + $0x10c] sm:$0xf0] }
 0x79b   : > { %v12777_v5 = vpack.c.bf16 %v5621_v56, %v5617_v50  ;;  %v12779_v27 = vpop.f32.mrf.mxu2  ;;  %v12781_v13 = vpop.f32.mrf.mxu3  ;;  %v9446_v50 = vor.u32 %v10196_v58, %v9445_v47  ;;  %6466 = vmatpush.bf16.msra.mxu0 %v9318_v54  ;;  %v9431_v47 = vld [vmem:[#allocation28 + $0xf0] sm:$0xf0]  ;;  %v10286_v58 = vld [vmem:[#allocation28 + $0x3e4] sm:$0xf] }
 0x79c   : > { %v5227_v19 = vpop.f32.mrf.mxu0  ;;  %v5276_v9 = vpop.f32.mrf.mxu1 }
 0x79d   : > { %v5228_v24 = vadd.f32 %v5227_v19, %v12715_v37 }
 0x79f   : > { %v5277_v35 = vadd.f32 %v5276_v9, %v5228_v24  ;;  %5422 = vmatmul.bf16.gmra.mxu0 %v12677_v32  ;;  %5471 = vmatmul.bf16.gmra.mxu1 %v12679_v2 }
 0x7a0   : > { %5520 = vmatmul.bf16.gmra.mxu2 %v12677_v32  ;;  %5569 = vmatmul.bf16.gmra.mxu3 %v12679_v2  ;;  %v10200_v2 = vld [vmem:[#allocation28 + $0x12c] sm:$0xf0] }
 0x7a1   : > { %v9462_v15 = vor.u32 %v10200_v2, %v9461_v28  ;;  %v5625_v34 = vmax.f32 %v5277_v35, 0.0  ;;  %v10254_v28 = vld [vmem:[#allocation28 + $0x2e4] sm:$0xf] }
 0x7a3   : > { %v5325_v57 = vpop.f32.mrf.mxu2  ;;  %v5374_v18 = vpop.f32.mrf.mxu3  ;;  %6514 = vmatpush.bf16.msra.mxu1 %v9462_v15 }
 0x7a4   : > { %v5326_v42 = vadd.f32 %v5325_v57, %v12723_v39  ;;  %v5229_v23 = vpop.f32.mrf.mxu0  ;;  %v5278_v33 = vpop.f32.mrf.mxu1  ;;  %v10260_v57 = vld [vmem:[#allocation28 + $0x30c] sm:$0xf0] }
 0x7a5   : > { %v5230_v6 = vadd.f32 %v5229_v23, %v12715_v37 }
 0x7a6   : > { %v12790_v29 = vadd.f32 %v5374_v18, %v5326_v42 }
 0x7a7   : > { %v5279_v32 = vadd.f32 %v5278_v33, %v5230_v6  ;;  %6515 = vmatpush.bf16.msra.mxu1 %v9446_v50 }
 0x7a9   : > { %v5629_v62 = vmax.f32 %v5279_v32, 0.0  ;;  %v9687_v32 = vld [vmem:[#allocation28 + $0x2f0] sm:$0xf0] }
 0x7aa   : > { %v9690_v55 = vor.u32 %v10254_v28, %v9687_v32  ;;  %v9415_v28 = vld [vmem:[#allocation28 + $0xd0] sm:$0xf0] }
 0x7ab   : > { %v12792_v48 = vpack.c.bf16 %v5629_v62, %v5625_v34  ;;  %v12794_v30 = vpop.f32.mrf.mxu2  ;;  %v12796_v25 = vpop.f32.mrf.mxu3 }
 0x7ac   : > { %v5232_v11 = vpop.f32.mrf.mxu0  ;;  %v5281_v7 = vpop.f32.mrf.mxu1  ;;  %6753 = vmatpush.bf16.msrb.mxu2 %v9690_v55  ;;  %v10282_v55 = vld [vmem:[#allocation28 + $0x3c4] sm:$0xf] }
 0x7ad   : > { %v5233_v56 = vadd.f32 %v5232_v11, %v12715_v37  ;;  %v9815_v11 = vld [vmem:[#allocation28 + $0x3f0] sm:$0xf0] }
 0x7af   : > { %v5282_v49 = vadd.f32 %v5281_v7, %v5233_v56  ;;  %5427 = vmatmul.bf16.gmra.mxu0 %v12689_v26  ;;  %5476 = vmatmul.bf16.gmra.mxu1 %v12691_v12  ;;  %v9818_v7 = vor.u32 %v10286_v58, %v9815_v11 }
 0x7b0   : > { %5525 = vmatmul.bf16.gmra.mxu2 %v12689_v26  ;;  %5574 = vmatmul.bf16.gmra.mxu3 %v12691_v12  ;;  %v9702_v12 = vor.u32 %v10260_v57, %v9701_v41  ;;  %v12835_v57 = vperm.slane %v12712_v45, 3 }
 0x7b1   : > { %v5633_v26 = vmax.f32 %v5282_v49, 0.0 }
 0x7b2   : > { %6613 = vmatpush.bf16.msra.mxu3 %v9702_v12 }
 0x7b3   : > { %v5330_v63 = vpop.f32.mrf.mxu2  ;;  %v5379_v14 = vpop.f32.mrf.mxu3 }
 0x7b4   : > { %v5331_v19 = vadd.f32 %v5330_v63, %v12723_v39  ;;  %v5234_v9 = vpop.f32.mrf.mxu0  ;;  %v5283_v43 = vpop.f32.mrf.mxu1 }
 0x7b5   : > { %v5235_v24 = vadd.f32 %v5234_v9, %v12715_v37  ;;  %v10250_v9 = vld [vmem:[#allocation28 + $0x2c4] sm:$0xf] }
 0x7b6   : > { %v12805_v35 = vadd.f32 %v5379_v14, %v5331_v19  ;;  %6802 = vmatpush.bf16.msrb.mxu3 %v9818_v7 }
 0x7b7   : > { %v5284_v17 = vadd.f32 %v5283_v43, %v5235_v24  ;;  %v9671_v43 = vld [vmem:[#allocation28 + $0x2d0] sm:$0xf0] }
 0x7b8   : > { %v9674_v41 = vor.u32 %v10250_v9, %v9671_v43 }
 0x7b9   : > { %v5637_v18 = vmax.f32 %v5284_v17, 0.0 }
 0x7ba   : > { %6754 = vmatpush.bf16.msrb.mxu2 %v9674_v41 }
 0x7bb   : > { %v12807_v36 = vpack.c.bf16 %v5637_v18, %v5633_v26  ;;  %v12809_v42 = vpop.f32.mrf.mxu2  ;;  %v12811_v23 = vpop.f32.mrf.mxu3 }
 0x7bc   : > { %v5237_v33 = vpop.f32.mrf.mxu0  ;;  %v5286_v6 = vpop.f32.mrf.mxu1 }
 0x7bd   : > { %v5238_v4 = vadd.f32 %v5237_v33, %v12715_v37 }
 0x7bf   : > { %v5287_v51 = vadd.f32 %v5286_v6, %v5238_v4  ;;  %5432 = vmatmul.bf16.gmra.mxu0 %v12701_v1  ;;  %5481 = vmatmul.bf16.gmra.mxu1 %v12703_v20 }
 0x7c0   : > { %5530 = vmatmul.bf16.gmra.mxu2 %v12701_v1  ;;  %5579 = vmatmul.bf16.gmra.mxu3 %v12703_v20  ;;  %v9434_v20 = vor.u32 %v10190_v61, %v9431_v47  ;;  %v9543_v61 = vld [vmem:[#allocation28 + $0x1d0] sm:$0xf0] }
 0x7c1   : > { %v5641_v1 = vmax.f32 %v5287_v51, 0.0  ;;  %v10186_v51 = vld [vmem:[#allocation28 + $0xc4] sm:$0xf] }
 0x7c2   : > { %6655 = vmatpush.bf16.msrb.mxu0 %v9434_v20 }
 0x7c3   : > { %v5335_v40 = vpop.f32.mrf.mxu2  ;;  %v5384_v2 = vpop.f32.mrf.mxu3 }
 0x7c4   : > { %v5336_v53 = vadd.f32 %v5335_v40, %v12723_v39  ;;  %v5239_v15 = vpop.f32.mrf.mxu0  ;;  %v5288_v34 = vpop.f32.mrf.mxu1 }
 0x7c5   : > { %v5240_v62 = vadd.f32 %v5239_v15, %v12715_v37  ;;  %v10222_v37 = vld [vmem:[#allocation28 + $0x1e4] sm:$0xf] }
 0x7c6   : > { %v12820_v59 = vadd.f32 %v5384_v2, %v5336_v53  ;;  %v9562_v14 = vor.u32 %v10222_v37, %v9559_v16  ;;  %v9418_v2 = vor.u32 %v10186_v51, %v9415_v28  ;;  %v9799_v53 = vld [vmem:[#allocation28 + $0x3d0] sm:$0xf0] }
 0x7c7   : > { %v5289_v21 = vadd.f32 %v5288_v34, %v5240_v62  ;;  %v9802_v15 = vor.u32 %v10282_v55, %v9799_v53 }
 0x7c8   : > { %6704 = vmatpush.bf16.msrb.mxu1 %v9562_v14  ;;  %6656 = vmatpush.bf16.msrb.mxu0 %v9418_v2  ;;  %v9655_v14 = vld [vmem:[#allocation28 + $0x2b0] sm:$0xf0] }
 0x7c9   : > { %v5645_v54 = vmax.f32 %v5289_v21, 0.0  ;;  %v10218_v21 = vld [vmem:[#allocation28 + $0x1c4] sm:$0xf]  ;;  %6803 = vmatpush.bf16.msrb.mxu3 %v9802_v15 }
 0x7ca   : > { %v9546_v58 = vor.u32 %v10218_v21, %v9543_v61 }
 0x7cb   : > { %v12822_v50 = vpack.c.bf16 %v5645_v54, %v5641_v1  ;;  %v12824_v56 = vpop.f32.mrf.mxu2  ;;  %v12826_v49 = vpop.f32.mrf.mxu3 }
 0x7cc   : > { %v5398_v60 = vpop.f32.mrf.mxu0  ;;  %v5447_v63 = vpop.f32.mrf.mxu1  ;;  %6705 = vmatpush.bf16.msrb.mxu1 %v9546_v58 }
 0x7cd   : > { %v5399_v19 = vadd.f32 %v5398_v60, %v12829_v44 }
 0x7cf   : > { %6467 = vmatmul.bf16.vlgmr.msra.gmra.mxu0 %v12727_v3  ;;  %6516 = vmatmul.bf16.vlgmr.msra.gmra.mxu1 %v12735_v38  ;;  %v5448_v12 = vadd.f32 %v5447_v63, %v5399_v19  ;;  %v10246_v63 = vld [vmem:[#allocation28 + $0x2a4] sm:$0xf] }
 0x7d0   : > { %v9658_v43 = vor.u32 %v10246_v63, %v9655_v14  ;;  %v9639_v63 = vld [vmem:[#allocation28 + $0x290] sm:$0xf0] }
 0x7d1   : > { %v5587_v32 = vmax.f32 %v5448_v12, 0.0 }
 0x7d2   : > { %6755 = vmatpush.bf16.msrb.mxu2 %v9658_v43 }
 0x7d3   : > { %v5496_v24 = vpop.f32.mrf.mxu2  ;;  %v5545_v17 = vpop.f32.mrf.mxu3 }
 0x7d4   : > { %v5400_v26 = vpop.f32.mrf.mxu0  ;;  %v5449_v18 = vpop.f32.mrf.mxu1  ;;  %v5497_v4 = vadd.f32 %v5496_v24, %v12835_v57 }
 0x7d5   : > { %v5401_v33 = vadd.f32 %v5400_v26, %v12829_v44 }
 0x7d6   : > { %v5546_v47 = vadd.f32 %v5545_v17, %v5497_v4 }
 0x7d7   : > { %v5450_v6 = vadd.f32 %v5449_v18, %v5401_v33  ;;  %v10182_v33 = vld [vmem:[#allocation28 + $0xa4] sm:$0xf] }
 0x7d8   : > { %v5588_v7 = vmax.f32 %v5546_v47, 0.0 }
 0x7d9   : > { %v5591_v40 = vmax.f32 %v5450_v6, 0.0  ;;  %v9399_v6 = vld [vmem:[#allocation28 + $0xb0] sm:$0xf0] }
 0x7da   : > { %v9402_v28 = vor.u32 %v10182_v33, %v9399_v6  ;;  %v9383_v33 = vld [vmem:[#allocation28 + $0x90] sm:$0xf0] }
 0x7db   : > { %v12839_v34 = vpack.c.bf16 %v5591_v40, %v5587_v32  ;;  %v5498_v45 = vpop.f32.mrf.mxu2  ;;  %v5547_v62 = vpop.f32.mrf.mxu3  ;;  %v10278_v32 = vld [vmem:[#allocation28 + $0x3a4] sm:$0xf]  ;;  %v9783_v40 = vld [vmem:[#allocation28 + $0x3b0] sm:$0xf0] }
 0x7dc   : > { %v5499_v1 = vadd.f32 %v5498_v45, %v12835_v57  ;;  %v5403_v54 = vpop.f32.mrf.mxu0  ;;  %v5452_v20 = vpop.f32.mrf.mxu1  ;;  %v9786_v2 = vor.u32 %v10278_v32, %v9783_v40  ;;  %6657 = vmatpush.bf16.msrb.mxu0 %v9402_v28  ;;  %v10214_v45 = vld [vmem:[#allocation28 + $0x1a4] sm:$0xf]  ;;  %v9767_v32 = vld [vmem:[#allocation28 + $0x390] sm:$0xf0] }
 0x7dd   : > { %6565 = vmatmul.bf16.vlgmr.msra.gmra.mxu2 %v12839_v34  ;;  %v5404_v16 = vadd.f32 %v5403_v54, %v12829_v44  ;;  %v10274_v28 = vld [vmem:[#allocation28 + $0x384] sm:$0xf] }
 0x7de   : > { %v5548_v11 = vadd.f32 %v5547_v62, %v5499_v1  ;;  %v9527_v62 = vld [vmem:[#allocation28 + $0x1b0] sm:$0xf0]  ;;  %6804 = vmatpush.bf16.msrb.mxu3 %v9786_v2  ;;  %v9770_v40 = vor.u32 %v10274_v28, %v9767_v32 }
 0x7df   : > { %6472 = vmatmul.bf16.gmra.mxu0 %v12739_v22  ;;  %6521 = vmatmul.bf16.gmra.mxu1 %v12747_v46  ;;  %v5453_v41 = vadd.f32 %v5452_v20, %v5404_v16  ;;  %v9530_v54 = vor.u32 %v10214_v45, %v9527_v62  ;;  %v10242_v16 = vld [vmem:[#allocation28 + $0x284] sm:$0xf]  ;;  %v9511_v62 = vld [vmem:[#allocation28 + $0x190] sm:$0xf0] }
 0x7e0   : > { %v5592_v37 = vmax.f32 %v5548_v11, 0.0  ;;  %v10210_v45 = vld [vmem:[#allocation28 + $0x184] sm:$0xf] }
 0x7e1   : > { %v5595_v4 = vmax.f32 %v5453_v41, 0.0  ;;  %6706 = vmatpush.bf16.msrb.mxu1 %v9530_v54  ;;  %v9514_v54 = vor.u32 %v10210_v45, %v9511_v62  ;;  %v5618_v45 = vmax.f32 %v12775_v8, 0.0  ;;  %v5328_v8 = vadd.f32 %v12794_v30, %v12723_v39 }
 0x7e2   : > { %v12846_v60 = vpack.c.bf16 %v5592_v37, %v5588_v7  ;;  %6805 = vmatpush.bf16.msrb.mxu3 %v9770_v40 }
 0x7e3   : > { %v5501_v19 = vpop.f32.mrf.mxu2  ;;  %v5550_v9 = vpop.f32.mrf.mxu3 }
 0x7e4   : > { %6614 = vmatmul.bf16.vlgmr.msra.gmra.mxu3 %v12846_v60  ;;  %v5405_v24 = vpop.f32.mrf.mxu0  ;;  %v5454_v17 = vpop.f32.mrf.mxu1  ;;  %v5502_v12 = vadd.f32 %v5501_v19, %v12835_v57 }
 0x7e5   : > { %v5406_v26 = vadd.f32 %v5405_v24, %v12829_v44  ;;  %6707 = vmatpush.bf16.msrb.mxu1 %v9514_v54 }
 0x7e6   : > { %v5551_v21 = vadd.f32 %v5550_v9, %v5502_v12  ;;  %v9642_v9 = vor.u32 %v10242_v16, %v9639_v63  ;;  %v10178_v12 = vld [vmem:[#allocation28 + $0x84] sm:$0xf] }
 0x7e7   : > { %v5455_v18 = vadd.f32 %v5454_v17, %v5406_v26 }
 0x7e8   : > { %v5596_v58 = vmax.f32 %v5551_v21, 0.0  ;;  %6756 = vmatpush.bf16.msrb.mxu2 %v9642_v9 }
 0x7e9   : > { %v5599_v51 = vmax.f32 %v5455_v18, 0.0 }
 0x7eb   : > { %v12851_v55 = vpack.c.bf16 %v5599_v51, %v5595_v4  ;;  %v5503_v53 = vpop.f32.mrf.mxu2  ;;  %v5552_v15 = vpop.f32.mrf.mxu3  ;;  %v9386_v51 = vor.u32 %v10178_v12, %v9383_v33 }
 0x7ec   : > { %v5504_v61 = vadd.f32 %v5503_v53, %v12835_v57  ;;  %v5408_v47 = vpop.f32.mrf.mxu0  ;;  %v5457_v1 = vpop.f32.mrf.mxu1 }
 0x7ed   : > { %6570 = vmatmul.bf16.gmra.mxu2 %v12851_v55  ;;  %v5409_v7 = vadd.f32 %v5408_v47, %v12829_v44  ;;  %6658 = vmatpush.bf16.msrb.mxu0 %v9386_v51  ;;  %v9367_v51 = vld [vmem:[#allocation28 + $0x70] sm:$0xf0] }
 0x7ee   : > { %v5553_v20 = vadd.f32 %v5552_v15, %v5504_v61 }
 0x7ef   : > { %6477 = vmatmul.bf16.gmra.mxu0 %v12751_v31  ;;  %6526 = vmatmul.bf16.gmra.mxu1 %v12759_v0  ;;  %v5458_v17 = vadd.f32 %v5457_v1, %v5409_v7 }
 0x7f0   : > { %v5600_v11 = vmax.f32 %v5553_v20, 0.0 }
 0x7f1   : > { %v5603_v6 = vmax.f32 %v5458_v17, 0.0 }
 0x7f2   : > { %v12858_v37 = vpack.c.bf16 %v5600_v11, %v5596_v58  ;;  %v5323_v58 = vadd.f32 %v12779_v27, %v12723_v39 }
 0x7f3   : > { %v5506_v14 = vpop.f32.mrf.mxu2  ;;  %v5555_v19 = vpop.f32.mrf.mxu3 }
 0x7f4   : > { %6619 = vmatmul.bf16.gmra.mxu3 %v12858_v37  ;;  %v5410_v43 = vpop.f32.mrf.mxu0  ;;  %v5459_v24 = vpop.f32.mrf.mxu1  ;;  %v5507_v18 = vadd.f32 %v5506_v14, %v12835_v57  ;;  %v10238_v14 = vld [vmem:[#allocation28 + $0x264] sm:$0xf]  ;;  %v5372_v17 = vadd.f32 %v12781_v13, %v5323_v58 }
 0x7f5   : > { %v5411_v41 = vadd.f32 %v5410_v43, %v12829_v44 }
 0x7f6   : > { %v5556_v21 = vadd.f32 %v5555_v19, %v5507_v18  ;;  %v9623_v19 = vld [vmem:[#allocation28 + $0x270] sm:$0xf0]  ;;  %v5622_v33 = vmax.f32 %v5372_v17, 0.0  ;;  %v10234_v17 = vld [vmem:[#allocation28 + $0x244] sm:$0xf] }
 0x7f7   : > { %v5460_v26 = vadd.f32 %v5459_v24, %v5411_v41  ;;  %v9626_v24 = vor.u32 %v10238_v14, %v9623_v19 }
 0x7f8   : > { %v5604_v11 = vmax.f32 %v5556_v21, 0.0 }
 0x7f9   : > { %v5607_v4 = vmax.f32 %v5460_v26, 0.0  ;;  %6757 = vmatpush.bf16.msrb.mxu2 %v9626_v24 }
 0x7fb   : > { %v12863_v2 = vpack.c.bf16 %v5607_v4, %v5603_v6  ;;  %v5508_v53 = vpop.f32.mrf.mxu2  ;;  %v5557_v15 = vpop.f32.mrf.mxu3  ;;  %v10174_v4 = vld [vmem:[#allocation28 + $0x64] sm:$0xf] }
 0x7fc   : > { %v5509_v61 = vadd.f32 %v5508_v53, %v12835_v57  ;;  %v5413_v47 = vpop.f32.mrf.mxu0  ;;  %v5462_v1 = vpop.f32.mrf.mxu1  ;;  %v9370_v40 = vor.u32 %v10174_v4, %v9367_v51  ;;  %v10270_v53 = vld [vmem:[#allocation28 + $0x364] sm:$0xf] }
 0x7fd   : > { %6575 = vmatmul.bf16.gmra.mxu2 %v12863_v2  ;;  %v5414_v16 = vadd.f32 %v5413_v47, %v12829_v44  ;;  %v10206_v47 = vld [vmem:[#allocation28 + $0x164] sm:$0xf] }
 0x7fe   : > { %v5558_v20 = vadd.f32 %v5557_v15, %v5509_v61  ;;  %v9751_v15 = vld [vmem:[#allocation28 + $0x370] sm:$0xf0]  ;;  %6659 = vmatpush.bf16.msrb.mxu0 %v9370_v40  ;;  %v10170_v40 = vld [vmem:[#allocation28 + $0x44] sm:$0xf] }
 0x7ff   : > { %6482 = vmatmul.bf16.gmra.mxu0 %v12763_v10  ;;  %6531 = vmatmul.bf16.gmra.mxu1 %v12771_v52  ;;  %v5463_v18 = vadd.f32 %v5462_v1, %v5414_v16  ;;  %v9754_v13 = vor.u32 %v10270_v53, %v9751_v15  ;;  %v9495_v1 = vld [vmem:[#allocation28 + $0x170] sm:$0xf0]  ;;  %v12882_v16 = vpack.c.bf16 %v5622_v33, %v5618_v45 }
 0x800   : > { %v5608_v7 = vmax.f32 %v5558_v20, 0.0  ;;  %v9351_v53 = vld [vmem:[#allocation28 + $0x50] sm:$0xf0] }
 0x801   : > { %v5611_v28 = vmax.f32 %v5463_v18, 0.0  ;;  %6806 = vmatpush.bf16.msrb.mxu3 %v9754_v13  ;;  %v9354_v45 = vor.u32 %v10170_v40, %v9351_v53 }
 0x802   : > { %v12872_v63 = vpack.c.bf16 %v5608_v7, %v5604_v11  ;;  %v9498_v7 = vor.u32 %v10206_v47, %v9495_v1  ;;  %v5626_v47 = vmax.f32 %v12790_v29, 0.0 }
 0x803   : > { %v5511_v9 = vpop.f32.mrf.mxu2  ;;  %v5560_v43 = vpop.f32.mrf.mxu3  ;;  %6660 = vmatpush.bf16.msrb.mxu0 %v9354_v45 }
 0x804   : > { %6624 = vmatmul.bf16.gmra.mxu3 %v12872_v63  ;;  %v5415_v41 = vpop.f32.mrf.mxu0  ;;  %v5464_v26 = vpop.f32.mrf.mxu1  ;;  %v5512_v6 = vadd.f32 %v5511_v9, %v12835_v57  ;;  %6708 = vmatpush.bf16.msrb.mxu1 %v9498_v7 }
 0x805   : > { %v5416_v27 = vadd.f32 %v5415_v41, %v12829_v44  ;;  %v9607_v41 = vld [vmem:[#allocation28 + $0x250] sm:$0xf0] }
 0x806   : > { %v5561_v54 = vadd.f32 %v5560_v43, %v5512_v6 }
 0x807   : > { %v5465_v12 = vadd.f32 %v5464_v26, %v5416_v27  ;;  %v9610_v27 = vor.u32 %v10234_v17, %v9607_v41 }
 0x808   : > { %v5612_v19 = vmax.f32 %v5561_v54, 0.0 }
 0x809   : > { %v5615_v32 = vmax.f32 %v5465_v12, 0.0  ;;  %v5377_v12 = vadd.f32 %v12796_v25, %v5328_v8  ;;  %6758 = vmatpush.bf16.msrb.mxu2 %v9610_v27 }
 0x80b   : > { %v12879_v62 = vpack.c.bf16 %v5615_v32, %v5611_v28  ;;  %v5513_v21 = vpop.f32.mrf.mxu2  ;;  %v5562_v61 = vpop.f32.mrf.mxu3  ;;  %v5630_v28 = vmax.f32 %v5377_v12, 0.0  ;;  %v10230_v12 = vld [vmem:[#allocation28 + $0x224] sm:$0xf] }
 0x80c   : > { %v5514_v20 = vadd.f32 %v5513_v21, %v12835_v57  ;;  %v5418_v58 = vpop.f32.mrf.mxu0  ;;  %v5467_v11 = vpop.f32.mrf.mxu1  ;;  %v10266_v21 = vld [vmem:[#allocation28 + $0x344] sm:$0xf] }
 0x80d   : > { %6580 = vmatmul.bf16.gmra.mxu2 %v12879_v62  ;;  %v5419_v43 = vadd.f32 %v5418_v58, %v12829_v44  ;;  %v10202_v58 = vld [vmem:[#allocation28 + $0x144] sm:$0xf] }
 0x80e   : > { %v5563_v14 = vadd.f32 %v5562_v61, %v5514_v20  ;;  %v9735_v61 = vld [vmem:[#allocation28 + $0x350] sm:$0xf0] }
 0x80f   : > { %6487 = vmatmul.bf16.gmra.mxu0 %v12777_v5  ;;  %6536 = vmatmul.bf16.gmra.mxu1 %v12882_v16  ;;  %v5468_v4 = vadd.f32 %v5467_v11, %v5419_v43  ;;  %v9738_v25 = vor.u32 %v10266_v21, %v9735_v61  ;;  %v9479_v11 = vld [vmem:[#allocation28 + $0x150] sm:$0xf0]  ;;  %v12900_v43 = vpack.c.bf16 %v5630_v28, %v5626_v47  ;;  %v10262_v47 = vld [vmem:[#allocation28 + $0x324] sm:$0xf] }
 0x810   : > { %v5616_v9 = vmax.f32 %v5563_v14, 0.0  ;;  %v9463_v61 = vld [vmem:[#allocation28 + $0x130] sm:$0xf0] }
 0x811   : > { %v5619_v15 = vmax.f32 %v5468_v4, 0.0  ;;  %6807 = vmatpush.bf16.msrb.mxu3 %v9738_v25 }
 0x812   : > { %v12890_v24 = vpack.c.bf16 %v5616_v9, %v5612_v19  ;;  %v9482_v9 = vor.u32 %v10202_v58, %v9479_v11 }
 0x813   : > { %v5516_v26 = vpop.f32.mrf.mxu2  ;;  %v5565_v18 = vpop.f32.mrf.mxu3 }
 0x814   : > { %6629 = vmatmul.bf16.gmra.mxu3 %v12890_v24  ;;  %v5420_v33 = vpop.f32.mrf.mxu0  ;;  %v5469_v6 = vpop.f32.mrf.mxu1  ;;  %v5517_v32 = vadd.f32 %v5516_v26, %v12835_v57  ;;  %6709 = vmatpush.bf16.msrb.mxu1 %v9482_v9  ;;  %v5333_v26 = vadd.f32 %v12809_v42, %v12723_v39  ;;  %v10166_v42 = vld [vmem:[#allocation28 + $0x24] sm:$0xf]  ;;  %v5634_v9 = vmax.f32 %v12805_v35, 0.0 }
 0x815   : > { %v5421_v30 = vadd.f32 %v5420_v33, %v12829_v44  ;;  %v9591_v33 = vld [vmem:[#allocation28 + $0x230] sm:$0xf0] }
 0x816   : > { %v5566_v7 = vadd.f32 %v5565_v18, %v5517_v32  ;;  %v5382_v32 = vadd.f32 %v12811_v23, %v5333_v26 }
 0x817   : > { %v5470_v51 = vadd.f32 %v5469_v6, %v5421_v30  ;;  %v9594_v30 = vor.u32 %v10230_v12, %v9591_v33 }
 0x818   : > { %v5620_v29 = vmax.f32 %v5566_v7, 0.0  ;;  %v5638_v58 = vmax.f32 %v5382_v32, 0.0 }
 0x819   : > { %v5623_v13 = vmax.f32 %v5470_v51, 0.0  ;;  %6759 = vmatpush.bf16.msrb.mxu2 %v9594_v30 }
 0x81b   : > { %v12897_v1 = vpack.c.bf16 %v5623_v13, %v5619_v15  ;;  %v5518_v54 = vpop.f32.mrf.mxu2  ;;  %v5567_v20 = vpop.f32.mrf.mxu3  ;;  %v9335_v15 = vld [vmem:[#allocation28 + $0x30] sm:$0xf0]  ;;  %v10198_v13 = vld [vmem:[#allocation28 + $0x124] sm:$0xf] }
 0x81c   : > { %v5519_v14 = vadd.f32 %v5518_v54, %v12835_v57  ;;  %v5423_v8 = vpop.f32.mrf.mxu0  ;;  %v5472_v19 = vpop.f32.mrf.mxu1  ;;  %v9338_v21 = vor.u32 %v10166_v42, %v9335_v15  ;;  %v9719_v54 = vld [vmem:[#allocation28 + $0x330] sm:$0xf0]  ;;  %v10226_v15 = vld [vmem:[#allocation28 + $0x204] sm:$0xf] }
 0x81d   : > { %6585 = vmatmul.bf16.gmra.mxu2 %v12897_v1  ;;  %v5424_v18 = vadd.f32 %v5423_v8, %v12829_v44  ;;  %v9722_v23 = vor.u32 %v10262_v47, %v9719_v54  ;;  %v9319_v8 = vld [vmem:[#allocation28 + $0x10] sm:$0xf0]  ;;  %v10258_v54 = vld [vmem:[#allocation28 + $0x304] sm:$0xf] }
 0x81e   : > { %v5568_v17 = vadd.f32 %v5567_v20, %v5519_v14  ;;  %v9466_v20 = vor.u32 %v10198_v13, %v9463_v61  ;;  %6661 = vmatpush.bf16.msrb.mxu0 %v9338_v21  ;;  %v10162_v14 = vld [vmem:[#allocation28 + $0x4] sm:$0xf]  ;;  %v9575_v13 = vld [vmem:[#allocation28 + $0x210] sm:$0xf0] }
 0x81f   : > { %6492 = vmatmul.bf16.gmra.mxu0 %v12792_v48  ;;  %6541 = vmatmul.bf16.gmra.mxu1 %v12900_v43  ;;  %v5473_v40 = vadd.f32 %v5472_v19, %v5424_v18  ;;  %v10194_v19 = vld [vmem:[#allocation28 + $0x104] sm:$0xf]  ;;  %v9322_v26 = vor.u32 %v10162_v14, %v9319_v8  ;;  %v9447_v18 = vld [vmem:[#allocation28 + $0x110] sm:$0xf0]  ;;  %v9578_v61 = vor.u32 %v10226_v15, %v9575_v13 }
 0x820   : > { %v5624_v41 = vmax.f32 %v5568_v17, 0.0  ;;  %6710 = vmatpush.bf16.msrb.mxu1 %v9466_v20  ;;  %6808 = vmatpush.bf16.msrb.mxu3 %v9722_v23  ;;  %v9703_v20 = vld [vmem:[#allocation28 + $0x310] sm:$0xf0] }
 0x821   : > { %v5627_v11 = vmax.f32 %v5473_v40, 0.0  ;;  %6760 = vmatpush.bf16.msrb.mxu2 %v9578_v61  ;;  %v9437_v61 = vld [vmem:[#allocation28 + $0xe8] sm:$0xf] }
 0x822   : > { %v12908_v27 = vpack.c.bf16 %v5624_v41, %v5620_v29  ;;  %6662 = vmatpush.bf16.msrb.mxu0 %v9322_v26 }
 0x823   : > { %v5521_v6 = vpop.f32.mrf.mxu2  ;;  %v5570_v4 = vpop.f32.mrf.mxu3 }
 0x824   : > { %6634 = vmatmul.bf16.gmra.mxu3 %v12908_v27  ;;  %v5425_v51 = vpop.f32.mrf.mxu0  ;;  %v5474_v28 = vpop.f32.mrf.mxu1  ;;  %v5522_v25 = vadd.f32 %v5521_v6, %v12835_v57 }
 0x825   : > { %v5426_v53 = vadd.f32 %v5425_v51, %v12829_v44  ;;  %v9450_v51 = vor.u32 %v10194_v19, %v9447_v18 }
 0x826   : > { %v5571_v12 = vadd.f32 %v5570_v4, %v5522_v25  ;;  %v5338_v4 = vadd.f32 %v12824_v56, %v12723_v39  ;;  %v9706_v56 = vor.u32 %v10258_v54, %v9703_v20 }
 0x827   : > { %v5475_v45 = vadd.f32 %v5474_v28, %v5426_v53  ;;  %v12918_v28 = vpack.c.bf16 %v5638_v58, %v5634_v9  ;;  %6711 = vmatpush.bf16.msrb.mxu1 %v9450_v51  ;;  %v5642_v9 = vmax.f32 %v12820_v59, 0.0 }
 0x828   : > { %v5628_v35 = vmax.f32 %v5571_v12, 0.0  ;;  %v5387_v58 = vadd.f32 %v12826_v49, %v5338_v4  ;;  %6809 = vmatpush.bf16.msrb.mxu3 %v9706_v56 }
 0x829   : > { %v5631_v7 = vmax.f32 %v5475_v45, 0.0 }
 0x82a   : > { %v5646_v14 = vmax.f32 %v5387_v58, 0.0 }
 0x82b   : > { %v12915_v17 = vpack.c.bf16 %v5631_v7, %v5627_v11  ;;  %v5523_v29 = vpop.f32.mrf.mxu2  ;;  %v5572_v41 = vpop.f32.mrf.mxu3 }
 0x82c   : > { %v5524_v33 = vadd.f32 %v5523_v29, %v12835_v57  ;;  %v5428_v6 = vpop.f32.mrf.mxu0  ;;  %v5477_v30 = vpop.f32.mrf.mxu1 }
 0x82d   : > { %6590 = vmatmul.bf16.gmra.mxu2 %v12915_v17  ;;  %v5429_v53 = vadd.f32 %v5428_v6, %v12829_v44  ;;  %v12936_v6 = vpack.c.bf16 %v5646_v14, %v5642_v9 }
 0x82e   : > { %v5573_v32 = vadd.f32 %v5572_v41, %v5524_v33 }
 0x82f   : > { %6497 = vmatmul.bf16.gmra.mxu0 %v12807_v36  ;;  %6546 = vmatmul.bf16.gmra.mxu1 %v12918_v28  ;;  %v5478_v11 = vadd.f32 %v5477_v30, %v5429_v53 }
 0x830   : > { %v5632_v40 = vmax.f32 %v5573_v32, 0.0 }
 0x831   : > { %v5635_v8 = vmax.f32 %v5478_v11, 0.0  ;;  %v10289_v11 = vld [vmem:[#allocation28 + $0x3f4] sm:$0xf0] }
 0x832   : > { %v12926_v42 = vpack.c.bf16 %v5632_v40, %v5628_v35  ;;  %v9693_v35 = vld [vmem:[#allocation28 + $0x2e8] sm:$0xf]  ;;  %v10257_v40 = vld [vmem:[#allocation28 + $0x2f4] sm:$0xf0] }
 0x833   : > { %v5526_v45 = vpop.f32.mrf.mxu2  ;;  %v5575_v21 = vpop.f32.mrf.mxu3  ;;  %v9694_v53 = vor.u32 %v10257_v40, %v9693_v35 }
 0x834   : > { %6639 = vmatmul.bf16.gmra.mxu3 %v12926_v42  ;;  %v5430_v25 = vpop.f32.mrf.mxu0  ;;  %v5479_v47 = vpop.f32.mrf.mxu1  ;;  %v5527_v23 = vadd.f32 %v5526_v45, %v12835_v57 }
 0x835   : > { %v5431_v39 = vadd.f32 %v5430_v25, %v12829_v44  ;;  %6949 = vmatpush.bf16.msra.mxu2 %v9694_v53  ;;  %v10193_v25 = vld [vmem:[#allocation28 + $0xf4] sm:$0xf0] }
 0x836   : > { %v5576_v18 = vadd.f32 %v5575_v21, %v5527_v23  ;;  %v9438_v58 = vor.u32 %v10193_v25, %v9437_v61  ;;  %v10225_v23 = vld [vmem:[#allocation28 + $0x1f4] sm:$0xf0] }
 0x837   : > { %v5480_v7 = vadd.f32 %v5479_v47, %v5431_v39  ;;  %v9821_v47 = vld [vmem:[#allocation28 + $0x3e8] sm:$0xf] }
 0x838   : > { %v5636_v51 = vmax.f32 %v5576_v18, 0.0  ;;  %v9822_v39 = vor.u32 %v10289_v11, %v9821_v47  ;;  %6851 = vmatpush.bf16.msra.mxu0 %v9438_v58  ;;  %v10253_v58 = vld [vmem:[#allocation28 + $0x2d4] sm:$0xf0]  ;;  %v9421_v11 = vld [vmem:[#allocation28 + $0xc8] sm:$0xf] }
 0x839   : > { %v5639_v19 = vmax.f32 %v5480_v7, 0.0  ;;  %v9565_v7 = vld [vmem:[#allocation28 + $0x1e8] sm:$0xf] }
 0x83a   : > { %6998 = vmatpush.bf16.msra.mxu3 %v9822_v39 }
 0x83b   : > { %v12933_v29 = vpack.c.bf16 %v5639_v19, %v5635_v8  ;;  %v5528_v41 = vpop.f32.mrf.mxu2  ;;  %v5577_v26 = vpop.f32.mrf.mxu3  ;;  %v9566_v8 = vor.u32 %v10225_v23, %v9565_v7  ;;  %v10189_v7 = vld [vmem:[#allocation28 + $0xd4] sm:$0xf0]  ;;  %v9805_v23 = vld [vmem:[#allocation28 + $0x3c8] sm:$0xf] }
 0x83c   : > { %v5529_v49 = vadd.f32 %v5528_v41, %v12835_v57  ;;  %v5433_v12 = vpop.f32.mrf.mxu0  ;;  %v5482_v33 = vpop.f32.mrf.mxu1 }
 0x83d   : > { %6595 = vmatmul.bf16.gmra.mxu2 %v12933_v29  ;;  %v5434_v32 = vadd.f32 %v5433_v12, %v12829_v44  ;;  %6900 = vmatpush.bf16.msra.mxu1 %v9566_v8 }
 0x83e   : > { %v5578_v30 = vadd.f32 %v5577_v26, %v5529_v49 }
 0x83f   : > { %6502 = vmatmul.bf16.gmra.mxu0 %v12822_v50  ;;  %6551 = vmatmul.bf16.gmra.mxu1 %v12936_v6  ;;  %v5483_v54 = vadd.f32 %v5482_v33, %v5434_v32 }
 0x840   : > { %v5640_v59 = vmax.f32 %v5578_v30, 0.0 }
 0x841   : > { %v5643_v19 = vmax.f32 %v5483_v54, 0.0 }
 0x842   : > { %v12942_v4 = vpack.c.bf16 %v5640_v59, %v5636_v51 }
 0x843   : > { %v5531_v15 = vpop.f32.mrf.mxu2  ;;  %v5580_v13 = vpop.f32.mrf.mxu3 }
 0x844   : > { %6644 = vmatmul.bf16.gmra.mxu3 %v12942_v4  ;;  %v5435_v45 = vpop.f32.mrf.mxu0  ;;  %v5484_v21 = vpop.f32.mrf.mxu1  ;;  %v5532_v14 = vadd.f32 %v5531_v15, %v12835_v57 }
 0x845   : > { %v5436_v20 = vadd.f32 %v5435_v45, %v12829_v44 }
 0x846   : > { %v5581_v18 = vadd.f32 %v5580_v13, %v5532_v14  ;;  %v10285_v14 = vld [vmem:[#allocation28 + $0x3d4] sm:$0xf0] }
 0x847   : > { %v5485_v56 = vadd.f32 %v5484_v21, %v5436_v20  ;;  %v9677_v20 = vld [vmem:[#allocation28 + $0x2c8] sm:$0xf] }
 0x848   : > { %v5644_v51 = vmax.f32 %v5581_v18, 0.0  ;;  %v9806_v18 = vor.u32 %v10285_v14, %v9805_v23 }
 0x849   : > { %v5647_v9 = vmax.f32 %v5485_v56, 0.0  ;;  %v9678_v56 = vor.u32 %v10253_v58, %v9677_v20 }
 0x84a   : > { %6999 = vmatpush.bf16.msra.mxu3 %v9806_v18  ;;  %v10185_v18 = vld [vmem:[#allocation28 + $0xb4] sm:$0xf0] }
 0x84b   : > { %v12947_v41 = vpack.c.bf16 %v5647_v9, %v5643_v19  ;;  %v5533_v26 = vpop.f32.mrf.mxu2  ;;  %v5582_v33 = vpop.f32.mrf.mxu3  ;;  %6950 = vmatpush.bf16.msra.mxu2 %v9678_v56 }
 0x84c   : > { %v5534_v44 = vadd.f32 %v5533_v26, %v12835_v57  ;;  %v6468_v49 = vpop.f32.mrf.mxu0  ;;  %v6517_v12 = vpop.f32.mrf.mxu1  ;;  %v12959_v57 = vld [vmem:[%s13552_s8] sm:$0xf]  ;;  %v9422_v26 = vor.u32 %v10189_v7, %v9421_v11 }
 0x84d   : > { %6600 = vmatmul.bf16.gmra.mxu2 %v12947_v41  ;;  %v12962_v53 = vperm.slane %v12959_v57, 0 }
 0x84e   : > { %v5583_v30 = vadd.f32 %v5582_v33, %v5534_v44  ;;  %v9549_v44 = vld [vmem:[#allocation28 + $0x1c8] sm:$0xf]  ;;  %6852 = vmatpush.bf16.msra.mxu0 %v9422_v26 }
 0x84f   : > { %6663 = vmatmul.bf16.vlgmr.msrb.gmra.mxu0 %v12727_v3  ;;  %6712 = vmatmul.bf16.vlgmr.msrb.gmra.mxu1 %v12735_v38  ;;  %v6469_v45 = vadd.f32 %v6468_v49, %v12962_v53  ;;  %v10221_v49 = vld [vmem:[#allocation28 + $0x1d4] sm:$0xf0] }
 0x850   : > { %v5648_v59 = vmax.f32 %v5583_v30, 0.0 }
 0x851   : > { %v6518_v61 = vadd.f32 %v6517_v12, %v6469_v45  ;;  %v9550_v12 = vor.u32 %v10221_v49, %v9549_v44  ;;  %v9789_v44 = vld [vmem:[#allocation28 + $0x3a8] sm:$0xf]  ;;  %v10281_v49 = vld [vmem:[#allocation28 + $0x3b4] sm:$0xf0] }
 0x852   : > { %v12953_v32 = vpack.c.bf16 %v5648_v59, %v5644_v51 }
 0x853   : > { %6901 = vmatpush.bf16.msra.mxu1 %v9550_v12 }
 0x854   : > { %6649 = vmatmul.bf16.gmra.mxu3 %v12953_v32  ;;  %v6470_v35 = vpop.f32.mrf.mxu0  ;;  %v6519_v40 = vpop.f32.mrf.mxu1 }
 0x855   : > { %v6471_v8 = vadd.f32 %v6470_v35, %v12962_v53 }
 0x857   : > { %v6520_v30 = vadd.f32 %v6519_v40, %v6471_v8  ;;  %v9661_v8 = vld [vmem:[#allocation28 + $0x2a8] sm:$0xf] }
 0x85c   : > { %v6473_v15 = vpop.f32.mrf.mxu0  ;;  %v6522_v13 = vpop.f32.mrf.mxu1 }
 0x85d   : > { %6761 = vmatmul.bf16.vlgmr.msrb.gmra.mxu2 %v12839_v34 }
 0x85f   : > { %6668 = vmatmul.bf16.gmra.mxu0 %v12739_v22  ;;  %6717 = vmatmul.bf16.gmra.mxu1 %v12747_v46 }
 0x860   : > { %v6566_v21 = vpop.f32.mrf.mxu2 }
 0x861   : > { %v6567_v54 = vadd.f32 %v6566_v21, %v6518_v61  ;;  %v6474_v61 = vadd.f32 %v6473_v15, %v12962_v53 }
 0x863   : > { %v6523_v40 = vadd.f32 %v6522_v13, %v6474_v61 }
 0x864   : > { %6810 = vmatmul.bf16.vlgmr.msrb.gmra.mxu3 %v12846_v60  ;;  %v6475_v25 = vpop.f32.mrf.mxu0  ;;  %v12969_v47 = vpop.f32.mrf.mxu1 }
 0x865   : > { %v6476_v13 = vadd.f32 %v6475_v25, %v12962_v53 }
 0x867   : > { %v6615_v39 = vpop.f32.mrf.mxu3 }
 0x868   : > { %v6616_v19 = vadd.f32 %v6615_v39, %v6567_v54  ;;  %v6568_v9 = vpop.f32.mrf.mxu2 }
 0x869   : > { %v6569_v35 = vadd.f32 %v6568_v9, %v6520_v30  ;;  %v9405_v9 = vld [vmem:[#allocation28 + $0xa8] sm:$0xf] }
 0x86a   : > { %v7243_v33 = vsub.f32 0.0, %v6616_v19  ;;  %v10249_v19 = vld [vmem:[#allocation28 + $0x2b4] sm:$0xf0]  ;;  %v9406_v30 = vor.u32 %v10185_v18, %v9405_v9 }
 0x86b   : > { %v9662_v26 = vor.u32 %v10249_v19, %v9661_v8 }
 0x86c   : > { %v7307_v51 = vmul.f32 1.442695, %v7243_v33  ;;  %v6478_v59 = vpop.f32.mrf.mxu0  ;;  %v12972_v45 = vpop.f32.mrf.mxu1  ;;  %6853 = vmatpush.bf16.msra.mxu0 %v9406_v30 }
 0x86d   : > { %6766 = vmatmul.bf16.gmra.mxu2 %v12851_v55 }
 0x86e   : > { %10555 = vpow2.f32 %v7307_v51  ;;  %v9790_v51 = vor.u32 %v10281_v49, %v9789_v44  ;;  %6951 = vmatpush.bf16.msra.mxu2 %v9662_v26 }
 0x86f   : > { %v6617_v21 = vpop.f32.mrf.mxu3  ;;  %6673 = vmatmul.bf16.gmra.mxu0 %v12751_v31  ;;  %6722 = vmatmul.bf16.gmra.mxu1 %v12759_v0 }
 0x870   : > { %v6618_v54 = vadd.f32 %v6617_v21, %v6569_v35  ;;  %v6571_v20 = vpop.f32.mrf.mxu2  ;;  %v9533_v35 = vld [vmem:[#allocation28 + $0x1a8] sm:$0xf]  ;;  %v10217_v21 = vld [vmem:[#allocation28 + $0x1b4] sm:$0xf0]  ;;  %7000 = vmatpush.bf16.msra.mxu3 %v9790_v51 }
 0x871   : > { %v6572_v14 = vadd.f32 %v6571_v20, %v6523_v40  ;;  %v9534_v61 = vor.u32 %v10217_v21, %v9533_v35  ;;  %v9645_v51 = vld [vmem:[#allocation28 + $0x288] sm:$0xf] }
 0x872   : > { %v7247_v58 = vsub.f32 0.0, %v6618_v54 }
 0x873   : > { %6902 = vmatpush.bf16.msra.mxu1 %v9534_v61  ;;  %v9389_v61 = vld [vmem:[#allocation28 + $0x88] sm:$0xf] }
 0x874   : > { %v10556_v11 = vpop.eup %10555  ;;  %v7315_v39 = vmul.f32 1.442695, %v7247_v58  ;;  %6815 = vmatmul.bf16.gmra.mxu3 %v12858_v37  ;;  %v12979_v56 = vpop.f32.mrf.mxu0  ;;  %v6525_v58 = vadd.f32 %v12969_v47, %v6476_v13  ;;  %v6479_v47 = vadd.f32 %v6478_v59, %v12962_v53  ;;  %v10245_v59 = vld [vmem:[#allocation28 + $0x294] sm:$0xf0] }
 0x875   : > { %v12981_v7 = vpop.f32.mrf.mxu1  ;;  %v7435_v23 = vadd.f32 1.0, %v10556_v11  ;;  %v9646_v21 = vor.u32 %v10245_v59, %v9645_v51 }
 0x876   : > { %10557 = vpow2.f32 %v7315_v39  ;;  %v6528_v18 = vadd.f32 %v12972_v45, %v6479_v47  ;;  %v9773_v45 = vld [vmem:[#allocation28 + $0x388] sm:$0xf] }
 0x877   : > { %10559 = vrcp.f32 %v7435_v23  ;;  %v6620_v15 = vpop.f32.mrf.mxu3  ;;  %6952 = vmatpush.bf16.msra.mxu2 %v9646_v21 }
 0x878   : > { %v6621_v12 = vadd.f32 %v6620_v15, %v6572_v14  ;;  %v6573_v33 = vpop.f32.mrf.mxu2 }
 0x879   : > { %v6574_v14 = vadd.f32 %v6573_v33, %v6525_v58 }
 0x87a   : > { %v7251_v54 = vsub.f32 0.0, %v6621_v12 }
 0x87c   : > { %v10558_v20 = vpop.eup %10557  ;;  %v7323_v11 = vmul.f32 1.442695, %v7251_v54  ;;  %v12985_v40 = vpop.f32.mrf.mxu0  ;;  %v10181_v54 = vld [vmem:[#allocation28 + $0x94] sm:$0xf0] }
 0x87d   : > { %v12987_v25 = vpop.f32.mrf.mxu1  ;;  %v10560_v39 = vpop.eup %10559  ;;  %v7439_v23 = vadd.f32 1.0, %v10558_v20  ;;  %6771 = vmatmul.bf16.gmra.mxu2 %v12863_v2  ;;  %v6481_v20 = vadd.f32 %v12979_v56, %v12962_v53 }
 0x87e   : > { %7563 = vst [vmem:[%s12992_s2] sm:$0xff] %v10560_v39  ;;  %10561 = vpow2.f32 %v7323_v11  ;;  %v9390_v39 = vor.u32 %v10181_v54, %v9389_v61 }
 0x87f   : > { %10563 = vrcp.f32 %v7439_v23  ;;  %v6622_v8 = vpop.f32.mrf.mxu3  ;;  %6678 = vmatmul.bf16.gmra.mxu0 %v12763_v10  ;;  %6727 = vmatmul.bf16.gmra.mxu1 %v12771_v52  ;;  %v10277_v23 = vld [vmem:[#allocation28 + $0x394] sm:$0xf0] }
 0x880   : > { %v6623_v19 = vadd.f32 %v6622_v8, %v6574_v14  ;;  %v6576_v9 = vpop.f32.mrf.mxu2  ;;  %v9517_v14 = vld [vmem:[#allocation28 + $0x188] sm:$0xf]  ;;  %v10213_v8 = vld [vmem:[#allocation28 + $0x194] sm:$0xf0]  ;;  %v9774_v47 = vor.u32 %v10277_v23, %v9773_v45  ;;  %6854 = vmatpush.bf16.msra.mxu0 %v9390_v39 }
 0x881   : > { %v6577_v30 = vadd.f32 %v6576_v9, %v6528_v18 }
 0x882   : > { %v7255_v15 = vsub.f32 0.0, %v6623_v19  ;;  %v9518_v19 = vor.u32 %v10213_v8, %v9517_v14  ;;  %7001 = vmatpush.bf16.msra.mxu3 %v9774_v47  ;;  %v9629_v14 = vld [vmem:[#allocation28 + $0x268] sm:$0xf] }
 0x884   : > { %v10562_v26 = vpop.eup %10561  ;;  %v7331_v44 = vmul.f32 1.442695, %v7255_v15  ;;  %6820 = vmatmul.bf16.gmra.mxu3 %v12872_v63  ;;  %v13000_v49 = vpop.f32.mrf.mxu0  ;;  %6903 = vmatpush.bf16.msra.mxu1 %v9518_v19  ;;  %v9373_v19 = vld [vmem:[#allocation28 + $0x68] sm:$0xf] }
 0x885   : > { %v13002_v13 = vpop.f32.mrf.mxu1  ;;  %v10564_v12 = vpop.eup %10563  ;;  %v7443_v33 = vadd.f32 1.0, %v10562_v26  ;;  %v6530_v26 = vadd.f32 %v12981_v7, %v6481_v20  ;;  %v6484_v7 = vadd.f32 %v12985_v40, %v12962_v53  ;;  %v10241_v40 = vld [vmem:[#allocation28 + $0x274] sm:$0xf0] }
 0x886   : > { %7567 = vst [vmem:[%s12992_s2 + $0x20] sm:$0xff] %v10564_v12  ;;  %10565 = vpow2.f32 %v7331_v44  ;;  %v9630_v47 = vor.u32 %v10241_v40, %v9629_v14 }
 0x887   : > { %10567 = vrcp.f32 %v7443_v33  ;;  %v6625_v35 = vpop.f32.mrf.mxu3  ;;  %v6533_v54 = vadd.f32 %v12987_v25, %v6484_v7  ;;  %v9757_v25 = vld [vmem:[#allocation28 + $0x368] sm:$0xf] }
 0x888   : > { %v6626_v58 = vadd.f32 %v6625_v35, %v6577_v30  ;;  %v6578_v11 = vpop.f32.mrf.mxu2  ;;  %6953 = vmatpush.bf16.msra.mxu2 %v9630_v47 }
 0x889   : > { %v6579_v30 = vadd.f32 %v6578_v11, %v6530_v26 }
 0x88a   : > { %v7259_v9 = vsub.f32 0.0, %v6626_v58 }
 0x88c   : > { %v10566_v15 = vpop.eup %10565  ;;  %v7339_v18 = vmul.f32 1.442695, %v7259_v9  ;;  %v13008_v44 = vpop.f32.mrf.mxu0  ;;  %v10177_v9 = vld [vmem:[#allocation28 + $0x74] sm:$0xf0] }
 0x88d   : > { %v13010_v56 = vpop.f32.mrf.mxu1  ;;  %v10568_v12 = vpop.eup %10567  ;;  %v7447_v33 = vadd.f32 1.0, %v10566_v15  ;;  %6776 = vmatmul.bf16.gmra.mxu2 %v12879_v62  ;;  %v6486_v15 = vadd.f32 %v13000_v49, %v12962_v53 }
 0x88e   : > { %7571 = vst [vmem:[%s12992_s2 + $0x40] sm:$0xff] %v10568_v12  ;;  %10569 = vpow2.f32 %v7339_v18  ;;  %v9374_v12 = vor.u32 %v10177_v9, %v9373_v19  ;;  %v9357_v19 = vld [vmem:[#allocation28 + $0x48] sm:$0xf]  ;;  %v10173_v9 = vld [vmem:[#allocation28 + $0x54] sm:$0xf0] }
 0x88f   : > { %10571 = vrcp.f32 %v7447_v33  ;;  %v6627_v51 = vpop.f32.mrf.mxu3  ;;  %6683 = vmatmul.bf16.gmra.mxu0 %v12777_v5  ;;  %6732 = vmatmul.bf16.gmra.mxu1 %v12882_v16  ;;  %v10273_v33 = vld [vmem:[#allocation28 + $0x374] sm:$0xf0] }
 0x890   : > { %v6628_v59 = vadd.f32 %v6627_v51, %v6579_v30  ;;  %v6581_v35 = vpop.f32.mrf.mxu2  ;;  %v9501_v30 = vld [vmem:[#allocation28 + $0x168] sm:$0xf]  ;;  %v10209_v51 = vld [vmem:[#allocation28 + $0x174] sm:$0xf0]  ;;  %v9758_v7 = vor.u32 %v10273_v33, %v9757_v25  ;;  %6855 = vmatpush.bf16.msra.mxu0 %v9374_v12  ;;  %v9358_v25 = vor.u32 %v10173_v9, %v9357_v19 }
 0x891   : > { %v6582_v23 = vadd.f32 %v6581_v35, %v6533_v54  ;;  %v10169_v19 = vld [vmem:[#allocation28 + $0x34] sm:$0xf0]  ;;  %v9469_v9 = vld [vmem:[#allocation28 + $0x128] sm:$0xf] }
 0x892   : > { %v7263_v21 = vsub.f32 0.0, %v6628_v59  ;;  %v9502_v59 = vor.u32 %v10209_v51, %v9501_v30  ;;  %7002 = vmatpush.bf16.msra.mxu3 %v9758_v7 }
 0x894   : > { %v10570_v61 = vpop.eup %10569  ;;  %v7347_v45 = vmul.f32 1.442695, %v7263_v21  ;;  %6825 = vmatmul.bf16.gmra.mxu3 %v12890_v24  ;;  %v13020_v20 = vpop.f32.mrf.mxu0  ;;  %6904 = vmatpush.bf16.msra.mxu1 %v9502_v59 }
 0x895   : > { %v13022_v58 = vpop.f32.mrf.mxu1  ;;  %v10572_v11 = vpop.eup %10571  ;;  %v7451_v39 = vadd.f32 1.0, %v10570_v61  ;;  %v6535_v61 = vadd.f32 %v13002_v13, %v6486_v15  ;;  %v6489_v13 = vadd.f32 %v13008_v44, %v12962_v53  ;;  %v9485_v15 = vld [vmem:[#allocation28 + $0x148] sm:$0xf]  ;;  %6856 = vmatpush.bf16.msra.mxu0 %v9358_v25  ;;  %v10201_v25 = vld [vmem:[#allocation28 + $0x134] sm:$0xf0] }
 0x896   : > { %7575 = vst [vmem:[%s12992_s2 + $0x60] sm:$0xff] %v10572_v11  ;;  %10573 = vpow2.f32 %v7347_v45 }
 0x897   : > { %10575 = vrcp.f32 %v7451_v39  ;;  %v6630_v8 = vpop.f32.mrf.mxu3 }
 0x898   : > { %v6631_v26 = vadd.f32 %v6630_v8, %v6582_v23  ;;  %v6583_v18 = vpop.f32.mrf.mxu2 }
 0x899   : > { %v6584_v23 = vadd.f32 %v6583_v18, %v6535_v61  ;;  %v6538_v18 = vadd.f32 %v13010_v56, %v6489_v13  ;;  %v10237_v61 = vld [vmem:[#allocation28 + $0x254] sm:$0xf0] }
 0x89a   : > { %v7267_v35 = vsub.f32 0.0, %v6631_v26  ;;  %v10205_v26 = vld [vmem:[#allocation28 + $0x154] sm:$0xf0] }
 0x89b   : > { %v9486_v44 = vor.u32 %v10205_v26, %v9485_v15  ;;  %v9470_v15 = vor.u32 %v10201_v25, %v9469_v9 }
 0x89c   : > { %v10574_v21 = vpop.eup %10573  ;;  %v7355_v54 = vmul.f32 1.442695, %v7267_v35  ;;  %v13028_v45 = vpop.f32.mrf.mxu0 }
 0x89d   : > { %v13030_v49 = vpop.f32.mrf.mxu1  ;;  %v10576_v11 = vpop.eup %10575  ;;  %v7455_v39 = vadd.f32 1.0, %v10574_v21  ;;  %6781 = vmatmul.bf16.gmra.mxu2 %v12897_v1  ;;  %v9613_v21 = vld [vmem:[#allocation28 + $0x248] sm:$0xf]  ;;  %6905 = vmatpush.bf16.msra.mxu1 %v9486_v44  ;;  %v10197_v44 = vld [vmem:[#allocation28 + $0x114] sm:$0xf0] }
 0x89e   : > { %7579 = vst [vmem:[%s12992_s2 + $0x80] sm:$0xff] %v10576_v11  ;;  %10577 = vpow2.f32 %v7355_v54  ;;  %v9614_v56 = vor.u32 %v10237_v61, %v9613_v21  ;;  %v9741_v11 = vld [vmem:[#allocation28 + $0x348] sm:$0xf] }
 0x89f   : > { %10579 = vrcp.f32 %v7455_v39  ;;  %v6632_v14 = vpop.f32.mrf.mxu3  ;;  %6688 = vmatmul.bf16.gmra.mxu0 %v12792_v48  ;;  %6737 = vmatmul.bf16.gmra.mxu1 %v12900_v43  ;;  %v10269_v39 = vld [vmem:[#allocation28 + $0x354] sm:$0xf0] }
 0x8a0   : > { %v6633_v40 = vadd.f32 %v6632_v14, %v6584_v23  ;;  %v6586_v8 = vpop.f32.mrf.mxu2  ;;  %v9341_v23 = vld [vmem:[#allocation28 + $0x28] sm:$0xf]  ;;  %v6491_v14 = vadd.f32 %v13020_v20, %v12962_v53  ;;  %6954 = vmatpush.bf16.msra.mxu2 %v9614_v56 }
 0x8a1   : > { %v6587_v35 = vadd.f32 %v6586_v8, %v6538_v18  ;;  %v9342_v8 = vor.u32 %v10169_v19, %v9341_v23  ;;  %v10165_v18 = vld [vmem:[#allocation28 + $0x14] sm:$0xf0]  ;;  %6906 = vmatpush.bf16.msra.mxu1 %v9470_v15  ;;  %v9597_v15 = vld [vmem:[#allocation28 + $0x228] sm:$0xf] }
 0x8a2   : > { %v7271_v47 = vsub.f32 0.0, %v6633_v40  ;;  %v6540_v20 = vadd.f32 %v13022_v58, %v6491_v14  ;;  %v6494_v58 = vadd.f32 %v13028_v45, %v12962_v53 }
 0x8a3   : > { %6857 = vmatpush.bf16.msra.mxu0 %v9342_v8 }
 0x8a4   : > { %v10578_v12 = vpop.eup %10577  ;;  %v7363_v33 = vmul.f32 1.442695, %v7271_v47  ;;  %6830 = vmatmul.bf16.gmra.mxu3 %v12908_v27  ;;  %v13040_v30 = vpop.f32.mrf.mxu0  ;;  %v9742_v47 = vor.u32 %v10269_v39, %v9741_v11  ;;  %v6543_v9 = vadd.f32 %v13030_v49, %v6494_v58 }
 0x8a5   : > { %v13042_v51 = vpop.f32.mrf.mxu1  ;;  %v10580_v7 = vpop.eup %10579  ;;  %v7459_v59 = vadd.f32 1.0, %v10578_v12  ;;  %v9325_v12 = vld [vmem:[#allocation28 + $0x8] sm:$0xf] }
 0x8a6   : > { %7583 = vst [vmem:[%s12992_s2 + $0xa0] sm:$0xff] %v10580_v7  ;;  %10581 = vpow2.f32 %v7363_v33  ;;  %7003 = vmatpush.bf16.msra.mxu3 %v9742_v47  ;;  %v9453_v33 = vld [vmem:[#allocation28 + $0x108] sm:$0xf]  ;;  %v9326_v61 = vor.u32 %v10165_v18, %v9325_v12 }
 0x8a7   : > { %10583 = vrcp.f32 %v7459_v59  ;;  %v6635_v54 = vpop.f32.mrf.mxu3 }
 0x8a8   : > { %v6636_v13 = vadd.f32 %v6635_v54, %v6587_v35  ;;  %v6588_v40 = vpop.f32.mrf.mxu2  ;;  %v9454_v54 = vor.u32 %v10197_v44, %v9453_v33  ;;  %6858 = vmatpush.bf16.msra.mxu0 %v9326_v61  ;;  %v9725_v44 = vld [vmem:[#allocation28 + $0x328] sm:$0xf] }
 0x8a9   : > { %v6589_v39 = vadd.f32 %v6588_v40, %v6540_v20 }
 0x8aa   : > { %v7275_v26 = vsub.f32 0.0, %v6636_v13  ;;  %6907 = vmatpush.bf16.msra.mxu1 %v9454_v54 }
 0x8ac   : > { %v10582_v7 = vpop.eup %10581  ;;  %v7371_v59 = vmul.f32 1.442695, %v7275_v26  ;;  %v13048_v35 = vpop.f32.mrf.mxu0  ;;  %v10233_v26 = vld [vmem:[#allocation28 + $0x234] sm:$0xf0] }
 0x8ad   : > { %v13050_v21 = vpop.f32.mrf.mxu1  ;;  %v10584_v56 = vpop.eup %10583  ;;  %v7463_v11 = vadd.f32 1.0, %v10582_v7  ;;  %6786 = vmatmul.bf16.gmra.mxu2 %v12915_v17  ;;  %v9598_v45 = vor.u32 %v10233_v26, %v9597_v15  ;;  %v10265_v7 = vld [vmem:[#allocation28 + $0x334] sm:$0xf0]  ;;  %v9709_v15 = vld [vmem:[#allocation28 + $0x308] sm:$0xf] }
 0x8ae   : > { %7587 = vst [vmem:[%s12992_s2 + $0xc0] sm:$0xff] %v10584_v56  ;;  %10585 = vpow2.f32 %v7371_v59  ;;  %v9726_v49 = vor.u32 %v10265_v7, %v9725_v44  ;;  %v6496_v59 = vadd.f32 %v13040_v30, %v12962_v53  ;;  %v9581_v56 = vld [vmem:[#allocation28 + $0x208] sm:$0xf]  ;;  %v10261_v26 = vld [vmem:[#allocation28 + $0x314] sm:$0xf0] }
 0x8af   : > { %10587 = vrcp.f32 %v7463_v11  ;;  %v6637_v23 = vpop.f32.mrf.mxu3  ;;  %6693 = vmatmul.bf16.gmra.mxu0 %v12807_v36  ;;  %6742 = vmatmul.bf16.gmra.mxu1 %v12918_v28  ;;  %v10229_v11 = vld [vmem:[#allocation28 + $0x214] sm:$0xf0] }
 0x8b0   : > { %v6638_v14 = vadd.f32 %v6637_v23, %v6589_v39  ;;  %v6591_v13 = vpop.f32.mrf.mxu2  ;;  %6955 = vmatpush.bf16.msra.mxu2 %v9598_v45  ;;  %7004 = vmatpush.bf16.msra.mxu3 %v9726_v49  ;;  %v9582_v39 = vor.u32 %v10229_v11, %v9581_v56 }
 0x8b1   : > { %v6592_v33 = vadd.f32 %v6591_v13, %v6543_v9 }
 0x8b2   : > { %v7279_v47 = vsub.f32 0.0, %v6638_v14  ;;  %v6545_v14 = vadd.f32 %v13042_v51, %v6496_v59  ;;  %v9710_v51 = vor.u32 %v10261_v26, %v9709_v15 }
 0x8b4   : > { %v10586_v19 = vpop.eup %10585  ;;  %v7379_v25 = vmul.f32 1.442695, %v7279_v47  ;;  %6835 = vmatmul.bf16.gmra.mxu3 %v12926_v42  ;;  %v6500_v40 = vpop.f32.mrf.mxu0  ;;  %6956 = vmatpush.bf16.msra.mxu2 %v9582_v39 }
 0x8b5   : > { %v13060_v8 = vpop.f32.mrf.mxu1  ;;  %v10588_v12 = vpop.eup %10587  ;;  %v7467_v18 = vadd.f32 1.0, %v10586_v19  ;;  %7005 = vmatpush.bf16.msra.mxu3 %v9710_v51  ;;  %v6501_v39 = vadd.f32 %v6500_v40, %v12962_v53 }
 0x8b6   : > { %7591 = vst [vmem:[%s12992_s2 + $0xe0] sm:$0xff] %v10588_v12  ;;  %10589 = vpow2.f32 %v7379_v25 }
 0x8b7   : > { %10591 = vrcp.f32 %v7467_v18  ;;  %v6640_v20 = vpop.f32.mrf.mxu3  ;;  %v6499_v18 = vadd.f32 %v13048_v35, %v12962_v53 }
 0x8b8   : > { %v6641_v61 = vadd.f32 %v6640_v20, %v6592_v33  ;;  %v6593_v54 = vpop.f32.mrf.mxu2 }
 0x8b9   : > { %v6594_v30 = vadd.f32 %v6593_v54, %v6545_v14  ;;  %v6548_v20 = vadd.f32 %v13050_v21, %v6499_v18 }
 0x8ba   : > { %v7283_v23 = vsub.f32 0.0, %v6641_v61 }
 0x8bc   : > { %v10590_v58 = vpop.eup %10589  ;;  %v7387_v13 = vmul.f32 1.442695, %v7283_v23  ;;  %v6503_v47 = vpop.f32.mrf.mxu0 }
 0x8bd   : > { %v6552_v19 = vpop.f32.mrf.mxu1  ;;  %v10592_v9 = vpop.eup %10591  ;;  %v7471_v25 = vadd.f32 1.0, %v10590_v58  ;;  %6791 = vmatmul.bf16.gmra.mxu2 %v12933_v29 }
 0x8be   : > { %7595 = vst [vmem:[%s12992_s2 + $0x100] sm:$0xff] %v10592_v9  ;;  %10593 = vpow2.f32 %v7387_v13  ;;  %v6550_v13 = vadd.f32 %v13060_v8, %v6501_v39  ;;  %v6504_v8 = vadd.f32 %v6503_v47, %v12962_v53  ;;  %v9695_v39 = vld [vmem:[#allocation28 + $0x2f8] sm:$0xf0] }
 0x8bf   : > { %10595 = vrcp.f32 %v7471_v25  ;;  %v6642_v12 = vpop.f32.mrf.mxu3  ;;  %6698 = vmatmul.bf16.gmra.mxu0 %v12822_v50  ;;  %6747 = vmatmul.bf16.gmra.mxu1 %v12936_v6 }
 0x8c0   : > { %v6643_v45 = vadd.f32 %v6642_v12, %v6594_v30  ;;  %v6596_v33 = vpop.f32.mrf.mxu2 }
 0x8c1   : > { %v6597_v11 = vadd.f32 %v6596_v33, %v6548_v20 }
 0x8c2   : > { %v7287_v44 = vsub.f32 0.0, %v6643_v45 }
 0x8c4   : > { %v10594_v7 = vpop.eup %10593  ;;  %v7395_v49 = vmul.f32 1.442695, %v7287_v44  ;;  %6840 = vmatmul.bf16.gmra.mxu3 %v12942_v4  ;;  %v6505_v59 = vpop.f32.mrf.mxu0  ;;  %v6553_v44 = vadd.f32 %v6552_v19, %v6504_v8  ;;  %v10287_v19 = vld [vmem:[#allocation28 + $0x3ec] sm:$0xf] }
 0x8c5   : > { %v13074_v61 = vpop.f32.mrf.mxu1  ;;  %v10596_v54 = vpop.eup %10595  ;;  %v7475_v56 = vadd.f32 1.0, %v10594_v7 }
 0x8c6   : > { %7599 = vst [vmem:[%s12992_s2 + $0x120] sm:$0xff] %v10596_v54  ;;  %10597 = vpow2.f32 %v7395_v49 }
 0x8c7   : > { %10599 = vrcp.f32 %v7475_v56  ;;  %v6645_v35 = vpop.f32.mrf.mxu3 }
 0x8c8   : > { %v6646_v23 = vadd.f32 %v6645_v35, %v6597_v11  ;;  %v6598_v58 = vpop.f32.mrf.mxu2  ;;  %v10255_v35 = vld [vmem:[#allocation28 + $0x2ec] sm:$0xf] }
 0x8c9   : > { %v6599_v12 = vadd.f32 %v6598_v58, %v6550_v13  ;;  %v10191_v58 = vld [vmem:[#allocation28 + $0xec] sm:$0xf] }
 0x8ca   : > { %v7291_v14 = vsub.f32 0.0, %v6646_v23  ;;  %v9698_v23 = vor.u32 %v10255_v35, %v9695_v39 }
 0x8cc   : > { %v10598_v21 = vpop.eup %10597  ;;  %v7403_v9 = vmul.f32 1.442695, %v7291_v14  ;;  %v13079_v25 = vpop.f32.mrf.mxu0  ;;  %v9439_v14 = vld [vmem:[#allocation28 + $0xf8] sm:$0xf0]  ;;  %7145 = vmatpush.bf16.msrb.mxu2 %v9698_v23 }
 0x8cd   : > { %v13081_v30 = vpop.f32.mrf.mxu1  ;;  %v10600_v15 = vpop.eup %10599  ;;  %v7479_v26 = vadd.f32 1.0, %v10598_v21  ;;  %6796 = vmatmul.bf16.gmra.mxu2 %v12947_v41  ;;  %v6506_v21 = vadd.f32 %v6505_v59, %v12962_v53 }
 0x8ce   : > { %7603 = vst [vmem:[%s12992_s2 + $0x140] sm:$0xff] %v10600_v15  ;;  %10601 = vpow2.f32 %v7403_v9  ;;  %v9442_v15 = vor.u32 %v10191_v58, %v9439_v14 }
 0x8cf   : > { %10603 = vrcp.f32 %v7479_v26  ;;  %v6647_v40 = vpop.f32.mrf.mxu3  ;;  %6859 = vmatmul.bf16.vlgmr.msra.gmra.mxu0 %v12727_v3  ;;  %6908 = vmatmul.bf16.vlgmr.msra.gmra.mxu1 %v12735_v38  ;;  %v9823_v26 = vld [vmem:[#allocation28 + $0x3f8] sm:$0xf0] }
 0x8d0   : > { %v6648_v51 = vadd.f32 %v6647_v40, %v6599_v12  ;;  %v6601_v18 = vpop.f32.mrf.mxu2  ;;  %v10223_v12 = vld [vmem:[#allocation28 + $0x1ec] sm:$0xf]  ;;  %v9567_v40 = vld [vmem:[#allocation28 + $0x1f8] sm:$0xf0]  ;;  %v9826_v8 = vor.u32 %v10287_v19, %v9823_v26  ;;  %7047 = vmatpush.bf16.msrb.mxu0 %v9442_v15 }
 0x8d1   : > { %v6602_v11 = vadd.f32 %v6601_v18, %v6553_v44  ;;  %v13097_v44 = vperm.slane %v12959_v57, 1  ;;  %v10251_v26 = vld [vmem:[#allocation28 + $0x2cc] sm:$0xf] }
 0x8d2   : > { %v7295_v45 = vsub.f32 0.0, %v6648_v51  ;;  %v9570_v51 = vor.u32 %v10223_v12, %v9567_v40  ;;  %7194 = vmatpush.bf16.msrb.mxu3 %v9826_v8  ;;  %v10187_v8 = vld [vmem:[#allocation28 + $0xcc] sm:$0xf] }
 0x8d3   : > { %v6665_v57 = vadd.f32 %v13079_v25, %v13097_v44  ;;  %v9679_v25 = vld [vmem:[#allocation28 + $0x2d8] sm:$0xf0] }
 0x8d4   : > { %v10602_v33 = vpop.eup %10601  ;;  %v7411_v7 = vmul.f32 1.442695, %v7295_v45  ;;  %6845 = vmatmul.bf16.gmra.mxu3 %v12953_v32  ;;  %v13089_v20 = vpop.f32.mrf.mxu0  ;;  %7096 = vmatpush.bf16.msrb.mxu1 %v9570_v51  ;;  %v9682_v40 = vor.u32 %v10251_v26, %v9679_v25  ;;  %v9423_v51 = vld [vmem:[#allocation28 + $0xd8] sm:$0xf0] }
 0x8d5   : > { %v13091_v49 = vpop.f32.mrf.mxu1  ;;  %v10604_v54 = vpop.eup %10603  ;;  %v7483_v56 = vadd.f32 1.0, %v10602_v33  ;;  %v6555_v33 = vadd.f32 %v13074_v61, %v6506_v21  ;;  %v6714_v58 = vadd.f32 %v13081_v30, %v6665_v57  ;;  %v10283_v30 = vld [vmem:[#allocation28 + $0x3cc] sm:$0xf] }
 0x8d6   : > { %7607 = vst [vmem:[%s12992_s2 + $0x160] sm:$0xff] %v10604_v54  ;;  %10605 = vpow2.f32 %v7411_v7  ;;  %7146 = vmatpush.bf16.msrb.mxu2 %v9682_v40 }
 0x8d7   : > { %10607 = vrcp.f32 %v7483_v56  ;;  %v6650_v47 = vpop.f32.mrf.mxu3 }
 0x8d8   : > { %v6651_v13 = vadd.f32 %v6650_v47, %v6602_v11  ;;  %v6603_v9 = vpop.f32.mrf.mxu2 }
 0x8d9   : > { %v6604_v11 = vadd.f32 %v6603_v9, %v6555_v33 }
 0x8da   : > { %v7299_v18 = vsub.f32 0.0, %v6651_v13 }
 0x8dc   : > { %v10606_v45 = vpop.eup %10605  ;;  %v7419_v53 = vmul.f32 1.442695, %v7299_v18  ;;  %v13099_v59 = vpop.f32.mrf.mxu0  ;;  %v6667_v18 = vadd.f32 %v13089_v20, %v13097_v44 }
 0x8dd   : > { %v13101_v7 = vpop.f32.mrf.mxu1  ;;  %v10608_v54 = vpop.eup %10607  ;;  %v7487_v56 = vadd.f32 1.0, %v10606_v45  ;;  %6957 = vmatmul.bf16.vlgmr.msra.gmra.mxu2 %v12839_v34 }
 0x8de   : > { %7611 = vst [vmem:[%s12992_s2 + $0x180] sm:$0xff] %v10608_v54  ;;  %10609 = vpow2.f32 %v7419_v53  ;;  %v9426_v53 = vor.u32 %v10187_v8, %v9423_v51  ;;  %v9807_v54 = vld [vmem:[#allocation28 + $0x3d8] sm:$0xf0] }
 0x8df   : > { %10611 = vrcp.f32 %v7487_v56  ;;  %v6652_v35 = vpop.f32.mrf.mxu3  ;;  %6864 = vmatmul.bf16.gmra.mxu0 %v12739_v22  ;;  %6913 = vmatmul.bf16.gmra.mxu1 %v12747_v46  ;;  %v10219_v56 = vld [vmem:[#allocation28 + $0x1cc] sm:$0xf] }
 0x8e0   : > { %v6653_v61 = vadd.f32 %v6652_v35, %v6604_v11  ;;  %v6762_v39 = vpop.f32.mrf.mxu2  ;;  %v9551_v11 = vld [vmem:[#allocation28 + $0x1d8] sm:$0xf0]  ;;  %v9810_v35 = vor.u32 %v10283_v30, %v9807_v54  ;;  %7048 = vmatpush.bf16.msrb.mxu0 %v9426_v53  ;;  %v10247_v54 = vld [vmem:[#allocation28 + $0x2ac] sm:$0xf] }
 0x8e1   : > { %v6763_v15 = vadd.f32 %v6762_v39, %v6714_v58  ;;  %v9554_v57 = vor.u32 %v10219_v56, %v9551_v11 }
 0x8e2   : > { %v7303_v47 = vsub.f32 0.0, %v6653_v61  ;;  %7195 = vmatpush.bf16.msrb.mxu3 %v9810_v35  ;;  %v10183_v35 = vld [vmem:[#allocation28 + $0xac] sm:$0xf] }
 0x8e3   : > { %7097 = vmatpush.bf16.msrb.mxu1 %v9554_v57  ;;  %v9407_v57 = vld [vmem:[#allocation28 + $0xb8] sm:$0xf0] }
 0x8e4   : > { %v10610_v23 = vpop.eup %10609  ;;  %v7427_v14 = vmul.f32 1.442695, %v7303_v47  ;;  %7006 = vmatmul.bf16.vlgmr.msra.gmra.mxu3 %v12846_v60  ;;  %v13111_v19 = vpop.f32.mrf.mxu0  ;;  %v6716_v47 = vadd.f32 %v13091_v49, %v6667_v18  ;;  %v6670_v49 = vadd.f32 %v13099_v59, %v13097_v44  ;;  %v9663_v59 = vld [vmem:[#allocation28 + $0x2b8] sm:$0xf0] }
 0x8e5   : > { %v13113_v21 = vpop.f32.mrf.mxu1  ;;  %v10612_v13 = vpop.eup %10611  ;;  %v7491_v9 = vadd.f32 1.0, %v10610_v23  ;;  %v9666_v11 = vor.u32 %v10247_v54, %v9663_v59 }
 0x8e6   : > { %7615 = vst [vmem:[%s12992_s2 + $0x1a0] sm:$0xff] %v10612_v13  ;;  %10613 = vpow2.f32 %v7427_v14  ;;  %v6719_v8 = vadd.f32 %v13101_v7, %v6670_v49  ;;  %v10279_v7 = vld [vmem:[#allocation28 + $0x3ac] sm:$0xf] }
 0x8e7   : > { %10615 = vrcp.f32 %v7491_v9  ;;  %v6811_v12 = vpop.f32.mrf.mxu3  ;;  %7147 = vmatpush.bf16.msrb.mxu2 %v9666_v11 }
 0x8e8   : > { %v6812_v45 = vadd.f32 %v6811_v12, %v6763_v15  ;;  %v6764_v33 = vpop.f32.mrf.mxu2 }
 0x8e9   : > { %v6765_v9 = vadd.f32 %v6764_v33, %v6716_v47 }
 0x8ea   : > { %v7244_v61 = vsub.f32 0.0, %v6812_v45 }
 0x8ec   : > { %v10614_v39 = vpop.eup %10613  ;;  %v7309_v23 = vmul.f32 1.442695, %v7244_v61  ;;  %v13119_v58 = vpop.f32.mrf.mxu0  ;;  %v6672_v61 = vadd.f32 %v13111_v19, %v13097_v44 }
 0x8ed   : > { %v13121_v20 = vpop.f32.mrf.mxu1  ;;  %v10616_v14 = vpop.eup %10615  ;;  %v7495_v13 = vadd.f32 1.0, %v10614_v39  ;;  %6962 = vmatmul.bf16.gmra.mxu2 %v12851_v55 }
 0x8ee   : > { %7619 = vst [vmem:[%s12992_s2 + $0x1c0] sm:$0xff] %v10616_v14  ;;  %10617 = vpow2.f32 %v7309_v23  ;;  %v9410_v23 = vor.u32 %v10183_v35, %v9407_v57  ;;  %v9791_v14 = vld [vmem:[#allocation28 + $0x3b8] sm:$0xf0] }
 0x8ef   : > { %10619 = vrcp.f32 %v7495_v13  ;;  %v6813_v15 = vpop.f32.mrf.mxu3  ;;  %6869 = vmatmul.bf16.gmra.mxu0 %v12751_v31  ;;  %6918 = vmatmul.bf16.gmra.mxu1 %v12759_v0  ;;  %v10215_v13 = vld [vmem:[#allocation28 + $0x1ac] sm:$0xf] }
 0x8f0   : > { %v6814_v26 = vadd.f32 %v6813_v15, %v6765_v9  ;;  %v6767_v25 = vpop.f32.mrf.mxu2  ;;  %v9535_v9 = vld [vmem:[#allocation28 + $0x1b8] sm:$0xf0]  ;;  %v9794_v15 = vor.u32 %v10279_v7, %v9791_v14  ;;  %7049 = vmatpush.bf16.msrb.mxu0 %v9410_v23  ;;  %v10243_v14 = vld [vmem:[#allocation28 + $0x28c] sm:$0xf] }
 0x8f1   : > { %v6768_v53 = vadd.f32 %v6767_v25, %v6719_v8  ;;  %v9538_v49 = vor.u32 %v10215_v13, %v9535_v9 }
 0x8f2   : > { %v7248_v12 = vsub.f32 0.0, %v6814_v26  ;;  %7196 = vmatpush.bf16.msrb.mxu3 %v9794_v15  ;;  %v10179_v15 = vld [vmem:[#allocation28 + $0x8c] sm:$0xf] }
 0x8f3   : > { %7098 = vmatpush.bf16.msrb.mxu1 %v9538_v49  ;;  %v9391_v49 = vld [vmem:[#allocation28 + $0x98] sm:$0xf0] }
 0x8f4   : > { %v10618_v40 = vpop.eup %10617  ;;  %v7317_v51 = vmul.f32 1.442695, %v7248_v12  ;;  %7011 = vmatmul.bf16.gmra.mxu3 %v12858_v37  ;;  %v13131_v30 = vpop.f32.mrf.mxu0  ;;  %v6721_v12 = vadd.f32 %v13113_v21, %v6672_v61  ;;  %v6675_v21 = vadd.f32 %v13119_v58, %v13097_v44  ;;  %v9647_v58 = vld [vmem:[#allocation28 + $0x298] sm:$0xf0] }
 0x8f5   : > { %v13133_v18 = vpop.f32.mrf.mxu1  ;;  %v10620_v45 = vpop.eup %10619  ;;  %v7436_v33 = vadd.f32 1.0, %v10618_v40  ;;  %v9650_v9 = vor.u32 %v10243_v14, %v9647_v58 }
 0x8f6   : > { %7623 = vst [vmem:[%s12992_s2 + $0x1e0] sm:$0xff] %v10620_v45  ;;  %10621 = vpow2.f32 %v7317_v51  ;;  %v6724_v35 = vadd.f32 %v13121_v20, %v6675_v21  ;;  %v10275_v20 = vld [vmem:[#allocation28 + $0x38c] sm:$0xf] }
 0x8f7   : > { %10623 = vrcp.f32 %v7436_v33  ;;  %v6816_v56 = vpop.f32.mrf.mxu3  ;;  %7148 = vmatpush.bf16.msrb.mxu2 %v9650_v9 }
 0x8f8   : > { %v6817_v39 = vadd.f32 %v6816_v56, %v6768_v53  ;;  %v6769_v47 = vpop.f32.mrf.mxu2 }
 0x8f9   : > { %v6770_v33 = vadd.f32 %v6769_v47, %v6721_v12 }
 0x8fa   : > { %v7252_v26 = vsub.f32 0.0, %v6817_v39 }
 0x8fc   : > { %v10622_v25 = vpop.eup %10621  ;;  %v7325_v40 = vmul.f32 1.442695, %v7252_v26  ;;  %v13139_v8 = vpop.f32.mrf.mxu0  ;;  %v6677_v26 = vadd.f32 %v13131_v30, %v13097_v44 }
 0x8fd   : > { %v13141_v19 = vpop.f32.mrf.mxu1  ;;  %v10624_v51 = vpop.eup %10623  ;;  %v7440_v45 = vadd.f32 1.0, %v10622_v25  ;;  %6967 = vmatmul.bf16.gmra.mxu2 %v12863_v2 }
 0x8fe   : > { %7564 = vst [vmem:[%s12992_s2 + $0x8] sm:$0xff] %v10624_v51  ;;  %10625 = vpow2.f32 %v7325_v40  ;;  %v9394_v40 = vor.u32 %v10179_v15, %v9391_v49  ;;  %v9775_v51 = vld [vmem:[#allocation28 + $0x398] sm:$0xf0] }
 0x8ff   : > { %10627 = vrcp.f32 %v7440_v45  ;;  %v6818_v53 = vpop.f32.mrf.mxu3  ;;  %6874 = vmatmul.bf16.gmra.mxu0 %v12763_v10  ;;  %6923 = vmatmul.bf16.gmra.mxu1 %v12771_v52  ;;  %v10211_v45 = vld [vmem:[#allocation28 + $0x18c] sm:$0xf] }
 0x900   : > { %v6819_v54 = vadd.f32 %v6818_v53, %v6770_v33  ;;  %v6772_v59 = vpop.f32.mrf.mxu2  ;;  %v9519_v33 = vld [vmem:[#allocation28 + $0x198] sm:$0xf0]  ;;  %v9778_v53 = vor.u32 %v10275_v20, %v9775_v51  ;;  %7050 = vmatpush.bf16.msrb.mxu0 %v9394_v40  ;;  %v10239_v51 = vld [vmem:[#allocation28 + $0x26c] sm:$0xf] }
 0x901   : > { %v6773_v23 = vadd.f32 %v6772_v59, %v6724_v35  ;;  %v9522_v21 = vor.u32 %v10211_v45, %v9519_v33 }
 0x902   : > { %v7256_v56 = vsub.f32 0.0, %v6819_v54  ;;  %7197 = vmatpush.bf16.msrb.mxu3 %v9778_v53  ;;  %v10175_v53 = vld [vmem:[#allocation28 + $0x6c] sm:$0xf] }
 0x903   : > { %7099 = vmatpush.bf16.msrb.mxu1 %v9522_v21  ;;  %v9375_v21 = vld [vmem:[#allocation28 + $0x78] sm:$0xf0] }
 0x904   : > { %v10626_v11 = vpop.eup %10625  ;;  %v7333_v57 = vmul.f32 1.442695, %v7256_v56  ;;  %7016 = vmatmul.bf16.gmra.mxu3 %v12872_v63  ;;  %v13151_v7 = vpop.f32.mrf.mxu0  ;;  %v6726_v56 = vadd.f32 %v13133_v18, %v6677_v26  ;;  %v6680_v18 = vadd.f32 %v13139_v8, %v13097_v44  ;;  %v9631_v8 = vld [vmem:[#allocation28 + $0x278] sm:$0xf0] }
 0x905   : > { %v13153_v61 = vpop.f32.mrf.mxu1  ;;  %v10628_v39 = vpop.eup %10627  ;;  %v7444_v47 = vadd.f32 1.0, %v10626_v11  ;;  %v9634_v33 = vor.u32 %v10239_v51, %v9631_v8 }
 0x906   : > { %7568 = vst [vmem:[%s12992_s2 + $0x28] sm:$0xff] %v10628_v39  ;;  %10629 = vpow2.f32 %v7333_v57  ;;  %v6729_v15 = vadd.f32 %v13141_v19, %v6680_v18  ;;  %v10271_v19 = vld [vmem:[#allocation28 + $0x36c] sm:$0xf] }
 0x907   : > { %10631 = vrcp.f32 %v7444_v47  ;;  %v6821_v13 = vpop.f32.mrf.mxu3  ;;  %7149 = vmatpush.bf16.msrb.mxu2 %v9634_v33  ;;  %v10171_v33 = vld [vmem:[#allocation28 + $0x4c] sm:$0xf] }
 0x908   : > { %v6822_v25 = vadd.f32 %v6821_v13, %v6773_v23  ;;  %v6774_v12 = vpop.f32.mrf.mxu2 }
 0x909   : > { %v6775_v47 = vadd.f32 %v6774_v12, %v6726_v56 }
 0x90a   : > { %v7260_v54 = vsub.f32 0.0, %v6822_v25 }
 0x90c   : > { %v10630_v59 = vpop.eup %10629  ;;  %v7341_v11 = vmul.f32 1.442695, %v7260_v54  ;;  %v13159_v35 = vpop.f32.mrf.mxu0  ;;  %v6682_v54 = vadd.f32 %v13151_v7, %v13097_v44 }
 0x90d   : > { %v13161_v30 = vpop.f32.mrf.mxu1  ;;  %v10632_v57 = vpop.eup %10631  ;;  %v7448_v39 = vadd.f32 1.0, %v10630_v59  ;;  %6972 = vmatmul.bf16.gmra.mxu2 %v12879_v62 }
 0x90e   : > { %7572 = vst [vmem:[%s12992_s2 + $0x48] sm:$0xff] %v10632_v57  ;;  %10633 = vpow2.f32 %v7341_v11  ;;  %v9378_v11 = vor.u32 %v10175_v53, %v9375_v21  ;;  %v9759_v57 = vld [vmem:[#allocation28 + $0x378] sm:$0xf0] }
 0x90f   : > { %10635 = vrcp.f32 %v7448_v39  ;;  %v6823_v23 = vpop.f32.mrf.mxu3  ;;  %6879 = vmatmul.bf16.gmra.mxu0 %v12777_v5  ;;  %6928 = vmatmul.bf16.gmra.mxu1 %v12882_v16  ;;  %v10207_v39 = vld [vmem:[#allocation28 + $0x16c] sm:$0xf]  ;;  %v9359_v53 = vld [vmem:[#allocation28 + $0x58] sm:$0xf0] }
 0x910   : > { %v6824_v14 = vadd.f32 %v6823_v23, %v6775_v47  ;;  %v6777_v58 = vpop.f32.mrf.mxu2  ;;  %v9503_v47 = vld [vmem:[#allocation28 + $0x178] sm:$0xf0]  ;;  %v9762_v23 = vor.u32 %v10271_v19, %v9759_v57  ;;  %7051 = vmatpush.bf16.msrb.mxu0 %v9378_v11  ;;  %v9362_v21 = vor.u32 %v10171_v33, %v9359_v53  ;;  %v10203_v19 = vld [vmem:[#allocation28 + $0x14c] sm:$0xf] }
 0x911   : > { %v6778_v40 = vadd.f32 %v6777_v58, %v6729_v15  ;;  %v9506_v18 = vor.u32 %v10207_v39, %v9503_v47  ;;  %v10199_v33 = vld [vmem:[#allocation28 + $0x12c] sm:$0xf]  ;;  %v9471_v53 = vld [vmem:[#allocation28 + $0x138] sm:$0xf0] }
 0x912   : > { %v7264_v13 = vsub.f32 0.0, %v6824_v14  ;;  %7198 = vmatpush.bf16.msrb.mxu3 %v9762_v23 }
 0x913   : > { %7100 = vmatpush.bf16.msrb.mxu1 %v9506_v18 }
 0x914   : > { %v10634_v9 = vpop.eup %10633  ;;  %v7349_v49 = vmul.f32 1.442695, %v7264_v13  ;;  %7021 = vmatmul.bf16.gmra.mxu3 %v12890_v24  ;;  %v13171_v20 = vpop.f32.mrf.mxu0  ;;  %v6731_v13 = vadd.f32 %v13153_v61, %v6682_v54  ;;  %v6685_v61 = vadd.f32 %v13159_v35, %v13097_v44  ;;  %v9487_v54 = vld [vmem:[#allocation28 + $0x158] sm:$0xf0]  ;;  %7052 = vmatpush.bf16.msrb.mxu0 %v9362_v21  ;;  %v9474_v21 = vor.u32 %v10199_v33, %v9471_v53 }
 0x915   : > { %v13173_v26 = vpop.f32.mrf.mxu1  ;;  %v10636_v25 = vpop.eup %10635  ;;  %v7452_v12 = vadd.f32 1.0, %v10634_v9  ;;  %v9490_v35 = vor.u32 %v10203_v19, %v9487_v54  ;;  %v10163_v54 = vld [vmem:[#allocation28 + $0xc] sm:$0xf] }
 0x916   : > { %7576 = vst [vmem:[%s12992_s2 + $0x68] sm:$0xff] %v10636_v25  ;;  %10637 = vpow2.f32 %v7349_v49 }
 0x917   : > { %10639 = vrcp.f32 %v7452_v12  ;;  %v6826_v45 = vpop.f32.mrf.mxu3  ;;  %7101 = vmatpush.bf16.msrb.mxu1 %v9490_v35 }
 0x918   : > { %v6827_v59 = vadd.f32 %v6826_v45, %v6778_v40  ;;  %v6779_v56 = vpop.f32.mrf.mxu2 }
 0x919   : > { %v6780_v12 = vadd.f32 %v6779_v56, %v6731_v13  ;;  %v6734_v56 = vadd.f32 %v13161_v30, %v6685_v61 }
 0x91a   : > { %v7268_v14 = vsub.f32 0.0, %v6827_v59 }
 0x91b   : > { %7102 = vmatpush.bf16.msrb.mxu1 %v9474_v21  ;;  %v9599_v21 = vld [vmem:[#allocation28 + $0x238] sm:$0xf0] }
 0x91c   : > { %v10638_v58 = vpop.eup %10637  ;;  %v7357_v9 = vmul.f32 1.442695, %v7268_v14  ;;  %v13179_v15 = vpop.f32.mrf.mxu0  ;;  %v10235_v14 = vld [vmem:[#allocation28 + $0x24c] sm:$0xf] }
 0x91d   : > { %v13181_v7 = vpop.f32.mrf.mxu1  ;;  %v10640_v49 = vpop.eup %10639  ;;  %v7456_v25 = vadd.f32 1.0, %v10638_v58  ;;  %6977 = vmatmul.bf16.gmra.mxu2 %v12897_v1  ;;  %v9615_v58 = vld [vmem:[#allocation28 + $0x258] sm:$0xf0] }
 0x91e   : > { %7580 = vst [vmem:[%s12992_s2 + $0x88] sm:$0xff] %v10640_v49  ;;  %10641 = vpow2.f32 %v7357_v9  ;;  %v9618_v30 = vor.u32 %v10235_v14, %v9615_v58  ;;  %v10267_v9 = vld [vmem:[#allocation28 + $0x34c] sm:$0xf]  ;;  %v9743_v49 = vld [vmem:[#allocation28 + $0x358] sm:$0xf0] }
 0x91f   : > { %10643 = vrcp.f32 %v7456_v25  ;;  %v6828_v40 = vpop.f32.mrf.mxu3  ;;  %6884 = vmatmul.bf16.gmra.mxu0 %v12792_v48  ;;  %6933 = vmatmul.bf16.gmra.mxu1 %v12900_v43  ;;  %v10167_v25 = vld [vmem:[#allocation28 + $0x2c] sm:$0xf] }
 0x920   : > { %v6829_v51 = vadd.f32 %v6828_v40, %v6780_v12  ;;  %v6782_v8 = vpop.f32.mrf.mxu2  ;;  %v6687_v12 = vadd.f32 %v13171_v20, %v13097_v44  ;;  %7150 = vmatpush.bf16.msrb.mxu2 %v9618_v30 }
 0x921   : > { %v6783_v18 = vadd.f32 %v6782_v8, %v6734_v56  ;;  %v10195_v56 = vld [vmem:[#allocation28 + $0x10c] sm:$0xf] }
 0x922   : > { %v7272_v45 = vsub.f32 0.0, %v6829_v51  ;;  %v9746_v51 = vor.u32 %v10267_v9, %v9743_v49  ;;  %v6736_v20 = vadd.f32 %v13173_v26, %v6687_v12  ;;  %v6690_v26 = vadd.f32 %v13179_v15, %v13097_v44 }
 0x924   : > { %v10642_v59 = vpop.eup %10641  ;;  %v7365_v11 = vmul.f32 1.442695, %v7272_v45  ;;  %7026 = vmatmul.bf16.gmra.mxu3 %v12908_v27  ;;  %v13191_v57 = vpop.f32.mrf.mxu0  ;;  %v9343_v45 = vld [vmem:[#allocation28 + $0x38] sm:$0xf0] }
 0x925   : > { %v13193_v39 = vpop.f32.mrf.mxu1  ;;  %v10644_v47 = vpop.eup %10643  ;;  %v7460_v23 = vadd.f32 1.0, %v10642_v59  ;;  %v9346_v8 = vor.u32 %v10167_v25, %v9343_v45  ;;  %7199 = vmatpush.bf16.msrb.mxu3 %v9746_v51  ;;  %v9327_v59 = vld [vmem:[#allocation28 + $0x18] sm:$0xf0]  ;;  %v6739_v45 = vadd.f32 %v13181_v7, %v6690_v26 }
 0x926   : > { %7584 = vst [vmem:[%s12992_s2 + $0xa8] sm:$0xff] %v10644_v47  ;;  %10645 = vpow2.f32 %v7365_v11  ;;  %v9455_v11 = vld [vmem:[#allocation28 + $0x118] sm:$0xf0]  ;;  %v9330_v14 = vor.u32 %v10163_v54, %v9327_v59 }
 0x927   : > { %10647 = vrcp.f32 %v7460_v23  ;;  %v6831_v13 = vpop.f32.mrf.mxu3  ;;  %7053 = vmatpush.bf16.msrb.mxu0 %v9346_v8  ;;  %v9458_v58 = vor.u32 %v10195_v56, %v9455_v11  ;;  %v10231_v8 = vld [vmem:[#allocation28 + $0x22c] sm:$0xf]  ;;  %v9727_v11 = vld [vmem:[#allocation28 + $0x338] sm:$0xf0] }
 0x928   : > { %v6832_v40 = vadd.f32 %v6831_v13, %v6783_v18  ;;  %v6784_v61 = vpop.f32.mrf.mxu2  ;;  %v9602_v15 = vor.u32 %v10231_v8, %v9599_v21  ;;  %v10263_v56 = vld [vmem:[#allocation28 + $0x32c] sm:$0xf]  ;;  %v9711_v8 = vld [vmem:[#allocation28 + $0x318] sm:$0xf0] }
 0x929   : > { %v6785_v9 = vadd.f32 %v6784_v61, %v6736_v20  ;;  %7103 = vmatpush.bf16.msrb.mxu1 %v9458_v58  ;;  %v9730_v7 = vor.u32 %v10263_v56, %v9727_v11  ;;  %v6692_v20 = vadd.f32 %v13191_v57, %v13097_v44  ;;  %v10227_v58 = vld [vmem:[#allocation28 + $0x20c] sm:$0xf] }
 0x92a   : > { %v7276_v19 = vsub.f32 0.0, %v6832_v40  ;;  %7151 = vmatpush.bf16.msrb.mxu2 %v9602_v15 }
 0x92b   : > { %7054 = vmatpush.bf16.msrb.mxu0 %v9330_v14  ;;  %7200 = vmatpush.bf16.msrb.mxu3 %v9730_v7  ;;  %v6741_v26 = vadd.f32 %v13193_v39, %v6692_v20 }
 0x92c   : > { %v10646_v35 = vpop.eup %10645  ;;  %v7373_v47 = vmul.f32 1.442695, %v7276_v19  ;;  %v13199_v23 = vpop.f32.mrf.mxu0 }
 0x92d   : > { %v13201_v18 = vpop.f32.mrf.mxu1  ;;  %v10648_v13 = vpop.eup %10647  ;;  %v7464_v30 = vadd.f32 1.0, %v10646_v35  ;;  %6982 = vmatmul.bf16.gmra.mxu2 %v12915_v17 }
 0x92e   : > { %7588 = vst [vmem:[%s12992_s2 + $0xc8] sm:$0xff] %v10648_v13  ;;  %10649 = vpow2.f32 %v7373_v47  ;;  %v9583_v13 = vld [vmem:[#allocation28 + $0x218] sm:$0xf0] }
 0x92f   : > { %10651 = vrcp.f32 %v7464_v30  ;;  %v6833_v49 = vpop.f32.mrf.mxu3  ;;  %6889 = vmatmul.bf16.gmra.mxu0 %v12807_v36  ;;  %6938 = vmatmul.bf16.gmra.mxu1 %v12918_v28  ;;  %v9586_v30 = vor.u32 %v10227_v58, %v9583_v13 }
 0x930   : > { %v6834_v25 = vadd.f32 %v6833_v49, %v6785_v9  ;;  %v6787_v12 = vpop.f32.mrf.mxu2 }
 0x931   : > { %v6788_v59 = vadd.f32 %v6787_v12, %v6739_v45  ;;  %7152 = vmatpush.bf16.msrb.mxu2 %v9586_v30 }
 0x932   : > { %v7280_v40 = vsub.f32 0.0, %v6834_v25 }
 0x934   : > { %v10650_v51 = vpop.eup %10649  ;;  %v7381_v33 = vmul.f32 1.442695, %v7280_v40  ;;  %7031 = vmatmul.bf16.gmra.mxu3 %v12926_v42  ;;  %v6696_v61 = vpop.f32.mrf.mxu0 }
 0x935   : > { %v13211_v53 = vpop.f32.mrf.mxu1  ;;  %v10652_v19 = vpop.eup %10651  ;;  %v7468_v54 = vadd.f32 1.0, %v10650_v51  ;;  %v6697_v13 = vadd.f32 %v6696_v61, %v13097_v44 }
 0x936   : > { %7592 = vst [vmem:[%s12992_s2 + $0xe8] sm:$0xff] %v10652_v19  ;;  %10653 = vpow2.f32 %v7381_v33  ;;  %v10259_v33 = vld [vmem:[#allocation28 + $0x30c] sm:$0xf]  ;;  %v6695_v19 = vadd.f32 %v13199_v23, %v13097_v44 }
 0x937   : > { %10655 = vrcp.f32 %v7468_v54  ;;  %v6836_v35 = vpop.f32.mrf.mxu3  ;;  %v9714_v39 = vor.u32 %v10259_v33, %v9711_v8 }
 0x938   : > { %v6837_v47 = vadd.f32 %v6836_v35, %v6788_v59  ;;  %v6789_v14 = vpop.f32.mrf.mxu2  ;;  %v6744_v11 = vadd.f32 %v13201_v18, %v6695_v19  ;;  %v6746_v18 = vadd.f32 %v13211_v53, %v6697_v13 }
 0x939   : > { %v6790_v57 = vadd.f32 %v6789_v14, %v6741_v26  ;;  %7201 = vmatpush.bf16.msrb.mxu3 %v9714_v39 }
 0x93a   : > { %v7284_v9 = vsub.f32 0.0, %v6837_v47 }
 0x93c   : > { %v10654_v49 = vpop.eup %10653  ;;  %v7389_v25 = vmul.f32 1.442695, %v7284_v9  ;;  %v6699_v12 = vpop.f32.mrf.mxu0 }
 0x93d   : > { %v6748_v40 = vpop.f32.mrf.mxu1  ;;  %v10656_v51 = vpop.eup %10655  ;;  %v7472_v45 = vadd.f32 1.0, %v10654_v49  ;;  %6987 = vmatmul.bf16.gmra.mxu2 %v12933_v29  ;;  %v6700_v61 = vadd.f32 %v6699_v12, %v13097_v44 }
 0x93e   : > { %7596 = vst [vmem:[%s12992_s2 + $0x108] sm:$0xff] %v10656_v51  ;;  %10657 = vpow2.f32 %v7389_v25 }
 0x93f   : > { %10659 = vrcp.f32 %v7472_v45  ;;  %v6838_v21 = vpop.f32.mrf.mxu3  ;;  %6894 = vmatmul.bf16.gmra.mxu0 %v12822_v50  ;;  %6943 = vmatmul.bf16.gmra.mxu1 %v12936_v6 }
 0x940   : > { %v6839_v54 = vadd.f32 %v6838_v21, %v6790_v57  ;;  %v6792_v15 = vpop.f32.mrf.mxu2 }
 0x941   : > { %v6793_v58 = vadd.f32 %v6792_v15, %v6744_v11  ;;  %v6749_v15 = vadd.f32 %v6748_v40, %v6700_v61 }
 0x942   : > { %v7288_v59 = vsub.f32 0.0, %v6839_v54 }
 0x944   : > { %v10658_v56 = vpop.eup %10657  ;;  %v7397_v35 = vmul.f32 1.442695, %v7288_v59  ;;  %7036 = vmatmul.bf16.gmra.mxu3 %v12942_v4  ;;  %v6701_v7 = vpop.f32.mrf.mxu0 }
 0x945   : > { %v6750_v20 = vpop.f32.mrf.mxu1  ;;  %v10660_v47 = vpop.eup %10659  ;;  %v7476_v14 = vadd.f32 1.0, %v10658_v56 }
 0x946   : > { %7600 = vst [vmem:[%s12992_s2 + $0x128] sm:$0xff] %v10660_v47  ;;  %10661 = vpow2.f32 %v7397_v35 }
 0x947   : > { %10663 = vrcp.f32 %v7476_v14  ;;  %v6841_v23 = vpop.f32.mrf.mxu3 }
 0x948   : > { %v6842_v30 = vadd.f32 %v6841_v23, %v6793_v58  ;;  %v6794_v9 = vpop.f32.mrf.mxu2 }
 0x949   : > { %v6795_v8 = vadd.f32 %v6794_v9, %v6746_v18 }
 0x94a   : > { %v7292_v49 = vsub.f32 0.0, %v6842_v30  ;;  %v13239_v30 = vld [vmem:[%s13552_s8] sm:$0xf] }
 0x94b   : > { %v13242_v9 = vperm.slane %v13239_v30, 2 }
 0x94c   : > { %v10662_v26 = vpop.eup %10661  ;;  %v7405_v25 = vmul.f32 1.442695, %v7292_v49  ;;  %v6860_v51 = vpop.f32.mrf.mxu0 }
 0x94d   : > { %v6909_v45 = vpop.f32.mrf.mxu1  ;;  %v10664_v57 = vpop.eup %10663  ;;  %v7480_v33 = vadd.f32 1.0, %v10662_v26  ;;  %6992 = vmatmul.bf16.gmra.mxu2 %v12947_v41 }
 0x94e   : > { %7604 = vst [vmem:[%s12992_s2 + $0x148] sm:$0xff] %v10664_v57  ;;  %10665 = vpow2.f32 %v7405_v25 }
 0x94f   : > { %10667 = vrcp.f32 %v7480_v33  ;;  %v6843_v21 = vpop.f32.mrf.mxu3  ;;  %7055 = vmatmul.bf16.vlgmr.msrb.gmra.mxu0 %v12727_v3  ;;  %7104 = vmatmul.bf16.vlgmr.msrb.gmra.mxu1 %v12735_v38  ;;  %v6702_v38 = vadd.f32 %v6701_v7, %v13097_v44 }
 0x950   : > { %v6844_v53 = vadd.f32 %v6843_v21, %v6795_v8  ;;  %v6797_v39 = vpop.f32.mrf.mxu2 }
 0x951   : > { %v6798_v14 = vadd.f32 %v6797_v39, %v6749_v15  ;;  %v6751_v40 = vadd.f32 %v6750_v20, %v6702_v38  ;;  %v6861_v20 = vadd.f32 %v6860_v51, %v13242_v9 }
 0x952   : > { %v7296_v19 = vsub.f32 0.0, %v6844_v53 }
 0x953   : > { %v6910_v53 = vadd.f32 %v6909_v45, %v6861_v20 }
 0x954   : > { %v10666_v54 = vpop.eup %10665  ;;  %v7413_v59 = vmul.f32 1.442695, %v7296_v19  ;;  %7041 = vmatmul.bf16.gmra.mxu3 %v12953_v32  ;;  %v6862_v56 = vpop.f32.mrf.mxu0 }
 0x955   : > { %v6911_v11 = vpop.f32.mrf.mxu1  ;;  %v10668_v35 = vpop.eup %10667  ;;  %v7484_v47 = vadd.f32 1.0, %v10666_v54  ;;  %v6863_v51 = vadd.f32 %v6862_v56, %v13242_v9 }
 0x956   : > { %7608 = vst [vmem:[%s12992_s2 + $0x168] sm:$0xff] %v10668_v35  ;;  %10669 = vpow2.f32 %v7413_v59 }
 0x957   : > { %10671 = vrcp.f32 %v7484_v47  ;;  %v6846_v3 = vpop.f32.mrf.mxu3  ;;  %v6912_v45 = vadd.f32 %v6911_v11, %v6863_v51 }
 0x958   : > { %v6847_v12 = vadd.f32 %v6846_v3, %v6798_v14  ;;  %v6799_v58 = vpop.f32.mrf.mxu2 }
 0x959   : > { %v6800_v44 = vadd.f32 %v6799_v58, %v6751_v40 }
 0x95a   : > { %v7300_v23 = vsub.f32 0.0, %v6847_v12 }
 0x95c   : > { %v10670_v13 = vpop.eup %10669  ;;  %v7421_v49 = vmul.f32 1.442695, %v7300_v23  ;;  %v6865_v26 = vpop.f32.mrf.mxu0 }
 0x95d   : > { %v6914_v18 = vpop.f32.mrf.mxu1  ;;  %v10672_v25 = vpop.eup %10671  ;;  %v7488_v57 = vadd.f32 1.0, %v10670_v13  ;;  %7153 = vmatmul.bf16.vlgmr.msrb.gmra.mxu2 %v12839_v34  ;;  %v6866_v56 = vadd.f32 %v6865_v26, %v13242_v9 }
 0x95e   : > { %7612 = vst [vmem:[%s12992_s2 + $0x188] sm:$0xff] %v10672_v25  ;;  %10673 = vpow2.f32 %v7421_v49 }
 0x95f   : > { %10675 = vrcp.f32 %v7488_v57  ;;  %v6848_v7 = vpop.f32.mrf.mxu3  ;;  %7060 = vmatmul.bf16.gmra.mxu0 %v12739_v22  ;;  %7109 = vmatmul.bf16.gmra.mxu1 %v12747_v46  ;;  %v6915_v57 = vadd.f32 %v6914_v18, %v6866_v56 }
 0x960   : > { %v6849_v33 = vadd.f32 %v6848_v7, %v6800_v44  ;;  %v6958_v8 = vpop.f32.mrf.mxu2 }
 0x961   : > { %v6959_v22 = vadd.f32 %v6958_v8, %v6910_v53 }
 0x962   : > { %v7304_v21 = vsub.f32 0.0, %v6849_v33 }
 0x964   : > { %v10674_v61 = vpop.eup %10673  ;;  %v7429_v39 = vmul.f32 1.442695, %v7304_v21  ;;  %7202 = vmatmul.bf16.vlgmr.msrb.gmra.mxu3 %v12846_v60  ;;  %v6867_v34 = vpop.f32.mrf.mxu0 }
 0x965   : > { %v6916_v19 = vpop.f32.mrf.mxu1  ;;  %v10676_v54 = vpop.eup %10675  ;;  %v7492_v15 = vadd.f32 1.0, %v10674_v61  ;;  %v6868_v26 = vadd.f32 %v6867_v34, %v13242_v9 }
 0x966   : > { %7616 = vst [vmem:[%s12992_s2 + $0x1a8] sm:$0xff] %v10676_v54  ;;  %10677 = vpow2.f32 %v7429_v39 }
 0x967   : > { %10679 = vrcp.f32 %v7492_v15  ;;  %v7007_v46 = vpop.f32.mrf.mxu3  ;;  %v6917_v18 = vadd.f32 %v6916_v19, %v6868_v26 }
 0x968   : > { %v7008_v59 = vadd.f32 %v7007_v46, %v6959_v22  ;;  %v6960_v35 = vpop.f32.mrf.mxu2 }
 0x969   : > { %v6961_v23 = vadd.f32 %v6960_v35, %v6912_v45 }
 0x96a   : > { %v7245_v47 = vsub.f32 0.0, %v7008_v59 }
 0x96c   : > { %v10678_v14 = vpop.eup %10677  ;;  %v7311_v3 = vmul.f32 1.442695, %v7245_v47  ;;  %v6870_v38 = vpop.f32.mrf.mxu0 }
 0x96d   : > { %v6919_v60 = vpop.f32.mrf.mxu1  ;;  %v10680_v12 = vpop.eup %10679  ;;  %v7496_v58 = vadd.f32 1.0, %v10678_v14  ;;  %7158 = vmatmul.bf16.gmra.mxu2 %v12851_v55  ;;  %v6871_v34 = vadd.f32 %v6870_v38, %v13242_v9 }
 0x96e   : > { %7620 = vst [vmem:[%s12992_s2 + $0x1c8] sm:$0xff] %v10680_v12  ;;  %10681 = vpow2.f32 %v7311_v3 }
 0x96f   : > { %10683 = vrcp.f32 %v7496_v58  ;;  %v7009_v13 = vpop.f32.mrf.mxu3  ;;  %7065 = vmatmul.bf16.gmra.mxu0 %v12751_v31  ;;  %7114 = vmatmul.bf16.gmra.mxu1 %v12759_v0  ;;  %v6920_v14 = vadd.f32 %v6919_v60, %v6871_v34 }
 0x970   : > { %v7010_v11 = vadd.f32 %v7009_v13, %v6961_v23  ;;  %v6963_v40 = vpop.f32.mrf.mxu2 }
 0x971   : > { %v6964_v31 = vadd.f32 %v6963_v40, %v6915_v57 }
 0x972   : > { %v7249_v49 = vsub.f32 0.0, %v7010_v11 }
 0x974   : > { %v10682_v25 = vpop.eup %10681  ;;  %v7319_v44 = vmul.f32 1.442695, %v7249_v49  ;;  %7207 = vmatmul.bf16.gmra.mxu3 %v12858_v37  ;;  %v6872_v55 = vpop.f32.mrf.mxu0 }
 0x975   : > { %v6921_v7 = vpop.f32.mrf.mxu1  ;;  %v10684_v20 = vpop.eup %10683  ;;  %v7437_v33 = vadd.f32 1.0, %v10682_v25  ;;  %v6873_v38 = vadd.f32 %v6872_v55, %v13242_v9 }
 0x976   : > { %7624 = vst [vmem:[%s12992_s2 + $0x1e8] sm:$0xff] %v10684_v20  ;;  %10685 = vpow2.f32 %v7319_v44 }
 0x977   : > { %10687 = vrcp.f32 %v7437_v33  ;;  %v7012_v0 = vpop.f32.mrf.mxu3  ;;  %v6922_v60 = vadd.f32 %v6921_v7, %v6873_v38 }
 0x978   : > { %v7013_v8 = vadd.f32 %v7012_v0, %v6964_v31  ;;  %v6965_v21 = vpop.f32.mrf.mxu2 }
 0x979   : > { %v6966_v46 = vadd.f32 %v6965_v21, %v6917_v18 }
 0x97a   : > { %v7253_v61 = vsub.f32 0.0, %v7013_v8 }
 0x97c   : > { %v10686_v53 = vpop.eup %10685  ;;  %v7327_v39 = vmul.f32 1.442695, %v7253_v61  ;;  %v6875_v54 = vpop.f32.mrf.mxu0 }
 0x97d   : > { %v6924_v37 = vpop.f32.mrf.mxu1  ;;  %v10688_v15 = vpop.eup %10687  ;;  %v7441_v22 = vadd.f32 1.0, %v10686_v53  ;;  %7163 = vmatmul.bf16.gmra.mxu2 %v12863_v2  ;;  %v6876_v55 = vadd.f32 %v6875_v54, %v13242_v9 }
 0x97e   : > { %7565 = vst [vmem:[%s12992_s2 + $0x10] sm:$0xff] %v10688_v15  ;;  %10689 = vpow2.f32 %v7327_v39 }
 0x97f   : > { %10691 = vrcp.f32 %v7441_v22  ;;  %v7014_v51 = vpop.f32.mrf.mxu3  ;;  %7070 = vmatmul.bf16.gmra.mxu0 %v12763_v10  ;;  %7119 = vmatmul.bf16.gmra.mxu1 %v12771_v52  ;;  %v6925_v26 = vadd.f32 %v6924_v37, %v6876_v55 }
 0x980   : > { %v7015_v19 = vadd.f32 %v7014_v51, %v6966_v46  ;;  %v6968_v59 = vpop.f32.mrf.mxu2 }
 0x981   : > { %v6969_v10 = vadd.f32 %v6968_v59, %v6920_v14 }
 0x982   : > { %v7257_v35 = vsub.f32 0.0, %v7015_v19 }
 0x984   : > { %v10690_v47 = vpop.eup %10689  ;;  %v7335_v45 = vmul.f32 1.442695, %v7257_v35  ;;  %7212 = vmatmul.bf16.gmra.mxu3 %v12872_v63  ;;  %v6877_v2 = vpop.f32.mrf.mxu0 }
 0x985   : > { %v6926_v3 = vpop.f32.mrf.mxu1  ;;  %v10692_v12 = vpop.eup %10691  ;;  %v7445_v58 = vadd.f32 1.0, %v10690_v47  ;;  %v6878_v18 = vadd.f32 %v6877_v2, %v13242_v9 }
 0x986   : > { %7569 = vst [vmem:[%s12992_s2 + $0x30] sm:$0xff] %v10692_v12  ;;  %10693 = vpow2.f32 %v7335_v45 }
 0x987   : > { %10695 = vrcp.f32 %v7445_v58  ;;  %v7017_v52 = vpop.f32.mrf.mxu3  ;;  %v6927_v37 = vadd.f32 %v6926_v3, %v6878_v18 }
 0x988   : > { %v7018_v23 = vadd.f32 %v7017_v52, %v6969_v10  ;;  %v6970_v13 = vpop.f32.mrf.mxu2 }
 0x989   : > { %v6971_v44 = vadd.f32 %v6970_v13, %v6922_v60 }
 0x98a   : > { %v7261_v56 = vsub.f32 0.0, %v7018_v23 }
 0x98c   : > { %v10694_v11 = vpop.eup %10693  ;;  %v7343_v40 = vmul.f32 1.442695, %v7261_v56  ;;  %v6880_v49 = vpop.f32.mrf.mxu0 }
 0x98d   : > { %v6929_v63 = vpop.f32.mrf.mxu1  ;;  %v10696_v25 = vpop.eup %10695  ;;  %v7449_v57 = vadd.f32 1.0, %v10694_v11  ;;  %7168 = vmatmul.bf16.gmra.mxu2 %v12879_v62  ;;  %v6881_v47 = vadd.f32 %v6880_v49, %v13242_v9 }
 0x98e   : > { %7573 = vst [vmem:[%s12992_s2 + $0x50] sm:$0xff] %v10696_v25  ;;  %10697 = vpow2.f32 %v7343_v40 }
 0x98f   : > { %10699 = vrcp.f32 %v7449_v57  ;;  %v7019_v20 = vpop.f32.mrf.mxu3  ;;  %7075 = vmatmul.bf16.gmra.mxu0 %v12777_v5  ;;  %7124 = vmatmul.bf16.gmra.mxu1 %v12882_v16  ;;  %v6930_v12 = vadd.f32 %v6929_v63, %v6881_v47 }
 0x990   : > { %v7020_v7 = vadd.f32 %v7019_v20, %v6971_v44  ;;  %v6973_v33 = vpop.f32.mrf.mxu2 }
 0x991   : > { %v6974_v5 = vadd.f32 %v6973_v33, %v6925_v26 }
 0x992   : > { %v7265_v31 = vsub.f32 0.0, %v7020_v7 }
 0x994   : > { %v10698_v0 = vpop.eup %10697  ;;  %v7351_v8 = vmul.f32 1.442695, %v7265_v31  ;;  %7217 = vmatmul.bf16.gmra.mxu3 %v12890_v24  ;;  %v6882_v62 = vpop.f32.mrf.mxu0 }
 0x995   : > { %v6931_v21 = vpop.f32.mrf.mxu1  ;;  %v10700_v61 = vpop.eup %10699  ;;  %v7453_v53 = vadd.f32 1.0, %v10698_v0  ;;  %v6883_v23 = vadd.f32 %v6882_v62, %v13242_v9 }
 0x996   : > { %7577 = vst [vmem:[%s12992_s2 + $0x70] sm:$0xff] %v10700_v61  ;;  %10701 = vpow2.f32 %v7351_v8 }
 0x997   : > { %10703 = vrcp.f32 %v7453_v53  ;;  %v7022_v16 = vpop.f32.mrf.mxu3  ;;  %v6932_v40 = vadd.f32 %v6931_v21, %v6883_v23 }
 0x998   : > { %v7023_v39 = vadd.f32 %v7022_v16, %v6974_v5  ;;  %v6975_v54 = vpop.f32.mrf.mxu2 }
 0x999   : > { %v6976_v59 = vadd.f32 %v6975_v54, %v6927_v37 }
 0x99a   : > { %v7269_v15 = vsub.f32 0.0, %v7023_v39 }
 0x99c   : > { %v10702_v22 = vpop.eup %10701  ;;  %v7359_v46 = vmul.f32 1.442695, %v7269_v15  ;;  %v6885_v51 = vpop.f32.mrf.mxu0 }
 0x99d   : > { %v6934_v24 = vpop.f32.mrf.mxu1  ;;  %v10704_v34 = vpop.eup %10703  ;;  %v7457_v19 = vadd.f32 1.0, %v10702_v22  ;;  %7173 = vmatmul.bf16.gmra.mxu2 %v12897_v1  ;;  %v6886_v55 = vadd.f32 %v6885_v51, %v13242_v9 }
 0x99e   : > { %7581 = vst [vmem:[%s12992_s2 + $0x90] sm:$0xff] %v10704_v34  ;;  %10705 = vpow2.f32 %v7359_v46 }
 0x99f   : > { %10707 = vrcp.f32 %v7457_v19  ;;  %v7024_v35 = vpop.f32.mrf.mxu3  ;;  %7080 = vmatmul.bf16.gmra.mxu0 %v12792_v48  ;;  %7129 = vmatmul.bf16.gmra.mxu1 %v12900_v43  ;;  %v6935_v26 = vadd.f32 %v6934_v24, %v6886_v55 }
 0x9a0   : > { %v7025_v14 = vadd.f32 %v7024_v35, %v6976_v59  ;;  %v6978_v45 = vpop.f32.mrf.mxu2 }
 0x9a1   : > { %v6979_v48 = vadd.f32 %v6978_v45, %v6930_v12 }
 0x9a2   : > { %v7273_v2 = vsub.f32 0.0, %v7025_v14 }
 0x9a4   : > { %v10706_v3 = vpop.eup %10705  ;;  %v7367_v58 = vmul.f32 1.442695, %v7273_v2  ;;  %7222 = vmatmul.bf16.gmra.mxu3 %v12908_v27  ;;  %v6887_v1 = vpop.f32.mrf.mxu0 }
 0x9a5   : > { %v6936_v10 = vpop.f32.mrf.mxu1  ;;  %v10708_v52 = vpop.eup %10707  ;;  %v7461_v38 = vadd.f32 1.0, %v10706_v3  ;;  %v6888_v53 = vadd.f32 %v6887_v1, %v13242_v9 }
 0x9a6   : > { %7585 = vst [vmem:[%s12992_s2 + $0xb0] sm:$0xff] %v10708_v52  ;;  %10709 = vpow2.f32 %v7367_v58 }
 0x9a7   : > { %10711 = vrcp.f32 %v7461_v38  ;;  %v7027_v43 = vpop.f32.mrf.mxu3  ;;  %v6937_v54 = vadd.f32 %v6936_v10, %v6888_v53 }
 0x9a8   : > { %v7028_v13 = vadd.f32 %v7027_v43, %v6979_v48  ;;  %v6980_v56 = vpop.f32.mrf.mxu2 }
 0x9a9   : > { %v6981_v44 = vadd.f32 %v6980_v56, %v6932_v40 }
 0x9aa   : > { %v7277_v11 = vsub.f32 0.0, %v7028_v13 }
 0x9ac   : > { %v10710_v60 = vpop.eup %10709  ;;  %v7375_v49 = vmul.f32 1.442695, %v7277_v11  ;;  %v6890_v63 = vpop.f32.mrf.mxu0 }
 0x9ad   : > { %v6939_v27 = vpop.f32.mrf.mxu1  ;;  %v10712_v25 = vpop.eup %10711  ;;  %v7465_v57 = vadd.f32 1.0, %v10710_v60  ;;  %7178 = vmatmul.bf16.gmra.mxu2 %v12915_v17  ;;  %v6891_v34 = vadd.f32 %v6890_v63, %v13242_v9 }
 0x9ae   : > { %7589 = vst [vmem:[%s12992_s2 + $0xd0] sm:$0xff] %v10712_v25  ;;  %10713 = vpow2.f32 %v7375_v49 }
 0x9af   : > { %10715 = vrcp.f32 %v7465_v57  ;;  %v7029_v20 = vpop.f32.mrf.mxu3  ;;  %7085 = vmatmul.bf16.gmra.mxu0 %v12807_v36  ;;  %7134 = vmatmul.bf16.gmra.mxu1 %v12918_v28  ;;  %v6940_v14 = vadd.f32 %v6939_v27, %v6891_v34 }
 0x9b0   : > { %v7030_v7 = vadd.f32 %v7029_v20, %v6981_v44  ;;  %v6983_v33 = vpop.f32.mrf.mxu2 }
 0x9b1   : > { %v6984_v36 = vadd.f32 %v6983_v33, %v6935_v26 }
 0x9b2   : > { %v7281_v31 = vsub.f32 0.0, %v7030_v7 }
 0x9b4   : > { %v10714_v0 = vpop.eup %10713  ;;  %v7383_v8 = vmul.f32 1.442695, %v7281_v31  ;;  %7227 = vmatmul.bf16.gmra.mxu3 %v12926_v42  ;;  %v6892_v17 = vpop.f32.mrf.mxu0 }
 0x9b5   : > { %v6941_v62 = vpop.f32.mrf.mxu1  ;;  %v10716_v21 = vpop.eup %10715  ;;  %v7469_v61 = vadd.f32 1.0, %v10714_v0  ;;  %v6893_v58 = vadd.f32 %v6892_v17, %v13242_v9 }
 0x9b6   : > { %7593 = vst [vmem:[%s12992_s2 + $0xf0] sm:$0xff] %v10716_v21  ;;  %10717 = vpow2.f32 %v7383_v8 }
 0x9b7   : > { %10719 = vrcp.f32 %v7469_v61  ;;  %v7032_v28 = vpop.f32.mrf.mxu3  ;;  %v6942_v48 = vadd.f32 %v6941_v62, %v6893_v58  ;;  %v13307_v61 = vperm.slane %v13239_v30, 3 }
 0x9b8   : > { %v7033_v5 = vadd.f32 %v7032_v28, %v6984_v36  ;;  %v6985_v16 = vpop.f32.mrf.mxu2 }
 0x9b9   : > { %v6986_v51 = vadd.f32 %v6985_v16, %v6937_v54 }
 0x9ba   : > { %v7285_v18 = vsub.f32 0.0, %v7033_v5 }
 0x9bc   : > { %v10718_v39 = vpop.eup %10717  ;;  %v7391_v15 = vmul.f32 1.442695, %v7285_v18  ;;  %v6895_v22 = vpop.f32.mrf.mxu0 }
 0x9bd   : > { %v6944_v42 = vpop.f32.mrf.mxu1  ;;  %v10720_v37 = vpop.eup %10719  ;;  %v7473_v46 = vadd.f32 1.0, %v10718_v39  ;;  %7183 = vmatmul.bf16.gmra.mxu2 %v12933_v29  ;;  %v6896_v40 = vadd.f32 %v6895_v22, %v13242_v9 }
 0x9be   : > { %7597 = vst [vmem:[%s12992_s2 + $0x110] sm:$0xff] %v10720_v37  ;;  %10721 = vpow2.f32 %v7391_v15 }
 0x9bf   : > { %10723 = vrcp.f32 %v7473_v46  ;;  %v7034_v24 = vpop.f32.mrf.mxu3  ;;  %7090 = vmatmul.bf16.gmra.mxu0 %v12822_v50  ;;  %7139 = vmatmul.bf16.gmra.mxu1 %v12936_v6  ;;  %v6945_v57 = vadd.f32 %v6944_v42, %v6896_v40 }
 0x9c0   : > { %v7035_v19 = vadd.f32 %v7034_v24, %v6986_v51  ;;  %v6988_v59 = vpop.f32.mrf.mxu2 }
 0x9c1   : > { %v6989_v50 = vadd.f32 %v6988_v59, %v6940_v14 }
 0x9c2   : > { %v7289_v35 = vsub.f32 0.0, %v7035_v19 }
 0x9c4   : > { %v10722_v47 = vpop.eup %10721  ;;  %v7399_v45 = vmul.f32 1.442695, %v7289_v35  ;;  %7232 = vmatmul.bf16.gmra.mxu3 %v12942_v4  ;;  %v6897_v29 = vpop.f32.mrf.mxu0 }
 0x9c5   : > { %v6946_v2 = vpop.f32.mrf.mxu1  ;;  %v10724_v3 = vpop.eup %10723  ;;  %v7477_v12 = vadd.f32 1.0, %v10722_v47  ;;  %v6898_v0 = vadd.f32 %v6897_v29, %v13242_v9 }
 0x9c6   : > { %7601 = vst [vmem:[%s12992_s2 + $0x130] sm:$0xff] %v10724_v3  ;;  %10725 = vpow2.f32 %v7399_v45 }
 0x9c7   : > { %10727 = vrcp.f32 %v7477_v12  ;;  %v7037_v6 = vpop.f32.mrf.mxu3  ;;  %v6947_v21 = vadd.f32 %v6946_v2, %v6898_v0 }
 0x9c8   : > { %v7038_v1 = vadd.f32 %v7037_v6, %v6989_v50  ;;  %v6990_v10 = vpop.f32.mrf.mxu2 }
 0x9c9   : > { %v6991_v11 = vadd.f32 %v6990_v10, %v6942_v48 }
 0x9ca   : > { %v7293_v52 = vsub.f32 0.0, %v7038_v1 }
 0x9cc   : > { %v10726_v38 = vpop.eup %10725  ;;  %v7407_v43 = vmul.f32 1.442695, %v7293_v52  ;;  %v7056_v23 = vpop.f32.mrf.mxu0 }
 0x9cd   : > { %v7105_v4 = vpop.f32.mrf.mxu1  ;;  %v10728_v13 = vpop.eup %10727  ;;  %v7481_v56 = vadd.f32 1.0, %v10726_v38  ;;  %7188 = vmatmul.bf16.gmra.mxu2 %v12947_v41  ;;  %v7057_v9 = vadd.f32 %v7056_v23, %v13307_v61 }
 0x9ce   : > { %7605 = vst [vmem:[%s12992_s2 + $0x150] sm:$0xff] %v10728_v13  ;;  %10729 = vpow2.f32 %v7407_v43 }
 0x9cf   : > { %10731 = vrcp.f32 %v7481_v56  ;;  %v7039_v60 = vpop.f32.mrf.mxu3  ;;  %v7106_v42 = vadd.f32 %v7105_v4, %v7057_v9 }
 0x9d0   : > { %v7040_v49 = vadd.f32 %v7039_v60, %v6991_v11  ;;  %v6993_v63 = vpop.f32.mrf.mxu2 }
 0x9d1   : > { %v6994_v33 = vadd.f32 %v6993_v63, %v6945_v57 }
 0x9d2   : > { %v7297_v27 = vsub.f32 0.0, %v7040_v49 }
 0x9d4   : > { %v10730_v25 = vpop.eup %10729  ;;  %v7415_v44 = vmul.f32 1.442695, %v7297_v27  ;;  %7237 = vmatmul.bf16.gmra.mxu3 %v12953_v32  ;;  %v7058_v20 = vpop.f32.mrf.mxu0 }
 0x9d5   : > { %v7107_v55 = vpop.f32.mrf.mxu1  ;;  %v10732_v7 = vpop.eup %10731  ;;  %v7485_v41 = vadd.f32 1.0, %v10730_v25  ;;  %v7059_v59 = vadd.f32 %v7058_v20, %v13307_v61 }
 0x9d6   : > { %7609 = vst [vmem:[%s12992_s2 + $0x170] sm:$0xff] %v10732_v7  ;;  %10733 = vpow2.f32 %v7415_v44 }
 0x9d7   : > { %10735 = vrcp.f32 %v7485_v41  ;;  %v7042_v31 = vpop.f32.mrf.mxu3  ;;  %v7108_v29 = vadd.f32 %v7107_v55, %v7059_v59 }
 0x9d8   : > { %v7043_v26 = vadd.f32 %v7042_v31, %v6994_v33  ;;  %v6995_v8 = vpop.f32.mrf.mxu2 }
 0x9d9   : > { %v6996_v16 = vadd.f32 %v6995_v8, %v6947_v21 }
 0x9da   : > { %v7301_v17 = vsub.f32 0.0, %v7043_v26 }
 0x9dc   : > { %v10734_v62 = vpop.eup %10733  ;;  %v7423_v32 = vmul.f32 1.442695, %v7301_v17  ;;  %v7061_v36 = vpop.f32.mrf.mxu0 }
 0x9dd   : > { %v7110_v28 = vpop.f32.mrf.mxu1  ;;  %v10736_v53 = vpop.eup %10735  ;;  %v7489_v5 = vadd.f32 1.0, %v10734_v62  ;;  %v7062_v10 = vadd.f32 %v7061_v36, %v13307_v61 }
 0x9de   : > { %7613 = vst [vmem:[%s12992_s2 + $0x190] sm:$0xff] %v10736_v53  ;;  %10737 = vpow2.f32 %v7423_v32 }
 0x9df   : > { %10739 = vrcp.f32 %v7489_v5  ;;  %v7044_v18 = vpop.f32.mrf.mxu3  ;;  %v7111_v23 = vadd.f32 %v7110_v28, %v7062_v10 }
 0x9e0   : > { %v7045_v39 = vadd.f32 %v7044_v18, %v6996_v16  ;;  %v7154_v54 = vpop.f32.mrf.mxu2 }
 0x9e1   : > { %v7155_v34 = vadd.f32 %v7154_v54, %v7106_v42 }
 0x9e2   : > { %v7305_v15 = vsub.f32 0.0, %v7045_v39 }
 0x9e4   : > { %v10738_v22 = vpop.eup %10737  ;;  %v7431_v30 = vmul.f32 1.442695, %v7305_v15  ;;  %v7063_v37 = vpop.f32.mrf.mxu0 }
 0x9e5   : > { %v13311_v46 = vpop.f32.mrf.mxu1  ;;  %v10740_v51 = vpop.eup %10739  ;;  %v7493_v24 = vadd.f32 1.0, %v10738_v22  ;;  %v7064_v63 = vadd.f32 %v7063_v37, %v13307_v61 }
 0x9e6   : > { %7617 = vst [vmem:[%s12992_s2 + $0x1b0] sm:$0xff] %v10740_v51  ;;  %10741 = vpow2.f32 %v7431_v30 }
 0x9e7   : > { %10743 = vrcp.f32 %v7493_v24  ;;  %v7203_v19 = vpop.f32.mrf.mxu3 }
 0x9e8   : > { %v7204_v35 = vadd.f32 %v7203_v19, %v7155_v34  ;;  %v7156_v47 = vpop.f32.mrf.mxu2 }
 0x9e9   : > { %v7157_v58 = vadd.f32 %v7156_v47, %v7108_v29 }
 0x9ea   : > { %v7246_v14 = vsub.f32 0.0, %v7204_v35 }
 0x9ec   : > { %v10742_v45 = vpop.eup %10741  ;;  %v7313_v2 = vmul.f32 1.442695, %v7246_v14  ;;  %v13315_v3 = vpop.f32.mrf.mxu0 }
 0x9ed   : > { %v10744_v12 = vpop.eup %10743  ;;  %v7497_v50 = vadd.f32 1.0, %v10742_v45  ;;  %v13317_v6 = vpop.f32.mrf.mxu1 }
 0x9ee   : > { %7621 = vst [vmem:[%s12992_s2 + $0x1d0] sm:$0xff] %v10744_v12  ;;  %10745 = vpow2.f32 %v7313_v2 }
 0x9ef   : > { %10747 = vrcp.f32 %v7497_v50  ;;  %v7205_v1 = vpop.f32.mrf.mxu3 }
 0x9f0   : > { %v7206_v52 = vadd.f32 %v7205_v1, %v7157_v58  ;;  %v7159_v38 = vpop.f32.mrf.mxu2 }
 0x9f1   : > { %v7160_v60 = vadd.f32 %v7159_v38, %v7111_v23 }
 0x9f2   : > { %v7250_v48 = vsub.f32 0.0, %v7206_v52 }
 0x9f4   : > { %v10746_v43 = vpop.eup %10745  ;;  %v7321_v4 = vmul.f32 1.442695, %v7250_v48  ;;  %v13325_v13 = vpop.f32.mrf.mxu0 }
 0x9f5   : > { %v10748_v56 = vpop.eup %10747  ;;  %v7438_v11 = vadd.f32 1.0, %v10746_v43  ;;  %v13331_v40 = vpop.f32.mrf.mxu1 }
 0x9f6   : > { %7625 = vst [vmem:[%s12992_s2 + $0x1f0] sm:$0xff] %v10748_v56  ;;  %10749 = vpow2.f32 %v7321_v4 }
 0x9f7   : > { %10751 = vrcp.f32 %v7438_v11  ;;  %v7208_v49 = vpop.f32.mrf.mxu3 }
 0x9f8   : > { %v7209_v27 = vadd.f32 %v7208_v49, %v7160_v60  ;;  %v7161_v25 = vpop.f32.mrf.mxu2 }
 0x9f9   : > { %11350 = shalt.err (!%p11347_p8)
}
 0x9fa   : > { %s11510_s30 = smov 128   ;;  %s11511_s25 = smov 8   ;;  %v7254_v57 = vsub.f32 0.0, %v7209_v27  ;;  %v7113_v20 = vadd.f32 %v13311_v46, %v7064_v63  ;;  %v7067_v26 = vadd.f32 %v13315_v3, %v13307_v61 }
 0x9fb   : > { %10359 = dma.vmem_to_hbm [thread:$0]  (%p11809_p0), %s13328_s24, 2048, %s7671_s29, %s13339_s6, %s11510_s30, %s11510_s30, %s11511_s25  }
 0x9fc   : > { %s7687_s16 = sshll.u32 %s7684_s1, 4  ;;  %v10750_v44 = vpop.eup %10749  ;;  %v7329_v55 = vmul.f32 1.442695, %v7254_v57  ;;  %v7071_v7 = vpop.f32.mrf.mxu0  ;;  %v7162_v31 = vadd.f32 %v7161_v25, %v7113_v20  ;;  %s7685_s9 = sshll.u32 %s12499_s12, 4  ;;  %s7688_s16 = int_to_ptr.hbm [resolvable:$true] %s7687_s16  ;;  %s7686_s9 = int_to_ptr.vmem [resolvable:$true] %s7685_s9 }
 0x9fd   : > { %v10752_v41 = vpop.eup %10751  ;;  %v7442_v33 = vadd.f32 1.0, %v10750_v44  ;;  %s11365_s24 = sshra.s32 %s7688_s16, 4  ;;  %s11371_s19 = scalar_lea.hbm %s13554_s14, 256  ;;  %s11366_s24 = int_to_ptr.hbm [resolvable:$true] %s11365_s24 }
 0x9fe   : > { %7566 = vst [vmem:[%s12992_s2 + $0x18] sm:$0xff] %v10752_v41  ;;  %10753 = vpow2.f32 %v7329_v55  ;;  %s11367_s29 = scalar_lea.hbm %s11366_s24, 128  ;;  %p11372_p2 = scmp.lt.s32.totalorder %s11366_s24, %s13554_s14 }
 0x9ff   : > { %10755 = vrcp.f32 %v7442_v33  ;;  %v7210_v0 = vpop.f32.mrf.mxu3  ;;  %p11368_p10 = scmp.ne.s32.totalorder %s11366_s24, %s11367_s29  ;;  %p11373_p4 = scmp.lt.s32.totalorder %s11371_s19, %s11367_s29 }
 0xa00   : > { %v7211_v8 = vadd.f32 %v7210_v0, %v7162_v31  ;;  %v7164_v17 = vpop.f32.mrf.mxu2 }
 0xa01   : > { %p11369_p11 = pnand %p11368_p10, %p11809_p0  ;;  %p11374_p1 = por %p11373_p4, %p11372_p2 }
 0xa03   : > { %p11370_p12 = pneg %p11369_p11 }
 0xa05   : > { %p11375_p3 = pnand %p11374_p1, %p11370_p12 }
 0xa07   : > { %11378 = shalt.err (!%p11375_p3)
}
 0xa08   : > { %10360 = dma.vmem_to_hbm [thread:$0]  (%p11809_p0), %s7686_s9, 2048, %s7688_s16, %s13339_s6, %s11510_s30, %s11510_s30, %s11511_s25   ;;  %v7120_v62 = vpop.f32.mrf.mxu1  ;;  %v7258_v21 = vsub.f32 0.0, %v7211_v8  ;;  %v10754_v32 = vpop.eup %10753  ;;  %v7116_v36 = vadd.f32 %v13317_v6, %v7067_v26  ;;  %v7069_v39 = vadd.f32 %v13325_v13, %v13307_v61  ;;  %v7072_v35 = vadd.f32 %v7071_v7, %v13307_v61 }
 0xa09   : > { %v10756_v53 = vpop.eup %10755  ;;  %v7446_v5 = vadd.f32 1.0, %v10754_v32  ;;  %v7073_v16 = vpop.f32.mrf.mxu0  ;;  %s10291_s6 = sshll.u32 %s11663_s7, 9  ;;  %s13555_s15 = sld [smem:[#allocation71_spill]] }
 0xa0a   : > { %v7337_v28 = vmul.f32 1.442695, %v7258_v21  ;;  %7570 = vst [vmem:[%s12992_s2 + $0x38] sm:$0xff] %v10756_v53  ;;  %v7165_v18 = vadd.f32 %v7164_v17, %v7116_v36  ;;  %v7213_v9 = vpop.f32.mrf.mxu3  ;;  %v7166_v15 = vpop.f32.mrf.mxu2  ;;  %v7118_v37 = vadd.f32 %v13331_v40, %v7069_v39  ;;  %v7121_v2 = vadd.f32 %v7120_v62, %v7072_v35  ;;  %s7651_s30 = sshll.u32 %s12992_s2, 4  ;;  %s7628_s16 = scalar_lea.sflag [#allocation4], %s11871_s20  ;;  %s7652_s30 = int_to_ptr.vmem [resolvable:$true] %s7651_s30 }
 0xa0b   : > { %v7074_v10 = vadd.f32 %v7073_v16, %v13307_v61 }
 0xa0c   : > { %10757 = vpow2.f32 %v7337_v28  ;;  %v7214_v54 = vadd.f32 %v7213_v9, %v7165_v18  ;;  %v7167_v34 = vadd.f32 %v7166_v15, %v7118_v37 }
 0xa0d   : > { %10759 = vrcp.f32 %v7446_v5 }
 0xa0e   : > { %v7262_v22 = vsub.f32 0.0, %v7214_v54 }
 0xa0f   : > { %s7650_s21 = scalar_lea.hbm %s13555_s15, %s10291_s6  ;;  %s11399_s1 = scalar_lea.hbm %s13555_s15, 1024 }
 0xa10   : > { %v7122_v42 = vpop.f32.mrf.mxu1  ;;  %v7345_v46 = vmul.f32 1.442695, %v7262_v22  ;;  %s7653_s25 = sshll.u32 %s7650_s21, 4  ;;  %s7654_s25 = int_to_ptr.hbm [resolvable:$true] %s7653_s25 }
 0xa11   : > { %v7076_v19 = vpop.f32.mrf.mxu0  ;;  %v7123_v4 = vadd.f32 %v7122_v42, %v7074_v10  ;;  %s11393_s9 = sshra.s32 %s7654_s25, 4  ;;  %s11394_s9 = int_to_ptr.hbm [resolvable:$true] %s11393_s9 }
 0xa12   : > { %v10758_v30 = vpop.eup %10757  ;;  %10761 = vpow2.f32 %v7345_v46  ;;  %v7215_v59 = vpop.f32.mrf.mxu3  ;;  %v7077_v63 = vadd.f32 %v7076_v19, %v13307_v61  ;;  %s11395_s7 = scalar_lea.hbm %s11394_s9, 512  ;;  %p11400_p5 = scmp.lt.s32.totalorder %s11394_s9, %s13555_s15 }
 0xa13   : > { %v10760_v51 = vpop.eup %10759  ;;  %v7450_v24 = vadd.f32 1.0, %v10758_v30  ;;  %v7216_v47 = vadd.f32 %v7215_v59, %v7167_v34  ;;  %v7169_v14 = vpop.f32.mrf.mxu2  ;;  %p11396_p13 = scmp.ne.s32.totalorder %s11394_s9, %s11395_s7  ;;  %p11401_p8 = scmp.lt.s32.totalorder %s11399_s1, %s11395_s7 }
 0xa14   : > { %7574 = vst [vmem:[%s12992_s2 + $0x58] sm:$0xff] %v10760_v51  ;;  %v7170_v58 = vadd.f32 %v7169_v14, %v7121_v2 }
 0xa15   : > { %10763 = vrcp.f32 %v7450_v24  ;;  %v7266_v45 = vsub.f32 0.0, %v7216_v47  ;;  %p11397_p7 = pnand %p11396_p13, %p11809_p0  ;;  %p11402_p10 = por %p11401_p8, %p11400_p5 }
 0xa17   : > { %v7353_v3 = vmul.f32 1.442695, %v7266_v45  ;;  %p11398_p9 = pneg %p11397_p7 }
 0xa18   : > { %v10762_v29 = vpop.eup %10761  ;;  %v7125_v6 = vpop.f32.mrf.mxu1 }
 0xa19   : > { %v7454_v50 = vadd.f32 1.0, %v10762_v29  ;;  %10765 = vpow2.f32 %v7353_v3  ;;  %v7078_v48 = vpop.f32.mrf.mxu0  ;;  %v7126_v55 = vadd.f32 %v7125_v6, %v7077_v63  ;;  %p11403_p11 = pnand %p11402_p10, %p11398_p9 }
 0xa1a   : > { %v7218_v1 = vpop.f32.mrf.mxu3  ;;  %v7079_v26 = vadd.f32 %v7078_v48, %v13307_v61 }
 0xa1b   : > { %v10764_v12 = vpop.eup %10763  ;;  %10767 = vrcp.f32 %v7454_v50  ;;  %v7219_v52 = vadd.f32 %v7218_v1, %v7170_v58  ;;  %v7171_v38 = vpop.f32.mrf.mxu2 }
 0xa1c   : > { %7578 = vst [vmem:[%s12992_s2 + $0x78] sm:$0xff] %v10764_v12  ;;  %v7172_v60 = vadd.f32 %v7171_v38, %v7123_v4 }
 0xa1d   : > { %v7270_v43 = vsub.f32 0.0, %v7219_v52 }
 0xa1f   : > { %v10766_v23 = vpop.eup %10765  ;;  %v7361_v13 = vmul.f32 1.442695, %v7270_v43 }
 0xa20   : > { %v7458_v11 = vadd.f32 1.0, %v10766_v23  ;;  %v7127_v40 = vpop.f32.mrf.mxu1 }
 0xa21   : > { %v10768_v56 = vpop.eup %10767  ;;  %10769 = vpow2.f32 %v7361_v13  ;;  %v7081_v44 = vpop.f32.mrf.mxu0  ;;  %v7128_v36 = vadd.f32 %v7127_v40, %v7079_v26 }
 0xa22   : > { %7582 = vst [vmem:[%s12992_s2 + $0x98] sm:$0xff] %v10768_v56  ;;  %10771 = vrcp.f32 %v7458_v11  ;;  %v7220_v49 = vpop.f32.mrf.mxu3  ;;  %v7082_v39 = vadd.f32 %v7081_v44, %v13307_v61 }
 0xa23   : > { %v7221_v27 = vadd.f32 %v7220_v49, %v7172_v60  ;;  %v7174_v25 = vpop.f32.mrf.mxu2 }
 0xa24   : > { %v7175_v31 = vadd.f32 %v7174_v25, %v7126_v55 }
 0xa25   : > { %v7274_v57 = vsub.f32 0.0, %v7221_v27 }
 0xa27   : > { %v10770_v20 = vpop.eup %10769  ;;  %v7369_v7 = vmul.f32 1.442695, %v7274_v57 }
 0xa28   : > { %v10772_v41 = vpop.eup %10771  ;;  %v7462_v33 = vadd.f32 1.0, %v10770_v20  ;;  %v7130_v62 = vpop.f32.mrf.mxu1 }
 0xa29   : > { %7586 = vst [vmem:[%s12992_s2 + $0xb8] sm:$0xff] %v10772_v41  ;;  %10773 = vpow2.f32 %v7369_v7  ;;  %v7083_v16 = vpop.f32.mrf.mxu0  ;;  %v7131_v37 = vadd.f32 %v7130_v62, %v7082_v39 }
 0xa2a   : > { %10775 = vrcp.f32 %v7462_v33  ;;  %v7223_v0 = vpop.f32.mrf.mxu3  ;;  %v7084_v35 = vadd.f32 %v7083_v16, %v13307_v61 }
 0xa2b   : > { %v7224_v8 = vadd.f32 %v7223_v0, %v7175_v31  ;;  %v7176_v17 = vpop.f32.mrf.mxu2 }
 0xa2c   : > { %v7177_v18 = vadd.f32 %v7176_v17, %v7128_v36 }
 0xa2d   : > { %v7278_v21 = vsub.f32 0.0, %v7224_v8 }
 0xa2f   : > { %v10774_v32 = vpop.eup %10773  ;;  %v7377_v28 = vmul.f32 1.442695, %v7278_v21 }
 0xa30   : > { %v10776_v53 = vpop.eup %10775  ;;  %v7466_v5 = vadd.f32 1.0, %v10774_v32  ;;  %v7132_v42 = vpop.f32.mrf.mxu1 }
 0xa31   : > { %7590 = vst [vmem:[%s12992_s2 + $0xd8] sm:$0xff] %v10776_v53  ;;  %10777 = vpow2.f32 %v7377_v28  ;;  %v7086_v19 = vpop.f32.mrf.mxu0  ;;  %v7133_v2 = vadd.f32 %v7132_v42, %v7084_v35 }
 0xa32   : > { %10779 = vrcp.f32 %v7466_v5  ;;  %v7225_v9 = vpop.f32.mrf.mxu3  ;;  %v7087_v10 = vadd.f32 %v7086_v19, %v13307_v61 }
 0xa33   : > { %v7226_v54 = vadd.f32 %v7225_v9, %v7177_v18  ;;  %v7179_v15 = vpop.f32.mrf.mxu2 }
 0xa34   : > { %v7180_v34 = vadd.f32 %v7179_v15, %v7131_v37 }
 0xa35   : > { %v7282_v22 = vsub.f32 0.0, %v7226_v54 }
 0xa37   : > { %v10778_v30 = vpop.eup %10777  ;;  %v7385_v46 = vmul.f32 1.442695, %v7282_v22 }
 0xa38   : > { %v10780_v51 = vpop.eup %10779  ;;  %v7470_v24 = vadd.f32 1.0, %v10778_v30  ;;  %v7135_v50 = vpop.f32.mrf.mxu1 }
 0xa39   : > { %7594 = vst [vmem:[%s12992_s2 + $0xf8] sm:$0xff] %v10780_v51  ;;  %10781 = vpow2.f32 %v7385_v46  ;;  %v7088_v48 = vpop.f32.mrf.mxu0  ;;  %v7136_v4 = vadd.f32 %v7135_v50, %v7087_v10 }
 0xa3a   : > { %10783 = vrcp.f32 %v7470_v24  ;;  %v7228_v59 = vpop.f32.mrf.mxu3  ;;  %v7089_v63 = vadd.f32 %v7088_v48, %v13307_v61 }
 0xa3b   : > { %v7229_v47 = vadd.f32 %v7228_v59, %v7180_v34  ;;  %v7181_v14 = vpop.f32.mrf.mxu2 }
 0xa3c   : > { %v7182_v58 = vadd.f32 %v7181_v14, %v7133_v2 }
 0xa3d   : > { %v7286_v45 = vsub.f32 0.0, %v7229_v47 }
 0xa3f   : > { %v10782_v29 = vpop.eup %10781  ;;  %v7393_v3 = vmul.f32 1.442695, %v7286_v45 }
 0xa40   : > { %v10784_v12 = vpop.eup %10783  ;;  %v7474_v6 = vadd.f32 1.0, %v10782_v29  ;;  %v7137_v40 = vpop.f32.mrf.mxu1 }
 0xa41   : > { %7598 = vst [vmem:[%s12992_s2 + $0x118] sm:$0xff] %v10784_v12  ;;  %10785 = vpow2.f32 %v7393_v3  ;;  %v7091_v44 = vpop.f32.mrf.mxu0  ;;  %v7138_v55 = vadd.f32 %v7137_v40, %v7089_v63 }
 0xa42   : > { %10787 = vrcp.f32 %v7474_v6  ;;  %v7230_v1 = vpop.f32.mrf.mxu3  ;;  %v7092_v26 = vadd.f32 %v7091_v44, %v13307_v61 }
 0xa43   : > { %v7231_v52 = vadd.f32 %v7230_v1, %v7182_v58  ;;  %v7184_v38 = vpop.f32.mrf.mxu2 }
 0xa44   : > { %v7185_v60 = vadd.f32 %v7184_v38, %v7136_v4 }
 0xa45   : > { %v7290_v43 = vsub.f32 0.0, %v7231_v52 }
 0xa47   : > { %v10786_v23 = vpop.eup %10785  ;;  %v7401_v13 = vmul.f32 1.442695, %v7290_v43 }
 0xa48   : > { %v10788_v56 = vpop.eup %10787  ;;  %v7478_v11 = vadd.f32 1.0, %v10786_v23  ;;  %v7140_v17 = vpop.f32.mrf.mxu1 }
 0xa49   : > { %7602 = vst [vmem:[%s12992_s2 + $0x138] sm:$0xff] %v10788_v56  ;;  %10789 = vpow2.f32 %v7401_v13  ;;  %v7141_v36 = vadd.f32 %v7140_v17, %v7092_v26  ;;  %v7093_v5 = vpop.f32.mrf.mxu0 }
 0xa4a   : > { %10791 = vrcp.f32 %v7478_v11  ;;  %v7233_v49 = vpop.f32.mrf.mxu3  ;;  %v7094_v39 = vadd.f32 %v7093_v5, %v13307_v61 }
 0xa4b   : > { %v7234_v27 = vadd.f32 %v7233_v49, %v7185_v60  ;;  %v7186_v25 = vpop.f32.mrf.mxu2 }
 0xa4c   : > { %v7187_v31 = vadd.f32 %v7186_v25, %v7138_v55 }
 0xa4d   : > { %v7294_v57 = vsub.f32 0.0, %v7234_v27 }
 0xa4f   : > { %v10790_v20 = vpop.eup %10789  ;;  %v7409_v7 = vmul.f32 1.442695, %v7294_v57 }
 0xa50   : > { %v10792_v41 = vpop.eup %10791  ;;  %v7482_v33 = vadd.f32 1.0, %v10790_v20  ;;  %v7142_v22 = vpop.f32.mrf.mxu1 }
 0xa51   : > { %7606 = vst [vmem:[%s12992_s2 + $0x158] sm:$0xff] %v10792_v41  ;;  %10793 = vpow2.f32 %v7409_v7  ;;  %v7143_v37 = vadd.f32 %v7142_v22, %v7094_v39 }
 0xa52   : > { %10795 = vrcp.f32 %v7482_v33  ;;  %v7235_v0 = vpop.f32.mrf.mxu3 }
 0xa53   : > { %v7236_v8 = vadd.f32 %v7235_v0, %v7187_v31  ;;  %v7189_v62 = vpop.f32.mrf.mxu2 }
 0xa54   : > { %v7190_v18 = vadd.f32 %v7189_v62, %v7141_v36 }
 0xa55   : > { %v7298_v21 = vsub.f32 0.0, %v7236_v8 }
 0xa57   : > { %v10794_v32 = vpop.eup %10793  ;;  %v7417_v28 = vmul.f32 1.442695, %v7298_v21 }
 0xa58   : > { %v10796_v53 = vpop.eup %10795  ;;  %v7486_v16 = vadd.f32 1.0, %v10794_v32 }
 0xa59   : > { %7610 = vst [vmem:[%s12992_s2 + $0x178] sm:$0xff] %v10796_v53  ;;  %10797 = vpow2.f32 %v7417_v28 }
 0xa5a   : > { %10799 = vrcp.f32 %v7486_v16  ;;  %v7238_v9 = vpop.f32.mrf.mxu3 }
 0xa5b   : > { %v7239_v54 = vadd.f32 %v7238_v9, %v7190_v18  ;;  %v7191_v42 = vpop.f32.mrf.mxu2 }
 0xa5c   : > { %v7192_v34 = vadd.f32 %v7191_v42, %v7143_v37 }
 0xa5d   : > { %v7302_v15 = vsub.f32 0.0, %v7239_v54 }
 0xa5f   : > { %v10798_v30 = vpop.eup %10797  ;;  %v7425_v46 = vmul.f32 1.442695, %v7302_v15 }
 0xa60   : > { %v10800_v51 = vpop.eup %10799  ;;  %v7490_v24 = vadd.f32 1.0, %v10798_v30 }
 0xa61   : > { %7614 = vst [vmem:[%s12992_s2 + $0x198] sm:$0xff] %v10800_v51  ;;  %10801 = vpow2.f32 %v7425_v46 }
 0xa62   : > { %10803 = vrcp.f32 %v7490_v24  ;;  %v7240_v19 = vpop.f32.mrf.mxu3 }
 0xa63   : > { %v7241_v59 = vadd.f32 %v7240_v19, %v7192_v34 }
 0xa65   : > { %v7306_v61 = vsub.f32 0.0, %v7241_v59 }
 0xa67   : > { %v10802_v35 = vpop.eup %10801  ;;  %v7433_v47 = vmul.f32 1.442695, %v7306_v61 }
 0xa68   : > { %v10804_v14 = vpop.eup %10803  ;;  %v7494_v45 = vadd.f32 1.0, %v10802_v35 }
 0xa69   : > { %7618 = vst [vmem:[%s12992_s2 + $0x1b8] sm:$0xff] %v10804_v14  ;;  %10805 = vpow2.f32 %v7433_v47 }
 0xa6a   : > { %10807 = vrcp.f32 %v7494_v45 }
 0xa6f   : > { %v10806_v29 = vpop.eup %10805 }
 0xa70   : > { %v10808_v2 = vpop.eup %10807  ;;  %v7498_v3 = vadd.f32 1.0, %v10806_v29 }
 0xa71   : > { %7622 = vst [vmem:[%s12992_s2 + $0x1d8] sm:$0xff] %v10808_v2 }
 0xa72   : > { %10809 = vrcp.f32 %v7498_v3 }
 0xa78   : > { %v10810_v12 = vpop.eup %10809 }
 0xa79   : > { %7626 = vst [vmem:[%s12992_s2 + $0x1f8] sm:$0xff] %v10810_v12 }
 0xa7a   : > { %11406 = shalt.err (!%p11403_p11)
}
 0xa7b   : > { %s11512_s20 = smov 512   ;;  %s11513_s2 = smov 32  }
 0xa7c   : > { %10358 = dma.vmem_to_hbm [thread:$0]  (%p11809_p0), %s7652_s30, 8192, %s7654_s25, %s7628_s16, %s11512_s20, %s11512_s20, %s11513_s2  }
 0xa7d PF: > { %s7702_s12 = sand.u32 1, %s11473_s5   ;;  %p13556_p12 = scmp.ge.s32.totalorder %s11485_s28, 2 }
 0xa7e   : > { %s7703_s4 = scalar_lea.sflag [#allocation4], %s7702_s12 }
 0xa7f   : > { %p10418_p2 = pnand %p13556_p12, %p11819_p6 }
 0xa81   : > { %p10419_p4 = pneg %p10418_p2 }
 0xa83   : > { %11464 = dma.done.wait (%p10419_p4), %s7703_s4, 8192  }
 0xa84   : > { %11466 = vsyncadd (%p10419_p4), %s7703_s4, 4294959104  ;;  %s13557_s6 = sadd.s32 4294967294, %s11485_s28  }
 0xa85   : > { %s7712_s17 = sand.u32 1, %s13557_s6  }
 0xa86   : > { %s7713_s11 = scalar_lea.sflag [#allocation31], %s7712_s17 }
 0xa87   : > { %11468 = dma.done.wait (%p10419_p4), %s7713_s11, 4096  }
 0xa88   : > { %11470 = vsyncadd (%p10419_p4), %s7713_s11, 4294963200  ;;  %p51_p0 = scmp.ge.s32.totalorder %s11785_s22, 4   ;;  %s13558_s5 = smov %s11477_s26 }
 0xa89   : > { %s13559_s26 = smov %s11481_s27  ;;  %s13560_s27 = smov %s11797_s3 }
 0xa8a   : > { %s13561_s28 = smov %s11785_s22  ;;  %53 = sbr.rel (!%p51_p0) target bundleno = 42 (0x2a), region = 258 }
 0xa8f   :  { %7729 = vsyncpa [#allocation3], 1 }
 0xa90   :  { %7731 = vsyncpa [#allocation3 + $0x1], 1 }
 0xa91   :  { %7732 = vsyncpa [#allocation6], 1 }
 0xa92   :  { %7734 = vsyncpa [#allocation6 + $0x1], 1 }
 0xa93   :  { %7735 = vsyncpa [#allocation9], 1 }
 0xa94   :  { %7736 = vsyncpa [#allocation12], 1 }
 0xa95   :  { %7737 = vsyncpa [#allocation15], 1 }
 0xa96   :  { %7738 = vsyncpa [#allocation18], 1 }
 0xa97   :  { %7739 = vsyncpa [#allocation21], 1 }
 0xa98   :  { %7740 = vsyncpa [#allocation24], 1 }
 0xa99   :  { %7741 = vsyncpa [#allocation27], 1 }
 0xa9a   :  { %7742 = vsyncpa [#allocation4], 1 }
 0xa9b   :  { %7744 = vsyncpa [#allocation4 + $0x1], 1 }
 0xa9c   :  { %7745 = vsyncpa [#allocation31], 1 }
 0xa9d   :  { %7747 = vsyncpa [#allocation31 + $0x1], 1 }

</bundles_post_ra>
